<compile_context>
chip_gen: v7x
topology: tpu7x:2x2x1
jax: 0.10.0
libtpu: 0.0.40
codegen_flags: <defaults>
</compile_context>

<pallas_src>
import functools

import jax
import jax.numpy as jnp
from jax import lax
from jax.experimental import pallas as pl
from jax.experimental.pallas import tpu as pltpu


# ----------------------------------------------------------------------------
# helpers
# ----------------------------------------------------------------------------
def _round_up(x, m):
    return (x + m - 1) // m * m


def _make_taps(kh, kw, stride):
    """Static tap -> (plane index, row offset, col offset) mapping (di-major order)."""
    taps = []
    for di in range(kh):
        for dj in range(kw):
            if stride == 1:
                taps.append((0, di, dj))
            else:  # stride == 2 via 2x2 space-to-depth planes
                taps.append(((di % 2) * 2 + (dj % 2), di // 2, dj // 2))
    return tuple(taps)


def _space_to_depth2(x):
    """(N, H, W, C) -> (N*4, H//2, W//2, C); plane p*2+q holds x[:, p::2, q::2, :]."""
    n, h, w, c = x.shape
    x = x.reshape(n, h // 2, 2, w // 2, 2, c)
    x = jnp.transpose(x, (0, 2, 4, 1, 3, 5))
    return x.reshape(n * 4, h // 2, w // 2, c)


# ----------------------------------------------------------------------------
# Pallas kernel: fused conv (per-tap MXU accumulation) + bias + ReLU
# ----------------------------------------------------------------------------
def _conv_tap_kernel(x_ref, w_ref, b_ref, o_ref, *, taps, ho, wo, do_relu):
    cin = x_ref.shape[-1]
    cout = o_ref.shape[-1]
    acc = jnp.zeros((ho * wo, cout), jnp.float32)
    for t, (p, oh, ow) in enumerate(taps):
        patch = x_ref[p, oh:oh + ho, ow:ow + wo, :].reshape(ho * wo, cin)   # bf16
        acc = acc + jnp.dot(patch, w_ref[t], preferred_element_type=jnp.float32)
    acc = acc + b_ref[...]
    if do_relu:
        acc = jnp.maximum(acc, 0.0)
    o_ref[0] = acc.reshape(ho, wo, cout).astype(o_ref.dtype)


def conv2d_pallas(x_nhwc, w_hwio, bias, *, stride, pad, do_relu, out_dtype):
    """Fused conv: taps accumulated in-kernel, no HBM im2col. NHWC in / NHWC out."""
    kh, kw, cin, cout = w_hwio.shape
    n, h, w, _ = x_nhwc.shape

    # Pad input channels to a multiple of 8 (only triggers for the RGB input).
    cin_p = _round_up(cin, 8)
    if cin_p != cin:
        x_nhwc = jnp.pad(x_nhwc, ((0, 0), (0, 0), (0, 0), (0, cin_p - cin)))
        w_hwio = jnp.pad(w_hwio, ((0, 0), (0, 0), (0, cin_p - cin), (0, 0)))

    xp = jnp.pad(x_nhwc, ((0, 0), (pad, pad), (pad, pad), (0, 0))) if pad else x_nhwc
    hp, wp = h + 2 * pad, w + 2 * pad
    ho = (hp - kh) // stride + 1
    wo = (wp - kw) // stride + 1

    if stride == 1:
        planes, nplanes, ph, pw = xp, 1, hp, wp
    elif stride == 2:
        assert hp % 2 == 0 and wp % 2 == 0
        planes, nplanes, ph, pw = _space_to_depth2(xp), 4, hp // 2, wp // 2
    else:
        raise NotImplementedError("stride must be 1 or 2")

    taps = _make_taps(kh, kw, stride)
    planes = planes.astype(jnp.bfloat16)
    w_mat = w_hwio.reshape(kh * kw, cin_p, cout).astype(jnp.bfloat16)
    b_row = bias.reshape(1, cout).astype(jnp.float32)

    return pl.pallas_call(
        functools.partial(_conv_tap_kernel, taps=taps, ho=ho, wo=wo, do_relu=do_relu),
        out_shape=jax.ShapeDtypeStruct((n, ho, wo, cout), out_dtype),
        grid=(n,),
        in_specs=[
            pl.BlockSpec((nplanes, ph, pw, cin_p), lambda i: (i, 0, 0, 0)),
            pl.BlockSpec((kh * kw, cin_p, cout), lambda i: (0, 0, 0)),   # VMEM-resident
            pl.BlockSpec((1, cout), lambda i: (0, 0)),                   # VMEM-resident
        ],
        out_specs=pl.BlockSpec((1, ho, wo, cout), lambda i: (i, 0, 0, 0)),
        compiler_params=pltpu.CompilerParams(dimension_semantics=("parallel",)),
    )(planes, w_mat, b_row)


# ----------------------------------------------------------------------------
# Pallas kernel: fused DecoderV2 = 3x3 conv(512->128)+ReLU + 1x1 head (128->nc)
#   (channel-concat of pre/post features folded in via split weights; the
#    128-channel hidden map never touches HBM)
# ----------------------------------------------------------------------------
def _decoder_kernel(xpre_ref, xpost_ref, w1p_ref, w1q_ref, b1_ref, w2_ref, b2_ref,
                    o_ref, *, taps, ho, wo):
    c = xpre_ref.shape[-1]
    ch = w1p_ref.shape[-1]
    nc = o_ref.shape[-1]
    acc = jnp.zeros((ho * wo, ch), jnp.float32)
    for t, (p, oh, ow) in enumerate(taps):
        a = xpre_ref[p, oh:oh + ho, ow:ow + wo, :].reshape(ho * wo, c)
        acc = acc + jnp.dot(a, w1p_ref[t], preferred_element_type=jnp.float32)
        b = xpost_ref[p, oh:oh + ho, ow:ow + wo, :].reshape(ho * wo, c)
        acc = acc + jnp.dot(b, w1q_ref[t], preferred_element_type=jnp.float32)
    hidden = jnp.maximum(acc + b1_ref[...], 0.0)                       # (ho*wo, 128) f32
    logits = jnp.dot(hidden, w2_ref[...],
                     preferred_element_type=jnp.float32) + b2_ref[...]
    o_ref[0] = logits.reshape(ho, wo, nc).astype(o_ref.dtype)


def decoder_pallas(f_pre, f_post, w1_hwio, b1, w2_hwio, b2):
    n, h2, w2s, c = f_pre.shape
    assert w1_hwio.shape[2] == 2 * c
    ch = w1_hwio.shape[-1]            # hidden channels (128)
    nc = w2_hwio.shape[-1]            # num_classes
    pad = 1
    xp = jnp.pad(f_pre, ((0, 0), (pad, pad), (pad, pad), (0, 0))).astype(jnp.bfloat16)
    xq = jnp.pad(f_post, ((0, 0), (pad, pad), (pad, pad), (0, 0))).astype(jnp.bfloat16)
    hp, wp = h2 + 2 * pad, w2s + 2 * pad
    ho, wo = h2, w2s
    taps = _make_taps(3, 3, 1)

    w1p = w1_hwio[:, :, :c, :].reshape(9, c, ch).astype(jnp.bfloat16)
    w1q = w1_hwio[:, :, c:, :].reshape(9, c, ch).astype(jnp.bfloat16)
    b1r = b1.reshape(1, ch).astype(jnp.float32)
    w2m = w2_hwio.reshape(ch, nc).astype(jnp.float32)
    b2r = b2.reshape(1, nc).astype(jnp.float32)

    return pl.pallas_call(
        functools.partial(_decoder_kernel, taps=taps, ho=ho, wo=wo),
        out_shape=jax.ShapeDtypeStruct((n, ho, wo, nc), jnp.float32),
        grid=(n,),
        in_specs=[
            pl.BlockSpec((1, hp, wp, c), lambda i: (i, 0, 0, 0)),
            pl.BlockSpec((1, hp, wp, c), lambda i: (i, 0, 0, 0)),
            pl.BlockSpec((9, c, ch), lambda i: (0, 0, 0)),               # resident
            pl.BlockSpec((9, c, ch), lambda i: (0, 0, 0)),               # resident
            pl.BlockSpec((1, ch), lambda i: (0, 0)),
            pl.BlockSpec((ch, nc), lambda i: (0, 0)),
            pl.BlockSpec((1, nc), lambda i: (0, 0)),
        ],
        out_specs=pl.BlockSpec((1, ho, wo, nc), lambda i: (i, 0, 0, 0)),
        compiler_params=pltpu.CompilerParams(dimension_semantics=("parallel",)),
    )(xp, xq, w1p, w1q, b1r, w2m, b2r)


# ----------------------------------------------------------------------------
# Parameters (deterministic, PyTorch-conv-like uniform init)
# ----------------------------------------------------------------------------
def init_params(key, num_classes):
    def init_conv(k, kh, kw, cin, cout):
        k1, k2 = jax.random.split(k)
        scale = 1.0 / float(jnp.sqrt(kh * kw * cin))
        w = jax.random.uniform(k1, (kh, kw, cin, cout), jnp.float32, -scale, scale)
        b = jax.random.uniform(k2, (cout,), jnp.float32, -scale, scale)
        return w, b

    keys = jax.random.split(key, 4)
    return {
        "enc_conv1": init_conv(keys[0], 3, 3, 3, 32),
        "enc_conv2": init_conv(keys[1], 3, 3, 32, 256),
        "dec_conv1": init_conv(keys[2], 3, 3, 512, 128),
        "dec_conv2": init_conv(keys[3], 1, 1, 128, num_classes),
    }


# ----------------------------------------------------------------------------
# Model forward (NCHW in / NCHW logits out, like the PyTorch module)
# ----------------------------------------------------------------------------
@jax.jit
def disaster_sam_v2(params, pre_nchw, post_nchw):
    pre = jnp.transpose(pre_nchw, (0, 2, 3, 1)).astype(jnp.bfloat16)
    post = jnp.transpose(post_nchw, (0, 2, 3, 1)).astype(jnp.bfloat16)
    B = pre.shape[0]

    # Siamese (shared-weight) encoder: batch pre/post along N -> one call per layer.
    x = jnp.concatenate([pre, post], axis=0)
    w1, b1 = params["enc_conv1"]
    w2, b2 = params["enc_conv2"]
    x = conv2d_pallas(x, w1, b1, stride=1, pad=1, do_relu=True, out_dtype=jnp.bfloat16)
    x = conv2d_pallas(x, w2, b2, stride=2, pad=1, do_relu=True, out_dtype=jnp.bfloat16)
    f_pre, f_post = x[:B], x[B:]                         # each (B, H/2, W/2, 256) bf16

    # DecoderV2(512 -> num_classes): 3x3 conv + ReLU + fused 1x1 head.
    dw1, db1 = params["dec_conv1"]
    dw2, db2 = params["dec_conv2"]
    logits = decoder_pallas(f_pre, f_post, dw1, db1, dw2, db2)   # (B, H/2, W/2, nc) f32

    # nearest 2x upsample back to input resolution (XLA glue on a tiny tensor)
    logits = jnp.repeat(jnp.repeat(logits, 2, axis=1), 2, axis=2)
    return jnp.transpose(logits, (0, 3, 1, 2))


# ----------------------------------------------------------------------------
# Pure-JAX reference (same layer dtypes) for a correctness sanity check
# ----------------------------------------------------------------------------
@jax.jit
def reference_forward(params, pre_nchw, post_nchw):
    def conv(x, w, b, stride, pad, relu):
        y = lax.conv_general_dilated(
            x.astype(jnp.bfloat16), w.astype(jnp.bfloat16),
            window_strides=(stride, stride),
            padding=((pad, pad), (pad, pad)),
            dimension_numbers=("NHWC", "HWIO", "NHWC"),
            preferred_element_type=jnp.float32)
        y = y + b
        return jnp.maximum(y, 0.0) if relu else y

    pre = jnp.transpose(pre_nchw, (0, 2, 3, 1)).astype(jnp.bfloat16)
    post = jnp.transpose(post_nchw, (0, 2, 3, 1)).astype(jnp.bfloat16)
    w1, b1 = params["enc_conv1"]
    w2, b2 = params["enc_conv2"]

    def enc(x):
        x = conv(x, w1, b1, 1, 1, True).astype(jnp.bfloat16)
        x = conv(x, w2, b2, 2, 1, True).astype(jnp.bfloat16)
        return x

    feats = jnp.concatenate([enc(pre), enc(post)], axis=-1)
    dw1, db1 = params["dec_conv1"]
    dw2, db2 = params["dec_conv2"]
    h = conv(feats, dw1, db1, 1, 1, True)                            # f32
    nc = dw2.shape[-1]
    logits = jnp.tensordot(h, dw2.reshape(dw2.shape[2], nc), axes=[[3], [0]]) + db2
    logits = jnp.repeat(jnp.repeat(logits, 2, axis=1), 2, axis=2)
    return jnp.transpose(logits, (0, 3, 1, 2))


# ----------------------------------------------------------------------------
if __name__ == "__main__":
    key = jax.random.PRNGKey(0)
    k_params, k_pre, k_post = jax.random.split(key, 3)

    num_classes = 4
    B, C, H, W = 2, 3, 16, 16
    pre = jax.random.normal(k_pre, (B, C, H, W), jnp.float32)
    post = jax.random.normal(k_post, (B, C, H, W), jnp.float32)

    params = init_params(k_params, num_classes)

    out = disaster_sam_v2(params, pre, post)
    out = jax.block_until_ready(out)

    assert out.shape == (B, num_classes, H, W), out.shape
    assert out.dtype == jnp.float32
    assert bool(jnp.all(jnp.isfinite(out)))

    ref = jax.block_until_ready(reference_forward(params, pre, post))
    assert bool(jnp.allclose(out, ref, atol=5e-2, rtol=5e-2)), \
        float(jnp.max(jnp.abs(out - ref)))

    print("KERNEL_OK")
</pallas_src>

<mosaic_0001>
module attributes {stable_mosaic.version = 11 : i64} {
  func.func @_conv_tap_kernel(%arg0: i32, %arg1: memref<1x18x18x8xbf16, #tpu.memory_space<vmem>>, %arg2: memref<9x8x32xbf16, #tpu.memory_space<vmem>>, %arg3: memref<1x32xf32, #tpu.memory_space<vmem>>, %arg4: memref<1x16x16x32xbf16, #tpu.memory_space<vmem>>) attributes {dimension_semantics = [#tpu.dimension_semantics<parallel>], iteration_bounds = array<i64: 4>, scalar_prefetch = 0 : i64, scratch_operands = 0 : i64, tpu.core_type = #tpu.core_type<tc>, window_params = [{transform_indices = @transform_0, window_bounds = array<i64: 1, 18, 18, 8>}, {pipeline_mode = #tpu.pipeline_mode<synchronous>, transform_indices = @transform_1, window_bounds = array<i64: 9, 8, 32>}, {pipeline_mode = #tpu.pipeline_mode<synchronous>, transform_indices = @transform_2, window_bounds = array<i64: 1, 32>}, {transform_indices = @transform_3, window_bounds = array<i64: 1, 16, 16, 32>}]} {
    %cst = arith.constant 0.000000e+00 : f32
    %0 = vector.broadcast %cst : f32 to vector<256x32xf32>
    %c0 = arith.constant 0 : index
    %c0_0 = arith.constant 0 : index
    %c0_1 = arith.constant 0 : index
    %c0_2 = arith.constant 0 : index
    %1 = vector.load %arg1[%c0, %c0_0, %c0_1, %c0_2] : memref<1x18x18x8xbf16, #tpu.memory_space<vmem>>, vector<1x16x16x8xbf16>
    %2 = vector.shape_cast %1 : vector<1x16x16x8xbf16> to vector<16x16x8xbf16>
    %3 = vector.shape_cast %2 : vector<16x16x8xbf16> to vector<256x8xbf16>
    %c0_3 = arith.constant 0 : index
    %c0_4 = arith.constant 0 : index
    %c0_5 = arith.constant 0 : index
    %4 = vector.load %arg2[%c0_3, %c0_4, %c0_5] : memref<9x8x32xbf16, #tpu.memory_space<vmem>>, vector<1x8x32xbf16>
    %5 = vector.shape_cast %4 : vector<1x8x32xbf16> to vector<8x32xbf16>
    %cst_6 = arith.constant dense<0.000000e+00> : vector<256x32xf32>
    %6 = tpu.matmul %3, %5, %cst_6 {dimension_numbers = #tpu.dot_dimension_numbers<[1], [0], [0], [1], [0, 0, 1, 1], [], []>} : vector<256x8xbf16>, vector<8x32xbf16>, vector<256x32xf32> -> vector<256x32xf32>
    %7 = arith.addf %0, %6 : vector<256x32xf32>
    %c0_7 = arith.constant 0 : index
    %c0_8 = arith.constant 0 : index
    %c1 = arith.constant 1 : index
    %c0_9 = arith.constant 0 : index
    %8 = vector.load %arg1[%c0_7, %c0_8, %c1, %c0_9] : memref<1x18x18x8xbf16, #tpu.memory_space<vmem>>, vector<1x16x16x8xbf16>
    %9 = vector.shape_cast %8 : vector<1x16x16x8xbf16> to vector<16x16x8xbf16>
    %10 = vector.shape_cast %9 : vector<16x16x8xbf16> to vector<256x8xbf16>
    %c1_10 = arith.constant 1 : index
    %c0_11 = arith.constant 0 : index
    %c0_12 = arith.constant 0 : index
    %11 = vector.load %arg2[%c1_10, %c0_11, %c0_12] : memref<9x8x32xbf16, #tpu.memory_space<vmem>>, vector<1x8x32xbf16>
    %12 = vector.shape_cast %11 : vector<1x8x32xbf16> to vector<8x32xbf16>
    %cst_13 = arith.constant dense<0.000000e+00> : vector<256x32xf32>
    %13 = tpu.matmul %10, %12, %cst_13 {dimension_numbers = #tpu.dot_dimension_numbers<[1], [0], [0], [1], [0, 0, 1, 1], [], []>} : vector<256x8xbf16>, vector<8x32xbf16>, vector<256x32xf32> -> vector<256x32xf32>
    %14 = arith.addf %7, %13 : vector<256x32xf32>
    %c0_14 = arith.constant 0 : index
    %c0_15 = arith.constant 0 : index
    %c2 = arith.constant 2 : index
    %c0_16 = arith.constant 0 : index
    %15 = vector.load %arg1[%c0_14, %c0_15, %c2, %c0_16] : memref<1x18x18x8xbf16, #tpu.memory_space<vmem>>, vector<1x16x16x8xbf16>
    %16 = vector.shape_cast %15 : vector<1x16x16x8xbf16> to vector<16x16x8xbf16>
    %17 = vector.shape_cast %16 : vector<16x16x8xbf16> to vector<256x8xbf16>
    %c2_17 = arith.constant 2 : index
    %c0_18 = arith.constant 0 : index
    %c0_19 = arith.constant 0 : index
    %18 = vector.load %arg2[%c2_17, %c0_18, %c0_19] : memref<9x8x32xbf16, #tpu.memory_space<vmem>>, vector<1x8x32xbf16>
    %19 = vector.shape_cast %18 : vector<1x8x32xbf16> to vector<8x32xbf16>
    %cst_20 = arith.constant dense<0.000000e+00> : vector<256x32xf32>
    %20 = tpu.matmul %17, %19, %cst_20 {dimension_numbers = #tpu.dot_dimension_numbers<[1], [0], [0], [1], [0, 0, 1, 1], [], []>} : vector<256x8xbf16>, vector<8x32xbf16>, vector<256x32xf32> -> vector<256x32xf32>
    %21 = arith.addf %14, %20 : vector<256x32xf32>
    %c0_21 = arith.constant 0 : index
    %c1_22 = arith.constant 1 : index
    %c0_23 = arith.constant 0 : index
    %c0_24 = arith.constant 0 : index
    %22 = vector.load %arg1[%c0_21, %c1_22, %c0_23, %c0_24] : memref<1x18x18x8xbf16, #tpu.memory_space<vmem>>, vector<1x16x16x8xbf16>
    %23 = vector.shape_cast %22 : vector<1x16x16x8xbf16> to vector<16x16x8xbf16>
    %24 = vector.shape_cast %23 : vector<16x16x8xbf16> to vector<256x8xbf16>
    %c3 = arith.constant 3 : index
    %c0_25 = arith.constant 0 : index
    %c0_26 = arith.constant 0 : index
    %25 = vector.load %arg2[%c3, %c0_25, %c0_26] : memref<9x8x32xbf16, #tpu.memory_space<vmem>>, vector<1x8x32xbf16>
    %26 = vector.shape_cast %25 : vector<1x8x32xbf16> to vector<8x32xbf16>
    %cst_27 = arith.constant dense<0.000000e+00> : vector<256x32xf32>
    %27 = tpu.matmul %24, %26, %cst_27 {dimension_numbers = #tpu.dot_dimension_numbers<[1], [0], [0], [1], [0, 0, 1, 1], [], []>} : vector<256x8xbf16>, vector<8x32xbf16>, vector<256x32xf32> -> vector<256x32xf32>
    %28 = arith.addf %21, %27 : vector<256x32xf32>
    %c0_28 = arith.constant 0 : index
    %c1_29 = arith.constant 1 : index
    %c1_30 = arith.constant 1 : index
    %c0_31 = arith.constant 0 : index
    %29 = vector.load %arg1[%c0_28, %c1_29, %c1_30, %c0_31] : memref<1x18x18x8xbf16, #tpu.memory_space<vmem>>, vector<1x16x16x8xbf16>
    %30 = vector.shape_cast %29 : vector<1x16x16x8xbf16> to vector<16x16x8xbf16>
    %31 = vector.shape_cast %30 : vector<16x16x8xbf16> to vector<256x8xbf16>
    %c4 = arith.constant 4 : index
    %c0_32 = arith.constant 0 : index
    %c0_33 = arith.constant 0 : index
    %32 = vector.load %arg2[%c4, %c0_32, %c0_33] : memref<9x8x32xbf16, #tpu.memory_space<vmem>>, vector<1x8x32xbf16>
    %33 = vector.shape_cast %32 : vector<1x8x32xbf16> to vector<8x32xbf16>
    %cst_34 = arith.constant dense<0.000000e+00> : vector<256x32xf32>
    %34 = tpu.matmul %31, %33, %cst_34 {dimension_numbers = #tpu.dot_dimension_numbers<[1], [0], [0], [1], [0, 0, 1, 1], [], []>} : vector<256x8xbf16>, vector<8x32xbf16>, vector<256x32xf32> -> vector<256x32xf32>
    %35 = arith.addf %28, %34 : vector<256x32xf32>
    %c0_35 = arith.constant 0 : index
    %c1_36 = arith.constant 1 : index
    %c2_37 = arith.constant 2 : index
    %c0_38 = arith.constant 0 : index
    %36 = vector.load %arg1[%c0_35, %c1_36, %c2_37, %c0_38] : memref<1x18x18x8xbf16, #tpu.memory_space<vmem>>, vector<1x16x16x8xbf16>
    %37 = vector.shape_cast %36 : vector<1x16x16x8xbf16> to vector<16x16x8xbf16>
    %38 = vector.shape_cast %37 : vector<16x16x8xbf16> to vector<256x8xbf16>
    %c5 = arith.constant 5 : index
    %c0_39 = arith.constant 0 : index
    %c0_40 = arith.constant 0 : index
    %39 = vector.load %arg2[%c5, %c0_39, %c0_40] : memref<9x8x32xbf16, #tpu.memory_space<vmem>>, vector<1x8x32xbf16>
    %40 = vector.shape_cast %39 : vector<1x8x32xbf16> to vector<8x32xbf16>
    %cst_41 = arith.constant dense<0.000000e+00> : vector<256x32xf32>
    %41 = tpu.matmul %38, %40, %cst_41 {dimension_numbers = #tpu.dot_dimension_numbers<[1], [0], [0], [1], [0, 0, 1, 1], [], []>} : vector<256x8xbf16>, vector<8x32xbf16>, vector<256x32xf32> -> vector<256x32xf32>
    %42 = arith.addf %35, %41 : vector<256x32xf32>
    %c0_42 = arith.constant 0 : index
    %c2_43 = arith.constant 2 : index
    %c0_44 = arith.constant 0 : index
    %c0_45 = arith.constant 0 : index
    %43 = vector.load %arg1[%c0_42, %c2_43, %c0_44, %c0_45] : memref<1x18x18x8xbf16, #tpu.memory_space<vmem>>, vector<1x16x16x8xbf16>
    %44 = vector.shape_cast %43 : vector<1x16x16x8xbf16> to vector<16x16x8xbf16>
    %45 = vector.shape_cast %44 : vector<16x16x8xbf16> to vector<256x8xbf16>
    %c6 = arith.constant 6 : index
    %c0_46 = arith.constant 0 : index
    %c0_47 = arith.constant 0 : index
    %46 = vector.load %arg2[%c6, %c0_46, %c0_47] : memref<9x8x32xbf16, #tpu.memory_space<vmem>>, vector<1x8x32xbf16>
    %47 = vector.shape_cast %46 : vector<1x8x32xbf16> to vector<8x32xbf16>
    %cst_48 = arith.constant dense<0.000000e+00> : vector<256x32xf32>
    %48 = tpu.matmul %45, %47, %cst_48 {dimension_numbers = #tpu.dot_dimension_numbers<[1], [0], [0], [1], [0, 0, 1, 1], [], []>} : vector<256x8xbf16>, vector<8x32xbf16>, vector<256x32xf32> -> vector<256x32xf32>
    %49 = arith.addf %42, %48 : vector<256x32xf32>
    %c0_49 = arith.constant 0 : index
    %c2_50 = arith.constant 2 : index
    %c1_51 = arith.constant 1 : index
    %c0_52 = arith.constant 0 : index
    %50 = vector.load %arg1[%c0_49, %c2_50, %c1_51, %c0_52] : memref<1x18x18x8xbf16, #tpu.memory_space<vmem>>, vector<1x16x16x8xbf16>
    %51 = vector.shape_cast %50 : vector<1x16x16x8xbf16> to vector<16x16x8xbf16>
    %52 = vector.shape_cast %51 : vector<16x16x8xbf16> to vector<256x8xbf16>
    %c7 = arith.constant 7 : index
    %c0_53 = arith.constant 0 : index
    %c0_54 = arith.constant 0 : index
    %53 = vector.load %arg2[%c7, %c0_53, %c0_54] : memref<9x8x32xbf16, #tpu.memory_space<vmem>>, vector<1x8x32xbf16>
    %54 = vector.shape_cast %53 : vector<1x8x32xbf16> to vector<8x32xbf16>
    %cst_55 = arith.constant dense<0.000000e+00> : vector<256x32xf32>
    %55 = tpu.matmul %52, %54, %cst_55 {dimension_numbers = #tpu.dot_dimension_numbers<[1], [0], [0], [1], [0, 0, 1, 1], [], []>} : vector<256x8xbf16>, vector<8x32xbf16>, vector<256x32xf32> -> vector<256x32xf32>
    %56 = arith.addf %49, %55 : vector<256x32xf32>
    %c0_56 = arith.constant 0 : index
    %c2_57 = arith.constant 2 : index
    %c2_58 = arith.constant 2 : index
    %c0_59 = arith.constant 0 : index
    %57 = vector.load %arg1[%c0_56, %c2_57, %c2_58, %c0_59] : memref<1x18x18x8xbf16, #tpu.memory_space<vmem>>, vector<1x16x16x8xbf16>
    %58 = vector.shape_cast %57 : vector<1x16x16x8xbf16> to vector<16x16x8xbf16>
    %59 = vector.shape_cast %58 : vector<16x16x8xbf16> to vector<256x8xbf16>
    %c8 = arith.constant 8 : index
    %c0_60 = arith.constant 0 : index
    %c0_61 = arith.constant 0 : index
    %60 = vector.load %arg2[%c8, %c0_60, %c0_61] : memref<9x8x32xbf16, #tpu.memory_space<vmem>>, vector<1x8x32xbf16>
    %61 = vector.shape_cast %60 : vector<1x8x32xbf16> to vector<8x32xbf16>
    %cst_62 = arith.constant dense<0.000000e+00> : vector<256x32xf32>
    %62 = tpu.matmul %59, %61, %cst_62 {dimension_numbers = #tpu.dot_dimension_numbers<[1], [0], [0], [1], [0, 0, 1, 1], [], []>} : vector<256x8xbf16>, vector<8x32xbf16>, vector<256x32xf32> -> vector<256x32xf32>
    %63 = arith.addf %56, %62 : vector<256x32xf32>
    %c0_63 = arith.constant 0 : index
    %c0_64 = arith.constant 0 : index
    %64 = vector.load %arg3[%c0_63, %c0_64] : memref<1x32xf32, #tpu.memory_space<vmem>>, vector<1x32xf32>
    %65 = vector.broadcast %64 : vector<1x32xf32> to vector<256x32xf32>
    %66 = arith.addf %63, %65 : vector<256x32xf32>
    %cst_65 = arith.constant 0.000000e+00 : f32
    %67 = vector.broadcast %cst_65 : f32 to vector<256x32xf32>
    %68 = arith.maximumf %66, %67 : vector<256x32xf32>
    %69 = vector.shape_cast %68 : vector<256x32xf32> to vector<16x16x32xf32>
    %70 = arith.truncf %69 : vector<16x16x32xf32> to vector<16x16x32xbf16>
    %c0_66 = arith.constant 0 : index
    %c0_67 = arith.constant 0 : index
    %c0_68 = arith.constant 0 : index
    %c0_69 = arith.constant 0 : index
    %71 = vector.load %arg4[%c0_66, %c0_67, %c0_68, %c0_69] : memref<1x16x16x32xbf16, #tpu.memory_space<vmem>>, vector<1x16x16x32xbf16>
    %72 = vector.shape_cast %71 : vector<1x16x16x32xbf16> to vector<16x16x32xbf16>
    %73 = vector.shape_cast %70 : vector<16x16x32xbf16> to vector<1x16x16x32xbf16>
    tpu.vector_store %arg4[%c0_66, %c0_67, %c0_68, %c0_69], %73 {strides = array<i32>} : memref<1x16x16x32xbf16, #tpu.memory_space<vmem>>, vector<1x16x16x32xbf16>,
    return
  }
  func.func @transform_0(%arg0: i32) -> (i32, i32, i32, i32) {
    %c0_i32 = arith.constant 0 : i32
    %c0_i32_0 = arith.constant 0 : i32
    %c0_i32_1 = arith.constant 0 : i32
    %c0_i32_2 = arith.constant 0 : i32
    return %arg0, %c0_i32, %c0_i32_0, %c0_i32_1 : i32, i32, i32, i32
  }
  func.func @transform_1(%arg0: i32) -> (i32, i32, i32) {
    %c0_i32 = arith.constant 0 : i32
    %c0_i32_0 = arith.constant 0 : i32
    %c0_i32_1 = arith.constant 0 : i32
    %c0_i32_2 = arith.constant 0 : i32
    return %c0_i32, %c0_i32_0, %c0_i32_1 : i32, i32, i32
  }
  func.func @transform_2(%arg0: i32) -> (i32, i32) {
    %c0_i32 = arith.constant 0 : i32
    %c0_i32_0 = arith.constant 0 : i32
    %c0_i32_1 = arith.constant 0 : i32
    return %c0_i32, %c0_i32_0 : i32, i32
  }
  func.func @transform_3(%arg0: i32) -> (i32, i32, i32, i32) {
    %c0_i32 = arith.constant 0 : i32
    %c0_i32_0 = arith.constant 0 : i32
    %c0_i32_1 = arith.constant 0 : i32
    %c0_i32_2 = arith.constant 0 : i32
    return %arg0, %c0_i32, %c0_i32_0, %c0_i32_1 : i32, i32, i32, i32
  }
}

module attributes {stable_mosaic.version = 11 : i64} {
  func.func @_conv_tap_kernel(%arg0: i32, %arg1: memref<4x9x9x32xbf16, #tpu.memory_space<vmem>>, %arg2: memref<9x32x256xbf16, #tpu.memory_space<vmem>>, %arg3: memref<1x256xf32, #tpu.memory_space<vmem>>, %arg4: memref<1x8x8x256xbf16, #tpu.memory_space<vmem>>) attributes {dimension_semantics = [#tpu.dimension_semantics<parallel>], iteration_bounds = array<i64: 4>, scalar_prefetch = 0 : i64, scratch_operands = 0 : i64, tpu.core_type = #tpu.core_type<tc>, window_params = [{transform_indices = @transform_0, window_bounds = array<i64: 4, 9, 9, 32>}, {pipeline_mode = #tpu.pipeline_mode<synchronous>, transform_indices = @transform_1, window_bounds = array<i64: 9, 32, 256>}, {pipeline_mode = #tpu.pipeline_mode<synchronous>, transform_indices = @transform_2, window_bounds = array<i64: 1, 256>}, {transform_indices = @transform_3, window_bounds = array<i64: 1, 8, 8, 256>}]} {
    %cst = arith.constant 0.000000e+00 : f32
    %0 = vector.broadcast %cst : f32 to vector<64x256xf32>
    %c0 = arith.constant 0 : index
    %c0_0 = arith.constant 0 : index
    %c0_1 = arith.constant 0 : index
    %c0_2 = arith.constant 0 : index
    %1 = vector.load %arg1[%c0, %c0_0, %c0_1, %c0_2] : memref<4x9x9x32xbf16, #tpu.memory_space<vmem>>, vector<1x8x8x32xbf16>
    %2 = vector.shape_cast %1 : vector<1x8x8x32xbf16> to vector<8x8x32xbf16>
    %3 = vector.shape_cast %2 : vector<8x8x32xbf16> to vector<64x32xbf16>
    %c0_3 = arith.constant 0 : index
    %c0_4 = arith.constant 0 : index
    %c0_5 = arith.constant 0 : index
    %4 = vector.load %arg2[%c0_3, %c0_4, %c0_5] : memref<9x32x256xbf16, #tpu.memory_space<vmem>>, vector<1x32x256xbf16>
    %5 = vector.shape_cast %4 : vector<1x32x256xbf16> to vector<32x256xbf16>
    %cst_6 = arith.constant dense<0.000000e+00> : vector<64x256xf32>
    %6 = tpu.matmul %3, %5, %cst_6 {dimension_numbers = #tpu.dot_dimension_numbers<[1], [0], [0], [1], [0, 0, 1, 1], [], []>} : vector<64x32xbf16>, vector<32x256xbf16>, vector<64x256xf32> -> vector<64x256xf32>
    %7 = arith.addf %0, %6 : vector<64x256xf32>
    %c1 = arith.constant 1 : index
    %c0_7 = arith.constant 0 : index
    %c0_8 = arith.constant 0 : index
    %c0_9 = arith.constant 0 : index
    %8 = vector.load %arg1[%c1, %c0_7, %c0_8, %c0_9] : memref<4x9x9x32xbf16, #tpu.memory_space<vmem>>, vector<1x8x8x32xbf16>
    %9 = vector.shape_cast %8 : vector<1x8x8x32xbf16> to vector<8x8x32xbf16>
    %10 = vector.shape_cast %9 : vector<8x8x32xbf16> to vector<64x32xbf16>
    %c1_10 = arith.constant 1 : index
    %c0_11 = arith.constant 0 : index
    %c0_12 = arith.constant 0 : index
    %11 = vector.load %arg2[%c1_10, %c0_11, %c0_12] : memref<9x32x256xbf16, #tpu.memory_space<vmem>>, vector<1x32x256xbf16>
    %12 = vector.shape_cast %11 : vector<1x32x256xbf16> to vector<32x256xbf16>
    %cst_13 = arith.constant dense<0.000000e+00> : vector<64x256xf32>
    %13 = tpu.matmul %10, %12, %cst_13 {dimension_numbers = #tpu.dot_dimension_numbers<[1], [0], [0], [1], [0, 0, 1, 1], [], []>} : vector<64x32xbf16>, vector<32x256xbf16>, vector<64x256xf32> -> vector<64x256xf32>
    %14 = arith.addf %7, %13 : vector<64x256xf32>
    %c0_14 = arith.constant 0 : index
    %c0_15 = arith.constant 0 : index
    %c1_16 = arith.constant 1 : index
    %c0_17 = arith.constant 0 : index
    %15 = vector.load %arg1[%c0_14, %c0_15, %c1_16, %c0_17] : memref<4x9x9x32xbf16, #tpu.memory_space<vmem>>, vector<1x8x8x32xbf16>
    %16 = vector.shape_cast %15 : vector<1x8x8x32xbf16> to vector<8x8x32xbf16>
    %17 = vector.shape_cast %16 : vector<8x8x32xbf16> to vector<64x32xbf16>
    %c2 = arith.constant 2 : index
    %c0_18 = arith.constant 0 : index
    %c0_19 = arith.constant 0 : index
    %18 = vector.load %arg2[%c2, %c0_18, %c0_19] : memref<9x32x256xbf16, #tpu.memory_space<vmem>>, vector<1x32x256xbf16>
    %19 = vector.shape_cast %18 : vector<1x32x256xbf16> to vector<32x256xbf16>
    %cst_20 = arith.constant dense<0.000000e+00> : vector<64x256xf32>
    %20 = tpu.matmul %17, %19, %cst_20 {dimension_numbers = #tpu.dot_dimension_numbers<[1], [0], [0], [1], [0, 0, 1, 1], [], []>} : vector<64x32xbf16>, vector<32x256xbf16>, vector<64x256xf32> -> vector<64x256xf32>
    %21 = arith.addf %14, %20 : vector<64x256xf32>
    %c2_21 = arith.constant 2 : index
    %c0_22 = arith.constant 0 : index
    %c0_23 = arith.constant 0 : index
    %c0_24 = arith.constant 0 : index
    %22 = vector.load %arg1[%c2_21, %c0_22, %c0_23, %c0_24] : memref<4x9x9x32xbf16, #tpu.memory_space<vmem>>, vector<1x8x8x32xbf16>
    %23 = vector.shape_cast %22 : vector<1x8x8x32xbf16> to vector<8x8x32xbf16>
    %24 = vector.shape_cast %23 : vector<8x8x32xbf16> to vector<64x32xbf16>
    %c3 = arith.constant 3 : index
    %c0_25 = arith.constant 0 : index
    %c0_26 = arith.constant 0 : index
    %25 = vector.load %arg2[%c3, %c0_25, %c0_26] : memref<9x32x256xbf16, #tpu.memory_space<vmem>>, vector<1x32x256xbf16>
    %26 = vector.shape_cast %25 : vector<1x32x256xbf16> to vector<32x256xbf16>
    %cst_27 = arith.constant dense<0.000000e+00> : vector<64x256xf32>
    %27 = tpu.matmul %24, %26, %cst_27 {dimension_numbers = #tpu.dot_dimension_numbers<[1], [0], [0], [1], [0, 0, 1, 1], [], []>} : vector<64x32xbf16>, vector<32x256xbf16>, vector<64x256xf32> -> vector<64x256xf32>
    %28 = arith.addf %21, %27 : vector<64x256xf32>
    %c3_28 = arith.constant 3 : index
    %c0_29 = arith.constant 0 : index
    %c0_30 = arith.constant 0 : index
    %c0_31 = arith.constant 0 : index
    %29 = vector.load %arg1[%c3_28, %c0_29, %c0_30, %c0_31] : memref<4x9x9x32xbf16, #tpu.memory_space<vmem>>, vector<1x8x8x32xbf16>
    %30 = vector.shape_cast %29 : vector<1x8x8x32xbf16> to vector<8x8x32xbf16>
    %31 = vector.shape_cast %30 : vector<8x8x32xbf16> to vector<64x32xbf16>
    %c4 = arith.constant 4 : index
    %c0_32 = arith.constant 0 : index
    %c0_33 = arith.constant 0 : index
    %32 = vector.load %arg2[%c4, %c0_32, %c0_33] : memref<9x32x256xbf16, #tpu.memory_space<vmem>>, vector<1x32x256xbf16>
    %33 = vector.shape_cast %32 : vector<1x32x256xbf16> to vector<32x256xbf16>
    %cst_34 = arith.constant dense<0.000000e+00> : vector<64x256xf32>
    %34 = tpu.matmul %31, %33, %cst_34 {dimension_numbers = #tpu.dot_dimension_numbers<[1], [0], [0], [1], [0, 0, 1, 1], [], []>} : vector<64x32xbf16>, vector<32x256xbf16>, vector<64x256xf32> -> vector<64x256xf32>
    %35 = arith.addf %28, %34 : vector<64x256xf32>
    %c2_35 = arith.constant 2 : index
    %c0_36 = arith.constant 0 : index
    %c1_37 = arith.constant 1 : index
    %c0_38 = arith.constant 0 : index
    %36 = vector.load %arg1[%c2_35, %c0_36, %c1_37, %c0_38] : memref<4x9x9x32xbf16, #tpu.memory_space<vmem>>, vector<1x8x8x32xbf16>
    %37 = vector.shape_cast %36 : vector<1x8x8x32xbf16> to vector<8x8x32xbf16>
    %38 = vector.shape_cast %37 : vector<8x8x32xbf16> to vector<64x32xbf16>
    %c5 = arith.constant 5 : index
    %c0_39 = arith.constant 0 : index
    %c0_40 = arith.constant 0 : index
    %39 = vector.load %arg2[%c5, %c0_39, %c0_40] : memref<9x32x256xbf16, #tpu.memory_space<vmem>>, vector<1x32x256xbf16>
    %40 = vector.shape_cast %39 : vector<1x32x256xbf16> to vector<32x256xbf16>
    %cst_41 = arith.constant dense<0.000000e+00> : vector<64x256xf32>
    %41 = tpu.matmul %38, %40, %cst_41 {dimension_numbers = #tpu.dot_dimension_numbers<[1], [0], [0], [1], [0, 0, 1, 1], [], []>} : vector<64x32xbf16>, vector<32x256xbf16>, vector<64x256xf32> -> vector<64x256xf32>
    %42 = arith.addf %35, %41 : vector<64x256xf32>
    %c0_42 = arith.constant 0 : index
    %c1_43 = arith.constant 1 : index
    %c0_44 = arith.constant 0 : index
    %c0_45 = arith.constant 0 : index
    %43 = vector.load %arg1[%c0_42, %c1_43, %c0_44, %c0_45] : memref<4x9x9x32xbf16, #tpu.memory_space<vmem>>, vector<1x8x8x32xbf16>
    %44 = vector.shape_cast %43 : vector<1x8x8x32xbf16> to vector<8x8x32xbf16>
    %45 = vector.shape_cast %44 : vector<8x8x32xbf16> to vector<64x32xbf16>
    %c6 = arith.constant 6 : index
    %c0_46 = arith.constant 0 : index
    %c0_47 = arith.constant 0 : index
    %46 = vector.load %arg2[%c6, %c0_46, %c0_47] : memref<9x32x256xbf16, #tpu.memory_space<vmem>>, vector<1x32x256xbf16>
    %47 = vector.shape_cast %46 : vector<1x32x256xbf16> to vector<32x256xbf16>
    %cst_48 = arith.constant dense<0.000000e+00> : vector<64x256xf32>
    %48 = tpu.matmul %45, %47, %cst_48 {dimension_numbers = #tpu.dot_dimension_numbers<[1], [0], [0], [1], [0, 0, 1, 1], [], []>} : vector<64x32xbf16>, vector<32x256xbf16>, vector<64x256xf32> -> vector<64x256xf32>
    %49 = arith.addf %42, %48 : vector<64x256xf32>
    %c1_49 = arith.constant 1 : index
    %c1_50 = arith.constant 1 : index
    %c0_51 = arith.constant 0 : index
    %c0_52 = arith.constant 0 : index
    %50 = vector.load %arg1[%c1_49, %c1_50, %c0_51, %c0_52] : memref<4x9x9x32xbf16, #tpu.memory_space<vmem>>, vector<1x8x8x32xbf16>
    %51 = vector.shape_cast %50 : vector<1x8x8x32xbf16> to vector<8x8x32xbf16>
    %52 = vector.shape_cast %51 : vector<8x8x32xbf16> to vector<64x32xbf16>
    %c7 = arith.constant 7 : index
    %c0_53 = arith.constant 0 : index
    %c0_54 = arith.constant 0 : index
    %53 = vector.load %arg2[%c7, %c0_53, %c0_54] : memref<9x32x256xbf16, #tpu.memory_space<vmem>>, vector<1x32x256xbf16>
    %54 = vector.shape_cast %53 : vector<1x32x256xbf16> to vector<32x256xbf16>
    %cst_55 = arith.constant dense<0.000000e+00> : vector<64x256xf32>
    %55 = tpu.matmul %52, %54, %cst_55 {dimension_numbers = #tpu.dot_dimension_numbers<[1], [0], [0], [1], [0, 0, 1, 1], [], []>} : vector<64x32xbf16>, vector<32x256xbf16>, vector<64x256xf32> -> vector<64x256xf32>
    %56 = arith.addf %49, %55 : vector<64x256xf32>
    %c0_56 = arith.constant 0 : index
    %c1_57 = arith.constant 1 : index
    %c1_58 = arith.constant 1 : index
    %c0_59 = arith.constant 0 : index
    %57 = vector.load %arg1[%c0_56, %c1_57, %c1_58, %c0_59] : memref<4x9x9x32xbf16, #tpu.memory_space<vmem>>, vector<1x8x8x32xbf16>
    %58 = vector.shape_cast %57 : vector<1x8x8x32xbf16> to vector<8x8x32xbf16>
    %59 = vector.shape_cast %58 : vector<8x8x32xbf16> to vector<64x32xbf16>
    %c8 = arith.constant 8 : index
    %c0_60 = arith.constant 0 : index
    %c0_61 = arith.constant 0 : index
    %60 = vector.load %arg2[%c8, %c0_60, %c0_61] : memref<9x32x256xbf16, #tpu.memory_space<vmem>>, vector<1x32x256xbf16>
    %61 = vector.shape_cast %60 : vector<1x32x256xbf16> to vector<32x256xbf16>
    %cst_62 = arith.constant dense<0.000000e+00> : vector<64x256xf32>
    %62 = tpu.matmul %59, %61, %cst_62 {dimension_numbers = #tpu.dot_dimension_numbers<[1], [0], [0], [1], [0, 0, 1, 1], [], []>} : vector<64x32xbf16>, vector<32x256xbf16>, vector<64x256xf32> -> vector<64x256xf32>
    %63 = arith.addf %56, %62 : vector<64x256xf32>
    %c0_63 = arith.constant 0 : index
    %c0_64 = arith.constant 0 : index
    %64 = vector.load %arg3[%c0_63, %c0_64] : memref<1x256xf32, #tpu.memory_space<vmem>>, vector<1x256xf32>
    %65 = vector.broadcast %64 : vector<1x256xf32> to vector<64x256xf32>
    %66 = arith.addf %63, %65 : vector<64x256xf32>
    %cst_65 = arith.constant 0.000000e+00 : f32
    %67 = vector.broadcast %cst_65 : f32 to vector<64x256xf32>
    %68 = arith.maximumf %66, %67 : vector<64x256xf32>
    %69 = vector.shape_cast %68 : vector<64x256xf32> to vector<8x8x256xf32>
    %70 = arith.truncf %69 : vector<8x8x256xf32> to vector<8x8x256xbf16>
    %c0_66 = arith.constant 0 : index
    %c0_67 = arith.constant 0 : index
    %c0_68 = arith.constant 0 : index
    %c0_69 = arith.constant 0 : index
    %71 = vector.load %arg4[%c0_66, %c0_67, %c0_68, %c0_69] : memref<1x8x8x256xbf16, #tpu.memory_space<vmem>>, vector<1x8x8x256xbf16>
    %72 = vector.shape_cast %71 : vector<1x8x8x256xbf16> to vector<8x8x256xbf16>
    %73 = vector.shape_cast %70 : vector<8x8x256xbf16> to vector<1x8x8x256xbf16>
    tpu.vector_store %arg4[%c0_66, %c0_67, %c0_68, %c0_69], %73 {strides = array<i32>} : memref<1x8x8x256xbf16, #tpu.memory_space<vmem>>, vector<1x8x8x256xbf16>,
    return
  }
  func.func @transform_0(%arg0: i32) -> (i32, i32, i32, i32) {
    %c0_i32 = arith.constant 0 : i32
    %c0_i32_0 = arith.constant 0 : i32
    %c0_i32_1 = arith.constant 0 : i32
    %c0_i32_2 = arith.constant 0 : i32
    return %arg0, %c0_i32, %c0_i32_0, %c0_i32_1 : i32, i32, i32, i32
  }
  func.func @transform_1(%arg0: i32) -> (i32, i32, i32) {
    %c0_i32 = arith.constant 0 : i32
    %c0_i32_0 = arith.constant 0 : i32
    %c0_i32_1 = arith.constant 0 : i32
    %c0_i32_2 = arith.constant 0 : i32
    return %c0_i32, %c0_i32_0, %c0_i32_1 : i32, i32, i32
  }
  func.func @transform_2(%arg0: i32) -> (i32, i32) {
    %c0_i32 = arith.constant 0 : i32
    %c0_i32_0 = arith.constant 0 : i32
    %c0_i32_1 = arith.constant 0 : i32
    return %c0_i32, %c0_i32_0 : i32, i32
  }
  func.func @transform_3(%arg0: i32) -> (i32, i32, i32, i32) {
    %c0_i32 = arith.constant 0 : i32
    %c0_i32_0 = arith.constant 0 : i32
    %c0_i32_1 = arith.constant 0 : i32
    %c0_i32_2 = arith.constant 0 : i32
    return %arg0, %c0_i32, %c0_i32_0, %c0_i32_1 : i32, i32, i32, i32
  }
}

module attributes {stable_mosaic.version = 11 : i64} {
  func.func @_decoder_kernel(%arg0: i32, %arg1: memref<1x10x10x256xbf16, #tpu.memory_space<vmem>>, %arg2: memref<1x10x10x256xbf16, #tpu.memory_space<vmem>>, %arg3: memref<9x256x128xbf16, #tpu.memory_space<vmem>>, %arg4: memref<9x256x128xbf16, #tpu.memory_space<vmem>>, %arg5: memref<1x128xf32, #tpu.memory_space<vmem>>, %arg6: memref<128x4xf32, #tpu.memory_space<vmem>>, %arg7: memref<1x4xf32, #tpu.memory_space<vmem>>, %arg8: memref<1x8x8x4xf32, #tpu.memory_space<vmem>>) attributes {dimension_semantics = [#tpu.dimension_semantics<parallel>], iteration_bounds = array<i64: 2>, scalar_prefetch = 0 : i64, scratch_operands = 0 : i64, tpu.core_type = #tpu.core_type<tc>, window_params = [{transform_indices = @transform_0, window_bounds = array<i64: 1, 10, 10, 256>}, {transform_indices = @transform_1, window_bounds = array<i64: 1, 10, 10, 256>}, {pipeline_mode = #tpu.pipeline_mode<synchronous>, transform_indices = @transform_2, window_bounds = array<i64: 9, 256, 128>}, {pipeline_mode = #tpu.pipeline_mode<synchronous>, transform_indices = @transform_3, window_bounds = array<i64: 9, 256, 128>}, {pipeline_mode = #tpu.pipeline_mode<synchronous>, transform_indices = @transform_4, window_bounds = array<i64: 1, 128>}, {pipeline_mode = #tpu.pipeline_mode<synchronous>, transform_indices = @transform_5, window_bounds = array<i64: 128, 4>}, {pipeline_mode = #tpu.pipeline_mode<synchronous>, transform_indices = @transform_6, window_bounds = array<i64: 1, 4>}, {transform_indices = @transform_7, window_bounds = array<i64: 1, 8, 8, 4>}]} {
    %cst = arith.constant 0.000000e+00 : f32
    %0 = vector.broadcast %cst : f32 to vector<64x128xf32>
    %c0 = arith.constant 0 : index
    %c0_0 = arith.constant 0 : index
    %c0_1 = arith.constant 0 : index
    %c0_2 = arith.constant 0 : index
    %1 = vector.load %arg1[%c0, %c0_0, %c0_1, %c0_2] : memref<1x10x10x256xbf16, #tpu.memory_space<vmem>>, vector<1x8x8x256xbf16>
    %2 = vector.shape_cast %1 : vector<1x8x8x256xbf16> to vector<8x8x256xbf16>
    %3 = vector.shape_cast %2 : vector<8x8x256xbf16> to vector<64x256xbf16>
    %c0_3 = arith.constant 0 : index
    %c0_4 = arith.constant 0 : index
    %c0_5 = arith.constant 0 : index
    %4 = vector.load %arg3[%c0_3, %c0_4, %c0_5] : memref<9x256x128xbf16, #tpu.memory_space<vmem>>, vector<1x256x128xbf16>
    %5 = vector.shape_cast %4 : vector<1x256x128xbf16> to vector<256x128xbf16>
    %cst_6 = arith.constant dense<0.000000e+00> : vector<64x128xf32>
    %6 = tpu.matmul %3, %5, %cst_6 {dimension_numbers = #tpu.dot_dimension_numbers<[1], [0], [0], [1], [0, 0, 1, 1], [], []>} : vector<64x256xbf16>, vector<256x128xbf16>, vector<64x128xf32> -> vector<64x128xf32>
    %7 = arith.addf %0, %6 : vector<64x128xf32>
    %c0_7 = arith.constant 0 : index
    %c0_8 = arith.constant 0 : index
    %c0_9 = arith.constant 0 : index
    %c0_10 = arith.constant 0 : index
    %8 = vector.load %arg2[%c0_7, %c0_8, %c0_9, %c0_10] : memref<1x10x10x256xbf16, #tpu.memory_space<vmem>>, vector<1x8x8x256xbf16>
    %9 = vector.shape_cast %8 : vector<1x8x8x256xbf16> to vector<8x8x256xbf16>
    %10 = vector.shape_cast %9 : vector<8x8x256xbf16> to vector<64x256xbf16>
    %c0_11 = arith.constant 0 : index
    %c0_12 = arith.constant 0 : index
    %c0_13 = arith.constant 0 : index
    %11 = vector.load %arg4[%c0_11, %c0_12, %c0_13] : memref<9x256x128xbf16, #tpu.memory_space<vmem>>, vector<1x256x128xbf16>
    %12 = vector.shape_cast %11 : vector<1x256x128xbf16> to vector<256x128xbf16>
    %cst_14 = arith.constant dense<0.000000e+00> : vector<64x128xf32>
    %13 = tpu.matmul %10, %12, %cst_14 {dimension_numbers = #tpu.dot_dimension_numbers<[1], [0], [0], [1], [0, 0, 1, 1], [], []>} : vector<64x256xbf16>, vector<256x128xbf16>, vector<64x128xf32> -> vector<64x128xf32>
    %14 = arith.addf %7, %13 : vector<64x128xf32>
    %c0_15 = arith.constant 0 : index
    %c0_16 = arith.constant 0 : index
    %c1 = arith.constant 1 : index
    %c0_17 = arith.constant 0 : index
    %15 = vector.load %arg1[%c0_15, %c0_16, %c1, %c0_17] : memref<1x10x10x256xbf16, #tpu.memory_space<vmem>>, vector<1x8x8x256xbf16>
    %16 = vector.shape_cast %15 : vector<1x8x8x256xbf16> to vector<8x8x256xbf16>
    %17 = vector.shape_cast %16 : vector<8x8x256xbf16> to vector<64x256xbf16>
    %c1_18 = arith.constant 1 : index
    %c0_19 = arith.constant 0 : index
    %c0_20 = arith.constant 0 : index
    %18 = vector.load %arg3[%c1_18, %c0_19, %c0_20] : memref<9x256x128xbf16, #tpu.memory_space<vmem>>, vector<1x256x128xbf16>
    %19 = vector.shape_cast %18 : vector<1x256x128xbf16> to vector<256x128xbf16>
    %cst_21 = arith.constant dense<0.000000e+00> : vector<64x128xf32>
    %20 = tpu.matmul %17, %19, %cst_21 {dimension_numbers = #tpu.dot_dimension_numbers<[1], [0], [0], [1], [0, 0, 1, 1], [], []>} : vector<64x256xbf16>, vector<256x128xbf16>, vector<64x128xf32> -> vector<64x128xf32>
    %21 = arith.addf %14, %20 : vector<64x128xf32>
    %c0_22 = arith.constant 0 : index
    %c0_23 = arith.constant 0 : index
    %c1_24 = arith.constant 1 : index
    %c0_25 = arith.constant 0 : index
    %22 = vector.load %arg2[%c0_22, %c0_23, %c1_24, %c0_25] : memref<1x10x10x256xbf16, #tpu.memory_space<vmem>>, vector<1x8x8x256xbf16>
    %23 = vector.shape_cast %22 : vector<1x8x8x256xbf16> to vector<8x8x256xbf16>
    %24 = vector.shape_cast %23 : vector<8x8x256xbf16> to vector<64x256xbf16>
    %c1_26 = arith.constant 1 : index
    %c0_27 = arith.constant 0 : index
    %c0_28 = arith.constant 0 : index
    %25 = vector.load %arg4[%c1_26, %c0_27, %c0_28] : memref<9x256x128xbf16, #tpu.memory_space<vmem>>, vector<1x256x128xbf16>
    %26 = vector.shape_cast %25 : vector<1x256x128xbf16> to vector<256x128xbf16>
    %cst_29 = arith.constant dense<0.000000e+00> : vector<64x128xf32>
    %27 = tpu.matmul %24, %26, %cst_29 {dimension_numbers = #tpu.dot_dimension_numbers<[1], [0], [0], [1], [0, 0, 1, 1], [], []>} : vector<64x256xbf16>, vector<256x128xbf16>, vector<64x128xf32> -> vector<64x128xf32>
    %28 = arith.addf %21, %27 : vector<64x128xf32>
    %c0_30 = arith.constant 0 : index
    %c0_31 = arith.constant 0 : index
    %c2 = arith.constant 2 : index
    %c0_32 = arith.constant 0 : index
    %29 = vector.load %arg1[%c0_30, %c0_31, %c2, %c0_32] : memref<1x10x10x256xbf16, #tpu.memory_space<vmem>>, vector<1x8x8x256xbf16>
    %30 = vector.shape_cast %29 : vector<1x8x8x256xbf16> to vector<8x8x256xbf16>
    %31 = vector.shape_cast %30 : vector<8x8x256xbf16> to vector<64x256xbf16>
    %c2_33 = arith.constant 2 : index
    %c0_34 = arith.constant 0 : index
    %c0_35 = arith.constant 0 : index
    %32 = vector.load %arg3[%c2_33, %c0_34, %c0_35] : memref<9x256x128xbf16, #tpu.memory_space<vmem>>, vector<1x256x128xbf16>
    %33 = vector.shape_cast %32 : vector<1x256x128xbf16> to vector<256x128xbf16>
    %cst_36 = arith.constant dense<0.000000e+00> : vector<64x128xf32>
    %34 = tpu.matmul %31, %33, %cst_36 {dimension_numbers = #tpu.dot_dimension_numbers<[1], [0], [0], [1], [0, 0, 1, 1], [], []>} : vector<64x256xbf16>, vector<256x128xbf16>, vector<64x128xf32> -> vector<64x128xf32>
    %35 = arith.addf %28, %34 : vector<64x128xf32>
    %c0_37 = arith.constant 0 : index
    %c0_38 = arith.constant 0 : index
    %c2_39 = arith.constant 2 : index
    %c0_40 = arith.constant 0 : index
    %36 = vector.load %arg2[%c0_37, %c0_38, %c2_39, %c0_40] : memref<1x10x10x256xbf16, #tpu.memory_space<vmem>>, vector<1x8x8x256xbf16>
    %37 = vector.shape_cast %36 : vector<1x8x8x256xbf16> to vector<8x8x256xbf16>
    %38 = vector.shape_cast %37 : vector<8x8x256xbf16> to vector<64x256xbf16>
    %c2_41 = arith.constant 2 : index
    %c0_42 = arith.constant 0 : index
    %c0_43 = arith.constant 0 : index
    %39 = vector.load %arg4[%c2_41, %c0_42, %c0_43] : memref<9x256x128xbf16, #tpu.memory_space<vmem>>, vector<1x256x128xbf16>
    %40 = vector.shape_cast %39 : vector<1x256x128xbf16> to vector<256x128xbf16>
    %cst_44 = arith.constant dense<0.000000e+00> : vector<64x128xf32>
    %41 = tpu.matmul %38, %40, %cst_44 {dimension_numbers = #tpu.dot_dimension_numbers<[1], [0], [0], [1], [0, 0, 1, 1], [], []>} : vector<64x256xbf16>, vector<256x128xbf16>, vector<64x128xf32> -> vector<64x128xf32>
    %42 = arith.addf %35, %41 : vector<64x128xf32>
    %c0_45 = arith.constant 0 : index
    %c1_46 = arith.constant 1 : index
    %c0_47 = arith.constant 0 : index
    %c0_48 = arith.constant 0 : index
    %43 = vector.load %arg1[%c0_45, %c1_46, %c0_47, %c0_48] : memref<1x10x10x256xbf16, #tpu.memory_space<vmem>>, vector<1x8x8x256xbf16>
    %44 = vector.shape_cast %43 : vector<1x8x8x256xbf16> to vector<8x8x256xbf16>
    %45 = vector.shape_cast %44 : vector<8x8x256xbf16> to vector<64x256xbf16>
    %c3 = arith.constant 3 : index
    %c0_49 = arith.constant 0 : index
    %c0_50 = arith.constant 0 : index
    %46 = vector.load %arg3[%c3, %c0_49, %c0_50] : memref<9x256x128xbf16, #tpu.memory_space<vmem>>, vector<1x256x128xbf16>
    %47 = vector.shape_cast %46 : vector<1x256x128xbf16> to vector<256x128xbf16>
    %cst_51 = arith.constant dense<0.000000e+00> : vector<64x128xf32>
    %48 = tpu.matmul %45, %47, %cst_51 {dimension_numbers = #tpu.dot_dimension_numbers<[1], [0], [0], [1], [0, 0, 1, 1], [], []>} : vector<64x256xbf16>, vector<256x128xbf16>, vector<64x128xf32> -> vector<64x128xf32>
    %49 = arith.addf %42, %48 : vector<64x128xf32>
    %c0_52 = arith.constant 0 : index
    %c1_53 = arith.constant 1 : index
    %c0_54 = arith.constant 0 : index
    %c0_55 = arith.constant 0 : index
    %50 = vector.load %arg2[%c0_52, %c1_53, %c0_54, %c0_55] : memref<1x10x10x256xbf16, #tpu.memory_space<vmem>>, vector<1x8x8x256xbf16>
    %51 = vector.shape_cast %50 : vector<1x8x8x256xbf16> to vector<8x8x256xbf16>
    %52 = vector.shape_cast %51 : vector<8x8x256xbf16> to vector<64x256xbf16>
    %c3_56 = arith.constant 3 : index
    %c0_57 = arith.constant 0 : index
    %c0_58 = arith.constant 0 : index
    %53 = vector.load %arg4[%c3_56, %c0_57, %c0_58] : memref<9x256x128xbf16, #tpu.memory_space<vmem>>, vector<1x256x128xbf16>
    %54 = vector.shape_cast %53 : vector<1x256x128xbf16> to vector<256x128xbf16>
    %cst_59 = arith.constant dense<0.000000e+00> : vector<64x128xf32>
    %55 = tpu.matmul %52, %54, %cst_59 {dimension_numbers = #tpu.dot_dimension_numbers<[1], [0], [0], [1], [0, 0, 1, 1], [], []>} : vector<64x256xbf16>, vector<256x128xbf16>, vector<64x128xf32> -> vector<64x128xf32>
    %56 = arith.addf %49, %55 : vector<64x128xf32>
    %c0_60 = arith.constant 0 : index
    %c1_61 = arith.constant 1 : index
    %c1_62 = arith.constant 1 : index
    %c0_63 = arith.constant 0 : index
    %57 = vector.load %arg1[%c0_60, %c1_61, %c1_62, %c0_63] : memref<1x10x10x256xbf16, #tpu.memory_space<vmem>>, vector<1x8x8x256xbf16>
    %58 = vector.shape_cast %57 : vector<1x8x8x256xbf16> to vector<8x8x256xbf16>
    %59 = vector.shape_cast %58 : vector<8x8x256xbf16> to vector<64x256xbf16>
    %c4 = arith.constant 4 : index
    %c0_64 = arith.constant 0 : index
    %c0_65 = arith.constant 0 : index
    %60 = vector.load %arg3[%c4, %c0_64, %c0_65] : memref<9x256x128xbf16, #tpu.memory_space<vmem>>, vector<1x256x128xbf16>
    %61 = vector.shape_cast %60 : vector<1x256x128xbf16> to vector<256x128xbf16>
    %cst_66 = arith.constant dense<0.000000e+00> : vector<64x128xf32>
    %62 = tpu.matmul %59, %61, %cst_66 {dimension_numbers = #tpu.dot_dimension_numbers<[1], [0], [0], [1], [0, 0, 1, 1], [], []>} : vector<64x256xbf16>, vector<256x128xbf16>, vector<64x128xf32> -> vector<64x128xf32>
    %63 = arith.addf %56, %62 : vector<64x128xf32>
    %c0_67 = arith.constant 0 : index
    %c1_68 = arith.constant 1 : index
    %c1_69 = arith.constant 1 : index
    %c0_70 = arith.constant 0 : index
    %64 = vector.load %arg2[%c0_67, %c1_68, %c1_69, %c0_70] : memref<1x10x10x256xbf16, #tpu.memory_space<vmem>>, vector<1x8x8x256xbf16>
    %65 = vector.shape_cast %64 : vector<1x8x8x256xbf16> to vector<8x8x256xbf16>
    %66 = vector.shape_cast %65 : vector<8x8x256xbf16> to vector<64x256xbf16>
    %c4_71 = arith.constant 4 : index
    %c0_72 = arith.constant 0 : index
    %c0_73 = arith.constant 0 : index
    %67 = vector.load %arg4[%c4_71, %c0_72, %c0_73] : memref<9x256x128xbf16, #tpu.memory_space<vmem>>, vector<1x256x128xbf16>
    %68 = vector.shape_cast %67 : vector<1x256x128xbf16> to vector<256x128xbf16>
    %cst_74 = arith.constant dense<0.000000e+00> : vector<64x128xf32>
    %69 = tpu.matmul %66, %68, %cst_74 {dimension_numbers = #tpu.dot_dimension_numbers<[1], [0], [0], [1], [0, 0, 1, 1], [], []>} : vector<64x256xbf16>, vector<256x128xbf16>, vector<64x128xf32> -> vector<64x128xf32>
    %70 = arith.addf %63, %69 : vector<64x128xf32>
    %c0_75 = arith.constant 0 : index
    %c1_76 = arith.constant 1 : index
    %c2_77 = arith.constant 2 : index
    %c0_78 = arith.constant 0 : index
    %71 = vector.load %arg1[%c0_75, %c1_76, %c2_77, %c0_78] : memref<1x10x10x256xbf16, #tpu.memory_space<vmem>>, vector<1x8x8x256xbf16>
    %72 = vector.shape_cast %71 : vector<1x8x8x256xbf16> to vector<8x8x256xbf16>
    %73 = vector.shape_cast %72 : vector<8x8x256xbf16> to vector<64x256xbf16>
    %c5 = arith.constant 5 : index
    %c0_79 = arith.constant 0 : index
    %c0_80 = arith.constant 0 : index
    %74 = vector.load %arg3[%c5, %c0_79, %c0_80] : memref<9x256x128xbf16, #tpu.memory_space<vmem>>, vector<1x256x128xbf16>
    %75 = vector.shape_cast %74 : vector<1x256x128xbf16> to vector<256x128xbf16>
    %cst_81 = arith.constant dense<0.000000e+00> : vector<64x128xf32>
    %76 = tpu.matmul %73, %75, %cst_81 {dimension_numbers = #tpu.dot_dimension_numbers<[1], [0], [0], [1], [0, 0, 1, 1], [], []>} : vector<64x256xbf16>, vector<256x128xbf16>, vector<64x128xf32> -> vector<64x128xf32>
    %77 = arith.addf %70, %76 : vector<64x128xf32>
    %c0_82 = arith.constant 0 : index
    %c1_83 = arith.constant 1 : index
    %c2_84 = arith.constant 2 : index
    %c0_85 = arith.constant 0 : index
    %78 = vector.load %arg2[%c0_82, %c1_83, %c2_84, %c0_85] : memref<1x10x10x256xbf16, #tpu.memory_space<vmem>>, vector<1x8x8x256xbf16>
    %79 = vector.shape_cast %78 : vector<1x8x8x256xbf16> to vector<8x8x256xbf16>
    %80 = vector.shape_cast %79 : vector<8x8x256xbf16> to vector<64x256xbf16>
    %c5_86 = arith.constant 5 : index
    %c0_87 = arith.constant 0 : index
    %c0_88 = arith.constant 0 : index
    %81 = vector.load %arg4[%c5_86, %c0_87, %c0_88] : memref<9x256x128xbf16, #tpu.memory_space<vmem>>, vector<1x256x128xbf16>
    %82 = vector.shape_cast %81 : vector<1x256x128xbf16> to vector<256x128xbf16>
    %cst_89 = arith.constant dense<0.000000e+00> : vector<64x128xf32>
    %83 = tpu.matmul %80, %82, %cst_89 {dimension_numbers = #tpu.dot_dimension_numbers<[1], [0], [0], [1], [0, 0, 1, 1], [], []>} : vector<64x256xbf16>, vector<256x128xbf16>, vector<64x128xf32> -> vector<64x128xf32>
    %84 = arith.addf %77, %83 : vector<64x128xf32>
    %c0_90 = arith.constant 0 : index
    %c2_91 = arith.constant 2 : index
    %c0_92 = arith.constant 0 : index
    %c0_93 = arith.constant 0 : index
    %85 = vector.load %arg1[%c0_90, %c2_91, %c0_92, %c0_93] : memref<1x10x10x256xbf16, #tpu.memory_space<vmem>>, vector<1x8x8x256xbf16>
    %86 = vector.shape_cast %85 : vector<1x8x8x256xbf16> to vector<8x8x256xbf16>
    %87 = vector.shape_cast %86 : vector<8x8x256xbf16> to vector<64x256xbf16>
    %c6 = arith.constant 6 : index
    %c0_94 = arith.constant 0 : index
    %c0_95 = arith.constant 0 : index
    %88 = vector.load %arg3[%c6, %c0_94, %c0_95] : memref<9x256x128xbf16, #tpu.memory_space<vmem>>, vector<1x256x128xbf16>
    %89 = vector.shape_cast %88 : vector<1x256x128xbf16> to vector<256x128xbf16>
    %cst_96 = arith.constant dense<0.000000e+00> : vector<64x128xf32>
    %90 = tpu.matmul %87, %89, %cst_96 {dimension_numbers = #tpu.dot_dimension_numbers<[1], [0], [0], [1], [0, 0, 1, 1], [], []>} : vector<64x256xbf16>, vector<256x128xbf16>, vector<64x128xf32> -> vector<64x128xf32>
    %91 = arith.addf %84, %90 : vector<64x128xf32>
    %c0_97 = arith.constant 0 : index
    %c2_98 = arith.constant 2 : index
    %c0_99 = arith.constant 0 : index
    %c0_100 = arith.constant 0 : index
    %92 = vector.load %arg2[%c0_97, %c2_98, %c0_99, %c0_100] : memref<1x10x10x256xbf16, #tpu.memory_space<vmem>>, vector<1x8x8x256xbf16>
    %93 = vector.shape_cast %92 : vector<1x8x8x256xbf16> to vector<8x8x256xbf16>
    %94 = vector.shape_cast %93 : vector<8x8x256xbf16> to vector<64x256xbf16>
    %c6_101 = arith.constant 6 : index
    %c0_102 = arith.constant 0 : index
    %c0_103 = arith.constant 0 : index
    %95 = vector.load %arg4[%c6_101, %c0_102, %c0_103] : memref<9x256x128xbf16, #tpu.memory_space<vmem>>, vector<1x256x128xbf16>
    %96 = vector.shape_cast %95 : vector<1x256x128xbf16> to vector<256x128xbf16>
    %cst_104 = arith.constant dense<0.000000e+00> : vector<64x128xf32>
    %97 = tpu.matmul %94, %96, %cst_104 {dimension_numbers = #tpu.dot_dimension_numbers<[1], [0], [0], [1], [0, 0, 1, 1], [], []>} : vector<64x256xbf16>, vector<256x128xbf16>, vector<64x128xf32> -> vector<64x128xf32>
    %98 = arith.addf %91, %97 : vector<64x128xf32>
    %c0_105 = arith.constant 0 : index
    %c2_106 = arith.constant 2 : index
    %c1_107 = arith.constant 1 : index
    %c0_108 = arith.constant 0 : index
    %99 = vector.load %arg1[%c0_105, %c2_106, %c1_107, %c0_108] : memref<1x10x10x256xbf16, #tpu.memory_space<vmem>>, vector<1x8x8x256xbf16>
    %100 = vector.shape_cast %99 : vector<1x8x8x256xbf16> to vector<8x8x256xbf16>
    %101 = vector.shape_cast %100 : vector<8x8x256xbf16> to vector<64x256xbf16>
    %c7 = arith.constant 7 : index
    %c0_109 = arith.constant 0 : index
    %c0_110 = arith.constant 0 : index
    %102 = vector.load %arg3[%c7, %c0_109, %c0_110] : memref<9x256x128xbf16, #tpu.memory_space<vmem>>, vector<1x256x128xbf16>
    %103 = vector.shape_cast %102 : vector<1x256x128xbf16> to vector<256x128xbf16>
    %cst_111 = arith.constant dense<0.000000e+00> : vector<64x128xf32>
    %104 = tpu.matmul %101, %103, %cst_111 {dimension_numbers = #tpu.dot_dimension_numbers<[1], [0], [0], [1], [0, 0, 1, 1], [], []>} : vector<64x256xbf16>, vector<256x128xbf16>, vector<64x128xf32> -> vector<64x128xf32>
    %105 = arith.addf %98, %104 : vector<64x128xf32>
    %c0_112 = arith.constant 0 : index
    %c2_113 = arith.constant 2 : index
    %c1_114 = arith.constant 1 : index
    %c0_115 = arith.constant 0 : index
    %106 = vector.load %arg2[%c0_112, %c2_113, %c1_114, %c0_115] : memref<1x10x10x256xbf16, #tpu.memory_space<vmem>>, vector<1x8x8x256xbf16>
    %107 = vector.shape_cast %106 : vector<1x8x8x256xbf16> to vector<8x8x256xbf16>
    %108 = vector.shape_cast %107 : vector<8x8x256xbf16> to vector<64x256xbf16>
    %c7_116 = arith.constant 7 : index
    %c0_117 = arith.constant 0 : index
    %c0_118 = arith.constant 0 : index
    %109 = vector.load %arg4[%c7_116, %c0_117, %c0_118] : memref<9x256x128xbf16, #tpu.memory_space<vmem>>, vector<1x256x128xbf16>
    %110 = vector.shape_cast %109 : vector<1x256x128xbf16> to vector<256x128xbf16>
    %cst_119 = arith.constant dense<0.000000e+00> : vector<64x128xf32>
    %111 = tpu.matmul %108, %110, %cst_119 {dimension_numbers = #tpu.dot_dimension_numbers<[1], [0], [0], [1], [0, 0, 1, 1], [], []>} : vector<64x256xbf16>, vector<256x128xbf16>, vector<64x128xf32> -> vector<64x128xf32>
    %112 = arith.addf %105, %111 : vector<64x128xf32>
    %c0_120 = arith.constant 0 : index
    %c2_121 = arith.constant 2 : index
    %c2_122 = arith.constant 2 : index
    %c0_123 = arith.constant 0 : index
    %113 = vector.load %arg1[%c0_120, %c2_121, %c2_122, %c0_123] : memref<1x10x10x256xbf16, #tpu.memory_space<vmem>>, vector<1x8x8x256xbf16>
    %114 = vector.shape_cast %113 : vector<1x8x8x256xbf16> to vector<8x8x256xbf16>
    %115 = vector.shape_cast %114 : vector<8x8x256xbf16> to vector<64x256xbf16>
    %c8 = arith.constant 8 : index
    %c0_124 = arith.constant 0 : index
    %c0_125 = arith.constant 0 : index
    %116 = vector.load %arg3[%c8, %c0_124, %c0_125] : memref<9x256x128xbf16, #tpu.memory_space<vmem>>, vector<1x256x128xbf16>
    %117 = vector.shape_cast %116 : vector<1x256x128xbf16> to vector<256x128xbf16>
    %cst_126 = arith.constant dense<0.000000e+00> : vector<64x128xf32>
    %118 = tpu.matmul %115, %117, %cst_126 {dimension_numbers = #tpu.dot_dimension_numbers<[1], [0], [0], [1], [0, 0, 1, 1], [], []>} : vector<64x256xbf16>, vector<256x128xbf16>, vector<64x128xf32> -> vector<64x128xf32>
    %119 = arith.addf %112, %118 : vector<64x128xf32>
    %c0_127 = arith.constant 0 : index
    %c2_128 = arith.constant 2 : index
    %c2_129 = arith.constant 2 : index
    %c0_130 = arith.constant 0 : index
    %120 = vector.load %arg2[%c0_127, %c2_128, %c2_129, %c0_130] : memref<1x10x10x256xbf16, #tpu.memory_space<vmem>>, vector<1x8x8x256xbf16>
    %121 = vector.shape_cast %120 : vector<1x8x8x256xbf16> to vector<8x8x256xbf16>
    %122 = vector.shape_cast %121 : vector<8x8x256xbf16> to vector<64x256xbf16>
    %c8_131 = arith.constant 8 : index
    %c0_132 = arith.constant 0 : index
    %c0_133 = arith.constant 0 : index
    %123 = vector.load %arg4[%c8_131, %c0_132, %c0_133] : memref<9x256x128xbf16, #tpu.memory_space<vmem>>, vector<1x256x128xbf16>
    %124 = vector.shape_cast %123 : vector<1x256x128xbf16> to vector<256x128xbf16>
    %cst_134 = arith.constant dense<0.000000e+00> : vector<64x128xf32>
    %125 = tpu.matmul %122, %124, %cst_134 {dimension_numbers = #tpu.dot_dimension_numbers<[1], [0], [0], [1], [0, 0, 1, 1], [], []>} : vector<64x256xbf16>, vector<256x128xbf16>, vector<64x128xf32> -> vector<64x128xf32>
    %126 = arith.addf %119, %125 : vector<64x128xf32>
    %c0_135 = arith.constant 0 : index
    %c0_136 = arith.constant 0 : index
    %127 = vector.load %arg5[%c0_135, %c0_136] : memref<1x128xf32, #tpu.memory_space<vmem>>, vector<1x128xf32>
    %128 = vector.broadcast %127 : vector<1x128xf32> to vector<64x128xf32>
    %129 = arith.addf %126, %128 : vector<64x128xf32>
    %cst_137 = arith.constant 0.000000e+00 : f32
    %130 = vector.broadcast %cst_137 : f32 to vector<64x128xf32>
    %131 = arith.maximumf %129, %130 : vector<64x128xf32>
    %c0_138 = arith.constant 0 : index
    %c0_139 = arith.constant 0 : index
    %132 = vector.load %arg6[%c0_138, %c0_139] : memref<128x4xf32, #tpu.memory_space<vmem>>, vector<128x4xf32>
    %cst_140 = arith.constant dense<0.000000e+00> : vector<64x4xf32>
    %133 = tpu.matmul %131, %132, %cst_140 {dimension_numbers = #tpu.dot_dimension_numbers<[1], [0], [0], [1], [0, 0, 1, 1], [], []>} : vector<64x128xf32>, vector<128x4xf32>, vector<64x4xf32> -> vector<64x4xf32>
    %c0_141 = arith.constant 0 : index
    %c0_142 = arith.constant 0 : index
    %134 = vector.load %arg7[%c0_141, %c0_142] : memref<1x4xf32, #tpu.memory_space<vmem>>, vector<1x4xf32>
    %135 = vector.broadcast %134 : vector<1x4xf32> to vector<64x4xf32>
    %136 = arith.addf %133, %135 : vector<64x4xf32>
    %137 = vector.shape_cast %136 : vector<64x4xf32> to vector<8x8x4xf32>
    %c0_143 = arith.constant 0 : index
    %c0_144 = arith.constant 0 : index
    %c0_145 = arith.constant 0 : index
    %c0_146 = arith.constant 0 : index
    %138 = vector.load %arg8[%c0_143, %c0_144, %c0_145, %c0_146] : memref<1x8x8x4xf32, #tpu.memory_space<vmem>>, vector<1x8x8x4xf32>
    %139 = vector.shape_cast %138 : vector<1x8x8x4xf32> to vector<8x8x4xf32>
    %140 = vector.shape_cast %137 : vector<8x8x4xf32> to vector<1x8x8x4xf32>
    tpu.vector_store %arg8[%c0_143, %c0_144, %c0_145, %c0_146], %140 {strides = array<i32>} : memref<1x8x8x4xf32, #tpu.memory_space<vmem>>, vector<1x8x8x4xf32>,
    return
  }
  func.func @transform_0(%arg0: i32) -> (i32, i32, i32, i32) {
    %c0_i32 = arith.constant 0 : i32
    %c0_i32_0 = arith.constant 0 : i32
    %c0_i32_1 = arith.constant 0 : i32
    %c0_i32_2 = arith.constant 0 : i32
    return %arg0, %c0_i32, %c0_i32_0, %c0_i32_1 : i32, i32, i32, i32
  }
  func.func @transform_1(%arg0: i32) -> (i32, i32, i32, i32) {
    %c0_i32 = arith.constant 0 : i32
    %c0_i32_0 = arith.constant 0 : i32
    %c0_i32_1 = arith.constant 0 : i32
    %c0_i32_2 = arith.constant 0 : i32
    return %arg0, %c0_i32, %c0_i32_0, %c0_i32_1 : i32, i32, i32, i32
  }
  func.func @transform_2(%arg0: i32) -> (i32, i32, i32) {
    %c0_i32 = arith.constant 0 : i32
    %c0_i32_0 = arith.constant 0 : i32
    %c0_i32_1 = arith.constant 0 : i32
    %c0_i32_2 = arith.constant 0 : i32
    return %c0_i32, %c0_i32_0, %c0_i32_1 : i32, i32, i32
  }
  func.func @transform_3(%arg0: i32) -> (i32, i32, i32) {
    %c0_i32 = arith.constant 0 : i32
    %c0_i32_0 = arith.constant 0 : i32
    %c0_i32_1 = arith.constant 0 : i32
    %c0_i32_2 = arith.constant 0 : i32
    return %c0_i32, %c0_i32_0, %c0_i32_1 : i32, i32, i32
  }
  func.func @transform_4(%arg0: i32) -> (i32, i32) {
    %c0_i32 = arith.constant 0 : i32
    %c0_i32_0 = arith.constant 0 : i32
    %c0_i32_1 = arith.constant 0 : i32
    return %c0_i32, %c0_i32_0 : i32, i32
  }
  func.func @transform_5(%arg0: i32) -> (i32, i32) {
    %c0_i32 = arith.constant 0 : i32
    %c0_i32_0 = arith.constant 0 : i32
    %c0_i32_1 = arith.constant 0 : i32
    return %c0_i32, %c0_i32_0 : i32, i32
  }
  func.func @transform_6(%arg0: i32) -> (i32, i32) {
    %c0_i32 = arith.constant 0 : i32
    %c0_i32_0 = arith.constant 0 : i32
    %c0_i32_1 = arith.constant 0 : i32
    return %c0_i32, %c0_i32_0 : i32, i32
  }
  func.func @transform_7(%arg0: i32) -> (i32, i32, i32, i32) {
    %c0_i32 = arith.constant 0 : i32
    %c0_i32_0 = arith.constant 0 : i32
    %c0_i32_1 = arith.constant 0 : i32
    %c0_i32_2 = arith.constant 0 : i32
    return %arg0, %c0_i32, %c0_i32_0, %c0_i32_1 : i32, i32, i32, i32
  }
}

</mosaic_0001>

<bundles_post_ra>
// kernel: disaster_sam_v2.4
= control target key start
LH: loop header
LB: loop body
LE: loop exit
PB: predicated region body
PF: predicated region fallthrough
CT: control target
= control target key end

     0   :  { %s2535_s12 = smov 0   ;;  %s2914_s0 = inlined_call_operand.vmem [shape: bf16[16,9,9,32], index: 0, kind: input, shape index: {}]   ;;  %s2915_s1 = inlined_call_operand.vmem [shape: bf16[9,32,256], index: 1, kind: input, shape index: {}]   ;;  %s2916_s2 = inlined_call_operand.vmem [shape: f32[1,256], index: 2, kind: input, shape index: {}]   ;;  %s2917_s3 = inlined_call_operand.vmem [shape: bf16[4,8,8,256], index: 3, kind: output, shape index: {}]  }
   0x1 LB: > { %s2541_s13 = sadd.s32 4294967295, %s2512_s12   ;;  %p2050_p0 = scmp.ge.s32.totalorder %s2512_s12, 1  ;;  %s2512_s12 = sphi %s2535_s12, %s13_s12  }
   0x2   : > { %p139_p1 = scmp.lt.s32.totalorder %s2512_s12, 5 }
   0x4   : > { %p140_p2 = pnand %p2050_p0, %p139_p1 }
   0x5   : > { %v2428_v0 = vld [vmem:[%s2915_s1 + $0x24] ss:$8 sps:$4 sm:$0xff] (!%p140_p2)   ;;  %s2051_s16 = sshll.u32 (!%p140_p2), %s2541_s13, 2  ;;  %v2514_v2 = vmov (!%p140_p2), 0   ;;  %v2432_v3 = vld [vmem:[%s2915_s1 + $0x20] ss:$8 sps:$4 sm:$0xff] (!%p140_p2)  }
   0x6   : > { %143 = sbr.rel (%p140_p2) target bundleno = 378 (0x17a), region = 32  ;;  %v2552_v1 = vld [vmem:[%s2915_s1 + $0x84] ss:$8 sps:$4 sm:$0xff] (!%p140_p2)   ;;  %288 = vmatprep.mubr.bf16.mxu1 (!%p140_p2), %v2514_v2  ;;  %976 = vmatprep.mubr.bf16.mxu0 (!%p140_p2), %v2514_v2  ;;  %p165_p3 = scmp.lt.s32.totalorder (!%p140_p2), %s2051_s16, 15  ;;  %v2562_v4 = vld [vmem:[%s2915_s1 + $0x80] ss:$8 sps:$4 sm:$0xff] (!%p140_p2)  }
   0x7   : > { %256 = vmatprep.subr.bf16.mxu1 (!%p140_p2), %v2428_v0  ;;  %944 = vmatprep.subr.bf16.mxu0 (!%p140_p2), %v2552_v1  ;;  %v2434_v5 = vld [vmem:[%s2915_s1 + $0x34] ss:$8 sps:$4 sm:$0xff] (!%p140_p2)   ;;  %v2438_v7 = vld [vmem:[%s2915_s1 + $0x30] ss:$8 sps:$4 sm:$0xff] (!%p140_p2)   ;;  %v2441_v9 = vld [vmem:[%s2915_s1] ss:$8 sps:$4 sm:$0xff] (!%p140_p2)  }
   0x8   : > { %257 = vmatpush1.bf16.msra.mxu1 (!%p140_p2), %v2432_v3  ;;  %945 = vmatpush1.bf16.msra.mxu0 (!%p140_p2), %v2562_v4  ;;  %v2572_v6 = vld [vmem:[%s2915_s1 + $0x94] ss:$8 sps:$4 sm:$0xff] (!%p140_p2)   ;;  %v2580_v8 = vld [vmem:[%s2915_s1 + $0x90] ss:$8 sps:$4 sm:$0xff] (!%p140_p2)   ;;  %v2443_v10 = vld [vmem:[%s2915_s1 + $0x4] ss:$8 sps:$4 sm:$0xff] (!%p140_p2)  }
   0x9   : > { %258 = vmatprep.subr.bf16.mxu1 (!%p140_p2), %v2434_v5  ;;  %946 = vmatprep.subr.bf16.mxu0 (!%p140_p2), %v2572_v6  ;;  %vm243_vm0 = vcmask (!%p140_p2), 261120   ;;  %v2445_v11 = vld [vmem:[%s2915_s1 + $0xa0] ss:$8 sps:$4 sm:$0xff] (!%p140_p2)   ;;  %v2447_v12 = vld [vmem:[%s2915_s1 + $0xa4] ss:$8 sps:$4 sm:$0xff] (!%p140_p2)   ;;  %p171_p4 = scmp.lt.s32.totalorder (!%p140_p2), %s2541_s13, 3 }
   0xa   : > { %v2450_v15 = vld [vmem:[%s2915_s1 + $0xb0] ss:$8 sps:$4 sm:$0xff] (!%p140_p2)   ;;  %v2452_v17 = vld [vmem:[%s2915_s1 + $0xb4] ss:$8 sps:$4 sm:$0xff] (!%p140_p2)   ;;  %vm470_vm1 = vsmask.f32 (!%p140_p2), 3328 }
   0xb   : > { %v2454_v19 = vld [vmem:[%s2915_s1 + $0x10] ss:$8 sps:$4 sm:$0xff] (!%p140_p2)   ;;  %v2456_v20 = vld [vmem:[%s2915_s1 + $0x14] ss:$8 sps:$4 sm:$0xff] (!%p140_p2)   ;;  %vm471_vm2 = vsmask.f32 (!%p140_p2), 7440 }
   0xc   : > { %259 = vmatpush1.bf16.msra.mxu1 (!%p140_p2), %v2438_v7  ;;  %947 = vmatpush1.bf16.msra.mxu0 (!%p140_p2), %v2580_v8  ;;  %v2459_v34 = vld [vmem:[%s2915_s1 + $0xc4] ss:$8 sps:$4 sm:$0xff] (!%p140_p2)   ;;  %vm2637_vm3 = vmor (!%p140_p2), %vm470_vm1, %vm471_vm2  ;;  %v2457_v57 = vld [vmem:[%s2915_s1 + $0xc0] ss:$8 sps:$4 sm:$0xff] (!%p140_p2)  }
   0xd   : > { %s2921_s16 = smov (!%p165_p3, %s2051_s16), 15  ;;  %381 = vmatprep.subr.bf16.mxu1 %v2443_v10  ;;  %1210 = vmatprep.subr.bf16.mxu0 %v2447_v12  ;;  %v2464_v0 = vld [vmem:[%s2915_s1 + $0x44] ss:$8 sps:$4 sm:$0xff]   ;;  %s2923_s13 = smov (!%p171_p4, %s2541_s13), 3 }
   0xe   : > { %s2418_s4 = smul.u32 72, %s2921_s16  ;;  %s2277_s19 = sshll.u32 %s2923_s13, 6 }
   0xf   : > { %s2889_s22 = scalar_lea.vmem %s2917_s3, %s2277_s19 }
  0x10   : > { %s2592_s11 = scalar_lea.vmem %s2914_s0, %s2418_s4 }
  0x11   : > { %v2440_v13 = vld [vmem:[%s2592_s11 + $0x48] ss:$8 sps:$4 sm:$0xff]   ;;  %v2444_v14 = vld [vmem:[%s2592_s11 + $0xd8] ss:$8 sps:$4 sm:$0xff]   ;;  %v2156_v22 = vld [vmem:[%s2592_s11 + $0x94] sm:$0x1] }
  0x12   : > { %2075 = vmatmul.mubr.msk.bf16.vlgmr.msra.gmra.mrb[0].mxu1 %vm243_vm0, %v2440_v13  ;;  %2151 = vmatmul.mubr.msk.bf16.vlgmr.msra.gmra.mrb[0].mxu0 %vm243_vm0, %v2444_v14  ;;  %v2448_v16 = vld [vmem:[%s2592_s11 + $0x58] ss:$8 sps:$4 sm:$0xff]   ;;  %v2449_v18 = vld [vmem:[%s2592_s11 + $0xe8] ss:$8 sps:$4 sm:$0xff]   ;;  %v2158_v24 = vld [vmem:[%s2592_s11 + $0x9c] sm:$0x1] }
  0x13   : > { %382 = vmatpush1.bf16.msra.mxu1 %v2441_v9  ;;  %1211 = vmatpush1.bf16.msra.mxu0 %v2445_v11  ;;  %v2155_v21 = vld [vmem:[%s2592_s11 + $0x90] sm:$0xf]  ;;  %v2157_v23 = vld [vmem:[%s2592_s11 + $0x98] sm:$0xf]  ;;  %v1059_v27 = vshll.u32 %v2156_v22, 16  ;;  %v1073_v30 = vshll.u32 %v2158_v24, 16 }
  0x14   : > { %298 = vmatprep.mubr.bf16.mxu1 %v2514_v2  ;;  %986 = vmatprep.mubr.bf16.mxu0 %v2514_v2  ;;  %v1050_v25 = vshrl.u32 %v2155_v21, 16  ;;  %v1053_v26 = vshll.u32 %v2155_v21, 16  ;;  %v1064_v28 = vshrl.u32 %v2157_v23, 16  ;;  %v1067_v29 = vshll.u32 %v2157_v23, 16  ;;  %v2453_v36 = vld [vmem:[%s2592_s11 + $0x68] ss:$8 sps:$4 sm:$0xff]  }
  0x15   : > { %1212 = vmatprep.subr.bf16.mxu0 %v2452_v17  ;;  %383 = vmatprep.subr.bf16.mxu1 %v2456_v20  ;;  %v1061_v38 = vrot.slane %v1059_v27, 5  ;;  %v1075_v39 = vrot.slane %v1073_v30, 5  ;;  %v2159_v40 = vld [vmem:[%s2592_s11 + $0xa0] sm:$0xf]  ;;  %v2160_v41 = vld [vmem:[%s2592_s11 + $0xa4] sm:$0x1] }
  0x16   : > { %v1052_v31 = vrot.slane %v1050_v25, 4  ;;  %v1055_v32 = vrot.slane %v1053_v26, 5  ;;  %v1066_v33 = vrot.slane %v1064_v28, 4  ;;  %v1069_v35 = vrot.slane %v1067_v29, 5  ;;  %v2161_v44 = vld [vmem:[%s2592_s11 + $0xa8] sm:$0xf] }
  0x17   : > { %1213 = vmatpush1.bf16.msra.mxu0 %v2450_v15  ;;  %384 = vmatpush1.bf16.msra.mxu1 %v2454_v19  ;;  %v2162_v45 = vld [vmem:[%s2592_s11 + $0xac] sm:$0x1]  ;;  %v1078_v46 = vshrl.u32 %v2159_v40, 16  ;;  %v1081_v47 = vshll.u32 %v2159_v40, 16  ;;  %v1087_v49 = vshll.u32 %v2160_v41, 16  ;;  %v1092_v50 = vshrl.u32 %v2161_v44, 16 }
  0x18   : > { %v1056_v37 = vor.u32 %v1055_v32, %v1052_v31  ;;  %1365 = vmatprep.subr.bf16.mxu0 %v2459_v34  ;;  %v1070_v43 = vor.u32 %v1069_v35, %v1066_v33  ;;  %v1095_v51 = vshll.u32 %v2161_v44, 16  ;;  %v1101_v55 = vshll.u32 %v2162_v45, 16  ;;  %v2163_v7 = vld [vmem:[%s2592_s11 + $0xb0] sm:$0xf]  ;;  %v2164_v9 = vld [vmem:[%s2592_s11 + $0xb4] sm:$0x1]  ;;  %634 = vmatprep.subr.bf16.mxu1 %v2464_v0 }
  0x19   : > { %v1080_v53 = vrot.slane %v1078_v46, 4  ;;  %v1083_v54 = vrot.slane %v1081_v47, 5  ;;  %v1094_v58 = vrot.slane %v1092_v50, 4  ;;  %v1089_v62 = vrot.slane %v1087_v49, 5  ;;  %v2165_v10 = vld [vmem:[%s2592_s11 + $0xb8] sm:$0xf] }
  0x1a   : > { %2076 = vmatmul.mubr.msk.bf16.gmra.mrb[4].mxu1 %vm243_vm0, %v2448_v16  ;;  %2152 = vmatmul.mubr.msk.bf16.gmra.mrb[4].mxu0 %vm243_vm0, %v2449_v18  ;;  %v1057_v48 = vrot.slane %v1056_v37, 4  ;;  %v1071_v52 = vrot.slane %v1070_v43, 4  ;;  %v1097_v59 = vrot.slane %v1095_v51, 5  ;;  %v1103_v63 = vrot.slane %v1101_v55, 5  ;;  %v2166_v12 = vld [vmem:[%s2592_s11 + $0xbc] sm:$0x1] }
  0x1b   : > { %308 = vmatprep.mubr.bf16.mxu1 %v2514_v2  ;;  %1242 = vmatprep.mubr.bf16.mxu0 %v2514_v2  ;;  %v1084_v61 = vor.u32 %v1083_v54, %v1080_v53  ;;  %v1106_v13 = vshrl.u32 %v2163_v7, 16  ;;  %v1109_v14 = vshll.u32 %v2163_v7, 16  ;;  %v1115_v15 = vshll.u32 %v2164_v9, 16  ;;  %v2460_v16 = vld [vmem:[%s2592_s11 + $0x78] ss:$8 sps:$4 sm:$0xff]  }
  0x1c   : > { %v1062_v56 = vsel %vm2637_vm3, %v1057_v48, %v1061_v38  ;;  %v1076_v60 = vsel %vm2637_vm3, %v1071_v52, %v1075_v39  ;;  %v1098_v5 = vor.u32 %v1097_v59, %v1094_v58  ;;  %v1120_v18 = vshrl.u32 %v2165_v10, 16  ;;  %v2465_v24 = vld [vmem:[%s2915_s1 + $0xd0] ss:$8 sps:$4 sm:$0xff]   ;;  %v2467_v28 = vld [vmem:[%s2915_s1 + $0xd4] ss:$8 sps:$4 sm:$0xff]  }
  0x1d   : > { %v2175_v3 = vcombine.low %v1062_v56, %v1076_v60  ;;  %v1085_v11 = vrot.slane %v1084_v61, 4  ;;  %v1123_v19 = vshll.u32 %v2165_v10, 16  ;;  %v1108_v21 = vrot.slane %v1106_v13, 4  ;;  %v2167_v33 = vld [vmem:[%s2592_s11 + $0xc0] sm:$0xf] }
  0x1e   : > { %v1099_v17 = vrot.slane %v1098_v5, 4  ;;  %v1111_v22 = vrot.slane %v1109_v14, 5  ;;  %v1129_v23 = vshll.u32 %v2166_v12, 16  ;;  %v1122_v26 = vrot.slane %v1120_v18, 4  ;;  %v2168_v34 = vld [vmem:[%s2592_s11 + $0xc4] sm:$0x1] }
  0x1f   : > { %v1090_v20 = vsel %vm2637_vm3, %v1085_v11, %v1089_v62  ;;  %v1125_v27 = vrot.slane %v1123_v19, 5  ;;  %v1117_v30 = vrot.slane %v1115_v15, 5  ;;  %v2169_v35 = vld [vmem:[%s2592_s11 + $0xc8] sm:$0xf]  ;;  %v2170_v38 = vld [vmem:[%s2592_s11 + $0xcc] sm:$0x1] }
  0x20   : > { %v1104_v25 = vsel %vm2637_vm3, %v1099_v17, %v1103_v63  ;;  %v1112_v29 = vor.u32 %v1111_v22, %v1108_v21  ;;  %v1131_v37 = vrot.slane %v1129_v23, 5  ;;  %v1134_v39 = vshrl.u32 %v2167_v33, 16  ;;  %v2461_v54 = vld [vmem:[%s2592_s11] ss:$8 sps:$4 sm:$0xff]   ;;  %v2476_v58 = vld [vmem:[%s2915_s1 + $0xe4] ss:$8 sps:$4 sm:$0xff]  }
  0x21   : > { %v2176_v31 = vcombine.low %v1090_v20, %v1104_v25  ;;  %v1126_v32 = vor.u32 %v1125_v27, %v1122_v26  ;;  %v1137_v40 = vshll.u32 %v2167_v33, 16  ;;  %v1148_v43 = vshrl.u32 %v2169_v35, 16  ;;  %v2462_v55 = vld [vmem:[%s2915_s1 + $0x40] ss:$8 sps:$4 sm:$0xff]   ;;  %v2472_v61 = vld [vmem:[%s2915_s1 + $0x54] ss:$8 sps:$4 sm:$0xff]  }
  0x22   : > { %2077 = vmatmul.mubr.msk.bf16.gmra.mrb[8].mxu1 %vm243_vm0, %v2453_v36  ;;  %2183 = vmatmul.mubr.msk.bf16.vlgmr.msra.gmra.mrb[0].mxu0 %vm243_vm0, %v2175_v3  ;;  %v1113_v36 = vrot.slane %v1112_v29, 4  ;;  %v1151_v44 = vshll.u32 %v2169_v35, 16  ;;  %v1136_v45 = vrot.slane %v1134_v39, 4  ;;  %v1143_v47 = vshll.u32 %v2168_v34, 16  ;;  %v2470_v0 = vld [vmem:[%s2915_s1 + $0x50] ss:$8 sps:$4 sm:$0xff]  }
  0x23   : > { %318 = vmatprep.mubr.bf16.mxu1 %v2514_v2  ;;  %1366 = vmatpush1.bf16.msra.mxu0 %v2457_v57  ;;  %v1127_v41 = vrot.slane %v1126_v32, 4  ;;  %v1139_v46 = vrot.slane %v1137_v40, 5  ;;  %v1150_v48 = vrot.slane %v1148_v43, 4  ;;  %v1157_v50 = vshll.u32 %v2170_v38, 16  ;;  %v2481_v7 = vld [vmem:[%s2915_s1 + $0x64] ss:$8 sps:$4 sm:$0xff]  }
  0x24   : > { %1252 = vmatprep.mubr.bf16.mxu0 %v2514_v2  ;;  %1367 = vmatprep.subr.bf16.mxu0 %v2467_v28  ;;  %v1153_v49 = vrot.slane %v1151_v44, 5  ;;  %v1118_v51 = vsel %vm2637_vm3, %v1113_v36, %v1117_v30  ;;  %v1145_v57 = vrot.slane %v1143_v47, 5  ;;  %v2468_v9 = vld [vmem:[%s2592_s11 + $0x10] ss:$8 sps:$4 sm:$0xff]   ;;  %v454_v10 = vld [vmem:[%s2592_s11] sm:$0xf] }
  0x25   : > { %v1132_v52 = vsel %vm2637_vm3, %v1127_v41, %v1131_v37  ;;  %v1140_v53 = vor.u32 %v1139_v46, %v1136_v45  ;;  %v1159_v60 = vrot.slane %v1157_v50, 5  ;;  %v456_v11 = vld [vmem:[%s2592_s11 + $0x8] sm:$0xf]  ;;  %v474_v13 = vshrl.u32 %v454_v10, 16  ;;  %v455_v17 = vld [vmem:[%s2592_s11 + $0x4] sm:$0x1] }
  0x26   : > { %v1154_v56 = vor.u32 %v1153_v49, %v1150_v48  ;;  %v2177_v59 = vcombine.low %v1118_v51, %v1132_v52  ;;  %v477_v14 = vshll.u32 %v454_v10, 16  ;;  %v488_v15 = vshrl.u32 %v456_v11, 16  ;;  %v457_v18 = vld [vmem:[%s2592_s11 + $0xc] sm:$0x1]  ;;  %v2469_v19 = vld [vmem:[%s2592_s11 + $0x20] ss:$8 sps:$4 sm:$0xff]  }
  0x27   : > { %1368 = vmatpush1.bf16.msra.mxu0 %v2465_v24  ;;  %v1141_v62 = vrot.slane %v1140_v53, 4  ;;  %v458_v20 = vld [vmem:[%s2592_s11 + $0x10] sm:$0xf]  ;;  %v476_v21 = vrot.slane %v474_v13, 4  ;;  %v460_v25 = vld [vmem:[%s2592_s11 + $0x18] sm:$0xf] }
  0x28   : > { %v1155_v63 = vrot.slane %v1154_v56, 4  ;;  %1520 = vmatprep.subr.bf16.mxu0 %v2476_v58  ;;  %v479_v22 = vrot.slane %v477_v14, 5  ;;  %v490_v23 = vrot.slane %v488_v15, 4  ;;  %v483_v26 = vshll.u32 %v455_v17, 16  ;;  %v2473_v28 = vld [vmem:[%s2592_s11 + $0x8] ss:$8 sps:$4 sm:$0xff]  }
  0x29   : > { %v1146_v3 = vsel %vm2637_vm3, %v1141_v62, %v1145_v57  ;;  %v497_v27 = vshll.u32 %v457_v18, 16  ;;  %v502_v29 = vshrl.u32 %v458_v20, 16  ;;  %v505_v30 = vshll.u32 %v458_v20, 16  ;;  %v2485_v36 = vld [vmem:[%s2915_s1 + $0xf4] ss:$8 sps:$4 sm:$0xff]  }
  0x2a   : > { %2078 = vmatmul.mubr.msk.bf16.gmra.mrb[12].mxu1 %vm243_vm0, %v2460_v16  ;;  %2184 = vmatmul.mubr.msk.bf16.gmra.mrb[4].mxu0 %vm243_vm0, %v2176_v31  ;;  %v1160_v5 = vsel %vm2637_vm3, %v1155_v63, %v1159_v60  ;;  %v491_v16 = vshll.u32 %v456_v11, 16  ;;  %v2474_v31 = vld [vmem:[%s2915_s1 + $0xe0] ss:$8 sps:$4 sm:$0xff]   ;;  %v516_v32 = vshrl.u32 %v460_v25, 16  ;;  %v519_v33 = vshll.u32 %v460_v25, 16 }
  0x2b   : > { %413 = vmatprep.mubr.bf16.mxu1 %v2514_v2  ;;  %1262 = vmatprep.mubr.bf16.mxu0 %v2514_v2  ;;  %v2178_v12 = vcombine.low %v1146_v3, %v1160_v5  ;;  %v480_v34 = vor.u32 %v479_v22, %v476_v21  ;;  %v485_v37 = vrot.slane %v483_v26, 5  ;;  %v499_v38 = vrot.slane %v497_v27, 5  ;;  %v2477_v39 = vld [vmem:[%s2592_s11 + $0x30] ss:$8 sps:$4 sm:$0xff]   ;;  %v459_v40 = vld [vmem:[%s2592_s11 + $0x14] sm:$0x1] }
  0x2c   : > { %v493_v24 = vrot.slane %v491_v16, 5  ;;  %v461_v41 = vld [vmem:[%s2592_s11 + $0x1c] sm:$0x1]  ;;  %v504_v43 = vrot.slane %v502_v29, 4  ;;  %v507_v44 = vrot.slane %v505_v30, 5  ;;  %v518_v46 = vrot.slane %v516_v32, 4 }
  0x2d   : > { %v2483_v45 = vld [vmem:[%s2915_s1 + $0xf0] ss:$8 sps:$4 sm:$0xff]   ;;  %v521_v47 = vrot.slane %v519_v33, 5  ;;  %v462_v48 = vld [vmem:[%s2592_s11 + $0x20] sm:$0xf]  ;;  %v481_v49 = vrot.slane %v480_v34, 4 }
  0x2e   : > { %v494_v35 = vor.u32 %v493_v24, %v490_v23  ;;  %v2493_v51 = vld [vmem:[%s2915_s1 + $0x104] ss:$8 sps:$4 sm:$0xff]   ;;  %v511_v52 = vshll.u32 %v459_v40, 16  ;;  %v525_v53 = vshll.u32 %v461_v41, 16  ;;  %v508_v56 = vor.u32 %v507_v44, %v504_v43  ;;  %v2479_v16 = vld [vmem:[%s2915_s1 + $0x60] ss:$8 sps:$4 sm:$0xff]  }
  0x2f   : > { %v530_v57 = vshrl.u32 %v462_v48, 16  ;;  %v522_v58 = vor.u32 %v521_v47, %v518_v46  ;;  %v486_v62 = vsel %vm2637_vm3, %v481_v49, %v485_v37  ;;  %v2482_v17 = vld [vmem:[%s2592_s11 + $0x28] ss:$8 sps:$4 sm:$0xff]   ;;  %v2489_v18 = vld [vmem:[%s2915_s1 + $0x74] ss:$8 sps:$4 sm:$0xff]  }
  0x30   : > { %v495_v50 = vrot.slane %v494_v35, 4  ;;  %v527_v3 = vrot.slane %v525_v53, 5  ;;  %v509_v5 = vrot.slane %v508_v56, 4  ;;  %v468_v20 = vld [vmem:[%s2592_s11 + $0x38] sm:$0xf] }
  0x31   : > { %v532_v10 = vrot.slane %v530_v57, 4  ;;  %v523_v11 = vrot.slane %v522_v58, 4  ;;  %v2487_v27 = vld [vmem:[%s2915_s1 + $0x70] ss:$8 sps:$4 sm:$0xff]   ;;  %v572_v30 = vshrl.u32 %v468_v20, 16 }
  0x32   : > { %2087 = vmatmul.mubr.msk.bf16.vlgmr.msra.gmra.mrb[0].mxu1 %vm243_vm0, %v2461_v54  ;;  %2185 = vmatmul.mubr.msk.bf16.gmra.mrb[8].mxu0 %vm243_vm0, %v2177_v59  ;;  %v464_v54 = vld [vmem:[%s2592_s11 + $0x28] sm:$0xf]  ;;  %v533_v59 = vshll.u32 %v462_v48, 16  ;;  %v500_v63 = vsel %vm2637_vm3, %v495_v50, %v499_v38  ;;  %v467_v37 = vld [vmem:[%s2592_s11 + $0x34] sm:$0x1] }
  0x33   : > { %635 = vmatpush1.bf16.msra.mxu1 %v2462_v55  ;;  %423 = vmatprep.mubr.bf16.mxu1 %v2514_v2  ;;  %v2478_v55 = vld [vmem:[%s2592_s11 + $0x18] ss:$8 sps:$4 sm:$0xff]   ;;  %v544_v60 = vshrl.u32 %v464_v54, 16  ;;  %v2095_v13 = vcombine.low %v486_v62, %v500_v63  ;;  %v528_v24 = vsel %vm2637_vm3, %v523_v11, %v527_v3  ;;  %v574_v40 = vrot.slane %v572_v30, 4  ;;  %v469_v44 = vld [vmem:[%s2592_s11 + $0x3c] sm:$0x1] }
  0x34   : > { %636 = vmatprep.subr.bf16.mxu1 %v2472_v61  ;;  %1272 = vmatprep.mubr.bf16.mxu0 %v2514_v2  ;;  %v547_v61 = vshll.u32 %v464_v54, 16  ;;  %v2486_v43 = vld [vmem:[%s2592_s11 + $0x38] ss:$8 sps:$4 sm:$0xff]   ;;  %v567_v46 = vshll.u32 %v467_v37, 16  ;;  %v581_v50 = vshll.u32 %v469_v44, 16 }
  0x35   : > { %v546_v14 = vrot.slane %v544_v60, 4  ;;  %v2491_v56 = vld [vmem:[%s2915_s1 + $0x100] ss:$8 sps:$4 sm:$0xff]   ;;  %v2499_v57 = vld [vmem:[%s2915_s1 + $0x114] ss:$8 sps:$4 sm:$0xff]  }
  0x36   : > { %v549_v15 = vrot.slane %v547_v61, 5  ;;  %v583_v54 = vrot.slane %v581_v50, 5  ;;  %v2497_v60 = vld [vmem:[%s2915_s1 + $0x110] ss:$8 sps:$4 sm:$0xff]   ;;  %v2494_v62 = vld [vmem:[%s2592_s11 + $0x60] ss:$8 sps:$4 sm:$0xff]  }
  0x37   : > { %637 = vmatpush1.bf16.msra.mxu1 %v2470_v0  ;;  %v513_v0 = vrot.slane %v511_v52, 5  ;;  %v569_v52 = vrot.slane %v567_v46, 5  ;;  %v2235_v63 = vld [vmem:[%s2592_s11 + $0x8] sm:$0xf]  ;;  %v2496_v11 = vld [vmem:[%s2592_s11 + $0x70] ss:$8 sps:$4 sm:$0xff]  }
  0x38   : > { %789 = vmatprep.subr.bf16.mxu1 %v2481_v7  ;;  %v463_v7 = vld [vmem:[%s2592_s11 + $0x24] sm:$0x1]  ;;  %v550_v26 = vor.u32 %v549_v15, %v546_v14  ;;  %v1626_v3 = vshrl.u32 %v2235_v63, 16  ;;  %v2502_v50 = vld [vmem:[%s2592_s11 + $0xb0] ss:$8 sps:$4 sm:$0xff]  }
  0x39   : > { %v539_v21 = vshll.u32 %v463_v7, 16  ;;  %v514_v23 = vsel %vm2637_vm3, %v509_v5, %v513_v0  ;;  %v2237_v0 = vld [vmem:[%s2592_s11 + $0x10] sm:$0xf]  ;;  %v1629_v5 = vshll.u32 %v2235_v63, 16 }
  0x3a   : > { %2088 = vmatmul.mubr.msk.bf16.gmra.mrb[4].mxu1 %vm243_vm0, %v2468_v9  ;;  %2186 = vmatmul.mubr.msk.bf16.gmra.mrb[12].mxu0 %vm243_vm0, %v2178_v12  ;;  %v465_v9 = vld [vmem:[%s2592_s11 + $0x2c] sm:$0x1]  ;;  %v535_v12 = vrot.slane %v533_v59, 5  ;;  %v2096_v33 = vcombine.low %v514_v23, %v528_v24  ;;  %v551_v35 = vrot.slane %v550_v26, 4  ;;  %v1640_v7 = vshrl.u32 %v2237_v0, 16 }
  0x3b   : > { %433 = vmatprep.mubr.bf16.mxu1 %v2514_v2  ;;  %1397 = vmatprep.mubr.bf16.mxu0 %v2514_v2  ;;  %v553_v22 = vshll.u32 %v465_v9, 16  ;;  %v541_v32 = vrot.slane %v539_v21, 5  ;;  %v1643_v9 = vshll.u32 %v2237_v0, 16  ;;  %v1631_v14 = vrot.slane %v1629_v5, 5 }
  0x3c   : > { %v536_v25 = vor.u32 %v535_v12, %v532_v10  ;;  %v2495_v10 = vld [vmem:[%s2592_s11 + $0x90] ss:$8 sps:$4 sm:$0xff]   ;;  %v1642_v15 = vrot.slane %v1640_v7, 4 }
  0x3d   : > { %v2239_v12 = vld [vmem:[%s2592_s11 + $0x18] sm:$0xf] }
  0x3e   : > { %v537_v34 = vrot.slane %v536_v25, 4  ;;  %v1657_v21 = vshll.u32 %v2239_v12, 16 }
  0x40   : > { %v1659_v30 = vrot.slane %v1657_v21, 5 }
  0x42   : > { %2089 = vmatmul.mubr.msk.bf16.gmra.mrb[8].mxu1 %vm243_vm0, %v2469_v19  ;;  %2207 = vmatmul.mubr.msk.bf16.vlgmr.msra.gmra.mrb[0].mxu0 %vm243_vm0, %v2473_v28  ;;  %v466_v19 = vld [vmem:[%s2592_s11 + $0x30] sm:$0xf] }
  0x43   : > { %443 = vmatprep.mubr.bf16.mxu1 %v2514_v2  ;;  %1521 = vmatpush1.bf16.msra.mxu0 %v2474_v31  ;;  %v558_v28 = vshrl.u32 %v466_v19, 16  ;;  %v561_v29 = vshll.u32 %v466_v19, 16  ;;  %v575_v31 = vshll.u32 %v468_v20, 16  ;;  %v2238_v19 = vld [vmem:[%s2592_s11 + $0x14] sm:$0x1]  ;;  %v1654_v20 = vshrl.u32 %v2239_v12, 16 }
  0x44   : > { %1407 = vmatprep.mubr.bf16.mxu0 %v2514_v2  ;;  %1522 = vmatprep.subr.bf16.mxu0 %v2485_v36  ;;  %v555_v36 = vrot.slane %v553_v22, 5 }
  0x45   : > { %v560_v38 = vrot.slane %v558_v28, 4  ;;  %v577_v41 = vrot.slane %v575_v31, 5  ;;  %v2501_v28 = vld [vmem:[%s2592_s11 + $0x80] ss:$8 sps:$4 sm:$0xff]   ;;  %v2240_v31 = vld [vmem:[%s2592_s11 + $0x1c] sm:$0x1] }
  0x46   : > { %v556_v47 = vsel %vm2637_vm3, %v551_v35, %v555_v36 }
  0x47   : > { %1523 = vmatpush1.bf16.msra.mxu0 %v2483_v45  ;;  %v542_v45 = vsel %vm2637_vm3, %v537_v34, %v541_v32  ;;  %v578_v49 = vor.u32 %v577_v41, %v574_v40  ;;  %v2242_v32 = vld [vmem:[%s2592_s11 + $0x24] sm:$0x1]  ;;  %v1663_v41 = vshll.u32 %v2240_v31, 16  ;;  %v2504_v31 = vld [vmem:[%s2592_s11 + $0xf8] ss:$8 sps:$4 sm:$0xff]  }
  0x48   : > { %1786 = vmatprep.subr.bf16.mxu0 %v2493_v51 }
  0x49   : > { %v579_v53 = vrot.slane %v578_v49, 4 }
  0x4a   : > { %2090 = vmatmul.mubr.msk.bf16.gmra.mrb[12].mxu1 %vm243_vm0, %v2477_v39  ;;  %2208 = vmatmul.mubr.msk.bf16.gmra.mrb[4].mxu0 %vm243_vm0, %v2478_v55  ;;  %v563_v39 = vrot.slane %v561_v29, 5  ;;  %v2490_v55 = vld [vmem:[%s2592_s11 + $0x50] ss:$8 sps:$4 sm:$0xff]   ;;  %v1656_v29 = vrot.slane %v1654_v20, 4 }
  0x4b   : > { %666 = vmatprep.mubr.bf16.mxu1 %v2514_v2  ;;  %1417 = vmatprep.mubr.bf16.mxu0 %v2514_v2  ;;  %v584_v59 = vsel %vm2637_vm3, %v579_v53, %v583_v54 }
  0x4c   : > { %v564_v48 = vor.u32 %v563_v39, %v560_v38  ;;  %v2243_v38 = vld [vmem:[%s2592_s11 + $0x28] sm:$0xf]  ;;  %v2245_v39 = vld [vmem:[%s2592_s11 + $0x30] sm:$0xf]  ;;  %v1660_v40 = vor.u32 %v1659_v30, %v1656_v29 }
  0x4d   : > { %v1682_v44 = vshrl.u32 %v2243_v38, 16  ;;  %v1699_v49 = vshll.u32 %v2245_v39, 16 }
  0x4e   : > { %v565_v51 = vrot.slane %v564_v48, 4  ;;  %v1696_v48 = vshrl.u32 %v2245_v39, 16 }
  0x50   : > { %v570_v58 = vsel %vm2637_vm3, %v565_v51, %v569_v52  ;;  %v1665_v51 = vrot.slane %v1663_v41, 5 }
  0x51   : > { %v2098_v61 = vcombine.low %v570_v58, %v584_v59  ;;  %v2246_v58 = vld [vmem:[%s2592_s11 + $0x34] sm:$0x1]  ;;  %v1698_v59 = vrot.slane %v1696_v48, 4 }
  0x52   : > { %2103 = vmatmul.mubr.msk.bf16.vlgmr.msra.gmra.mrb[0].mxu1 %vm243_vm0, %v2095_v13  ;;  %2209 = vmatmul.mubr.msk.bf16.gmra.mrb[8].mxu0 %vm243_vm0, %v2482_v17  ;;  %v1628_v13 = vrot.slane %v1626_v3, 4  ;;  %v2241_v17 = vld [vmem:[%s2592_s11 + $0x20] sm:$0xf]  ;;  %v1705_v7 = vshll.u32 %v2246_v58, 16 }
  0x53   : > { %790 = vmatpush1.bf16.msra.mxu1 %v2479_v16  ;;  %676 = vmatprep.mubr.bf16.mxu1 %v2514_v2  ;;  %v1645_v16 = vrot.slane %v1643_v9, 5  ;;  %v1668_v22 = vshrl.u32 %v2241_v17, 16  ;;  %v1671_v23 = vshll.u32 %v2241_v17, 16 }
  0x54   : > { %791 = vmatprep.subr.bf16.mxu1 %v2489_v18  ;;  %1427 = vmatprep.mubr.bf16.mxu0 %v2514_v2  ;;  %v2236_v18 = vld [vmem:[%s2592_s11 + $0xc] sm:$0x1]  ;;  %v1632_v24 = vor.u32 %v1631_v14, %v1628_v13  ;;  %v2503_v14 = vld [vmem:[%s2592_s11 + $0xc0] ss:$8 sps:$4 sm:$0xff]  }
  0x55   : > { %v1635_v25 = vshll.u32 %v2236_v18, 16  ;;  %v1646_v26 = vor.u32 %v1645_v16, %v1642_v15  ;;  %v1707_v18 = vrot.slane %v1705_v7, 5 }
  0x56   : > { %v1633_v34 = vrot.slane %v1632_v24, 4 }
  0x57   : > { %792 = vmatpush1.bf16.msra.mxu1 %v2487_v27  ;;  %v1649_v27 = vshll.u32 %v2238_v19, 16  ;;  %v1637_v35 = vrot.slane %v1635_v25, 5  ;;  %v1647_v36 = vrot.slane %v1646_v26, 4  ;;  %v2248_v19 = vld [vmem:[%s2592_s11 + $0x3c] sm:$0x1] }
  0x58   : > { %2286 = vmatprep.subr.bf16.mxu1 %v2552_v1  ;;  %v2097_v1 = vcombine.low %v542_v45, %v556_v47  ;;  %v1685_v45 = vshll.u32 %v2243_v38, 16  ;;  %v1719_v26 = vshll.u32 %v2248_v19, 16  ;;  %v2505_v38 = vld [vmem:[%s2592_s11 + $0x108] ss:$8 sps:$4 sm:$0xff]  }
  0x59   : > { %v1651_v37 = vrot.slane %v1649_v27, 5  ;;  %v1638_v46 = vsel %vm2637_vm3, %v1633_v34, %v1637_v35 }
  0x5a   : > { %2104 = vmatmul.mubr.msk.bf16.gmra.mrb[4].mxu1 %vm243_vm0, %v2096_v33  ;;  %2210 = vmatmul.mubr.msk.bf16.gmra.mrb[12].mxu0 %vm243_vm0, %v2486_v43  ;;  %v1670_v33 = vrot.slane %v1668_v22, 4  ;;  %v2250_v22 = vld [vmem:[%s2592_s11 + $0x44] sm:$0x1] }
  0x5b   : > { %686 = vmatprep.mubr.bf16.mxu1 %v2514_v2  ;;  %1552 = vmatprep.mubr.bf16.mxu0 %v2514_v2  ;;  %v1652_v47 = vsel %vm2637_vm3, %v1647_v36, %v1651_v37  ;;  %v1733_v27 = vshll.u32 %v2250_v22, 16 }
  0x5c   : > { %v2255_v53 = vcombine.low %v1638_v46, %v1652_v47 }
  0x5d   : > { %v1735_v35 = vrot.slane %v1733_v27, 5 }
  0x62   : > { %2105 = vmatmul.mubr.msk.bf16.gmra.mrb[8].mxu1 %vm243_vm0, %v2097_v1  ;;  %2231 = vmatmul.mubr.msk.bf16.vlgmr.msra.gmra.mrb[0].mxu0 %vm243_vm0, %v2490_v55  ;;  %v1661_v1 = vrot.slane %v1660_v40, 4  ;;  %v2244_v55 = vld [vmem:[%s2592_s11 + $0x2c] sm:$0x1] }
  0x63   : > { %696 = vmatprep.mubr.bf16.mxu1 %v2514_v2  ;;  %1787 = vmatpush1.bf16.msra.mxu0 %v2491_v56  ;;  %v1684_v56 = vrot.slane %v1682_v44, 4  ;;  %v1691_v0 = vshll.u32 %v2244_v55, 16  ;;  %v1877_v44 = vlaneseq }
  0x64   : > { %1562 = vmatprep.mubr.bf16.mxu0 %v2514_v2  ;;  %1788 = vmatprep.subr.bf16.mxu0 %v2499_v57  ;;  %v1687_v57 = vrot.slane %v1685_v45, 5  ;;  %v1666_v63 = vsel %vm2637_vm3, %v1661_v1, %v1665_v51 }
  0x65   : > { %v1693_v15 = vrot.slane %v1691_v0, 5  ;;  %v1878_v46 = vshrl.u32 %v1877_v44, 7 }
  0x66   : > { %v1688_v5 = vor.u32 %v1687_v57, %v1684_v56 }
  0x67   : > { %1789 = vmatpush1.bf16.msra.mxu0 %v2497_v60  ;;  %v1701_v60 = vrot.slane %v1699_v49, 5  ;;  %v1879_v42 = vsub.s32 0, %v1878_v46  ;;  %v1875_v49 = vld [vmem:[%s2916_s2] sm:$0x3] }
  0x68   : > { %v1689_v17 = vrot.slane %v1688_v5, 4 }
  0x69   : > { %v2877_v1 = vrot.slane %v1875_v49, %v1879_v42 }
  0x6a   : > { %2106 = vmatmul.mubr.msk.bf16.gmra.mrb[12].mxu1 %vm243_vm0, %v2098_v61  ;;  %2232 = vmatmul.mubr.msk.bf16.gmra.mrb[4].mxu0 %vm243_vm0, %v2494_v62  ;;  %v2247_v61 = vld [vmem:[%s2592_s11 + $0x38] sm:$0xf]  ;;  %v2249_v62 = vld [vmem:[%s2592_s11 + $0x40] sm:$0xf] }
  0x6b   : > { %821 = vmatprep.mubr.bf16.mxu1 %v2514_v2  ;;  %1572 = vmatprep.mubr.bf16.mxu0 %v2514_v2  ;;  %v1710_v9 = vshrl.u32 %v2247_v61, 16  ;;  %v1724_v12 = vshrl.u32 %v2249_v62, 16  ;;  %v1727_v13 = vshll.u32 %v2249_v62, 16 }
  0x6d   : > { %v1712_v20 = vrot.slane %v1710_v9, 4  ;;  %v1726_v24 = vrot.slane %v1724_v12, 4  ;;  %v1729_v25 = vrot.slane %v1727_v13, 5 }
  0x6f   : > { %v1730_v30 = vor.u32 %v1729_v25, %v1726_v24 }
  0x71   : > { %v1731_v34 = vrot.slane %v1730_v30, 4 }
  0x72   : > { %2127 = vmatmul.mubr.msk.bf16.vlgmr.msra.gmra.mrb[0].mxu1 %vm243_vm0, %v2495_v10  ;;  %2233 = vmatmul.mubr.msk.bf16.gmra.mrb[8].mxu0 %vm243_vm0, %v2496_v11  ;;  %v1702_v10 = vor.u32 %v1701_v60, %v1698_v59  ;;  %v1713_v11 = vshll.u32 %v2247_v61, 16 }
  0x73   : > { %2288 = vmatpush1.bf16.msra.mxu1 %v2562_v4  ;;  %831 = vmatprep.mubr.bf16.mxu1 %v2514_v2  ;;  %v2500_v4 = vld [vmem:[%s2592_s11 + $0xa0] ss:$8 sps:$4 sm:$0xff]   ;;  %v1736_v37 = vsel %vm2637_vm3, %v1731_v34, %v1735_v35 }
  0x74   : > { %2287 = vmatprep.subr.bf16.mxu1 %v2572_v6  ;;  %1582 = vmatprep.mubr.bf16.mxu0 %v2514_v2  ;;  %v1673_v6 = vrot.slane %v1671_v23, 5  ;;  %v1703_v21 = vrot.slane %v1702_v10, 4  ;;  %v1715_v23 = vrot.slane %v1713_v11, 5 }
  0x76   : > { %v1674_v43 = vor.u32 %v1673_v6, %v1670_v33  ;;  %v1716_v29 = vor.u32 %v1715_v23, %v1712_v20  ;;  %v1721_v6 = vrot.slane %v1719_v26, 5 }
  0x77   : > { %2289 = vmatpush1.bf16.msra.mxu1 %v2580_v8  ;;  %v1677_v8 = vshll.u32 %v2242_v32, 16 }
  0x78   : > { %v1675_v54 = vrot.slane %v1674_v43, 4  ;;  %v1717_v33 = vrot.slane %v1716_v29, 4 }
  0x79   : > { %v1679_v52 = vrot.slane %v1677_v8, 5 }
  0x7a   : > { %2128 = vmatmul.mubr.msk.bf16.gmra.mrb[4].mxu1 %vm243_vm0, %v2500_v4  ;;  %2234 = vmatmul.mubr.msk.bf16.gmra.mrb[12].mxu0 %vm243_vm0, %v2501_v28  ;;  %v1694_v4 = vsel %vm2637_vm3, %v1689_v17, %v1693_v15  ;;  %v1708_v28 = vsel %vm2637_vm3, %v1703_v21, %v1707_v18  ;;  %v1722_v36 = vsel %vm2637_vm3, %v1717_v33, %v1721_v6 }
  0x7b   : > { %841 = vmatprep.mubr.bf16.mxu1 %v2514_v2  ;;  %1818 = vmatprep.mubr.bf16.mxu0 %v2514_v2  ;;  %v1680_v3 = vsel %vm2637_vm3, %v1675_v54, %v1679_v52  ;;  %v2257_v32 = vcombine.low %v1694_v4, %v1708_v28  ;;  %v2258_v39 = vcombine.low %v1722_v36, %v1736_v37 }
  0x7c   : > { %v2256_v16 = vcombine.low %v1666_v63, %v1680_v3 }
  0x82   : > { %2129 = vmatmul.mubr.msk.bf16.gmra.mrb[8].mxu1 %vm243_vm0, %v2502_v50  ;;  %2263 = vmatmul.mubr.msk.bf16.vlgmr.msra.gmra.mrb[0].mxu0 %vm243_vm0, %v2255_v53  ;;  %v1883_v50 = vsub.s32 1, %v1878_v46 }
  0x83   : > { %851 = vmatprep.mubr.bf16.mxu1 %v2514_v2  ;;  %1828 = vmatprep.mubr.bf16.mxu0 %v2514_v2 }
  0x84   : > { %v2880_v52 = vrot.slane %v1875_v49, %v1883_v50 }
  0x8a   : > { %2130 = vmatmul.mubr.msk.bf16.gmra.mrb[12].mxu1 %vm243_vm0, %v2503_v14  ;;  %2264 = vmatmul.mubr.msk.bf16.gmra.mrb[4].mxu0 %vm243_vm0, %v2256_v16 }
  0x8b   : > { %996 = vmatprep.mubr.bf16.mxu1 %v2514_v2  ;;  %1838 = vmatprep.mubr.bf16.mxu0 %v2514_v2 }
  0x92   : > { %2153 = vmatmul.mubr.msk.bf16.vlgmr.msra.gmra.mrb[8].mxu1 %vm243_vm0, %v2504_v31  ;;  %2265 = vmatmul.mubr.msk.bf16.gmra.mrb[8].mxu0 %vm243_vm0, %v2257_v32 }
  0x93   : > { %1006 = vmatprep.mubr.bf16.mxu1 %v2514_v2  ;;  %1848 = vmatprep.mubr.bf16.mxu0 %v2514_v2 }
  0x9a   : > { %2154 = vmatmul.mubr.msk.bf16.gmra.mrb[12].mxu1 %vm243_vm0, %v2505_v38  ;;  %2266 = vmatmul.mubr.msk.bf16.gmra.mrb[12].mxu0 %vm243_vm0, %v2258_v39 }
 0x145   : > { %v823_v40 = vpop.f32.mrb[0].mxu1 }
 0x146   : > { %v825_v41 = vpop.f32.mrb[1].mxu1 }
 0x147   : > { %v827_v8 = vpop.f32.mrb[2].mxu1 }
 0x148   : > { %v829_v43 = vpop.f32.mrb[3].mxu1 }
 0x14d   : > { %v833_v2 = vpop.f32.mrb[4].mxu1 }
 0x14e   : > { %v835_v45 = vpop.f32.mrb[5].mxu1 }
 0x14f   : > { %v837_v47 = vpop.f32.mrb[6].mxu1 }
 0x150   : > { %v839_v48 = vpop.f32.mrb[7].mxu1 }
 0x155   : > { %v1820_v51 = vpop.f32.mrb[0].mxu0 }
 0x156   : > { %v2290_v53 = vadd.f32 %v1820_v51, %v823_v40  ;;  %v1822_v54 = vpop.f32.mrb[1].mxu0 }
 0x157   : > { %v2291_v55 = vadd.f32 %v1822_v54, %v825_v41  ;;  %v1824_v56 = vpop.f32.mrb[2].mxu0 }
 0x158   : > { %v1887_v57 = vadd.f32 %v2290_v53, %v2877_v1  ;;  %v2292_v58 = vadd.f32 %v1824_v56, %v827_v8  ;;  %v1826_v59 = vpop.f32.mrb[3].mxu0 }
 0x159   : > { %v1888_v60 = vadd.f32 %v2291_v55, %v2880_v52  ;;  %v2293_v61 = vadd.f32 %v1826_v59, %v829_v43 }
 0x15a   : > { %v1903_v62 = vmax.f32 %v1887_v57, 0.0  ;;  %v1889_v63 = vadd.f32 %v2292_v58, %v2877_v1 }
 0x15b   : > { %v1904_v0 = vmax.f32 %v1888_v60, 0.0  ;;  %v1890_v3 = vadd.f32 %v2293_v61, %v2880_v52 }
 0x15c   : > { %v1905_v5 = vmax.f32 %v1889_v63, 0.0 }
 0x15d   : > { %v2278_v7 = vpack.c.bf16 %v1904_v0, %v1903_v62  ;;  %v1906_v9 = vmax.f32 %v1890_v3, 0.0  ;;  %v1830_v10 = vpop.f32.mrb[4].mxu0 }
 0x15e   : > { %v2294_v11 = vadd.f32 %v1830_v10, %v833_v2  ;;  %v1832_v12 = vpop.f32.mrb[5].mxu0 }
 0x15f   : > { %1983 = vst [vmem:[%s2889_s22] sm:$0xff] %v2278_v7  ;;  %v2279_v13 = vpack.c.bf16 %v1906_v9, %v1905_v5  ;;  %v2295_v14 = vadd.f32 %v1832_v12, %v835_v45  ;;  %v1834_v15 = vpop.f32.mrb[6].mxu0 }
 0x160   : > { %v1891_v16 = vadd.f32 %v2294_v11, %v2877_v1  ;;  %v2296_v17 = vadd.f32 %v1834_v15, %v837_v47  ;;  %v1836_v18 = vpop.f32.mrb[7].mxu0 }
 0x161   : > { %1984 = vst [vmem:[%s2889_s22 + $0x8] sm:$0xff] %v2279_v13  ;;  %v1892_v19 = vadd.f32 %v2295_v14, %v2880_v52  ;;  %v2297_v20 = vadd.f32 %v1836_v18, %v839_v48 }
 0x162   : > { %v1907_v21 = vmax.f32 %v1891_v16, 0.0  ;;  %v1893_v22 = vadd.f32 %v2296_v17, %v2877_v1 }
 0x163   : > { %v1908_v23 = vmax.f32 %v1892_v19, 0.0  ;;  %v1894_v24 = vadd.f32 %v2297_v20, %v2880_v52 }
 0x164   : > { %v1909_v26 = vmax.f32 %v1893_v22, 0.0 }
 0x165   : > { %v998_v25 = vpop.f32.mrb[8].mxu1  ;;  %v2280_v4 = vpack.c.bf16 %v1908_v23, %v1907_v21  ;;  %v1910_v28 = vmax.f32 %v1894_v24, 0.0  ;;  %v1840_v29 = vpop.f32.mrb[8].mxu0 }
 0x166   : > { %v1000_v27 = vpop.f32.mrb[9].mxu1  ;;  %v2298_v31 = vadd.f32 %v1840_v29, %v998_v25  ;;  %v1842_v32 = vpop.f32.mrb[9].mxu0 }
 0x167   : > { %v1002_v30 = vpop.f32.mrb[10].mxu1  ;;  %1985 = vst [vmem:[%s2889_s22 + $0x10] sm:$0xff] %v2280_v4  ;;  %v2281_v6 = vpack.c.bf16 %v1910_v28, %v1909_v26  ;;  %v2299_v34 = vadd.f32 %v1842_v32, %v1000_v27  ;;  %v1844_v35 = vpop.f32.mrb[10].mxu0 }
 0x168   : > { %v1004_v33 = vpop.f32.mrb[11].mxu1  ;;  %v1895_v36 = vadd.f32 %v2298_v31, %v2877_v1  ;;  %v2300_v37 = vadd.f32 %v1844_v35, %v1002_v30  ;;  %v1846_v38 = vpop.f32.mrb[11].mxu0 }
 0x169   : > { %1986 = vst [vmem:[%s2889_s22 + $0x18] sm:$0xff] %v2281_v6  ;;  %v1896_v39 = vadd.f32 %v2299_v34, %v2880_v52  ;;  %v2301_v40 = vadd.f32 %v1846_v38, %v1004_v33 }
 0x16a   : > { %v1911_v41 = vmax.f32 %v1895_v36, 0.0  ;;  %v1897_v8 = vadd.f32 %v2300_v37, %v2877_v1 }
 0x16b   : > { %v1912_v43 = vmax.f32 %v1896_v39, 0.0  ;;  %v1898_v44 = vadd.f32 %v2301_v40, %v2880_v52 }
 0x16c   : > { %v1913_v45 = vmax.f32 %v1897_v8, 0.0 }
 0x16d   : > { %v1008_v2 = vpop.f32.mrb[12].mxu1  ;;  %v2282_v47 = vpack.c.bf16 %v1912_v43, %v1911_v41  ;;  %v1914_v48 = vmax.f32 %v1898_v44, 0.0  ;;  %v1850_v42 = vpop.f32.mrb[12].mxu0 }
 0x16e   : > { %v1010_v46 = vpop.f32.mrb[13].mxu1  ;;  %v2302_v50 = vadd.f32 %v1850_v42, %v1008_v2  ;;  %v1852_v51 = vpop.f32.mrb[13].mxu0 }
 0x16f   : > { %v1012_v49 = vpop.f32.mrb[14].mxu1  ;;  %1987 = vst [vmem:[%s2889_s22 + $0x20] sm:$0xff] %v2282_v47  ;;  %v2283_v54 = vpack.c.bf16 %v1914_v48, %v1913_v45  ;;  %v2303_v55 = vadd.f32 %v1852_v51, %v1010_v46  ;;  %v1854_v56 = vpop.f32.mrb[14].mxu0 }
 0x170   : > { %v1014_v53 = vpop.f32.mrb[15].mxu1  ;;  %v1899_v57 = vadd.f32 %v2302_v50, %v2877_v1  ;;  %v2304_v58 = vadd.f32 %v1854_v56, %v1012_v49  ;;  %v1856_v59 = vpop.f32.mrb[15].mxu0 }
 0x171   : > { %1988 = vst [vmem:[%s2889_s22 + $0x28] sm:$0xff] %v2283_v54  ;;  %v1900_v60 = vadd.f32 %v2303_v55, %v2880_v52  ;;  %v2305_v61 = vadd.f32 %v1856_v59, %v1014_v53 }
 0x172   : > { %v1915_v62 = vmax.f32 %v1899_v57, 0.0  ;;  %v1901_v63 = vadd.f32 %v2304_v58, %v2877_v1 }
 0x173   : > { %v1916_v0 = vmax.f32 %v1900_v60, 0.0  ;;  %v1902_v3 = vadd.f32 %v2305_v61, %v2880_v52 }
 0x174   : > { %v1917_v5 = vmax.f32 %v1901_v63, 0.0 }
 0x175   : > { %v2284_v7 = vpack.c.bf16 %v1916_v0, %v1915_v62  ;;  %v1918_v9 = vmax.f32 %v1902_v3, 0.0 }
 0x177   : > { %1989 = vst [vmem:[%s2889_s22 + $0x30] sm:$0xff] %v2284_v7  ;;  %v2285_v10 = vpack.c.bf16 %v1918_v9, %v1917_v5 }
 0x179   : > { %1990 = vst [vmem:[%s2889_s22 + $0x38] sm:$0xff] %v2285_v10 }
 0x17a PF: > { %s13_s12 = sadd.s32 1, %s2512_s12  }
 0x17b   : > { %p10_p5 = scmp.ge.s32.totalorder %s13_s12, 6  }
 0x17d   :  { %12 = sbr.rel (!%p10_p5) target bundleno = 1 (0x1), region = 75 }

// kernel: disaster_sam_v2.3
= control target key start
LH: loop header
LB: loop body
LE: loop exit
PB: predicated region body
PF: predicated region fallthrough
CT: control target
= control target key end

     0   :  { %s6499_s12 = smov 0   ;;  %s8338_s0 = inlined_call_operand.vmem [shape: bf16[4,18,18,8], index: 0, kind: input, shape index: {}]   ;;  %s8339_s1 = inlined_call_operand.vmem [shape: bf16[9,8,32], index: 1, kind: input, shape index: {}]   ;;  %s8340_s2 = inlined_call_operand.vmem [shape: f32[1,32], index: 2, kind: input, shape index: {}]   ;;  %s8341_s3 = inlined_call_operand.vmem [shape: bf16[4,16,16,32], index: 3, kind: output, shape index: {}]  }
   0x1 LB: > { %s5018_s13 = sadd.s32 4294967295, %s6477_s12   ;;  %p5022_p0 = scmp.ge.s32.totalorder %s6477_s12, 1  ;;  %s6477_s12 = sphi %s6499_s12, %s13_s12  }
   0x2   : > { %p137_p1 = scmp.lt.s32.totalorder %s6477_s12, 5 }
   0x4   : > { %p138_p2 = pnand %p5022_p0, %p137_p1 }
   0x6   : > { %141 = sbr.rel (%p138_p2) target bundleno = 589 (0x24d), region = 32 }
   0xd   : > { %v5026_v0 = vld [vmem:[%s8339_s1 + $0x4] sm:$0xf]  ;;  %vm707_vm0 = vcmask 1043456   ;;  %v5253_v1 = vld [vmem:[%s8339_s1 + $0x10] sm:$0xf]  ;;  %p161_p3 = scmp.lt.s32.totalorder %s5018_s13, 3 }
   0xe   : > { %6347 = vmatprep.subr.msk.bf16.mxu1 %vm707_vm0, %v5026_v0  ;;  %6351 = vmatprep.subr.msk.bf16.mxu0 %vm707_vm0, %v5253_v1  ;;  %v709_v2 = vsel %vm707_vm0, %v5026_v0, 0  ;;  %v6517_v3 = vsel %vm707_vm0, %v5253_v1, 0  ;;  %v204_v4 = vld [vmem:[%s8339_s1] sm:$0xf]  ;;  %v5318_v5 = vld [vmem:[%s8339_s1 + $0x14] sm:$0xf] }
   0xf   : > { %8355 = vst [vmem:[#allocation2_spill] sm:$0xff] %v6517_v3  ;;  %5784 = vmatpush3.bf16.msra.mxu1 %v709_v2  ;;  %5920 = vmatpush3.bf16.msra.mxu0 %v6517_v3  ;;  %s8410_s13 = smov (!%p161_p3, %s5018_s13), 3  ;;  %vm221_vm1 = vsmask.f32 3328  ;;  %vm222_vm2 = vsmask.f32 7440 }
  0x10   : > { %6348 = vmatprep.subr.msk.bf16.mxu1 %vm707_vm0, %v204_v4  ;;  %6353 = vmatprep.subr.msk.bf16.mxu0 %vm707_vm0, %v5318_v5  ;;  %s6357_s22 = smul.u32 216, %s8410_s13  ;;  %vm658_vm3 = vcmask 64512   ;;  %v6547_v17 = vsel %vm707_vm0, %v204_v4, 0  ;;  %v6553_v26 = vld [vmem:[%s8339_s1 + $0x18] sm:$0xf]  ;;  %vm6560_vm4 = vmor %vm221_vm1, %vm222_vm2  ;;  %v6566_v37 = vsel %vm707_vm0, %v5318_v5, 0 }
  0x11   : > { %v6570_v41 = vsel %vm707_vm0, %v6553_v26, 0  ;;  %vm1212_vm5 = vcmask 1042432   ;;  %vm1213_vm6 = vcmask 1046532   ;;  %s5597_s17 = sshll.u32 %s8410_s13, 7  ;;  %vm4930_vm8 = vcmask 257024  }
  0x12   : > { %s6534_s25 = scalar_lea.vmem %s8338_s0, %s6357_s22  ;;  %vm6786_vm7 = vmor %vm1212_vm5, %vm1213_vm6  ;;  %s8234_s20 = scalar_lea.vmem %s8341_s3, %s5597_s17 }
  0x13   : > { %v172_v6 = vld [vmem:[%s6534_s25] sm:$0xf]  ;;  %v173_v7 = vld [vmem:[%s6534_s25 + $0x4] sm:$0xf]  ;;  %v205_v8 = vld [vmem:[%s6534_s25 + $0x8] sm:$0x1] }
  0x14   : > { %v225_v9 = vshrl.u32 %v172_v6, 16  ;;  %v228_v10 = vshll.u32 %v172_v6, 16  ;;  %v234_v11 = vshll.u32 %v173_v7, 16  ;;  %v238_v12 = vshrl.u32 %v173_v7, 16  ;;  %v5205_v13 = vld [vmem:[%s6534_s25 + $0xc] sm:$0xf] }
  0x15   : > { %v244_v14 = vshll.u32 %v205_v8, 16  ;;  %v6541_v15 = vld [vmem:[%s6534_s25 + $0x10] sm:$0xf]  ;;  %v6544_v16 = vld [vmem:[%s6534_s25 + $0x14] sm:$0x1]  ;;  %v2029_v23 = vshrl.u32 %v5205_v13, 16 }
  0x16   : > { %v227_v18 = vrot.slane %v225_v9, 4  ;;  %v230_v19 = vrot.slane %v228_v10, 5  ;;  %v236_v20 = vrot.slane %v234_v11, 5  ;;  %v240_v21 = vrot.slane %v238_v12, 4  ;;  %v174_v31 = vld [vmem:[%s6534_s25 + $0xc] sm:$0xf] }
  0x17   : > { %v246_v22 = vrot.slane %v244_v14, 5  ;;  %v2032_v24 = vshll.u32 %v5205_v13, 16  ;;  %v2038_v25 = vshll.u32 %v6541_v15, 16  ;;  %v2042_v29 = vshrl.u32 %v6541_v15, 16  ;;  %v175_v36 = vld [vmem:[%s6534_s25 + $0x10] sm:$0xf] }
  0x18   : > { %v231_v27 = vor.u32 %v230_v19, %v227_v18  ;;  %v241_v28 = vor.u32 %v240_v21, %v236_v20  ;;  %v2048_v30 = vshll.u32 %v6544_v16, 16  ;;  %v2031_v33 = vrot.slane %v2029_v23, 4  ;;  %v206_v44 = vld [vmem:[%s6534_s25 + $0x14] sm:$0x1]  ;;  %v5208_v55 = vld [vmem:[%s6534_s25 + $0x18] sm:$0xf] }
  0x19   : > { %v2034_v34 = vrot.slane %v2032_v24, 5  ;;  %v2040_v35 = vrot.slane %v2038_v25, 5  ;;  %v2044_v40 = vrot.slane %v2042_v29, 4  ;;  %v249_v45 = vshrl.u32 %v174_v31, 16  ;;  %v6579_v60 = vld [vmem:[%s6534_s25 + $0x1c] sm:$0xf] }
  0x1a   : > { %v232_v38 = vrot.slane %v231_v27, 4  ;;  %v242_v39 = vrot.slane %v241_v28, 4  ;;  %v2050_v43 = vrot.slane %v2048_v30, 5  ;;  %v252_v46 = vshll.u32 %v174_v31, 16  ;;  %v6587_v1 = vld [vmem:[%s6534_s25 + $0x20] sm:$0x1] }
  0x1b   : > { %v2035_v42 = vor.u32 %v2034_v34, %v2031_v33  ;;  %v2045_v49 = vor.u32 %v2044_v40, %v2040_v35  ;;  %v258_v50 = vshll.u32 %v175_v36, 16  ;;  %v251_v53 = vrot.slane %v249_v45, 4  ;;  %v176_v18 = vld [vmem:[%s6534_s25 + $0x18] sm:$0xf]  ;;  %v177_v23 = vld [vmem:[%s6534_s25 + $0x1c] sm:$0xf] }
  0x1c   : > { %v237_v47 = vsel %vm6560_vm4, %v232_v38, %v236_v20  ;;  %v247_v48 = vsel %vm6560_vm4, %v242_v39, %v246_v22  ;;  %v254_v54 = vrot.slane %v252_v46, 5  ;;  %v262_v58 = vshrl.u32 %v175_v36, 16  ;;  %v207_v31 = vld [vmem:[%s6534_s25 + $0x20] sm:$0x1]  ;;  %v5211_v40 = vld [vmem:[%s6534_s25 + $0x24] sm:$0xf] }
  0x1d   : > { %v5027_v51 = vcombine.low %v237_v47, %v247_v48  ;;  %v2036_v52 = vrot.slane %v2035_v42, 4  ;;  %v2046_v56 = vrot.slane %v2045_v49, 4  ;;  %v260_v57 = vrot.slane %v258_v50, 5  ;;  %v6610_v46 = vld [vmem:[%s6534_s25 + $0x28] sm:$0xf] }
  0x1e   : > { %v268_v59 = vshll.u32 %v206_v44, 16  ;;  %v2772_v62 = vrot.slane %v6541_v15, 5  ;;  %v2775_v63 = vrot.slane %v6544_v16, 5  ;;  %v255_v0 = vor.u32 %v254_v54, %v251_v53  ;;  %v6619_v54 = vld [vmem:[%s6534_s25 + $0x2c] sm:$0x1] }
  0x1f   : > { %5785 = vmatprep.mubr.msk.bf16.mxu1 %vm658_vm3, %v5027_v51  ;;  %v2041_v61 = vsel %vm6560_vm4, %v2036_v52, %v2040_v35  ;;  %v2051_v2 = vsel %vm6560_vm4, %v2046_v56, %v2050_v43  ;;  %v264_v4 = vrot.slane %v262_v58, 4  ;;  %v2053_v6 = vshrl.u32 %v5208_v55, 16  ;;  %v5107_v51 = vld [vmem:[%s8339_s1 + $0x8] sm:$0xf]  ;;  %v6819_v16 = vld [vmem:[%s6534_s25 + $0x7c] sm:$0xf] }
  0x20   : > { %v270_v5 = vrot.slane %v268_v59, 5  ;;  %v5254_v7 = vcombine.low %v2041_v61, %v2051_v2  ;;  %v256_v8 = vrot.slane %v255_v0, 4  ;;  %v2056_v9 = vshll.u32 %v5208_v55, 16  ;;  %v178_v0 = vld [vmem:[%s6534_s25 + $0x24] sm:$0xf] }
  0x21   : > { %v2062_v10 = vshll.u32 %v6579_v60, 16  ;;  %v265_v11 = vor.u32 %v264_v4, %v260_v57  ;;  %v2055_v12 = vrot.slane %v2053_v6, 4  ;;  %v2066_v13 = vshrl.u32 %v6579_v60, 16 }
  0x22   : > { %v2072_v14 = vshll.u32 %v6587_v1, 16  ;;  %5921 = vmatprep.mubr.msk.bf16.mxu0 %vm658_vm3, %v5254_v7  ;;  %v261_v19 = vsel %vm6560_vm4, %v256_v8, %v260_v57  ;;  %v2058_v20 = vrot.slane %v2056_v9, 5  ;;  %v2779_v22 = vrot.slane %v6579_v60, 5  ;;  %v179_v7 = vld [vmem:[%s6534_s25 + $0x28] sm:$0xf] }
  0x23   : > { %v2064_v21 = vrot.slane %v2062_v10, 5  ;;  %v266_v24 = vrot.slane %v265_v11, 4  ;;  %v2068_v25 = vrot.slane %v2066_v13, 4  ;;  %v2782_v28 = vrot.slane %v6587_v1, 5  ;;  %v208_v13 = vld [vmem:[%s6534_s25 + $0x2c] sm:$0x1] }
  0x24   : > { %v2074_v27 = vrot.slane %v2072_v14, 5  ;;  %v2059_v29 = vor.u32 %v2058_v20, %v2055_v12  ;;  %v6603_v30 = vrot.slane %v2779_v22, 4  ;;  %v273_v33 = vshrl.u32 %v176_v18, 16 }
  0x25   : > { %v276_v34 = vshll.u32 %v176_v18, 16  ;;  %v271_v35 = vsel %vm6560_vm4, %v266_v24, %v270_v5  ;;  %v2069_v36 = vor.u32 %v2068_v25, %v2064_v21  ;;  %v282_v38 = vshll.u32 %v177_v23, 16  ;;  %v5214_v24 = vld [vmem:[%s6534_s25 + $0x30] sm:$0xf] }
  0x26   : > { %v286_v39 = vshrl.u32 %v177_v23, 16  ;;  %v5028_v42 = vcombine.low %v261_v19, %v271_v35  ;;  %v2060_v43 = vrot.slane %v2059_v29, 4  ;;  %v275_v44 = vrot.slane %v273_v33, 4  ;;  %v6639_v33 = vld [vmem:[%s6534_s25 + $0x34] sm:$0xf] }
  0x27   : > { %v278_v45 = vrot.slane %v276_v34, 5  ;;  %v2070_v47 = vrot.slane %v2069_v36, 4  ;;  %v284_v48 = vrot.slane %v282_v38, 5  ;;  %v292_v50 = vshll.u32 %v207_v31, 16 }
  0x28   : > { %v288_v49 = vrot.slane %v286_v39, 4  ;;  %5786 = vmatmul.mubr.msk.bf16.vlgmr.msra.gmra.mrb[0].mxu1 %vm658_vm3, %v5028_v42  ;;  %v2065_v52 = vsel %vm6560_vm4, %v2060_v43, %v2064_v21  ;;  %v2077_v55 = vshrl.u32 %v5211_v40, 16  ;;  %v2080_v56 = vshll.u32 %v5211_v40, 16  ;;  %v6647_v40 = vld [vmem:[%s6534_s25 + $0x38] sm:$0x1] }
  0x29   : > { %v279_v53 = vor.u32 %v278_v45, %v275_v44  ;;  %5818 = vmatpush3.bf16.msra.mxu1 %v6547_v17  ;;  %v2075_v57 = vsel %vm6560_vm4, %v2070_v47, %v2074_v27  ;;  %v294_v59 = vrot.slane %v292_v50, 5  ;;  %v2086_v61 = vshll.u32 %v6610_v46, 16 }
  0x2a   : > { %v289_v58 = vor.u32 %v288_v49, %v284_v48  ;;  %v5255_v2 = vcombine.low %v2065_v52, %v2075_v57  ;;  %v2079_v5 = vrot.slane %v2077_v55, 4  ;;  %v2082_v6 = vrot.slane %v2080_v56, 5  ;;  %6349 = vmatprep.subr.msk.bf16.mxu1 %vm707_vm0, %v5107_v51  ;;  %v180_v52 = vld [vmem:[%s6534_s25 + $0x30] sm:$0xf] }
  0x2b   : > { %v280_v4 = vrot.slane %v279_v53, 4  ;;  %v2088_v9 = vrot.slane %v2086_v61, 5  ;;  %v2090_v17 = vshrl.u32 %v6610_v46, 16  ;;  %v2096_v10 = vshll.u32 %v6619_v54, 16 }
  0x2c   : > { %v290_v8 = vrot.slane %v289_v58, 4  ;;  %5922 = vmatmul.mubr.msk.bf16.vlgmr.msra.gmra.mrb[0].mxu0 %vm658_vm3, %v5255_v2  ;;  %v2083_v12 = vor.u32 %v2082_v6, %v2079_v5  ;;  %v297_v14 = vshrl.u32 %v178_v0, 16  ;;  %v300_v18 = vshll.u32 %v178_v0, 16  ;;  %v181_v58 = vld [vmem:[%s6534_s25 + $0x34] sm:$0xf] }
  0x2d   : > { %v285_v11 = vsel %vm6560_vm4, %v280_v4, %v284_v48  ;;  %5954 = vmatpush3.bf16.msra.mxu0 %v6566_v37  ;;  %v2092_v20 = vrot.slane %v2090_v17, 4  ;;  %v2098_v21 = vrot.slane %v2096_v10, 5  ;;  %v306_v23 = vshll.u32 %v179_v7, 16  ;;  %v209_v4 = vld [vmem:[%s6534_s25 + $0x38] sm:$0x1] }
  0x2e   : > { %v295_v19 = vsel %vm6560_vm4, %v290_v8, %v294_v59  ;;  %v2084_v27 = vrot.slane %v2083_v12, 4  ;;  %v299_v29 = vrot.slane %v297_v14, 4  ;;  %v302_v31 = vrot.slane %v300_v18, 5  ;;  %6354 = vmatprep.subr.msk.bf16.mxu0 %vm707_vm0, %v6553_v26  ;;  %v5217_v12 = vld [vmem:[%s6534_s25 + $0x3c] sm:$0xf] }
  0x2f   : > { %v5029_v25 = vcombine.low %v285_v11, %v295_v19  ;;  %v2093_v34 = vor.u32 %v2092_v20, %v2088_v9  ;;  %v308_v35 = vrot.slane %v306_v23, 5  ;;  %v310_v37 = vshrl.u32 %v179_v7, 16  ;;  %v6664_v20 = vld [vmem:[%s6534_s25 + $0x40] sm:$0xf] }
  0x30   : > { %v316_v36 = vshll.u32 %v208_v13, 16  ;;  %v2089_v38 = vsel %vm6560_vm4, %v2084_v27, %v2088_v9  ;;  %v303_v39 = vor.u32 %v302_v31, %v299_v29  ;;  %v2101_v42 = vshrl.u32 %v5214_v24, 16 }
  0x31   : > { %5789 = vmatprep.mubr.msk.bf16.mxu1 %vm658_vm3, %v5029_v25  ;;  %v2104_v43 = vshll.u32 %v5214_v24, 16  ;;  %v2094_v44 = vrot.slane %v2093_v34, 4  ;;  %v312_v45 = vrot.slane %v310_v37, 4  ;;  %v2110_v26 = vshll.u32 %v6639_v33, 16  ;;  %v6669_v34 = vld [vmem:[%s6534_s25 + $0x44] sm:$0x1] }
  0x32   : > { %v318_v47 = vrot.slane %v316_v36, 5  ;;  %v304_v48 = vrot.slane %v303_v39, 4  ;;  %v2103_v49 = vrot.slane %v2101_v42, 4  ;;  %v2114_v51 = vshrl.u32 %v6639_v33, 16  ;;  %v182_v42 = vld [vmem:[%s6534_s25 + $0x3c] sm:$0xf] }
  0x33   : > { %v2106_v50 = vrot.slane %v2104_v43, 5  ;;  %v2099_v53 = vsel %vm6560_vm4, %v2094_v44, %v2098_v21  ;;  %v313_v55 = vor.u32 %v312_v45, %v308_v35  ;;  %v2112_v56 = vrot.slane %v2110_v26, 5  ;;  %v183_v26 = vld [vmem:[%s6534_s25 + $0x40] sm:$0xf] }
  0x34   : > { %v2120_v57 = vshll.u32 %v6647_v40, 16  ;;  %v5256_v59 = vcombine.low %v2089_v38, %v2099_v53  ;;  %v309_v61 = vsel %vm6560_vm4, %v304_v48, %v308_v35  ;;  %v2116_v2 = vrot.slane %v2114_v51, 4 }
  0x35   : > { %v2107_v0 = vor.u32 %v2106_v50, %v2103_v49  ;;  %v314_v5 = vrot.slane %v313_v55, 4  ;;  %v321_v7 = vshrl.u32 %v180_v52, 16  ;;  %v324_v8 = vshll.u32 %v180_v52, 16 }
  0x36   : > { %v2122_v6 = vrot.slane %v2120_v57, 5  ;;  %5925 = vmatprep.mubr.msk.bf16.mxu0 %vm658_vm3, %v5256_v59  ;;  %v2117_v17 = vor.u32 %v2116_v2, %v2112_v56  ;;  %v330_v10 = vshll.u32 %v181_v58, 16  ;;  %v334_v11 = vshrl.u32 %v181_v58, 16  ;;  %v5220_v2 = vld [vmem:[%s6534_s25 + $0x48] sm:$0xf] }
  0x37   : > { %v2108_v9 = vrot.slane %v2107_v0, 4  ;;  %v319_v13 = vsel %vm6560_vm4, %v314_v5, %v318_v47  ;;  %v323_v14 = vrot.slane %v321_v7, 4  ;;  %v326_v18 = vrot.slane %v324_v8, 5  ;;  %v6687_v8 = vld [vmem:[%s6534_s25 + $0x4c] sm:$0xf] }
  0x38   : > { %v340_v19 = vshll.u32 %v209_v4, 16  ;;  %v5030_v21 = vcombine.low %v309_v61, %v319_v13  ;;  %v2118_v24 = vrot.slane %v2117_v17, 4  ;;  %v332_v25 = vrot.slane %v330_v10, 5  ;;  %v210_v61 = vld [vmem:[%s6534_s25 + $0x44] sm:$0x1] }
  0x39   : > { %v2113_v23 = vsel %vm6560_vm4, %v2108_v9, %v2112_v56  ;;  %v327_v27 = vor.u32 %v326_v18, %v323_v14  ;;  %v336_v29 = vrot.slane %v334_v11, 4  ;;  %v2125_v35 = vshrl.u32 %v5217_v12, 16 }
  0x3a   : > { %v342_v31 = vrot.slane %v340_v19, 5  ;;  %5790 = vmatmul.mubr.msk.bf16.gmra.mrb[4].mxu1 %vm658_vm3, %v5030_v21  ;;  %v2123_v37 = vsel %vm6560_vm4, %v2118_v24, %v2122_v6  ;;  %v2128_v36 = vshll.u32 %v5217_v12, 16  ;;  %v2134_v38 = vshll.u32 %v6664_v20, 16 }
  0x3b   : > { %v2138_v39 = vshrl.u32 %v6664_v20, 16  ;;  %v5257_v43 = vcombine.low %v2113_v23, %v2123_v37  ;;  %v328_v44 = vrot.slane %v327_v27, 4  ;;  %v337_v45 = vor.u32 %v336_v29, %v332_v25  ;;  %v6695_v23 = vld [vmem:[%s6534_s25 + $0x50] sm:$0x1]  ;;  %v6699_v27 = vld [vmem:[%s6534_s25 + $0x48] sm:$0xf] }
  0x3c   : > { %v2127_v47 = vrot.slane %v2125_v35, 4  ;;  %v2130_v48 = vrot.slane %v2128_v36, 5  ;;  %v2136_v49 = vrot.slane %v2134_v38, 5  ;;  %v2144_v51 = vshll.u32 %v6669_v34, 16  ;;  %v6702_v36 = vld [vmem:[%s6534_s25 + $0x4c] sm:$0xf] }
  0x3d   : > { %v2140_v50 = vrot.slane %v2138_v39, 4  ;;  %5926 = vmatmul.mubr.msk.bf16.gmra.mrb[4].mxu0 %vm658_vm3, %v5257_v43  ;;  %v333_v52 = vsel %vm6560_vm4, %v328_v44, %v332_v25  ;;  %v338_v53 = vrot.slane %v337_v45, 4  ;;  %v345_v55 = vshrl.u32 %v182_v42, 16 }
  0x3e   : > { %v348_v56 = vshll.u32 %v182_v42, 16  ;;  %v2131_v57 = vor.u32 %v2130_v48, %v2127_v47  ;;  %v2146_v59 = vrot.slane %v2144_v51, 5  ;;  %v354_v0 = vshll.u32 %v183_v26, 16 }
  0x3f   : > { %v2141_v58 = vor.u32 %v2140_v50, %v2136_v49  ;;  %v343_v4 = vsel %vm6560_vm4, %v338_v53, %v342_v31  ;;  %v347_v5 = vrot.slane %v345_v55, 4  ;;  %v358_v7 = vshrl.u32 %v183_v26, 16  ;;  %v211_v26 = vld [vmem:[%s6534_s25 + $0x50] sm:$0x1]  ;;  %v5223_v53 = vld [vmem:[%s6534_s25 + $0x54] sm:$0xf] }
  0x40   : > { %v350_v6 = vrot.slane %v348_v56, 5  ;;  %v5031_v9 = vcombine.low %v333_v52, %v343_v4  ;;  %v2132_v17 = vrot.slane %v2131_v57, 4  ;;  %v356_v11 = vrot.slane %v354_v0, 5  ;;  %v6718_v4 = vld [vmem:[%s6534_s25 + $0x58] sm:$0xf] }
  0x41   : > { %v2142_v10 = vrot.slane %v2141_v58, 4  ;;  %v360_v13 = vrot.slane %v358_v7, 4  ;;  %v364_v14 = vshll.u32 %v210_v61, 16  ;;  %v2149_v18 = vshrl.u32 %v5220_v2, 16 }
  0x42   : > { %v351_v12 = vor.u32 %v350_v6, %v347_v5  ;;  %5793 = vmatprep.mubr.msk.bf16.mxu1 %vm658_vm3, %v5031_v9  ;;  %v2137_v19 = vsel %vm6560_vm4, %v2132_v17, %v2136_v49  ;;  %v2152_v24 = vshll.u32 %v5220_v2, 16  ;;  %v2158_v25 = vshll.u32 %v6687_v8, 16 }
  0x43   : > { %v2147_v21 = vsel %vm6560_vm4, %v2142_v10, %v2146_v59  ;;  %v361_v35 = vor.u32 %v360_v13, %v356_v11  ;;  %v366_v37 = vrot.slane %v364_v14, 5  ;;  %v2151_v38 = vrot.slane %v2149_v18, 4 }
  0x44   : > { %v5258_v29 = vcombine.low %v2137_v19, %v2147_v21  ;;  %v352_v31 = vrot.slane %v351_v12, 4  ;;  %v2154_v39 = vrot.slane %v2152_v24, 5  ;;  %v2160_v42 = vrot.slane %v2158_v25, 5  ;;  %v6724_v12 = vld [vmem:[%s6534_s25 + $0x5c] sm:$0x1] }
  0x45   : > { %v2162_v43 = vshrl.u32 %v6687_v8, 16  ;;  %v362_v45 = vrot.slane %v361_v35, 4  ;;  %v2168_v47 = vshll.u32 %v6695_v23, 16  ;;  %v369_v48 = vshrl.u32 %v6699_v27, 16  ;;  %v6728_v24 = vld [vmem:[%s6534_s25 + $0x54] sm:$0xf] }
  0x46   : > { %5929 = vmatprep.mubr.msk.bf16.mxu0 %vm658_vm3, %v5258_v29  ;;  %v357_v44 = vsel %vm6560_vm4, %v352_v31, %v356_v11  ;;  %v2155_v49 = vor.u32 %v2154_v39, %v2151_v38  ;;  %v372_v51 = vshll.u32 %v6699_v27, 16  ;;  %v378_v52 = vshll.u32 %v6702_v36, 16 }
  0x47   : > { %v2164_v50 = vrot.slane %v2162_v43, 4  ;;  %v367_v55 = vsel %vm6560_vm4, %v362_v45, %v366_v37  ;;  %v2170_v56 = vrot.slane %v2168_v47, 5  ;;  %v371_v57 = vrot.slane %v369_v48, 4  ;;  %v6734_v37 = vld [vmem:[%s6534_s25 + $0x58] sm:$0xf] }
  0x48   : > { %v382_v58 = vshrl.u32 %v6702_v36, 16  ;;  %v5032_v59 = vcombine.low %v357_v44, %v367_v55  ;;  %v2156_v61 = vrot.slane %v2155_v49, 4  ;;  %v374_v2 = vrot.slane %v372_v51, 5 }
  0x49   : > { %v2165_v0 = vor.u32 %v2164_v50, %v2160_v42  ;;  %v380_v5 = vrot.slane %v378_v52, 5  ;;  %v388_v7 = vshll.u32 %v211_v26, 16  ;;  %v2173_v9 = vshrl.u32 %v5223_v53, 16  ;;  %v212_v26 = vld [vmem:[%s6534_s25 + $0x5c] sm:$0x1] }
  0x4a   : > { %v384_v6 = vrot.slane %v382_v58, 4  ;;  %5794 = vmatmul.mubr.msk.bf16.gmra.mrb[8].mxu1 %vm658_vm3, %v5032_v59  ;;  %v2161_v17 = vsel %vm6560_vm4, %v2156_v61, %v2160_v42  ;;  %v375_v11 = vor.u32 %v374_v2, %v371_v57  ;;  %v2176_v13 = vshll.u32 %v5223_v53, 16  ;;  %v5226_v53 = vld [vmem:[%s6534_s25 + $0x60] sm:$0xf]  ;;  %v6748_v59 = vld [vmem:[%s6534_s25 + $0x64] sm:$0xf] }
  0x4b   : > { %v2166_v10 = vrot.slane %v2165_v0, 4  ;;  %v390_v18 = vrot.slane %v388_v7, 5  ;;  %v2175_v19 = vrot.slane %v2173_v9, 4  ;;  %v2182_v21 = vshll.u32 %v6718_v4, 16  ;;  %v6755_v9 = vld [vmem:[%s6534_s25 + $0x68] sm:$0x1] }
  0x4c   : > { %v385_v14 = vor.u32 %v384_v6, %v380_v5  ;;  %v376_v29 = vrot.slane %v375_v11, 4  ;;  %v2178_v31 = vrot.slane %v2176_v13, 5  ;;  %v2186_v35 = vshrl.u32 %v6718_v4, 16 }
  0x4d   : > { %v2171_v25 = vsel %vm6560_vm4, %v2166_v10, %v2170_v56  ;;  %v2184_v42 = vrot.slane %v2182_v21, 5  ;;  %v2192_v43 = vshll.u32 %v6724_v12, 16  ;;  %v393_v48 = vshrl.u32 %v6728_v24, 16 }
  0x4e   : > { %v5259_v38 = vcombine.low %v2161_v17, %v2171_v25  ;;  %v386_v39 = vrot.slane %v385_v14, 4  ;;  %v381_v44 = vsel %vm6560_vm4, %v376_v29, %v380_v5  ;;  %v2179_v45 = vor.u32 %v2178_v31, %v2175_v19  ;;  %v6759_v19 = vld [vmem:[%s6534_s25 + $0x60] sm:$0xf] }
  0x4f   : > { %v2188_v47 = vrot.slane %v2186_v35, 4  ;;  %v2194_v50 = vrot.slane %v2192_v43, 5  ;;  %v396_v51 = vshll.u32 %v6728_v24, 16  ;;  %v402_v52 = vshll.u32 %v6734_v37, 16  ;;  %v6765_v35 = vld [vmem:[%s6534_s25 + $0x64] sm:$0xf] }
  0x50   : > { %5930 = vmatmul.mubr.msk.bf16.gmra.mrb[8].mxu0 %vm658_vm3, %v5259_v38  ;;  %v391_v49 = vsel %vm6560_vm4, %v386_v39, %v390_v18  ;;  %v2180_v56 = vrot.slane %v2179_v45, 4  ;;  %v395_v58 = vrot.slane %v393_v48, 4  ;;  %v406_v2 = vshrl.u32 %v6734_v37, 16 }
  0x51   : > { %v5033_v55 = vcombine.low %v381_v44, %v391_v49  ;;  %v2189_v57 = vor.u32 %v2188_v47, %v2184_v42  ;;  %v398_v61 = vrot.slane %v396_v51, 5  ;;  %v404_v0 = vrot.slane %v402_v52, 5 }
  0x52   : > { %v412_v5 = vshll.u32 %v212_v26, 16  ;;  %v2185_v6 = vsel %vm6560_vm4, %v2180_v56, %v2184_v42  ;;  %v2197_v17 = vshrl.u32 %v5226_v53, 16  ;;  %v2200_v10 = vshll.u32 %v5226_v53, 16 }
  0x53   : > { %5797 = vmatprep.mubr.msk.bf16.mxu1 %vm658_vm3, %v5033_v55  ;;  %v2190_v7 = vrot.slane %v2189_v57, 4  ;;  %v399_v11 = vor.u32 %v398_v61, %v395_v58  ;;  %v408_v13 = vrot.slane %v406_v2, 4  ;;  %v2206_v18 = vshll.u32 %v6748_v59, 16  ;;  %v5286_v58 = vld [vmem:[%s6534_s25 + $0xc] sm:$0xe] }
  0x54   : > { %v414_v14 = vrot.slane %v412_v5, 5  ;;  %v2199_v25 = vrot.slane %v2197_v17, 4  ;;  %v2202_v29 = vrot.slane %v2200_v10, 5  ;;  %v2210_v31 = vshrl.u32 %v6748_v59, 16 }
  0x55   : > { %v2195_v21 = vsel %vm6560_vm4, %v2190_v7, %v2194_v50  ;;  %v400_v39 = vrot.slane %v399_v11, 4  ;;  %v409_v42 = vor.u32 %v408_v13, %v404_v0  ;;  %v2208_v43 = vrot.slane %v2206_v18, 5  ;;  %v213_v50 = vld [vmem:[%s6534_s25 + $0x68] sm:$0x1] }
  0x56   : > { %v5260_v38 = vcombine.low %v2185_v6, %v2195_v21  ;;  %v2203_v44 = vor.u32 %v2202_v29, %v2199_v25  ;;  %v2212_v45 = vrot.slane %v2210_v31, 4  ;;  %v2216_v47 = vshll.u32 %v6755_v9, 16  ;;  %v6793_v29 = vld [vmem:[%s6534_s25 + $0x70] sm:$0xf] }
  0x57   : > { %v417_v26 = vshrl.u32 %v6759_v19, 16  ;;  %v405_v48 = vsel %vm6560_vm4, %v400_v39, %v404_v0  ;;  %v410_v49 = vrot.slane %v409_v42, 4  ;;  %v420_v51 = vshll.u32 %v6759_v19, 16  ;;  %v6780_v0 = vld [vmem:[%s6534_s25 + $0x6c] sm:$0xf] }
  0x58   : > { %5933 = vmatprep.mubr.msk.bf16.mxu0 %vm658_vm3, %v5260_v38  ;;  %v426_v52 = vshll.u32 %v6765_v35, 16  ;;  %v2204_v53 = vrot.slane %v2203_v44, 4  ;;  %v2213_v55 = vor.u32 %v2212_v45, %v2208_v43  ;;  %v2218_v56 = vrot.slane %v2216_v47, 5 }
  0x59   : > { %v419_v57 = vrot.slane %v417_v26, 4  ;;  %v415_v61 = vsel %vm6560_vm4, %v410_v49, %v414_v14  ;;  %v422_v2 = vrot.slane %v420_v51, 5  ;;  %v430_v6 = vshrl.u32 %v6765_v35, 16  ;;  %v214_v26 = vld [vmem:[%s6534_s25 + $0x74] sm:$0x1] }
  0x5a   : > { %v428_v5 = vrot.slane %v426_v52, 5  ;;  %v5034_v7 = vcombine.low %v405_v48, %v415_v61  ;;  %v2209_v17 = vsel %vm6560_vm4, %v2204_v53, %v2208_v43  ;;  %v2214_v10 = vrot.slane %v2213_v55, 4  ;;  %v5287_v48 = vld [vmem:[%s6534_s25 + $0x18] sm:$0xe] }
  0x5b   : > { %v436_v11 = vshll.u32 %v213_v50, 16  ;;  %v423_v14 = vor.u32 %v422_v2, %v419_v57  ;;  %v432_v18 = vrot.slane %v430_v6, 4  ;;  %v5302_v21 = vrot.slane %v5286_v58, 9  ;;  %v6812_v53 = vld [vmem:[%s6534_s25 + $0x78] sm:$0xf] }
  0x5c   : > { %v2774_v25 = vrot.slane %v2772_v62, 4  ;;  %5798 = vmatmul.mubr.msk.bf16.gmra.mrb[12].mxu1 %vm658_vm3, %v5034_v7  ;;  %v2219_v31 = vsel %vm6560_vm4, %v2214_v10, %v2218_v56  ;;  %v441_v39 = vshrl.u32 %v6780_v0, 16  ;;  %v444_v42 = vshll.u32 %v6780_v0, 16  ;;  %v215_v57 = vld [vmem:[%s6534_s25 + $0x80] sm:$0x1] }
  0x5d   : > { %v438_v38 = vrot.slane %v436_v11, 5  ;;  %v5261_v43 = vcombine.low %v2209_v17, %v2219_v31  ;;  %v424_v44 = vrot.slane %v423_v14, 4  ;;  %v433_v45 = vor.u32 %v432_v18, %v428_v5  ;;  %v5288_v10 = vld [vmem:[%s6534_s25 + $0x24] sm:$0xe] }
  0x5e   : > { %v2773_v47 = vsel %vm6786_vm7, %v5302_v21, %v2772_v62  ;;  %v2776_v49 = vsel %vm6786_vm7, %v2774_v25, %v2775_v63  ;;  %v443_v50 = vrot.slane %v441_v39, 4  ;;  %v446_v51 = vrot.slane %v444_v42, 5  ;;  %v6838_v39 = vld [vmem:[%s6534_s25 + $0x84] sm:$0xf] }
  0x5f   : > { %v450_v52 = vshll.u32 %v6793_v29, 16  ;;  %5934 = vmatmul.mubr.msk.bf16.gmra.mrb[12].mxu0 %vm658_vm3, %v5261_v43  ;;  %v429_v15 = vsel %vm6560_vm4, %v424_v44, %v428_v5  ;;  %v434_v62 = vrot.slane %v433_v45, 4  ;;  %v5319_v55 = vcombine.low %v2773_v47, %v2776_v49  ;;  %v6846_v43 = vld [vmem:[%s6534_s25 + $0x88] sm:$0xf] }
  0x60   : > { %v454_v56 = vshrl.u32 %v6793_v29, 16  ;;  %v447_v63 = vor.u32 %v446_v51, %v443_v50  ;;  %v460_v61 = vshll.u32 %v214_v26, 16  ;;  %v5303_v2 = vrot.slane %v5287_v48, 9 }
  0x61   : > { %v452_v58 = vrot.slane %v450_v52, 5  ;;  %v439_v6 = vsel %vm6560_vm4, %v434_v62, %v438_v38  ;;  %5955 = vmatprep.mubr.msk.bf16.mxu0 %vm658_vm3, %v5319_v55  ;;  %v2783_v5 = vsel %vm6786_vm7, %v6603_v30, %v2782_v28  ;;  %v465_v17 = vshrl.u32 %v6812_v53, 16  ;;  %v216_v52 = vld [vmem:[%s6534_s25 + $0x8c] sm:$0x1] }
  0x62   : > { %v456_v7 = vrot.slane %v454_v56, 4  ;;  %v5035_v11 = vcombine.low %v429_v15, %v439_v6  ;;  %v448_v14 = vrot.slane %v447_v63, 4  ;;  %v462_v18 = vrot.slane %v460_v61, 5 }
  0x63   : > { %v2780_v21 = vsel %vm6786_vm7, %v5303_v2, %v2779_v22  ;;  %v467_v38 = vrot.slane %v465_v17, 4  ;;  %v468_v1 = vshll.u32 %v6812_v53, 16  ;;  %v474_v30 = vshll.u32 %v6819_v16, 16  ;;  %v6851_v22 = vld [vmem:[%s8339_s1 + $0x1c] sm:$0xf] }
  0x64   : > { %v457_v25 = vor.u32 %v456_v7, %v452_v58  ;;  %v5320_v31 = vcombine.low %v2780_v21, %v2783_v5  ;;  %5801 = vmatprep.mubr.msk.bf16.mxu1 %vm658_vm3, %v5035_v11  ;;  %v453_v28 = vsel %vm6560_vm4, %v448_v14, %v452_v58  ;;  %v478_v60 = vshrl.u32 %v6819_v16, 16  ;;  %v6870_v5 = vld [vmem:[%s6534_s25 + $0x90] sm:$0xf] }
  0x65   : > { %v484_v42 = vshll.u32 %v215_v57, 16  ;;  %v470_v45 = vrot.slane %v468_v1, 5  ;;  %v5304_v47 = vrot.slane %v5288_v10, 9  ;;  %v2786_v26 = vrot.slane %v6610_v46, 5  ;;  %v5289_v57 = vld [vmem:[%s6534_s25 + $0x30] sm:$0xe] }
  0x66   : > { %v458_v44 = vrot.slane %v457_v25, 4  ;;  %v476_v48 = vrot.slane %v474_v30, 5  ;;  %v480_v49 = vrot.slane %v478_v60, 4  ;;  %v2789_v51 = vrot.slane %v6619_v54, 5  ;;  %v6882_v30 = vld [vmem:[%s6534_s25 + $0x94] sm:$0xf] }
  0x67   : > { %v486_v50 = vrot.slane %v484_v42, 5  ;;  %5956 = vmatmul.mubr.msk.bf16.vlgmr.msra.gmra.mrb[0].mxu0 %vm658_vm3, %v5320_v31  ;;  %v471_v62 = vor.u32 %v470_v45, %v467_v38  ;;  %v2787_v55 = vsel %vm6786_vm7, %v5304_v47, %v2786_v26  ;;  %v2788_v56 = vrot.slane %v2786_v26, 4  ;;  %v217_v60 = vld [vmem:[%s6534_s25 + $0x98] sm:$0x1]  ;;  %v5290_v26 = vld [vmem:[%s6534_s25 + $0x3c] sm:$0xe] }
  0x68   : > { %v463_v15 = vsel %vm6560_vm4, %v458_v44, %v462_v18  ;;  %5988 = vmatpush3.bf16.msra.mxu0 %v6570_v41  ;;  %v481_v46 = vor.u32 %v480_v49, %v476_v48  ;;  %v489_v58 = vshrl.u32 %v6838_v39, 16  ;;  %v492_v54 = vshll.u32 %v6838_v39, 16 }
  0x69   : > { %v5036_v63 = vcombine.low %v453_v28, %v463_v15  ;;  %v472_v61 = vrot.slane %v471_v62, 4  ;;  %v2790_v2 = vsel %vm6786_vm7, %v2788_v56, %v2789_v51  ;;  %v498_v6 = vshll.u32 %v6846_v43, 16  ;;  %6355 = vmatprep.subr.msk.bf16.mxu0 %vm707_vm0, %v6851_v22 }
  0x6a   : > { %v502_v7 = vshrl.u32 %v6846_v43, 16  ;;  %v482_v41 = vrot.slane %v481_v46, 4  ;;  %v5321_v17 = vcombine.low %v2787_v55, %v2790_v2  ;;  %v491_v10 = vrot.slane %v489_v58, 4  ;;  %v6902_v46 = vld [vmem:[%s6534_s25 + $0xa0] sm:$0xf] }
  0x6b   : > { %5802 = vmatmul.mubr.msk.bf16.gmra.mrb[16].mxu1 %vm658_vm3, %v5036_v63  ;;  %v494_v11 = vrot.slane %v492_v54, 5  ;;  %v477_v14 = vsel %vm6560_vm4, %v472_v61, %v476_v48  ;;  %v500_v18 = vrot.slane %v498_v6, 5  ;;  %v508_v25 = vshll.u32 %v216_v52, 16  ;;  %v6891_v52 = vld [vmem:[%s6534_s25 + $0x9c] sm:$0xf] }
  0x6c   : > { %v504_v21 = vrot.slane %v502_v7, 4  ;;  %v487_v31 = vsel %vm6560_vm4, %v482_v41, %v486_v50  ;;  %5959 = vmatprep.mubr.msk.bf16.mxu0 %vm658_vm3, %v5321_v17  ;;  %v5305_v1 = vrot.slane %v5289_v57, 9  ;;  %v2793_v28 = vrot.slane %v6639_v33, 5 }
  0x6d   : > { %v495_v38 = vor.u32 %v494_v11, %v491_v10  ;;  %v5037_v42 = vcombine.low %v477_v14, %v487_v31  ;;  %v510_v45 = vrot.slane %v508_v25, 5  ;;  %v2796_v47 = vrot.slane %v6647_v40, 5  ;;  %v218_v10 = vld [vmem:[%s6534_s25 + $0xa4] sm:$0x1]  ;;  %v5291_v11 = vld [vmem:[%s6534_s25 + $0x48] sm:$0xe] }
  0x6e   : > { %v505_v44 = vor.u32 %v504_v21, %v500_v18  ;;  %v2794_v49 = vsel %vm6786_vm7, %v5305_v1, %v2793_v28  ;;  %v2795_v50 = vrot.slane %v2793_v28, 4  ;;  %v513_v51 = vshrl.u32 %v6870_v5, 16 }
  0x6f   : > { %v496_v48 = vrot.slane %v495_v38, 4  ;;  %5805 = vmatprep.mubr.msk.bf16.mxu1 %vm658_vm3, %v5037_v42  ;;  %v516_v15 = vshll.u32 %v6870_v5, 16  ;;  %v522_v62 = vshll.u32 %v6882_v30, 16  ;;  %v526_v40 = vshrl.u32 %v6882_v30, 16 }
  0x70   : > { %v506_v33 = vrot.slane %v505_v44, 4  ;;  %v2797_v56 = vsel %vm6786_vm7, %v2795_v50, %v2796_v47  ;;  %v515_v57 = vrot.slane %v513_v51, 4  ;;  %v532_v63 = vshll.u32 %v217_v60, 16 }
  0x71   : > { %v501_v55 = vsel %vm6560_vm4, %v496_v48, %v500_v18  ;;  %v5322_v54 = vcombine.low %v2794_v49, %v2797_v56  ;;  %v518_v61 = vrot.slane %v516_v15, 5  ;;  %v524_v2 = vrot.slane %v522_v62, 5  ;;  %v6928_v56 = vld [vmem:[%s6534_s25 + $0xac] sm:$0xf] }
  0x72   : > { %v511_v58 = vsel %vm6560_vm4, %v506_v33, %v510_v45  ;;  %v528_v7 = vrot.slane %v526_v40, 4  ;;  %v534_v41 = vrot.slane %v532_v63, 5  ;;  %v5306_v17 = vrot.slane %v5290_v26, 9  ;;  %v6923_v33 = vld [vmem:[%s6534_s25 + $0xa8] sm:$0xf] }
  0x73   : > { %v5038_v6 = vcombine.low %v501_v55, %v511_v58  ;;  %5960 = vmatmul.mubr.msk.bf16.gmra.mrb[4].mxu0 %vm658_vm3, %v5322_v54  ;;  %v519_v14 = vor.u32 %v518_v61, %v515_v57  ;;  %v2800_v18 = vrot.slane %v6664_v20, 5  ;;  %v2803_v21 = vrot.slane %v6669_v34, 5  ;;  %v219_v61 = vld [vmem:[%s6534_s25 + $0xb0] sm:$0x1] }
  0x74   : > { %v537_v25 = vshrl.u32 %v6891_v52, 16  ;;  %v529_v31 = vor.u32 %v528_v7, %v524_v2  ;;  %v540_v38 = vshll.u32 %v6891_v52, 16  ;;  %v546_v1 = vshll.u32 %v6902_v46, 16 }
  0x75   : > { %5806 = vmatmul.mubr.msk.bf16.gmra.mrb[20].mxu1 %vm658_vm3, %v5038_v6  ;;  %v550_v28 = vshrl.u32 %v6902_v46, 16  ;;  %v520_v60 = vrot.slane %v519_v14, 4  ;;  %v2801_v42 = vsel %vm6786_vm7, %v5306_v17, %v2800_v18  ;;  %v2802_v20 = vrot.slane %v2800_v18, 4  ;;  %v6943_v14 = vld [vmem:[%s6534_s25 + $0xb4] sm:$0xf] }
  0x76   : > { %v539_v44 = vrot.slane %v537_v25, 4  ;;  %v530_v34 = vrot.slane %v529_v31, 4  ;;  %v542_v45 = vrot.slane %v540_v38, 5  ;;  %v548_v47 = vrot.slane %v546_v1, 5 }
  0x77   : > { %v552_v26 = vrot.slane %v550_v28, 4  ;;  %v525_v48 = vsel %vm6560_vm4, %v520_v60, %v524_v2  ;;  %v2804_v49 = vsel %vm6786_vm7, %v2802_v20, %v2803_v21  ;;  %v556_v50 = vshll.u32 %v218_v10, 16  ;;  %v5292_v2 = vld [vmem:[%s6534_s25 + $0x54] sm:$0xe] }
  0x78   : > { %v5307_v51 = vrot.slane %v5291_v11, 9  ;;  %v535_v15 = vsel %vm6560_vm4, %v530_v34, %v534_v41  ;;  %v5323_v62 = vcombine.low %v2801_v42, %v2804_v49  ;;  %v543_v40 = vor.u32 %v542_v45, %v539_v44  ;;  %v6952_v42 = vld [vmem:[%s6534_s25 + $0xb8] sm:$0xf]  ;;  %v220_v49 = vld [vmem:[%s6534_s25 + $0xbc] sm:$0x1] }
  0x79   : > { %v553_v55 = vor.u32 %v552_v26, %v548_v47  ;;  %v5039_v57 = vcombine.low %v525_v48, %v535_v15  ;;  %v558_v63 = vrot.slane %v556_v50, 5  ;;  %v2807_v58 = vrot.slane %v6687_v8, 5 }
  0x7a   : > { %v2810_v54 = vrot.slane %v6695_v23, 5  ;;  %5963 = vmatprep.mubr.msk.bf16.mxu0 %vm658_vm3, %v5323_v62  ;;  %v544_v6 = vrot.slane %v543_v40, 4  ;;  %v561_v41 = vshrl.u32 %v6923_v33, 16  ;;  %v564_v17 = vshll.u32 %v6923_v33, 16 }
  0x7b   : > { %v554_v7 = vrot.slane %v553_v55, 4  ;;  %5809 = vmatprep.mubr.msk.bf16.mxu1 %vm658_vm3, %v5039_v57  ;;  %v2808_v10 = vsel %vm6786_vm7, %v5307_v51, %v2807_v58  ;;  %v2809_v11 = vrot.slane %v2807_v58, 4  ;;  %v570_v8 = vshll.u32 %v6928_v56, 16  ;;  %v5293_v55 = vld [vmem:[%s6534_s25 + $0x60] sm:$0xe] }
  0x7c   : > { %v574_v23 = vshrl.u32 %v6928_v56, 16  ;;  %v549_v18 = vsel %vm6560_vm4, %v544_v6, %v548_v47  ;;  %v563_v25 = vrot.slane %v561_v41, 4  ;;  %v566_v31 = vrot.slane %v564_v17, 5  ;;  %v5294_v6 = vld [vmem:[%s6534_s25 + $0x6c] sm:$0xe] }
  0x7d   : > { %v559_v21 = vsel %vm6560_vm4, %v554_v7, %v558_v63  ;;  %v2811_v1 = vsel %vm6786_vm7, %v2809_v11, %v2810_v54  ;;  %v572_v28 = vrot.slane %v570_v8, 5  ;;  %v580_v34 = vshll.u32 %v219_v61, 16  ;;  %v5230_v11 = vld [vmem:[%s6534_s25 + $0x70] sm:$0xf]  ;;  %v5231_v8 = vld [vmem:[%s6534_s25 + $0x74] sm:$0x1] }
  0x7e   : > { %v5040_v38 = vcombine.low %v549_v18, %v559_v21  ;;  %v576_v60 = vrot.slane %v574_v23, 4  ;;  %v5324_v20 = vcombine.low %v2808_v10, %v2811_v1  ;;  %v567_v44 = vor.u32 %v566_v31, %v563_v25 }
  0x7f   : > { %v5308_v45 = vrot.slane %v5292_v2, 9  ;;  %v2814_v26 = vrot.slane %v6718_v4, 5  ;;  %v2817_v48 = vrot.slane %v6724_v12, 5  ;;  %v585_v50 = vshrl.u32 %v6943_v14, 16 }
  0x80   : > { %5810 = vmatmul.mubr.msk.bf16.gmra.mrb[24].mxu1 %vm658_vm3, %v5040_v38  ;;  %v577_v47 = vor.u32 %v576_v60, %v572_v28  ;;  %5964 = vmatmul.mubr.msk.bf16.gmra.mrb[8].mxu0 %vm658_vm3, %v5324_v20  ;;  %v568_v51 = vrot.slane %v567_v44, 4  ;;  %v582_v15 = vrot.slane %v580_v34, 5  ;;  %v588_v62 = vshll.u32 %v6943_v14, 16 }
  0x81   : > { %v594_v40 = vshll.u32 %v6952_v42, 16  ;;  %v2815_v4 = vsel %vm6786_vm7, %v5308_v45, %v2814_v26  ;;  %v2816_v12 = vrot.slane %v2814_v26, 4  ;;  %v587_v63 = vrot.slane %v585_v50, 4 }
  0x82   : > { %v578_v57 = vrot.slane %v577_v47, 4  ;;  %v573_v58 = vsel %vm6560_vm4, %v568_v51, %v572_v28  ;;  %v590_v54 = vrot.slane %v588_v62, 5  ;;  %v598_v2 = vshrl.u32 %v6952_v42, 16  ;;  %v5295_v47 = vld [vmem:[%s6534_s25 + $0x78] sm:$0xe] }
  0x83   : > { %v596_v61 = vrot.slane %v594_v40, 5  ;;  %v2818_v41 = vsel %vm6786_vm7, %v2816_v12, %v2817_v48  ;;  %v604_v17 = vshll.u32 %v220_v49, 16  ;;  %v5309_v10 = vrot.slane %v5293_v55, 9  ;;  %v6414_v51 = vld [vmem:[%s6534_s25] sm:$0xf] }
  0x84   : > { %v583_v7 = vsel %vm6560_vm4, %v578_v57, %v582_v15  ;;  %v5325_v18 = vcombine.low %v2815_v4, %v2818_v41  ;;  %v591_v21 = vor.u32 %v590_v54, %v587_v63  ;;  %v600_v25 = vrot.slane %v598_v2, 4  ;;  %v6990_v15 = vld [vmem:[%s6534_s25 + $0x4] sm:$0xf]  ;;  %v6994_v40 = vld [vmem:[%s6534_s25 + $0x7c] sm:$0xf] }
  0x85   : > { %v5041_v23 = vcombine.low %v573_v58, %v583_v7  ;;  %v606_v31 = vrot.slane %v604_v17, 5  ;;  %v2821_v38 = vrot.slane %v6748_v59, 5  ;;  %v2824_v1 = vrot.slane %v6755_v9, 5  ;;  %v6997_v55 = vld [vmem:[%s6534_s25 + $0x80] sm:$0x1] }
  0x86   : > { %v5310_v28 = vrot.slane %v5294_v6, 9  ;;  %5967 = vmatprep.mubr.msk.bf16.mxu0 %vm658_vm3, %v5325_v18  ;;  %v592_v60 = vrot.slane %v591_v21, 4  ;;  %v601_v20 = vor.u32 %v600_v25, %v596_v61  ;;  %v2828_v44 = vrot.slane %v5230_v11, 5  ;;  %v5236_v57 = vld [vmem:[%s6534_s25 + $0x88] sm:$0xf] }
  0x87   : > { %5813 = vmatprep.mubr.msk.bf16.mxu1 %vm658_vm3, %v5041_v23  ;;  %v2831_v34 = vrot.slane %v5231_v8, 5  ;;  %v2822_v45 = vsel %vm6786_vm7, %v5309_v10, %v2821_v38  ;;  %v2823_v59 = vrot.slane %v2821_v38, 4  ;;  %v5059_v62 = vcombine.low %v6414_v51, %v6990_v15  ;;  %v5237_v54 = vld [vmem:[%s6534_s25 + $0x8c] sm:$0x1]  ;;  %v5239_v17 = vld [vmem:[%s6534_s25 + $0x94] sm:$0xf] }
  0x88   : > { %v597_v9 = vsel %vm6560_vm4, %v592_v60, %v596_v61  ;;  %v602_v26 = vrot.slane %v601_v20, 4  ;;  %v2829_v48 = vsel %vm6786_vm7, %v5310_v28, %v2828_v44  ;;  %v2830_v49 = vrot.slane %v2828_v44, 4  ;;  %v5296_v61 = vld [vmem:[%s6534_s25 + $0x84] sm:$0xe]  ;;  %v5297_v23 = vld [vmem:[%s6534_s25 + $0x90] sm:$0xe] }
  0x89   : > { %v2825_v50 = vsel %vm6786_vm7, %v2823_v59, %v2824_v1  ;;  %v5311_v58 = vrot.slane %v5295_v47, 9  ;;  %v2835_v7 = vrot.slane %v6994_v40, 5  ;;  %v2838_v41 = vrot.slane %v6997_v55, 5  ;;  %v5240_v25 = vld [vmem:[%s6534_s25 + $0x98] sm:$0x1] }
  0x8a   : > { %v607_v4 = vsel %vm6560_vm4, %v602_v26, %v606_v31  ;;  %v5326_v12 = vcombine.low %v2822_v45, %v2825_v50  ;;  %v2832_v63 = vsel %vm6786_vm7, %v2830_v49, %v2831_v34  ;;  %v5312_v10 = vrot.slane %v5296_v61, 9  ;;  %v5242_v31 = vld [vmem:[%s6534_s25 + $0xa0] sm:$0xf]  ;;  %v5243_v60 = vld [vmem:[%s6534_s25 + $0xa4] sm:$0x1] }
  0x8b   : > { %v5042_v2 = vcombine.low %v597_v9, %v607_v4  ;;  %v5327_v6 = vcombine.low %v2829_v48, %v2832_v63  ;;  %v2842_v11 = vrot.slane %v5236_v57, 5  ;;  %v2845_v8 = vrot.slane %v5237_v54, 5  ;;  %v5298_v20 = vld [vmem:[%s6534_s25 + $0x9c] sm:$0xe]  ;;  %v6416_v44 = vld [vmem:[%s6534_s25 + $0xc] sm:$0xf] }
  0x8c   : > { %5968 = vmatmul.mubr.msk.bf16.gmra.mrb[12].mxu0 %vm658_vm3, %v5326_v12  ;;  %v2836_v18 = vsel %vm6786_vm7, %v5311_v58, %v2835_v7  ;;  %v2837_v21 = vrot.slane %v2835_v7, 4  ;;  %v2849_v28 = vrot.slane %v5239_v17, 5  ;;  %v7024_v34 = vld [vmem:[%s6534_s25 + $0x10] sm:$0xf]  ;;  %v6418_v47 = vld [vmem:[%s6534_s25 + $0x18] sm:$0xf] }
  0x8d   : > { %5814 = vmatmul.mubr.msk.bf16.gmra.mrb[28].mxu1 %vm658_vm3, %v5042_v2  ;;  %5971 = vmatprep.mubr.msk.bf16.mxu0 %vm658_vm3, %v5327_v6  ;;  %v2843_v38 = vsel %vm6786_vm7, %v5312_v10, %v2842_v11  ;;  %v2844_v1 = vrot.slane %v2842_v11, 4  ;;  %v5060_v45 = vcombine.low %v6416_v44, %v7024_v34  ;;  %v7031_v9 = vld [vmem:[%s6534_s25 + $0x1c] sm:$0xf]  ;;  %v5313_v48 = vrot.slane %v5297_v23, 9  ;;  %v5245_v57 = vld [vmem:[%s6534_s25 + $0xac] sm:$0xf] }
  0x8e   : > { %5819 = vmatprep.mubr.msk.bf16.mxu1 %vm658_vm3, %v5059_v62  ;;  %v2839_v59 = vsel %vm6786_vm7, %v2837_v21, %v2838_v41  ;;  %v5061_v26 = vcombine.low %v6418_v47, %v7031_v9  ;;  %v2851_v51 = vrot.slane %v2849_v28, 4  ;;  %v2852_v62 = vrot.slane %v5240_v25, 5  ;;  %v6420_v54 = vld [vmem:[%s8339_s1 + $0x8] sm:$0xf]  ;;  %v5248_v2 = vld [vmem:[%s6534_s25 + $0xb8] sm:$0xf] }
  0x8f   : > { %v5328_v49 = vcombine.low %v2836_v18, %v2839_v59  ;;  %v2846_v50 = vsel %vm6786_vm7, %v2844_v1, %v2845_v8  ;;  %v5314_v12 = vrot.slane %v5298_v20, 9  ;;  %v2856_v63 = vrot.slane %v5242_v31, 5  ;;  %v7046_v7 = vld [vmem:[%s8339_s1 + $0xc] sm:$0xf]  ;;  %v5246_v10 = vld [vmem:[%s6534_s25 + $0xb0] sm:$0x1] }
  0x90   : > { %v5329_v4 = vcombine.low %v2843_v38, %v2846_v50  ;;  %v2859_v58 = vrot.slane %v5243_v60, 5  ;;  %v1426_v61 = vsel %vm707_vm0, %v6420_v54, 0  ;;  %v2850_v41 = vsel %vm6786_vm7, %v5313_v48, %v2849_v28  ;;  %v5299_v11 = vld [vmem:[%s6534_s25 + $0xa8] sm:$0xe]  ;;  %v5249_v25 = vld [vmem:[%s6534_s25 + $0xbc] sm:$0x1] }
  0x91   : > { %v2858_v6 = vrot.slane %v2856_v63, 4  ;;  %v2853_v17 = vsel %vm6786_vm7, %v2851_v51, %v2852_v62  ;;  %v2863_v8 = vrot.slane %v5245_v57, 5  ;;  %v2857_v23 = vsel %vm6786_vm7, %v5314_v12, %v2856_v63  ;;  %v5300_v31 = vld [vmem:[%s6534_s25 + $0xb4] sm:$0xe]  ;;  %v6421_v38 = vld [vmem:[%s6534_s25 + $0x24] sm:$0xf] }
  0x92   : > { %v2870_v21 = vrot.slane %v5248_v2, 5  ;;  %v7067_v1 = vld [vmem:[%s6534_s25 + $0x28] sm:$0xf]  ;;  %v5330_v60 = vcombine.low %v2850_v41, %v2853_v17  ;;  %v5315_v44 = vrot.slane %v5299_v11, 9  ;;  %v2866_v59 = vrot.slane %v5246_v10, 5 }
  0x93   : > { %v2860_v18 = vsel %vm6786_vm7, %v2858_v6, %v2859_v58  ;;  %v5062_v28 = vcombine.low %v6421_v38, %v7067_v1  ;;  %v6423_v47 = vld [vmem:[%s6534_s25 + $0x30] sm:$0xf]  ;;  %v2873_v51 = vrot.slane %v5249_v25, 5  ;;  %v5251_v62 = vld [vmem:[%s6534_s25 + $0xc4] sm:$0xf]  ;;  %v2258_v25 = vshrl.u32 %v6994_v40, 16 }
  0x94   : > { %5972 = vmatmul.mubr.msk.bf16.gmra.mrb[16].mxu0 %vm658_vm3, %v5328_v49  ;;  %v5331_v20 = vcombine.low %v2857_v23, %v2860_v18  ;;  %v5316_v49 = vrot.slane %v5300_v31, 9  ;;  %v2872_v50 = vrot.slane %v2870_v21, 4  ;;  %v2864_v57 = vsel %vm6786_vm7, %v5315_v44, %v2863_v8  ;;  %v5301_v12 = vld [vmem:[%s6534_s25 + $0xc0] sm:$0xe]  ;;  %v6425_v41 = vld [vmem:[%s6534_s25 + $0x3c] sm:$0xf] }
  0x95   : > { %5820 = vmatmul.mubr.msk.bf16.vlgmr.msra.gmra.mrb[0].mxu1 %vm658_vm3, %v5060_v45  ;;  %5975 = vmatprep.mubr.msk.bf16.mxu0 %vm658_vm3, %v5329_v4  ;;  %v2865_v45 = vrot.slane %v2863_v8, 4  ;;  %v2877_v63 = vrot.slane %v5251_v62, 5  ;;  %v5317_v6 = vrot.slane %v5301_v12, 9  ;;  %v7092_v17 = vld [vmem:[%s6534_s25 + $0x40] sm:$0xf]  ;;  %v5065_v18 = vcombine.low %v6699_v27, %v6702_v36  ;;  %v6377_v62 = vld [vmem:[%s6534_s25 + $0x24] sm:$0xff]  }
  0x96   : > { %5852 = vmatpush3.bf16.msra.mxu1 %v1426_v61  ;;  %5823 = vmatprep.mubr.msk.bf16.mxu1 %vm658_vm3, %v5061_v26  ;;  %v7072_v26 = vld [vmem:[%s6534_s25 + $0x34] sm:$0xf]  ;;  %v2871_v58 = vsel %vm6786_vm7, %v5316_v49, %v2870_v21  ;;  %v2874_v54 = vsel %vm6786_vm7, %v2872_v50, %v2873_v51  ;;  %v5252_v61 = vld [vmem:[%s6534_s25 + $0xc8] sm:$0x1]  ;;  %v5064_v10 = vcombine.low %v6425_v41, %v7092_v17  ;;  %v2254_v21 = vshll.u32 %v6994_v40, 16 }
  0x97   : > { %6350 = vmatprep.subr.msk.bf16.mxu1 %vm707_vm0, %v7046_v7  ;;  %v5063_v48 = vcombine.low %v6423_v47, %v7072_v26  ;;  %v2867_v4 = vsel %vm6786_vm7, %v2865_v45, %v2866_v59  ;;  %v5333_v11 = vcombine.low %v2871_v58, %v2874_v54  ;;  %v2879_v8 = vrot.slane %v2877_v63, 4  ;;  %v1164_v45 = vld [vmem:[%s6534_s25] sm:$0xe]  ;;  %v1165_v59 = vld [vmem:[%s6534_s25 + $0xc] sm:$0xe] }
  0x98   : > { %v5332_v2 = vcombine.low %v2864_v57, %v2867_v4  ;;  %v2880_v23 = vrot.slane %v5252_v61, 5  ;;  %v2878_v31 = vsel %vm6786_vm7, %v5317_v6, %v2877_v63  ;;  %v7107_v27 = vrot.slane %v2254_v21, 5  ;;  %v1168_v41 = vld [vmem:[%s6534_s25 + $0x30] sm:$0xe] }
  0x99   : > { %v2260_v36 = vrot.slane %v2258_v25, 4  ;;  %v5067_v44 = vcombine.low %v6759_v19, %v6765_v35  ;;  %v2264_v47 = vshll.u32 %v6997_v55, 16  ;;  %v5091_v19 = vrot.slane %v1164_v45, 9 }
  0x9a   : > { %v2881_v38 = vsel %vm6786_vm7, %v2879_v8, %v2880_v23  ;;  %8360 = vst [vmem:[#allocation3_spill] sm:$0xff] %v7107_v27  ;;  %v5092_v35 = vrot.slane %v1165_v59, 9  ;;  %v1231_v4 = vrot.slane %v7031_v9, 5  ;;  %v1238_v12 = vrot.slane %v7067_v1, 5  ;;  %v1169_v8 = vld [vmem:[%s6534_s25 + $0x3c] sm:$0xe] }
  0x9b   : > { %v5334_v40 = vcombine.low %v2878_v31, %v2881_v38  ;;  %v2261_v49 = vor.u32 %v2260_v36, %v7107_v27  ;;  %v7127_v51 = vrot.slane %v2264_v47, 5  ;;  %v5068_v58 = vcombine.low %v6780_v0, %v6793_v29  ;;  %v1170_v31 = vld [vmem:[%s6534_s25 + $0x48] sm:$0xe]  ;;  %v6431_v59 = vld [vmem:[%s6534_s25 + $0x38] sm:$0x1] }
  0x9c   : > { %5976 = vmatmul.mubr.msk.bf16.gmra.mrb[20].mxu0 %vm658_vm3, %v5330_v60  ;;  %v5066_v60 = vcombine.low %v6728_v24, %v6734_v37  ;;  %v6428_v24 = vld [vmem:[%s6534_s25 + $0x14] sm:$0x1]  ;;  %v4066_v54 = vsel %vm707_vm0, %v6851_v22, 0  ;;  %v5069_v61 = vcombine.low %v6812_v53, %v6819_v16  ;;  %v5070_v6 = vcombine.low %v6838_v39, %v6846_v43  ;;  %v6429_v16 = vld [vmem:[%s6534_s25 + $0x20] sm:$0x1] }
  0x9d   : > { %5824 = vmatmul.mubr.msk.bf16.gmra.mrb[4].mxu1 %vm658_vm3, %v5062_v28  ;;  %5979 = vmatprep.mubr.msk.bf16.mxu0 %vm658_vm3, %v5331_v20  ;;  %v1224_v28 = vrot.slane %v7024_v34, 5  ;;  %v6375_v20 = vld [vmem:[%s6534_s25 + $0x18] sm:$0xff]   ;;  %v6427_v34 = vld [vmem:[%s6534_s25 + $0x8] sm:$0x1]  ;;  %v1227_v37 = vrot.slane %v6428_v24, 5  ;;  %8361 = vst [vmem:[#allocation4_spill] sm:$0xff] %v7127_v51  ;;  %v5071_v9 = vcombine.low %v6870_v5, %v6882_v30 }
  0x9e   : > { %5827 = vmatprep.mubr.msk.bf16.mxu1 %vm658_vm3, %v5063_v48  ;;  %v1217_v48 = vrot.slane %v6990_v15, 5  ;;  %v1220_v50 = vrot.slane %v6427_v34, 5  ;;  %v1166_v15 = vld [vmem:[%s6534_s25 + $0x18] sm:$0xe]  ;;  %v7132_v63 = vrot.slane %v2261_v49, 4  ;;  %v1234_v22 = vrot.slane %v6429_v16, 5 }
  0x9f   : > { %v1226_v55 = vrot.slane %v1224_v28, 4  ;;  %v5093_v1 = vrot.slane %v1166_v15, 9  ;;  %v7154_v29 = vsel %vm6786_vm7, %v5092_v35, %v1224_v28  ;;  %v1240_v25 = vrot.slane %v1238_v12, 4  ;;  %v5416_v24 = vld [vmem:[%s6534_s25 + $0x18] sm:$0xf] }
  0xa0   : > { %v1219_v57 = vrot.slane %v1217_v48, 4  ;;  %8362 = vst [vmem:[#allocation5_spill] sm:$0xff] %v7132_v63  ;;  %v7150_v0 = vsel %vm6786_vm7, %v5091_v19, %v1217_v48  ;;  %v1248_v47 = vrot.slane %v6431_v59, 5  ;;  %v7191_v49 = vsel %vm707_vm0, %v7046_v7, 0  ;;  %v5417_v7 = vld [vmem:[%s6534_s25 + $0x1c] sm:$0xf] }
  0xa1   : > { %v7158_v53 = vsel %vm6786_vm7, %v1226_v55, %v1227_v37  ;;  %v7195_v34 = vsel %vm6786_vm7, %v5093_v1, %v1231_v4  ;;  %v6381_v37 = vld [vmem:[%s6534_s25 + $0x3c] sm:$0xff]   ;;  %v5096_v35 = vrot.slane %v1169_v8, 9  ;;  %v6432_v55 = vld [vmem:[%s6534_s25 + $0x44] sm:$0x1]  ;;  %v3587_v8 = vshll.u32 %v5416_v24, 16 }
  0xa2   : > { %v7169_v23 = vsel %vm6786_vm7, %v1219_v57, %v1220_v50  ;;  %v1171_v50 = vld [vmem:[%s6534_s25 + $0x54] sm:$0xe]  ;;  %v1255_v15 = vrot.slane %v6432_v55, 5  ;;  %v5420_v39 = vld [vmem:[%s6534_s25 + $0x28] sm:$0xf] }
  0xa3   : > { %v6439_v5 = vld [vmem:[%s6534_s25 + $0x70] sm:$0xf] }
  0xa4   : > { %5980 = vmatmul.mubr.msk.bf16.gmra.mrb[24].mxu0 %vm658_vm3, %v5332_v2  ;;  %v1167_v2 = vld [vmem:[%s6534_s25 + $0x24] sm:$0xe]  ;;  %v1280_v30 = vrot.slane %v6439_v5, 5 }
  0xa5   : > { %5828 = vmatmul.mubr.msk.bf16.gmra.mrb[8].mxu1 %vm658_vm3, %v5064_v10  ;;  %5983 = vmatprep.mubr.msk.bf16.mxu0 %vm658_vm3, %v5333_v11  ;;  %v1245_v10 = vrot.slane %v7072_v26, 5  ;;  %v6379_v11 = vld [vmem:[%s6534_s25 + $0x30] sm:$0xff]   ;;  %v7165_v26 = vld [vmem:[%s8339_s1 + $0x20] sm:$0xf]  ;;  %v5094_v21 = vrot.slane %v1167_v2, 9 }
  0xa6   : > { %5831 = vmatprep.mubr.msk.bf16.mxu1 %vm658_vm3, %v5065_v18  ;;  %v1233_v18 = vrot.slane %v1231_v4, 4  ;;  %v1282_v48 = vrot.slane %v1280_v30, 4 }
  0xa7   : > { %v1247_v45 = vrot.slane %v1245_v10, 4  ;;  %v7202_v19 = vsel %vm6786_vm7, %v5094_v21, %v1238_v12  ;;  %v3597_v21 = vshrl.u32 %v5417_v7, 16 }
  0xa8   : > { %v7211_v4 = vsel %vm6786_vm7, %v1233_v18, %v1234_v22  ;;  %v3584_v22 = vshrl.u32 %v5416_v24, 16  ;;  %v3593_v18 = vshll.u32 %v5417_v7, 16  ;;  %v5419_v24 = vld [vmem:[%s6534_s25 + $0x24] sm:$0xf] }
  0xa9   : > { %v7224_v1 = vsel %vm6786_vm7, %v1247_v45, %v1248_v47 }
  0xaa   : > { %v3586_v43 = vrot.slane %v3584_v22, 4  ;;  %v7266_v7 = vrot.slane %v3593_v18, 5  ;;  %v3611_v22 = vshll.u32 %v5419_v24, 16  ;;  %v3621_v18 = vshrl.u32 %v5420_v39, 16 }
  0xac   : > { %5984 = vmatmul.mubr.msk.bf16.gmra.mrb[28].mxu0 %vm658_vm3, %v5334_v40  ;;  %v6430_v40 = vld [vmem:[%s6534_s25 + $0x2c] sm:$0x1]  ;;  %v3613_v27 = vrot.slane %v3611_v22, 5 }
  0xad   : > { %5832 = vmatmul.mubr.msk.bf16.gmra.mrb[12].mxu1 %vm658_vm3, %v5066_v60  ;;  %5989 = vmatprep.mubr.msk.bf16.mxu0 %vm658_vm3, %v6375_v20  ;;  %v1241_v28 = vrot.slane %v6430_v40, 5  ;;  %v1252_v60 = vrot.slane %v7092_v17, 5  ;;  %v6435_v40 = vld [vmem:[%s6534_s25 + $0x50] sm:$0x1]  ;;  %v6440_v17 = vld [vmem:[%s6534_s25 + $0x74] sm:$0x1] }
  0xae   : > { %5835 = vmatprep.mubr.msk.bf16.mxu1 %vm658_vm3, %v5067_v44  ;;  %v5095_v44 = vrot.slane %v1168_v41, 9  ;;  %v5098_v41 = vrot.slane %v1171_v50, 9  ;;  %v1172_v50 = vld [vmem:[%s6534_s25 + $0x60] sm:$0xe]  ;;  %v5421_v20 = vld [vmem:[%s6534_s25 + $0x2c] sm:$0x1] }
  0xaf   : > { %v1254_v12 = vrot.slane %v1252_v60, 4  ;;  %v7237_v45 = vsel %vm6786_vm7, %v5096_v35, %v1252_v60  ;;  %v6436_v35 = vld [vmem:[%s6534_s25 + $0x5c] sm:$0x1] }
  0xb0   : > { %v7220_v2 = vsel %vm6786_vm7, %v5095_v44, %v1245_v10  ;;  %v1269_v55 = vrot.slane %v6436_v35, 5  ;;  %v1173_v35 = vld [vmem:[%s6534_s25 + $0x6c] sm:$0xe] }
  0xb1   : > { %v7241_v59 = vsel %vm6786_vm7, %v1254_v12, %v1255_v15  ;;  %v6437_v15 = vld [vmem:[%s6534_s25 + $0x64] sm:$0xf]  ;;  %v3599_v12 = vrot.slane %v3597_v21, 4  ;;  %v5100_v5 = vrot.slane %v1173_v35, 9 }
  0xb2   : > { %v6387_v21 = vld [vmem:[%s6534_s25 + $0x60] sm:$0xff]  }
  0xb4   : > { %5990 = vmatmul.mubr.msk.bf16.vlgmr.msra.gmra.mrb[0].mxu0 %vm658_vm3, %v6377_v62  ;;  %v6433_v62 = vld [vmem:[%s6534_s25 + $0x4c] sm:$0xf] }
  0xb5   : > { %5836 = vmatmul.mubr.msk.bf16.gmra.mrb[16].mxu1 %vm658_vm3, %v5068_v58  ;;  %6022 = vmatpush3.bf16.msra.mxu0 %v4066_v54  ;;  %v1259_v57 = vrot.slane %v6433_v62, 5  ;;  %v7215_v58 = vsel %vm6786_vm7, %v1240_v25, %v1241_v28  ;;  %v5097_v54 = vrot.slane %v1170_v31, 9  ;;  %v1262_v28 = vrot.slane %v6435_v40, 5 }
  0xb6   : > { %5839 = vmatprep.mubr.msk.bf16.mxu1 %vm658_vm3, %v5069_v61  ;;  %5993 = vmatprep.mubr.msk.bf16.mxu0 %vm658_vm3, %v6379_v11  ;;  %v6383_v61 = vld [vmem:[%s6534_s25 + $0x48] sm:$0xff]   ;;  %v6434_v11 = vld [vmem:[%s6534_s25 + $0x58] sm:$0xf]  ;;  %v1273_v62 = vrot.slane %v6437_v15, 5  ;;  %v5423_v15 = vld [vmem:[%s6534_s25 + $0x34] sm:$0xf] }
  0xb7   : > { %6356 = vmatprep.subr.msk.bf16.mxu0 %vm707_vm0, %v7165_v26  ;;  %v1266_v16 = vrot.slane %v6434_v11, 5  ;;  %v1261_v31 = vrot.slane %v1259_v57, 4  ;;  %v7245_v47 = vsel %vm6786_vm7, %v5097_v54, %v1259_v57  ;;  %v5418_v57 = vld [vmem:[%s6534_s25 + $0x20] sm:$0x1]  ;;  %v5422_v54 = vld [vmem:[%s6534_s25 + $0x30] sm:$0xf] }
  0xb8   : > { %v5099_v11 = vrot.slane %v1172_v50, 9  ;;  %v3635_v50 = vshll.u32 %v5422_v54, 16  ;;  %v3603_v25 = vshll.u32 %v5418_v57, 16  ;;  %v3641_v36 = vshll.u32 %v5423_v15, 16 }
  0xb9   : > { %v7256_v60 = vsel %vm6786_vm7, %v5098_v41, %v1266_v16  ;;  %v7272_v41 = vsel %vm6786_vm7, %v1261_v31, %v1262_v28  ;;  %v1275_v31 = vrot.slane %v1273_v62, 4  ;;  %v3632_v28 = vshrl.u32 %v5422_v54, 16 }
  0xba   : > { %v7314_v35 = vrot.slane %v3641_v36, 5 }
  0xbc   : > { %5994 = vmatmul.mubr.msk.bf16.gmra.mrb[4].mxu0 %vm658_vm3, %v6381_v37  ;;  %v1268_v37 = vrot.slane %v1266_v16, 4  ;;  %v6438_v16 = vld [vmem:[%s6534_s25 + $0x68] sm:$0x1] }
  0xbd   : > { %5840 = vmatmul.mubr.msk.bf16.gmra.mrb[20].mxu1 %vm658_vm3, %v5070_v6  ;;  %5997 = vmatprep.mubr.msk.bf16.mxu0 %vm658_vm3, %v6383_v61  ;;  %v3589_v6 = vrot.slane %v3587_v8, 5  ;;  %v6385_v61 = vld [vmem:[%s6534_s25 + $0x54] sm:$0xff]   ;;  %v1276_v40 = vrot.slane %v6438_v16, 5  ;;  %v3617_v8 = vshll.u32 %v5420_v39, 16  ;;  %v3600_v16 = vor.u32 %v3599_v12, %v7266_v7 }
  0xbe   : > { %5843 = vmatprep.mubr.msk.bf16.mxu1 %vm658_vm3, %v5071_v9  ;;  %v3608_v9 = vshrl.u32 %v5419_v24, 16  ;;  %v7281_v44 = vsel %vm6786_vm7, %v1268_v37, %v1269_v55  ;;  %v1283_v24 = vrot.slane %v6440_v17, 5  ;;  %v3645_v39 = vshrl.u32 %v5423_v15, 16 }
  0xbf   : > { %v3590_v10 = vor.u32 %v3589_v6, %v3586_v43  ;;  %v7287_v37 = vrot.slane %v3617_v8, 5  ;;  %v3623_v55 = vrot.slane %v3621_v18, 4  ;;  %v8363_v43 = vcombine.low %v6891_v52, %v6902_v46  ;;  %v6441_v8 = vld [vmem:[%s6534_s25 + $0x7c] sm:$0xf]  ;;  %v7323_v18 = vld [vmem:[%s6534_s25 + $0x38] sm:$0x1] }
  0xc0   : > { %v3610_v38 = vrot.slane %v3608_v9, 4  ;;  %v7296_v17 = vsel %vm6786_vm7, %v5099_v11, %v1273_v62  ;;  %v7300_v57 = vsel %vm6786_vm7, %v1275_v31, %v1276_v40  ;;  %v3634_v6 = vrot.slane %v3632_v28, 4  ;;  %8365 = vst [vmem:[#allocation6_spill] sm:$0xff] %v7323_v18 }
  0xc1   : > { %v3637_v12 = vrot.slane %v3635_v50, 5  ;;  %v8364_v52 = vcombine.low %v6923_v33, %v6928_v56  ;;  %v3591_v46 = vrot.slane %v3590_v10, 4  ;;  %v3601_v54 = vrot.slane %v3600_v16, 4  ;;  %v6389_v33 = vld [vmem:[%s6534_s25 + $0x6c] sm:$0xff]   ;;  %v1175_v16 = vld [vmem:[%s6534_s25 + $0x84] sm:$0xe] }
  0xc2   : > { %v3627_v62 = vshll.u32 %v5421_v20, 16  ;;  %v7308_v11 = vsel %vm6786_vm7, %v5100_v5, %v1280_v30  ;;  %v7312_v40 = vsel %vm6786_vm7, %v1282_v48, %v1283_v24  ;;  %v3647_v9 = vrot.slane %v3645_v39, 4  ;;  %v6390_v48 = vld [vmem:[%s6534_s25 + $0x78] sm:$0xff]  }
  0xc3   : > { %v3614_v10 = vor.u32 %v3613_v27, %v3610_v38  ;;  %v3624_v20 = vor.u32 %v3623_v55, %v7287_v37  ;;  %v1287_v30 = vrot.slane %v6441_v8, 5  ;;  %v3638_v38 = vor.u32 %v3637_v12, %v3634_v6  ;;  %v5425_v5 = vld [vmem:[%s6534_s25 + $0x3c] sm:$0xf] }
  0xc4   : > { %5998 = vmatmul.mubr.msk.bf16.gmra.mrb[8].mxu0 %vm658_vm3, %v6385_v61  ;;  %v3605_v61 = vrot.slane %v3603_v25, 5  ;;  %v1174_v25 = vld [vmem:[%s6534_s25 + $0x78] sm:$0xe]  ;;  %v7339_v50 = vrot.slane %v3627_v62, 5  ;;  %v3648_v39 = vor.u32 %v3647_v9, %v7314_v35  ;;  %v3651_v55 = vshll.u32 %v7323_v18, 16 }
  0xc5   : > { %5844 = vmatmul.mubr.msk.bf16.gmra.mrb[24].mxu1 %vm658_vm3, %v8363_v43  ;;  %6001 = vmatprep.mubr.msk.bf16.mxu0 %vm658_vm3, %v6387_v21  ;;  %v3596_v21 = vsel %vm6560_vm4, %v3591_v46, %v7266_v7  ;;  %v5101_v24 = vrot.slane %v1174_v25, 9  ;;  %v6442_v43 = vld [vmem:[%s6534_s25 + $0x88] sm:$0xf]  ;;  %v7347_v7 = vld [vmem:[%s6534_s25 + $0x40] sm:$0xf]  ;;  %v3615_v12 = vrot.slane %v3614_v10, 4  ;;  %v8367_v62 = vcombine.low %v6943_v14, %v6952_v42 }
  0xc6   : > { %5847 = vmatprep.mubr.msk.bf16.mxu1 %vm658_vm3, %v8364_v52  ;;  %v3606_v31 = vsel %vm6560_vm4, %v3601_v54, %v3605_v61  ;;  %v1294_v6 = vrot.slane %v6442_v43, 5  ;;  %8366 = vst [vmem:[#allocation7_spill] sm:$0xff] %v7347_v7  ;;  %v3625_v52 = vrot.slane %v3624_v20, 4  ;;  %v1289_v46 = vrot.slane %v1287_v30, 4  ;;  %v6443_v54 = vld [vmem:[%s6534_s25 + $0x80] sm:$0x1] }
  0xc7   : > { %v1290_v61 = vrot.slane %v6443_v54, 5  ;;  %v3639_v9 = vrot.slane %v3638_v38, 4  ;;  %v5102_v25 = vrot.slane %v1175_v16, 9  ;;  %v3656_v8 = vshrl.u32 %v5425_v5, 16  ;;  %v6391_v10 = vld [vmem:[%s6534_s25 + $0x84] sm:$0xff]  }
  0xc8   : > { %v3659_v43 = vshll.u32 %v5425_v5, 16  ;;  %v7361_v20 = vcombine.low %v3596_v21, %v3606_v31  ;;  %v7365_v14 = vsel %vm707_vm0, %v7165_v26, 0  ;;  %v3669_v38 = vshrl.u32 %v7347_v7, 16  ;;  %v6392_v21 = vld [vmem:[%s6534_s25 + $0x90] sm:$0xff]   ;;  %v6448_v18 = vld [vmem:[%s6534_s25 + $0xa0] sm:$0xf] }
  0xc9   : > { %v3649_v16 = vrot.slane %v3648_v39, 4  ;;  %v3653_v5 = vrot.slane %v3651_v55, 5  ;;  %v1296_v54 = vrot.slane %v1294_v6, 4  ;;  %v3620_v31 = vsel %vm6560_vm4, %v3615_v12, %v7287_v37 }
  0xca   : > { %v3630_v26 = vsel %vm6560_vm4, %v3625_v52, %v7339_v50  ;;  %v7380_v39 = vsel %vm6786_vm7, %v5101_v24, %v1287_v30  ;;  %v7384_v55 = vsel %vm6786_vm7, %v1289_v46, %v1290_v61  ;;  %v3644_v37 = vsel %vm6560_vm4, %v3639_v9, %v7314_v35  ;;  %v5431_v30 = vld [vmem:[%s6534_s25 + $0x54] sm:$0xf]  ;;  %v7401_v24 = vld [vmem:[%s6534_s25 + $0x58] sm:$0xf]  ;;  %v7406_v61 = vld [vmem:[%s6534_s25 + $0x90] sm:$0xe] }
  0xcb   : > { %v7397_v12 = vsel %vm6786_vm7, %v5102_v25, %v1294_v6  ;;  %v3658_v50 = vrot.slane %v3656_v8, 4  ;;  %v3661_v52 = vrot.slane %v3659_v43, 5  ;;  %v3671_v46 = vrot.slane %v3669_v38, 4 }
  0xcc   : > { %6002 = vmatmul.mubr.msk.bf16.gmra.mrb[12].mxu0 %vm658_vm3, %v6389_v33  ;;  %v8368_v33 = vcombine.low %v7150_v0, %v7169_v23  ;;  %v6444_v0 = vld [vmem:[%s6534_s25 + $0x8c] sm:$0x1]  ;;  %v3654_v36 = vsel %vm6560_vm4, %v3649_v16, %v3653_v5  ;;  %v3704_v25 = vshrl.u32 %v5431_v30, 16  ;;  %v3707_v8 = vshll.u32 %v5431_v30, 16 }
  0xcd   : > { %5848 = vmatmul.mubr.msk.bf16.gmra.mrb[28].mxu1 %vm658_vm3, %v8367_v62  ;;  %6005 = vmatprep.mubr.msk.bf16.mxu0 %vm658_vm3, %v6390_v48  ;;  %v3665_v48 = vshll.u32 %v7347_v7, 16  ;;  %v1297_v23 = vrot.slane %v6444_v0, 5  ;;  %v5428_v62 = vld [vmem:[%s6534_s25 + $0x48] sm:$0xf]  ;;  %v7390_v0 = vld [vmem:[%s6534_s25 + $0x4c] sm:$0xf]  ;;  %v8370_v38 = vcombine.low %v7154_v29, %v7158_v53  ;;  %v7424_v16 = vcombine.low %v3620_v31, %v3630_v26 }
  0xce   : > { %5853 = vmatprep.mubr.msk.bf16.mxu1 %vm658_vm3, %v8368_v33  ;;  %v7387_v33 = vld [vmem:[%s6534_s25 + $0x44] sm:$0x1]  ;;  %v3680_v27 = vshrl.u32 %v5428_v62, 16  ;;  %v3683_v15 = vshll.u32 %v5428_v62, 16  ;;  %v3689_v6 = vshll.u32 %v7390_v0, 16  ;;  %v3693_v9 = vshrl.u32 %v7390_v0, 16 }
  0xcf   : > { %8369 = vst [vmem:[#allocation8_spill] sm:$0xff] %v7387_v33  ;;  %v7403_v28 = vrot.slane %v3665_v48, 5  ;;  %v7412_v35 = vsel %vm6786_vm7, %v1296_v54, %v1297_v23  ;;  %v3713_v43 = vshll.u32 %v7401_v24, 16  ;;  %v3717_v48 = vshrl.u32 %v7401_v24, 16  ;;  %v5434_v31 = vld [vmem:[%s6534_s25 + $0x60] sm:$0xf] }
  0xd0   : > { %v3675_v5 = vshll.u32 %v7387_v33, 16  ;;  %v5103_v54 = vrot.slane %v7406_v61, 9  ;;  %v8371_v23 = vcombine.low %v7195_v34, %v7211_v4  ;;  %v7435_v29 = vcombine.low %v3644_v37, %v3654_v36  ;;  %v6393_v26 = vld [vmem:[%s6534_s25 + $0x9c] sm:$0xff]   ;;  %v6394_v30 = vld [vmem:[%s6534_s25 + $0xa8] sm:$0xff]   ;;  %v6445_v36 = vld [vmem:[%s8339_s1 + $0x10] sm:$0xf] }
  0xd1   : > { %v3662_v53 = vor.u32 %v3661_v52, %v3658_v50  ;;  %v3682_v62 = vrot.slane %v3680_v27, 4  ;;  %v7446_v34 = vrot.slane %v3689_v6, 5  ;;  %v3695_v4 = vrot.slane %v3693_v9, 4  ;;  %v6446_v6 = vld [vmem:[%s6534_s25 + $0x94] sm:$0xf] }
  0xd2   : > { %v3706_v27 = vrot.slane %v3704_v25, 4  ;;  %v3709_v37 = vrot.slane %v3707_v8, 5  ;;  %v7455_v50 = vrot.slane %v3713_v43, 5  ;;  %v3719_v52 = vrot.slane %v3717_v48, 4  ;;  %v7461_v9 = vld [vmem:[%s6534_s25 + $0x64] sm:$0xf] }
  0xd3   : > { %8372 = vst [vmem:[#allocation9_spill] sm:$0xff] %v7461_v9  ;;  %v3728_v61 = vshrl.u32 %v5434_v31, 16  ;;  %v7463_v22 = vrot.slane %v3662_v53, 4  ;;  %v1308_v25 = vrot.slane %v6448_v18, 5  ;;  %v3696_v43 = vor.u32 %v3695_v4, %v7446_v34 }
  0xd4   : > { %6006 = vmatmul.mubr.msk.bf16.gmra.mrb[16].mxu0 %vm658_vm3, %v6391_v10  ;;  %v3731_v10 = vshll.u32 %v5434_v31, 16  ;;  %v3710_v31 = vor.u32 %v3709_v37, %v3706_v27  ;;  %v3720_v53 = vor.u32 %v3719_v52, %v7455_v50  ;;  %v8373_v18 = vcombine.low %v7202_v19, %v7215_v58  ;;  %v6395_v37 = vld [vmem:[%s6534_s25 + $0xb4] sm:$0xff]  }
  0xd5   : > { %5854 = vmatmul.mubr.msk.bf16.vlgmr.msra.gmra.mrb[0].mxu1 %vm658_vm3, %v8370_v38  ;;  %6009 = vmatprep.mubr.msk.bf16.mxu0 %vm658_vm3, %v6392_v21  ;;  %v3685_v21 = vrot.slane %v3683_v15, 5  ;;  %v7444_v38 = vld [vmem:[%s6534_s25 + $0x50] sm:$0x1]  ;;  %v7453_v15 = vld [vmem:[%s6534_s25 + $0x5c] sm:$0x1]  ;;  %v8374_v27 = vcombine.low %v7220_v2, %v7224_v1  ;;  %v1310_v52 = vrot.slane %v1308_v25, 4 }
  0xd6   : > { %5886 = vmatpush3.bf16.msra.mxu1 %v7191_v49  ;;  %5857 = vmatprep.mubr.msk.bf16.mxu1 %vm658_vm3, %v8371_v23  ;;  %v3672_v49 = vor.u32 %v3671_v46, %v7403_v28  ;;  %v7457_v46 = vrot.slane %v3675_v5, 5  ;;  %v1301_v23 = vrot.slane %v6446_v6, 5  ;;  %v3699_v48 = vshll.u32 %v7444_v38, 16  ;;  %v1177_v5 = vld [vmem:[%s6534_s25 + $0x9c] sm:$0xe] }
  0xd7   : > { %6352 = vmatprep.subr.msk.bf16.mxu1 %vm707_vm0, %v6445_v36  ;;  %v6447_v36 = vld [vmem:[%s6534_s25 + $0x98] sm:$0x1]  ;;  %v3686_v7 = vor.u32 %v3685_v21, %v3682_v62  ;;  %v3723_v6 = vshll.u32 %v7453_v15, 16  ;;  %v3741_v62 = vshrl.u32 %v7461_v9, 16  ;;  %v3733_v4 = vrot.slane %v3731_v10, 5 }
  0xd8   : > { %v1304_v33 = vrot.slane %v6447_v36, 5  ;;  %v3673_v8 = vrot.slane %v3672_v49, 4  ;;  %v3737_v36 = vshll.u32 %v7461_v9, 16  ;;  %v7482_v21 = vsel %vm6786_vm7, %v5103_v54, %v1301_v23  ;;  %v7493_v2 = vld [vmem:[%s6534_s25 + $0x68] sm:$0x1] }
  0xd9   : > { %v3730_v49 = vrot.slane %v3728_v61, 4  ;;  %v3687_v19 = vrot.slane %v3686_v7, 4  ;;  %v5104_v58 = vrot.slane %v1177_v5, 9  ;;  %v3697_v3 = vrot.slane %v3696_v43, 4  ;;  %8375 = vst [vmem:[#allocation10_spill] sm:$0xff] %v7493_v2  ;;  %v6396_v5 = vld [vmem:[%s6534_s25 + $0xc0] sm:$0xff]  }
  0xda   : > { %v3701_v54 = vrot.slane %v3699_v48, 5  ;;  %v3725_v63 = vrot.slane %v3723_v6, 5  ;;  %v1315_v61 = vrot.slane %v6928_v56, 5  ;;  %v3711_v10 = vrot.slane %v3710_v31, 4  ;;  %v1179_v31 = vld [vmem:[%s6534_s25 + $0xb4] sm:$0xe] }
  0xdb   : > { %v3721_v51 = vrot.slane %v3720_v53, 4  ;;  %v7495_v1 = vrot.slane %v3737_v36, 5  ;;  %v3743_v7 = vrot.slane %v3741_v62, 4  ;;  %v3668_v43 = vsel %vm6560_vm4, %v7463_v22, %v7403_v28  ;;  %v6450_v62 = vld [vmem:[%s6534_s25 + $0xb0] sm:$0x1] }
  0xdc   : > { %6010 = vmatmul.mubr.msk.bf16.gmra.mrb[20].mxu0 %vm658_vm3, %v6393_v26  ;;  %v1303_v26 = vrot.slane %v1301_v23, 4  ;;  %v1178_v23 = vld [vmem:[%s6534_s25 + $0xa8] sm:$0xe]  ;;  %v3678_v48 = vsel %vm6560_vm4, %v3673_v8, %v7457_v46  ;;  %v3734_v6 = vor.u32 %v3733_v4, %v3730_v49  ;;  %v3692_v53 = vsel %vm6560_vm4, %v3687_v19, %v7446_v34  ;;  %v5437_v46 = vld [vmem:[%s6534_s25 + $0x6c] sm:$0xf] }
  0xdd   : > { %5858 = vmatmul.mubr.msk.bf16.gmra.mrb[4].mxu1 %vm658_vm3, %v8373_v18  ;;  %6013 = vmatprep.mubr.msk.bf16.mxu0 %vm658_vm3, %v6394_v30  ;;  %v6449_v18 = vld [vmem:[%s6534_s25 + $0xa4] sm:$0x1]  ;;  %v7515_v36 = vsel %vm6786_vm7, %v5104_v58, %v1308_v25  ;;  %v5105_v28 = vrot.slane %v1178_v23, 9  ;;  %v1317_v8 = vrot.slane %v1315_v61, 4  ;;  %v3747_v49 = vshll.u32 %v7493_v2, 16 }
  0xde   : > { %5861 = vmatprep.mubr.msk.bf16.mxu1 %vm658_vm3, %v8374_v27  ;;  %v1311_v30 = vrot.slane %v6449_v18, 5  ;;  %v7507_v56 = vsel %vm6786_vm7, %v1303_v26, %v1304_v33  ;;  %v3702_v33 = vsel %vm6560_vm4, %v3697_v3, %v3701_v54  ;;  %v1318_v26 = vrot.slane %v6450_v62, 5  ;;  %v5440_v18 = vld [vmem:[%s6534_s25 + $0x78] sm:$0xf]  ;;  %v7570_v54 = vld [vmem:[%s6534_s25 + $0xbc] sm:$0x1] }
  0xdf   : > { %v3716_v34 = vsel %vm6560_vm4, %v3711_v10, %v7455_v50  ;;  %v3726_v25 = vsel %vm6560_vm4, %v3721_v51, %v3725_v63  ;;  %v3744_v4 = vor.u32 %v3743_v7, %v7495_v1  ;;  %v5106_v27 = vrot.slane %v1179_v31, 9  ;;  %v7544_v51 = vld [vmem:[%s6534_s25 + $0x70] sm:$0xf]  ;;  %v7574_v10 = vld [vmem:[%s6534_s25 + $0x7c] sm:$0xf] }
  0xe0   : > { %v7519_v22 = vsel %vm6786_vm7, %v1310_v52, %v1311_v30  ;;  %v8377_v3 = vcombine.low %v7237_v45, %v7241_v59  ;;  %v7540_v19 = vrot.slane %v3734_v6, 4  ;;  %v1322_v50 = vrot.slane %v6952_v42, 5  ;;  %8378 = vst [vmem:[#allocation12_spill] sm:$0xff] %v7544_v51  ;;  %8380 = vst [vmem:[#allocation13_spill] sm:$0xff] %v7574_v10  ;;  %v5443_v7 = vld [vmem:[%s6534_s25 + $0x84] sm:$0xf] }
  0xe1   : > { %8376 = vst [vmem:[#allocation11_spill] sm:$0xff] %v7519_v22  ;;  %v3752_v63 = vshrl.u32 %v5437_v46, 16  ;;  %v8379_v45 = vcombine.low %v7245_v47, %v7272_v41  ;;  %v7552_v58 = vcombine.low %v3692_v53, %v3702_v33  ;;  %v7558_v42 = vsel %vm6786_vm7, %v5105_v28, %v1315_v61  ;;  %v6397_v61 = vld [vmem:[%s6534_s25 + $0xcc] sm:$0xff]   ;;  %v7586_v31 = vld [vmem:[%s6534_s25 + $0x88] sm:$0xf] }
  0xe2   : > { %v7561_v30 = vcombine.low %v3716_v34, %v3726_v25  ;;  %v7565_v47 = vsel %vm6786_vm7, %v1317_v8, %v1318_v26  ;;  %v7567_v41 = vrot.slane %v3747_v49, 5  ;;  %v3761_v6 = vshll.u32 %v7544_v51, 16  ;;  %8381 = vst [vmem:[#allocation14_spill] sm:$0xff] %v7586_v31  ;;  %v5446_v62 = vld [vmem:[%s6534_s25 + $0x90] sm:$0xf] }
  0xe3   : > { %v7592_v28 = vrot.slane %v1322_v50, 4  ;;  %v7594_v33 = vrot.slane %v3752_v63, 4  ;;  %v3765_v8 = vshrl.u32 %v7544_v51, 16  ;;  %v3776_v26 = vshrl.u32 %v5440_v18, 16  ;;  %v7601_v25 = vld [vmem:[%s6534_s25 + $0x94] sm:$0xf] }
  0xe4   : > { %6014 = vmatmul.mubr.msk.bf16.gmra.mrb[24].mxu0 %vm658_vm3, %v6395_v37  ;;  %v7538_v37 = vcombine.low %v3668_v43, %v3678_v48  ;;  %v7582_v43 = vsel %vm6786_vm7, %v5106_v27, %v1322_v50  ;;  %v3755_v48 = vshll.u32 %v5437_v46, 16  ;;  %v3779_v49 = vshll.u32 %v5440_v18, 16  ;;  %8382 = vst [vmem:[#allocation15_spill] sm:$0xff] %v7601_v25  ;;  %v7639_v2 = vld [vmem:[%s6534_s25 + $0x8c] sm:$0x1] }
  0xe5   : > { %5862 = vmatmul.mubr.msk.bf16.gmra.mrb[8].mxu1 %vm658_vm3, %v8377_v3  ;;  %6017 = vmatprep.mubr.msk.bf16.mxu0 %vm658_vm3, %v6396_v5  ;;  %v7578_v5 = vrot.slane %v3744_v4, 4  ;;  %v3785_v46 = vshll.u32 %v7574_v10, 16  ;;  %v3789_v34 = vshrl.u32 %v7574_v10, 16  ;;  %v3800_v4 = vshrl.u32 %v5443_v7, 16 }
  0xe6   : > { %5865 = vmatprep.mubr.msk.bf16.mxu1 %vm658_vm3, %v8379_v45  ;;  %v3803_v27 = vshll.u32 %v5443_v7, 16  ;;  %v3809_v3 = vshll.u32 %v7586_v31, 16  ;;  %v3813_v50 = vshrl.u32 %v7586_v31, 16  ;;  %v7611_v45 = vld [vmem:[%s6534_s25 + $0x74] sm:$0x1]  ;;  %v3757_v18 = vrot.slane %v3755_v48, 5 }
  0xe7   : > { %v3824_v52 = vshrl.u32 %v5446_v62, 16  ;;  %v3827_v53 = vshll.u32 %v5446_v62, 16  ;;  %v8383_v7 = vcombine.low %v7256_v60, %v7281_v44  ;;  %v3767_v59 = vrot.slane %v3765_v8, 4  ;;  %v5449_v48 = vld [vmem:[%s6534_s25 + $0x9c] sm:$0xf] }
  0xe8   : > { %v3833_v63 = vshll.u32 %v7601_v25, 16  ;;  %v3837_v23 = vshrl.u32 %v7601_v25, 16  ;;  %v8384_v62 = vcombine.low %v7296_v17, %v7300_v57  ;;  %v7629_v44 = vld [vmem:[%s6534_s25 + $0x80] sm:$0x1]  ;;  %v3778_v60 = vrot.slane %v3776_v26, 4 }
  0xe9   : > { %8385 = vst [vmem:[#allocation16_spill] sm:$0xff] %v7629_v44  ;;  %v3802_v31 = vrot.slane %v3800_v4, 4  ;;  %v3805_v8 = vrot.slane %v3803_v27, 5  ;;  %v7633_v10 = vrot.slane %v3809_v3, 5  ;;  %v3815_v51 = vrot.slane %v3813_v50, 4 }
  0xea   : > { %v7636_v25 = vld [vmem:[%s6534_s25 + $0xa0] sm:$0xf]  ;;  %v3826_v17 = vrot.slane %v3824_v52, 4  ;;  %v3829_v57 = vrot.slane %v3827_v53, 5  ;;  %v3851_v9 = vshll.u32 %v5449_v48, 16  ;;  %v3758_v26 = vor.u32 %v3757_v18, %v7594_v33 }
  0xeb   : > { %v3795_v27 = vshll.u32 %v7629_v44, 16  ;;  %v7648_v3 = vld [vmem:[%s6534_s25 + $0x98] sm:$0x1]  ;;  %v3857_v50 = vshll.u32 %v7636_v25, 16  ;;  %v3861_v52 = vshrl.u32 %v7636_v25, 16  ;;  %v3806_v22 = vor.u32 %v3805_v8, %v3802_v31 }
  0xec   : > { %6018 = vmatmul.mubr.msk.bf16.gmra.mrb[28].mxu0 %vm658_vm3, %v6397_v61  ;;  %v7619_v61 = vrot.slane %v3761_v6, 5  ;;  %v3791_v6 = vrot.slane %v3789_v34, 4  ;;  %v3839_v34 = vrot.slane %v3837_v23, 4  ;;  %v3819_v33 = vshll.u32 %v7639_v2, 16 }
  0xed   : > { %5866 = vmatmul.mubr.msk.bf16.gmra.mrb[12].mxu1 %vm658_vm3, %v8383_v7  ;;  %6023 = vmatprep.mubr.msk.bf16.mxu0 %vm658_vm3, %v7361_v20  ;;  %v3781_v7 = vrot.slane %v3779_v49, 5  ;;  %v7631_v20 = vrot.slane %v3785_v46, 5  ;;  %v3771_v49 = vshll.u32 %v7611_v45, 16  ;;  %v7643_v46 = vrot.slane %v3833_v63, 5 }
  0xee   : > { %5869 = vmatprep.mubr.msk.bf16.mxu1 %vm658_vm3, %v8384_v62  ;;  %v3848_v62 = vshrl.u32 %v5449_v48, 16  ;;  %v3768_v4 = vor.u32 %v3767_v59, %v7619_v61  ;;  %v3816_v23 = vor.u32 %v3815_v51, %v7633_v10  ;;  %v3830_v59 = vor.u32 %v3829_v57, %v3826_v17  ;;  %v7681_v57 = vld [vmem:[%s6534_s25 + $0xa4] sm:$0x1] }
  0xef   : > { %v3782_v53 = vor.u32 %v3781_v7, %v3778_v60  ;;  %v3792_v48 = vor.u32 %v3791_v6, %v7631_v20  ;;  %v3853_v18 = vrot.slane %v3851_v9, 5  ;;  %v8386_v44 = vcombine.low %v7308_v11, %v7312_v40 }
  0xf0   : > { %v3850_v63 = vrot.slane %v3848_v62, 4  ;;  %v8387_v31 = vrot.slane %v7570_v54, 5  ;;  %v3773_v51 = vrot.slane %v3771_v49, 5  ;;  %v3840_v60 = vor.u32 %v3839_v34, %v7643_v46  ;;  %v7684_v34 = vld [vmem:[%s6534_s25 + $0xac] sm:$0xf] }
  0xf1   : > { %v3843_v9 = vshll.u32 %v7648_v3, 16  ;;  %v8388_v11 = vcombine.low %v7380_v39, %v7384_v55  ;;  %v3759_v40 = vrot.slane %v3758_v26, 4  ;;  %v7677_v54 = vrot.slane %v3857_v50, 5 }
  0xf2   : > { %v3783_v7 = vrot.slane %v3782_v53, 4  ;;  %v3793_v6 = vrot.slane %v3792_v48, 4  ;;  %v3797_v8 = vrot.slane %v3795_v27, 5  ;;  %v3821_v17 = vrot.slane %v3819_v33, 5  ;;  %v7694_v48 = vld [vmem:[%s6534_s25 + $0xb0] sm:$0x1] }
  0xf3   : > { %v3807_v39 = vrot.slane %v3806_v22, 4  ;;  %v3817_v55 = vrot.slane %v3816_v23, 4  ;;  %v3831_v62 = vrot.slane %v3830_v59, 4  ;;  %v3854_v49 = vor.u32 %v3853_v18, %v3850_v63 }
  0xf4   : > { %6024 = vmatmul.mubr.msk.bf16.vlgmr.msra.gmra.mrb[0].mxu0 %vm658_vm3, %v7424_v16  ;;  %v7667_v16 = vsel %vm6786_vm7, %v7592_v28, %v8387_v31  ;;  %v3863_v28 = vrot.slane %v3861_v52, 4  ;;  %v3845_v26 = vrot.slane %v3843_v9, 5  ;;  %v3764_v52 = vsel %vm6560_vm4, %v3759_v40, %v7619_v61 }
  0xf5   : > { %5870 = vmatmul.mubr.msk.bf16.gmra.mrb[16].mxu1 %vm658_vm3, %v8386_v44  ;;  %6056 = vmatpush3.bf16.msra.mxu0 %v7365_v14  ;;  %v3769_v14 = vrot.slane %v3768_v4, 4  ;;  %v5452_v44 = vld [vmem:[%s6534_s25 + $0xa8] sm:$0xf]  ;;  %v3867_v22 = vshll.u32 %v7681_v57, 16  ;;  %v3788_v33 = vsel %vm6560_vm4, %v3783_v7, %v7631_v20  ;;  %v3798_v23 = vsel %vm6560_vm4, %v3793_v6, %v3797_v8 }
  0xf6   : > { %5873 = vmatprep.mubr.msk.bf16.mxu1 %vm658_vm3, %v8388_v11  ;;  %6027 = vmatprep.mubr.msk.bf16.mxu0 %vm658_vm3, %v7435_v29  ;;  %v3841_v29 = vrot.slane %v3840_v60, 4  ;;  %v3872_v4 = vshrl.u32 %v5452_v44, 16  ;;  %v3875_v50 = vshll.u32 %v5452_v44, 16  ;;  %v3864_v53 = vor.u32 %v3863_v28, %v7677_v54  ;;  %v5501_v11 = vld [vmem:[%s6534_s25 + $0x48] sm:$0xe] }
  0xf7   : > { %v3774_v27 = vsel %vm6560_vm4, %v3769_v14, %v3773_v51  ;;  %v3881_v59 = vshll.u32 %v7684_v34, 16  ;;  %v3885_v61 = vshrl.u32 %v7684_v34, 16  ;;  %v3812_v63 = vsel %vm6560_vm4, %v3807_v39, %v7633_v10  ;;  %v7759_v39 = vld [vmem:[%s6534_s25 + $0xb8] sm:$0xf] }
  0xf8   : > { %v3822_v18 = vsel %vm6560_vm4, %v3817_v55, %v3821_v17  ;;  %v3836_v20 = vsel %vm6560_vm4, %v3831_v62, %v7643_v46  ;;  %v3855_v31 = vrot.slane %v3854_v49, 4  ;;  %v8389_v51 = vcombine.low %v7397_v12, %v7412_v35 }
  0xf9   : > { %v3874_v10 = vrot.slane %v3872_v4, 4  ;;  %v3877_v60 = vrot.slane %v3875_v50, 5  ;;  %v3891_v9 = vshll.u32 %v7694_v48, 16  ;;  %v8390_v46 = vcombine.low %v7482_v21, %v7507_v56  ;;  %v5455_v21 = vld [vmem:[%s6534_s25 + $0xb4] sm:$0xf] }
  0xfa   : > { %v5122_v12 = vcombine.low %v7558_v42, %v7565_v47  ;;  %v8391_v35 = vsel %vm6560_vm4, %v7578_v5, %v7567_v41  ;;  %v3865_v14 = vrot.slane %v3864_v53, 4  ;;  %v3869_v28 = vrot.slane %v3867_v22, 5  ;;  %v5503_v4 = vld [vmem:[%s6534_s25 + $0x60] sm:$0xe]  ;;  %v5504_v53 = vld [vmem:[%s6534_s25 + $0x6c] sm:$0xe] }
  0xfb   : > { %v5123_v56 = vcombine.low %v7582_v43, %v7667_v16  ;;  %v7742_v44 = vcombine.low %v3764_v52, %v3774_v27  ;;  %v7744_v42 = vrot.slane %v3881_v59, 5  ;;  %v3887_v47 = vrot.slane %v3885_v61, 4  ;;  %v8400_v16 = vld [vmem:[#allocation4_spill] sm:$0xff] }
  0xfc   : > { %6028 = vmatmul.mubr.msk.bf16.gmra.mrb[4].mxu0 %vm658_vm3, %v7538_v37  ;;  %v3846_v37 = vsel %vm6560_vm4, %v3841_v29, %v3845_v26  ;;  %v7746_v41 = vcombine.low %v3788_v33, %v3798_v23  ;;  %v7748_v5 = vcombine.low %v3812_v63, %v3822_v18  ;;  %v3860_v6 = vsel %vm6560_vm4, %v3855_v31, %v7677_v54  ;;  %v8393_v23 = vld [vmem:[#allocation11_spill] sm:$0xff]  ;;  %v5458_v63 = vld [vmem:[%s6534_s25 + $0xc0] sm:$0xf]  ;;  %v8395_v18 = vld [vmem:[#allocation9_spill] sm:$0xff] }
  0xfd   : > { %5874 = vmatmul.mubr.msk.bf16.gmra.mrb[20].mxu1 %vm658_vm3, %v8389_v51  ;;  %6031 = vmatprep.mubr.msk.bf16.mxu0 %vm658_vm3, %v7552_v58  ;;  %v8392_v58 = vsel %vm6560_vm4, %v7540_v19, %v7495_v1  ;;  %v7750_v7 = vcombine.low %v3836_v20, %v3846_v37  ;;  %v5517_v1 = vrot.slane %v5501_v11, 9  ;;  %v5502_v19 = vld [vmem:[%s6534_s25 + $0x54] sm:$0xe]  ;;  %v3878_v8 = vor.u32 %v3877_v60, %v3874_v10  ;;  %v8396_v31 = vld [vmem:[#allocation10_spill] sm:$0xff] }
  0xfe   : > { %5877 = vmatprep.mubr.msk.bf16.mxu1 %vm658_vm3, %v8390_v46  ;;  %v5471_v40 = vcombine.low %v8392_v58, %v8391_v35  ;;  %v7756_v17 = vrot.slane %v3891_v9, 5  ;;  %v3896_v55 = vshrl.u32 %v5455_v21, 16  ;;  %v3870_v62 = vsel %vm6560_vm4, %v3865_v14, %v3869_v28  ;;  %v8397_v9 = vld [vmem:[#allocation12_spill] sm:$0xff]  ;;  %v7808_v35 = vld [vmem:[%s6534_s25 + $0xbc] sm:$0x1] }
  0xff   : > { %v3899_v49 = vshll.u32 %v5455_v21, 16  ;;  %v4355_v29 = vrot.slane %v7390_v0, 5  ;;  %v4358_v26 = vrot.slane %v7444_v38, 5  ;;  %v3888_v50 = vor.u32 %v3887_v47, %v7744_v42  ;;  %v7811_v58 = vld [vmem:[%s6534_s25 + $0xc4] sm:$0xf] }
 0x100   : > { %v5518_v52 = vrot.slane %v5502_v19, 9  ;;  %v4362_v54 = vrot.slane %v7401_v24, 5  ;;  %v4365_v27 = vrot.slane %v7453_v15, 5  ;;  %v3905_v22 = vshll.u32 %v7759_v39, 16  ;;  %v5505_v19 = vld [vmem:[%s6534_s25 + $0x78] sm:$0xe] }
 0x101   : > { %v3909_v33 = vshrl.u32 %v7759_v39, 16  ;;  %v7776_v0 = vsel %vm6786_vm7, %v5517_v1, %v4355_v29  ;;  %v4357_v38 = vrot.slane %v4355_v29, 4  ;;  %v8394_v59 = vcombine.low %v7515_v36, %v8393_v23  ;;  %v8398_v23 = vld [vmem:[#allocation13_spill] sm:$0xff] }
 0x102   : > { %v7783_v24 = vcombine.low %v3860_v6, %v3870_v62  ;;  %v7787_v15 = vsel %vm6786_vm7, %v5518_v52, %v4362_v54  ;;  %v5519_v61 = vrot.slane %v5503_v4, 9  ;;  %v4369_v20 = vrot.slane %v8395_v18, 5  ;;  %v6398_v6 = vld [vmem:[%s6534_s25 + $0xc] sm:$0xff]  }
 0x103   : > { %v7793_v36 = vsel %vm6786_vm7, %v4357_v38, %v4358_v26  ;;  %v4372_v51 = vrot.slane %v8396_v31, 5  ;;  %v5520_v37 = vrot.slane %v5504_v53, 9  ;;  %v4376_v11 = vrot.slane %v8397_v9, 5 }
 0x104   : > { %6032 = vmatmul.mubr.msk.bf16.gmra.mrb[8].mxu0 %vm658_vm3, %v7561_v30  ;;  %v4364_v30 = vrot.slane %v4362_v54, 4  ;;  %v5534_v10 = vcombine.low %v7776_v0, %v7793_v36  ;;  %v4379_v46 = vrot.slane %v7611_v45, 5  ;;  %v7817_v14 = vsel %vm6786_vm7, %v5519_v61, %v4369_v20 }
 0x105   : > { %5878 = vmatmul.mubr.msk.bf16.gmra.mrb[24].mxu1 %vm658_vm3, %v8394_v59  ;;  %6035 = vmatprep.mubr.msk.bf16.mxu0 %vm658_vm3, %v5471_v40  ;;  %v4371_v28 = vrot.slane %v4369_v20, 4  ;;  %v7819_v21 = vrot.slane %v3896_v55, 4  ;;  %v3920_v47 = vshrl.u32 %v5458_v63, 16  ;;  %v7823_v45 = vsel %vm6786_vm7, %v5520_v37, %v4376_v11  ;;  %v5232_v55 = vld [vmem:[%s6534_s25 + $0x78] sm:$0xf]  ;;  %v8399_v59 = vld [vmem:[#allocation16_spill] sm:$0xff] }
 0x106   : > { %5881 = vmatprep.mubr.msk.bf16.mxu1 %vm658_vm3, %v5122_v12  ;;  %v7801_v60 = vsel %vm6786_vm7, %v4364_v30, %v4365_v27  ;;  %v7805_v12 = vrot.slane %v3878_v8, 4  ;;  %v4378_v1 = vrot.slane %v4376_v11, 4  ;;  %v7827_v8 = vrot.slane %v3888_v50, 4 }
 0x107   : > { %v5535_v40 = vcombine.low %v7787_v15, %v7801_v60  ;;  %v7829_v62 = vrot.slane %v3899_v49, 5  ;;  %v3923_v29 = vshll.u32 %v5458_v63, 16  ;;  %v7833_v26 = vsel %vm6786_vm7, %v4371_v28, %v4372_v51  ;;  %v8402_v28 = vld [vmem:[#allocation14_spill] sm:$0xff] }
 0x108   : > { %v7836_v4 = vrot.slane %v3905_v22, 5  ;;  %v7838_v52 = vrot.slane %v3909_v33, 4  ;;  %v5536_v54 = vcombine.low %v7817_v14, %v7833_v26  ;;  %v7844_v27 = vsel %vm6786_vm7, %v4378_v1, %v4379_v46  ;;  %v5506_v33 = vld [vmem:[%s6534_s25 + $0x84] sm:$0xe]  ;;  %v6399_v1 = vld [vmem:[%s6534_s25 + $0x18] sm:$0xff]  }
 0x109   : > { %v3915_v49 = vshll.u32 %v7808_v35, 16  ;;  %v3929_v50 = vshll.u32 %v7811_v58, 16  ;;  %v5537_v53 = vcombine.low %v7823_v45, %v7844_v27  ;;  %v5521_v22 = vrot.slane %v5505_v19, 9  ;;  %v6461_v60 = vld [vmem:[%s6534_s25 + $0xa0] sm:$0xf] }
 0x10a   : > { %v3922_v38 = vrot.slane %v3920_v47, 4  ;;  %v4386_v30 = vrot.slane %v8399_v59, 5  ;;  %v2245_v61 = vshrl.u32 %v5232_v55, 16  ;;  %v3925_v63 = vrot.slane %v3923_v29, 5  ;;  %v5461_v29 = vld [vmem:[%s6534_s25 + $0xcc] sm:$0xf] }
 0x10b   : > { %v3933_v18 = vshrl.u32 %v7811_v58, 16  ;;  %v2248_v43 = vshll.u32 %v5232_v55, 16  ;;  %v5522_v37 = vrot.slane %v5506_v33, 9  ;;  %v3884_v9 = vsel %vm6560_vm4, %v7805_v12, %v7744_v42  ;;  %v7887_v55 = vld [vmem:[%s6534_s25 + $0xd0] sm:$0xf] }
 0x10c   : > { %6036 = vmatmul.mubr.msk.bf16.gmra.mrb[12].mxu0 %vm658_vm3, %v7742_v44  ;;  %v4383_v44 = vrot.slane %v8398_v23, 5  ;;  %v2247_v51 = vrot.slane %v2245_v61, 4  ;;  %v3902_v11 = vor.u32 %v7829_v62, %v7819_v21  ;;  %v4390_v47 = vrot.slane %v8402_v28, 5  ;;  %v6400_v21 = vld [vmem:[%s6534_s25 + $0x24] sm:$0xff]   ;;  %v6465_v27 = vld [vmem:[%s6534_s25 + $0xac] sm:$0xf] }
 0x10d   : > { %5882 = vmatmul.mubr.msk.bf16.gmra.mrb[28].mxu1 %vm658_vm3, %v5123_v56  ;;  %6039 = vmatprep.mubr.msk.bf16.mxu0 %vm658_vm3, %v7746_v41  ;;  %v8401_v56 = vld [vmem:[#allocation5_spill] sm:$0xff]  ;;  %v2250_v46 = vrot.slane %v2248_v43, 5  ;;  %v3894_v19 = vsel %vm6560_vm4, %v7827_v8, %v7756_v17  ;;  %v4393_v12 = vrot.slane %v7639_v2, 5  ;;  %v7895_v62 = vrot.slane %v3929_v50, 5  ;;  %v5507_v8 = vld [vmem:[%s6534_s25 + $0x90] sm:$0xe] }
 0x10e   : > { %5887 = vmatprep.mubr.msk.bf16.mxu1 %vm658_vm3, %v6398_v6  ;;  %v2267_v41 = vsel %vm6560_vm4, %v8401_v56, %v8400_v16  ;;  %v7869_v20 = vsel %vm6786_vm7, %v5521_v22, %v4383_v44  ;;  %v4385_v31 = vrot.slane %v4383_v44, 4  ;;  %v3912_v6 = vor.u32 %v7838_v52, %v7836_v4  ;;  %v7901_v52 = vld [vmem:[%s6534_s25 + $0xc8] sm:$0x1]  ;;  %v8404_v16 = vld [vmem:[#allocation2_spill] sm:$0xff] }
 0x10f   : > { %v3935_v22 = vrot.slane %v3933_v18, 4  ;;  %v2251_v17 = vor.u32 %v2250_v46, %v2247_v51  ;;  %v3917_v23 = vrot.slane %v3915_v49, 5  ;;  %v3926_v44 = vor.u32 %v3925_v63, %v3922_v38  ;;  %v8405_v51 = vld [vmem:[#allocation3_spill] sm:$0xff] }
 0x110   : > { %v7891_v42 = vsel %vm6786_vm7, %v4385_v31, %v4386_v30  ;;  %v7905_v59 = vsel %vm6786_vm7, %v5522_v37, %v4390_v47  ;;  %v4392_v30 = vrot.slane %v4390_v47, 4  ;;  %v3944_v2 = vshrl.u32 %v5461_v29, 16 }
 0x111   : > { %v5538_v33 = vcombine.low %v7869_v20, %v7891_v42  ;;  %v3947_v50 = vshll.u32 %v5461_v29, 16  ;;  %v3953_v61 = vshll.u32 %v7887_v55, 16  ;;  %v2252_v18 = vrot.slane %v2251_v17, 4  ;;  %v6401_v29 = vld [vmem:[%s6534_s25 + $0x30] sm:$0xff]  }
 0x112   : > { %v3957_v49 = vshrl.u32 %v7887_v55, 16  ;;  %v7916_v38 = vsel %vm6786_vm7, %v4392_v30, %v4393_v12  ;;  %v5523_v63 = vrot.slane %v5507_v8, 9  ;;  %v3936_v56 = vor.u32 %v3935_v22, %v7895_v62 }
 0x113   : > { %v3939_v31 = vshll.u32 %v7901_v52, 16  ;;  %v5539_v37 = vcombine.low %v7905_v59, %v7916_v38  ;;  %v5477_v46 = vcombine.low %v3884_v9, %v3894_v19  ;;  %v3903_v28 = vrot.slane %v3902_v11, 4  ;;  %v5508_v11 = vld [vmem:[%s6534_s25 + $0x9c] sm:$0xe] }
 0x114   : > { %6040 = vmatmul.mubr.msk.bf16.gmra.mrb[16].mxu0 %vm658_vm3, %v7748_v5  ;;  %v8403_v5 = vld [vmem:[#allocation15_spill] sm:$0xff]  ;;  %v3913_v47 = vrot.slane %v3912_v6, 4  ;;  %v3927_v12 = vrot.slane %v3926_v44, 4  ;;  %v4400_v8 = vrot.slane %v7648_v3, 5  ;;  %v3946_v30 = vrot.slane %v3944_v2, 4  ;;  %v6402_v19 = vld [vmem:[%s6534_s25 + $0x3c] sm:$0xff]  }
 0x115   : > { %5888 = vmatmul.mubr.msk.bf16.vlgmr.msra.gmra.mrb[0].mxu1 %vm658_vm3, %v6399_v1  ;;  %6043 = vmatprep.mubr.msk.bf16.mxu0 %vm658_vm3, %v7750_v7  ;;  %v4397_v43 = vrot.slane %v8403_v5, 5  ;;  %v2257_v7 = vsel %vm6560_vm4, %v2252_v18, %v8405_v51  ;;  %v3949_v18 = vrot.slane %v3947_v50, 5  ;;  %v7939_v5 = vrot.slane %v3953_v61, 5 }
 0x116   : > { %6090 = vmatpush3.bf16.msra.mxu1 %v8404_v16  ;;  %5891 = vmatprep.mubr.msk.bf16.mxu1 %vm658_vm3, %v6400_v21  ;;  %v7928_v1 = vcombine.low %v2257_v7, %v2267_v41  ;;  %v7932_v21 = vld [vmem:[%s6534_s25 + $0xd4] sm:$0x1]  ;;  %v3959_v9 = vrot.slane %v3957_v49, 4  ;;  %v3937_v41 = vrot.slane %v3936_v56, 4  ;;  %v3941_v6 = vrot.slane %v3939_v31, 5 }
 0x117   : > { %v7936_v22 = vsel %vm6786_vm7, %v5523_v63, %v4397_v43  ;;  %v4399_v17 = vrot.slane %v4397_v43, 4  ;;  %v3908_v63 = vsel %vm6560_vm4, %v3903_v28, %v7836_v4  ;;  %v3918_v2 = vsel %vm6560_vm4, %v3913_v47, %v3917_v23  ;;  %v6452_v16 = vld [vmem:[%s6534_s25 + $0x1c] sm:$0xf]  ;;  %v5509_v28 = vld [vmem:[%s6534_s25 + $0xa8] sm:$0xe] }
 0x118   : > { %v3963_v50 = vshll.u32 %v7932_v21, 16  ;;  %v5524_v61 = vrot.slane %v5508_v11, 9  ;;  %v4404_v49 = vrot.slane %v7636_v25, 5  ;;  %v3932_v4 = vsel %vm6560_vm4, %v3927_v12, %v7895_v62  ;;  %v5497_v62 = vld [vmem:[%s6534_s25 + $0x18] sm:$0xe]  ;;  %v6403_v47 = vld [vmem:[%s6534_s25 + $0x48] sm:$0xff]  }
 0x119   : > { %v7945_v44 = vsel %vm6786_vm7, %v4399_v17, %v4400_v8  ;;  %v3960_v43 = vor.u32 %v3959_v9, %v7939_v5  ;;  %v4407_v23 = vrot.slane %v7681_v57, 5  ;;  %v3942_v25 = vsel %vm6560_vm4, %v3937_v41, %v3941_v6  ;;  %v6453_v11 = vld [vmem:[%s6534_s25 + $0x20] sm:$0x1] }
 0x11a   : > { %v5540_v3 = vcombine.low %v7936_v22, %v7945_v44  ;;  %v4327_v56 = vrot.slane %v6452_v16, 5  ;;  %v7971_v31 = vsel %vm6786_vm7, %v5524_v61, %v4404_v49  ;;  %v4406_v51 = vrot.slane %v4404_v49, 4  ;;  %v5510_v49 = vld [vmem:[%s6534_s25 + $0xb4] sm:$0xe] }
 0x11b   : > { %v5478_v7 = vcombine.low %v3908_v63, %v3918_v2  ;;  %v3961_v17 = vrot.slane %v3960_v43, 4  ;;  %v5525_v41 = vrot.slane %v5509_v28, 9  ;;  %v4411_v6 = vrot.slane %v7684_v34, 5  ;;  %v5498_v2 = vld [vmem:[%s6534_s25 + $0x24] sm:$0xe] }
 0x11c   : > { %6044 = vmatmul.mubr.msk.bf16.gmra.mrb[20].mxu0 %vm658_vm3, %v7783_v24  ;;  %v3950_v24 = vor.u32 %v3949_v18, %v3946_v30  ;;  %v7976_v57 = vsel %vm6786_vm7, %v4406_v51, %v4407_v23  ;;  %v6404_v30 = vld [vmem:[%s6534_s25 + $0x54] sm:$0xff]   ;;  %v5513_v18 = vrot.slane %v5497_v62, 9  ;;  %v4329_v9 = vrot.slane %v4327_v56, 4  ;;  %v6456_v28 = vld [vmem:[%s6534_s25 + $0x2c] sm:$0x1] }
 0x11d   : > { %5892 = vmatmul.mubr.msk.bf16.gmra.mrb[4].mxu1 %vm658_vm3, %v6401_v29  ;;  %6047 = vmatprep.mubr.msk.bf16.mxu0 %vm658_vm3, %v5477_v46  ;;  %v3965_v46 = vrot.slane %v3963_v50, 5  ;;  %v5479_v29 = vcombine.low %v3932_v4, %v3942_v25  ;;  %v5541_v8 = vcombine.low %v7971_v31, %v7976_v57  ;;  %v4414_v63 = vrot.slane %v7694_v48, 5  ;;  %v6454_v50 = vld [vmem:[%s6534_s25 + $0x28] sm:$0xf]  ;;  %v5499_v25 = vld [vmem:[%s6534_s25 + $0x30] sm:$0xe] }
 0x11e   : > { %5895 = vmatprep.mubr.msk.bf16.mxu1 %vm658_vm3, %v6402_v19  ;;  %v3951_v12 = vrot.slane %v3950_v24, 4  ;;  %v4330_v19 = vrot.slane %v6453_v11, 5  ;;  %v4334_v61 = vrot.slane %v6454_v50, 5  ;;  %v7999_v48 = vsel %vm6786_vm7, %v5525_v41, %v4411_v6  ;;  %v6406_v11 = vld [vmem:[%s6534_s25 + $0x6c] sm:$0xff]   ;;  %v8406_v41 = vld [vmem:[#allocation6_spill] sm:$0xff] }
 0x11f   : > { %v3966_v34 = vsel %vm6560_vm4, %v3961_v17, %v3965_v46  ;;  %v4413_v24 = vrot.slane %v4411_v6, 4  ;;  %v4328_v43 = vsel %vm6786_vm7, %v5513_v18, %v4327_v56  ;;  %v5514_v51 = vrot.slane %v5498_v2, 9  ;;  %v5511_v50 = vld [vmem:[%s6534_s25 + $0xc0] sm:$0xe]  ;;  %v6470_v31 = vld [vmem:[%s6534_s25 + $0xc8] sm:$0x1] }
 0x120   : > { %v3956_v4 = vsel %vm6560_vm4, %v3951_v12, %v7939_v5  ;;  %v4331_v23 = vsel %vm6786_vm7, %v4329_v9, %v4330_v19  ;;  %v6455_v5 = vld [vmem:[%s6534_s25 + $0x34] sm:$0xf]  ;;  %v6405_v12 = vld [vmem:[%s6534_s25 + $0x60] sm:$0xff]   ;;  %v5515_v18 = vrot.slane %v5499_v25, 9  ;;  %v4421_v9 = vrot.slane %v7808_v35, 5 }
 0x121   : > { %v4341_v16 = vrot.slane %v6455_v5, 5  ;;  %v8010_v62 = vsel %vm6786_vm7, %v4413_v24, %v4414_v63  ;;  %v5480_v46 = vcombine.low %v3956_v4, %v3966_v34  ;;  %v5530_v17 = vcombine.low %v4328_v43, %v4331_v23  ;;  %v5500_v24 = vld [vmem:[%s6534_s25 + $0x3c] sm:$0xe] }
 0x122   : > { %v5542_v56 = vcombine.low %v7999_v48, %v8010_v62  ;;  %v4344_v6 = vrot.slane %v8406_v41, 5  ;;  %v4335_v35 = vsel %vm6786_vm7, %v5514_v51, %v4334_v61  ;;  %v5527_v5 = vrot.slane %v5511_v50, 9 }
 0x123   : > { %v4343_v19 = vrot.slane %v4341_v16, 4  ;;  %v4342_v23 = vsel %vm6786_vm7, %v5515_v18, %v4341_v16  ;;  %v4428_v51 = vrot.slane %v7901_v52, 5  ;;  %v2408_v57 = vshll.u32 %v6470_v31, 16 }
 0x124   : > { %6048 = vmatmul.mubr.msk.bf16.gmra.mrb[24].mxu0 %vm658_vm3, %v5478_v7  ;;  %v5526_v7 = vrot.slane %v5510_v49, 9 }
 0x125   : > { %5896 = vmatmul.mubr.msk.bf16.gmra.mrb[8].mxu1 %vm658_vm3, %v6403_v47  ;;  %6051 = vmatprep.mubr.msk.bf16.mxu0 %vm658_vm3, %v5479_v29  ;;  %v4337_v47 = vrot.slane %v6456_v28, 5  ;;  %v4418_v29 = vrot.slane %v7759_v39, 5  ;;  %v8407_v39 = vld [vmem:[#allocation7_spill] sm:$0xff]  ;;  %v4345_v25 = vsel %vm6786_vm7, %v4343_v19, %v4344_v6  ;;  %v5516_v28 = vrot.slane %v5500_v24, 9 }
 0x126   : > { %5899 = vmatprep.mubr.msk.bf16.mxu1 %vm658_vm3, %v6404_v30  ;;  %v4336_v30 = vrot.slane %v4334_v61, 4  ;;  %v4348_v49 = vrot.slane %v8407_v39, 5  ;;  %v4425_v61 = vrot.slane %v7811_v58, 5  ;;  %v6457_v39 = vld [vmem:[%s6534_s25 + $0x70] sm:$0xf]  ;;  %v4432_v24 = vrot.slane %v7887_v55, 5 }
 0x127   : > { %v8022_v63 = vsel %vm6786_vm7, %v5526_v7, %v4418_v29  ;;  %v4420_v2 = vrot.slane %v4418_v29, 4  ;;  %v5229_v7 = vld [vmem:[%s6534_s25 + $0x6c] sm:$0xf]  ;;  %v8408_v29 = vld [vmem:[#allocation8_spill] sm:$0xff] }
 0x128   : > { %v4338_v34 = vsel %vm6786_vm7, %v4336_v30, %v4337_v47  ;;  %v4350_v47 = vrot.slane %v4348_v49, 4  ;;  %v6407_v30 = vld [vmem:[%s6534_s25 + $0x78] sm:$0xff]   ;;  %v8053_v16 = vsel %vm6786_vm7, %v5527_v5, %v4425_v61  ;;  %v4427_v18 = vrot.slane %v4425_v61, 4 }
 0x129   : > { %v8029_v4 = vsel %vm6786_vm7, %v4420_v2, %v4421_v9  ;;  %v5532_v9 = vcombine.low %v4342_v23, %v4345_v25  ;;  %v2221_v19 = vshrl.u32 %v5229_v7, 16  ;;  %v2224_v41 = vshll.u32 %v5229_v7, 16 }
 0x12a   : > { %v5543_v43 = vcombine.low %v8022_v63, %v8029_v4  ;;  %v8058_v58 = vsel %vm6786_vm7, %v4427_v18, %v4428_v51  ;;  %v4349_v6 = vsel %vm6786_vm7, %v5516_v28, %v4348_v49  ;;  %v4435_v49 = vrot.slane %v7932_v21, 5  ;;  %v6409_v51 = vld [vmem:[%s6534_s25 + $0x90] sm:$0xff]   ;;  %v6410_v21 = vld [vmem:[%s6534_s25 + $0x9c] sm:$0xff]  }
 0x12b   : > { %v5544_v50 = vcombine.low %v8053_v16, %v8058_v58  ;;  %v2223_v23 = vrot.slane %v2221_v19, 4  ;;  %v2226_v25 = vrot.slane %v2224_v41, 5  ;;  %v4434_v7 = vrot.slane %v4432_v24, 4 }
 0x12c   : > { %6052 = vmatmul.mubr.msk.bf16.gmra.mrb[28].mxu0 %vm658_vm3, %v5480_v46  ;;  %v5531_v46 = vcombine.low %v4335_v35, %v4338_v34  ;;  %v2230_v35 = vshll.u32 %v6457_v39, 16  ;;  %v2234_v34 = vshrl.u32 %v6457_v39, 16 }
 0x12d   : > { %5900 = vmatmul.mubr.msk.bf16.gmra.mrb[12].mxu1 %vm658_vm3, %v6405_v12  ;;  %6057 = vmatprep.mubr.msk.bf16.mxu0 %vm658_vm3, %v5530_v17  ;;  %v4351_v12 = vrot.slane %v8408_v29, 5  ;;  %v5512_v17 = vld [vmem:[%s6534_s25 + $0xcc] sm:$0xe]  ;;  %v8080_v55 = vsel %vm6786_vm7, %v4434_v7, %v4435_v49 }
 0x12e   : > { %5903 = vmatprep.mubr.msk.bf16.mxu1 %vm658_vm3, %v6406_v11  ;;  %v6408_v11 = vld [vmem:[%s6534_s25 + $0x84] sm:$0xff]   ;;  %v5528_v52 = vrot.slane %v5512_v17, 9  ;;  %v2236_v28 = vrot.slane %v2234_v34, 4  ;;  %v6458_v17 = vld [vmem:[%s6534_s25 + $0x74] sm:$0x1] }
 0x12f   : > { %v4352_v2 = vsel %vm6786_vm7, %v4350_v47, %v4351_v12  ;;  %v5235_v47 = vld [vmem:[%s6534_s25 + $0x84] sm:$0xf]  ;;  %v2227_v12 = vor.u32 %v2226_v25, %v2223_v23  ;;  %v6412_v34 = vld [vmem:[%s6534_s25 + $0xb4] sm:$0xff]  }
 0x130   : > { %v8075_v5 = vsel %vm6786_vm7, %v5528_v52, %v4432_v24  ;;  %v5533_v61 = vcombine.low %v4349_v6, %v4352_v2  ;;  %v2272_v18 = vshll.u32 %v5235_v47, 16  ;;  %v5238_v6 = vld [vmem:[%s6534_s25 + $0x90] sm:$0xf]  ;;  %v6411_v2 = vld [vmem:[%s6534_s25 + $0xa8] sm:$0xff]  }
 0x131   : > { %v5545_v29 = vcombine.low %v8075_v5, %v8080_v55  ;;  %v2228_v52 = vrot.slane %v2227_v12, 4  ;;  %v2293_v23 = vshrl.u32 %v5238_v6, 16  ;;  %v2296_v25 = vshll.u32 %v5238_v6, 16 }
 0x132   : > { %v2326_v12 = vshll.u32 %v6461_v60, 16 }
 0x133   : > { %v2298_v14 = vrot.slane %v2296_v25, 5  ;;  %v6464_v25 = vld [vmem:[%s6534_s25 + $0xa4] sm:$0x1] }
 0x134   : > { %6058 = vmatmul.mubr.msk.bf16.vlgmr.msra.gmra.mrb[0].mxu0 %vm658_vm3, %v5531_v46  ;;  %v2232_v46 = vrot.slane %v2230_v35, 5  ;;  %v5241_v35 = vld [vmem:[%s6534_s25 + $0x9c] sm:$0xf]  ;;  %v8122_v6 = vrot.slane %v2326_v12, 5 }
 0x135   : > { %5904 = vmatmul.mubr.msk.bf16.gmra.mrb[16].mxu1 %vm658_vm3, %v6407_v30  ;;  %6061 = vmatprep.mubr.msk.bf16.mxu0 %vm658_vm3, %v5532_v9  ;;  %v2240_v30 = vshll.u32 %v6458_v17, 16  ;;  %v2269_v9 = vshrl.u32 %v5235_v47, 16  ;;  %v2320_v47 = vshll.u32 %v5241_v35, 16  ;;  %v6462_v17 = vld [vmem:[%s6534_s25 + $0x8c] sm:$0x1] }
 0x136   : > { %5907 = vmatprep.mubr.msk.bf16.mxu1 %vm658_vm3, %v6408_v11  ;;  %v2237_v13 = vor.u32 %v2236_v28, %v2232_v46  ;;  %v6459_v11 = vld [vmem:[%s6534_s25 + $0x88] sm:$0xf]  ;;  %v2233_v7 = vsel %vm6560_vm4, %v2228_v52, %v2232_v46 }
 0x137   : > { %v2278_v19 = vshll.u32 %v6459_v11, 16  ;;  %v2282_v41 = vshrl.u32 %v6459_v11, 16  ;;  %v2242_v0 = vrot.slane %v2240_v30, 5  ;;  %v2271_v36 = vrot.slane %v2269_v9, 4 }
 0x138   : > { %v2238_v39 = vrot.slane %v2237_v13, 4  ;;  %v2288_v30 = vshll.u32 %v6462_v17, 16  ;;  %v2295_v9 = vrot.slane %v2293_v23, 4  ;;  %v2322_v11 = vrot.slane %v2320_v47, 5 }
 0x139   : > { %v8099_v24 = vrot.slane %v2278_v19, 5  ;;  %v2284_v49 = vrot.slane %v2282_v41, 4  ;;  %v6413_v19 = vld [vmem:[%s6534_s25 + $0xc0] sm:$0xff]  }
 0x13a   : > { %v2243_v46 = vsel %vm6560_vm4, %v2238_v39, %v2242_v0  ;;  %v5244_v39 = vld [vmem:[%s6534_s25 + $0xa8] sm:$0xf] }
 0x13b   : > { %v2285_v13 = vor.u32 %v2284_v49, %v8099_v24  ;;  %v5262_v41 = vcombine.low %v2233_v7, %v2243_v46  ;;  %v2336_v7 = vshll.u32 %v6464_v25, 16  ;;  %v2344_v45 = vshll.u32 %v5244_v39, 16 }
 0x13c   : > { %6062 = vmatmul.mubr.msk.bf16.gmra.mrb[4].mxu0 %vm658_vm3, %v5533_v61  ;;  %v6460_v61 = vld [vmem:[%s6534_s25 + $0x94] sm:$0xf] }
 0x13d   : > { %5908 = vmatmul.mubr.msk.bf16.gmra.mrb[20].mxu1 %vm658_vm3, %v6409_v51  ;;  %6065 = vmatprep.mubr.msk.bf16.mxu0 %vm658_vm3, %v5534_v10  ;;  %v2274_v10 = vrot.slane %v2272_v18, 5  ;;  %v2302_v51 = vshll.u32 %v6460_v61, 16  ;;  %v2306_v28 = vshrl.u32 %v6460_v61, 16  ;;  %v2286_v0 = vrot.slane %v2285_v13, 4 }
 0x13e   : > { %5911 = vmatprep.mubr.msk.bf16.mxu1 %vm658_vm3, %v6410_v21  ;;  %v2317_v21 = vshrl.u32 %v5241_v35, 16  ;;  %v6463_v35 = vld [vmem:[%s6534_s25 + $0x98] sm:$0x1]  ;;  %v2341_v61 = vshrl.u32 %v5244_v39, 16  ;;  %v5250_v39 = vld [vmem:[%s6534_s25 + $0xc0] sm:$0xf] }
 0x13f   : > { %v2275_v15 = vor.u32 %v2274_v10, %v2271_v36  ;;  %v8119_v26 = vrot.slane %v2302_v51, 5  ;;  %v2290_v36 = vrot.slane %v2288_v30, 5  ;;  %v2299_v10 = vor.u32 %v2298_v14, %v2295_v9  ;;  %v5247_v51 = vld [vmem:[%s6534_s25 + $0xb4] sm:$0xf] }
 0x140   : > { %v2319_v18 = vrot.slane %v2317_v21, 4  ;;  %v2354_v21 = vshrl.u32 %v6465_v27, 16  ;;  %v2365_v20 = vshrl.u32 %v5247_v51, 16  ;;  %v2368_v42 = vshll.u32 %v5247_v51, 16 }
 0x141   : > { %v2276_v52 = vrot.slane %v2275_v15, 4  ;;  %v2291_v46 = vsel %vm6560_vm4, %v2286_v0, %v2290_v36  ;;  %v2300_v15 = vrot.slane %v2299_v10, 4  ;;  %v2338_v30 = vrot.slane %v2336_v7, 5 }
 0x142   : > { %v2323_v23 = vor.u32 %v2322_v11, %v2319_v18  ;;  %v2343_v9 = vrot.slane %v2341_v61, 4  ;;  %v2356_v11 = vrot.slane %v2354_v21, 4  ;;  %v6469_v61 = vld [vmem:[%s6534_s25 + $0xbc] sm:$0x1] }
 0x143   : > { %v2281_v47 = vsel %vm6560_vm4, %v2276_v52, %v8099_v24  ;;  %v2305_v0 = vsel %vm6560_vm4, %v2300_v15, %v8119_v26  ;;  %v2384_v22 = vshll.u32 %v6469_v61, 16 }
 0x144   : > { %6066 = vmatmul.mubr.msk.bf16.gmra.mrb[8].mxu0 %vm658_vm3, %v5535_v40  ;;  %v2330_v40 = vshrl.u32 %v6461_v60, 16  ;;  %v2324_v17 = vrot.slane %v2323_v23, 4  ;;  %v5264_v24 = vcombine.low %v2281_v47, %v2291_v46 }
 0x145   : > { %5912 = vmatmul.mubr.msk.bf16.gmra.mrb[24].mxu1 %vm658_vm3, %v6411_v2  ;;  %6069 = vmatprep.mubr.msk.bf16.mxu0 %vm658_vm3, %v5536_v54  ;;  %v2308_v54 = vrot.slane %v2306_v28, 4 }
 0x146   : > { %5915 = vmatprep.mubr.msk.bf16.mxu1 %vm658_vm3, %v6412_v34  ;;  %v2332_v2 = vrot.slane %v2330_v40, 4  ;;  %v2312_v34 = vshll.u32 %v6463_v35, 16  ;;  %v2329_v10 = vsel %vm6560_vm4, %v2324_v17, %v8122_v6  ;;  %v2410_v17 = vrot.slane %v2408_v57, 5 }
 0x147   : > { %v2309_v49 = vor.u32 %v2308_v54, %v8119_v26  ;;  %v2346_v54 = vrot.slane %v2344_v45, 5  ;;  %v6467_v26 = vld [vmem:[%s6534_s25 + $0xb0] sm:$0x1] }
 0x148   : > { %v2333_v28 = vor.u32 %v2332_v2, %v8122_v6  ;;  %v2314_v60 = vrot.slane %v2312_v34, 5  ;;  %v2360_v35 = vshll.u32 %v6467_v26, 16  ;;  %v2389_v34 = vshrl.u32 %v5250_v39, 16 }
 0x149   : > { %v2310_v13 = vrot.slane %v2309_v49, 4  ;;  %v2347_v38 = vor.u32 %v2346_v54, %v2343_v9  ;;  %v2392_v6 = vshll.u32 %v5250_v39, 16  ;;  %v6468_v49 = vld [vmem:[%s6534_s25 + $0xc4] sm:$0xf] }
 0x14a   : > { %v2334_v14 = vrot.slane %v2333_v28, 4  ;;  %v2398_v23 = vshll.u32 %v6468_v49, 16  ;;  %v2402_v25 = vshrl.u32 %v6468_v49, 16  ;;  %v2362_v45 = vrot.slane %v2360_v35, 5 }
 0x14b   : > { %v2315_v36 = vsel %vm6560_vm4, %v2310_v13, %v2314_v60  ;;  %v2348_v51 = vrot.slane %v2347_v38, 4  ;;  %v2386_v60 = vrot.slane %v2384_v22, 5 }
 0x14c   : > { %6070 = vmatmul.mubr.msk.bf16.gmra.mrb[12].mxu0 %vm658_vm3, %v5537_v53  ;;  %v2350_v53 = vshll.u32 %v6465_v27, 16  ;;  %v2339_v59 = vsel %vm6560_vm4, %v2334_v14, %v2338_v30  ;;  %v5265_v44 = vcombine.low %v2305_v0, %v2315_v36  ;;  %v2391_v27 = vrot.slane %v2389_v34, 4 }
 0x14d   : > { %5916 = vmatmul.mubr.msk.bf16.gmra.mrb[28].mxu1 %vm658_vm3, %v6413_v19  ;;  %6073 = vmatprep.mubr.msk.bf16.mxu0 %vm658_vm3, %v5538_v33  ;;  %v6466_v33 = vld [vmem:[%s6534_s25 + $0xb8] sm:$0xf]  ;;  %v2367_v19 = vrot.slane %v2365_v20, 4  ;;  %v2400_v21 = vrot.slane %v2398_v23, 5  ;;  %v2404_v47 = vrot.slane %v2402_v25, 4 }
 0x14e   : > { %5937 = vmatprep.mubr.msk.bf16.mxu1 %vm658_vm3, %v5262_v41  ;;  %v2374_v12 = vshll.u32 %v6466_v33, 16  ;;  %v2378_v40 = vshrl.u32 %v6466_v33, 16  ;;  %v2352_v18 = vrot.slane %v2350_v53, 5  ;;  %v2370_v41 = vrot.slane %v2368_v42, 5 }
 0x14f   : > { %v2394_v53 = vrot.slane %v2392_v6, 5 }
 0x150   : > { %v2376_v52 = vrot.slane %v2374_v12, 5  ;;  %v2380_v2 = vrot.slane %v2378_v40, 4  ;;  %v2353_v20 = vsel %vm6560_vm4, %v2348_v51, %v2352_v18  ;;  %v2405_v12 = vor.u32 %v2404_v47, %v2400_v21 }
 0x151   : > { %v2395_v33 = vor.u32 %v2394_v53, %v2391_v27 }
 0x152   : > { %v2381_v7 = vor.u32 %v2380_v2, %v2376_v52  ;;  %v2406_v13 = vrot.slane %v2405_v12, 4  ;;  %v8225_v2 = vld [vmem:[%s8340_s2] ss:$0 sm:$0xff] }
 0x153   : > { %v2396_v40 = vrot.slane %v2395_v33, 4 }
 0x154   : > { %6074 = vmatmul.mubr.msk.bf16.gmra.mrb[16].mxu0 %vm658_vm3, %v5539_v37  ;;  %v2357_v37 = vor.u32 %v2356_v11, %v2352_v18  ;;  %v2382_v15 = vrot.slane %v2381_v7, 4  ;;  %v2411_v9 = vsel %vm6560_vm4, %v2406_v13, %v2410_v17 }
 0x155   : > { %5938 = vmatmul.mubr.msk.bf16.vlgmr.msra.gmra.mrb[16].mxu1 %vm658_vm3, %v7928_v1  ;;  %6077 = vmatprep.mubr.msk.bf16.mxu0 %vm658_vm3, %v5540_v3  ;;  %v2371_v1 = vor.u32 %v2370_v41, %v2367_v19  ;;  %v5266_v3 = vcombine.low %v2329_v10, %v2339_v59  ;;  %v2401_v30 = vsel %vm6560_vm4, %v2396_v40, %v2400_v21 }
 0x156   : > { %5941 = vmatprep.mubr.msk.bf16.mxu1 %vm658_vm3, %v5264_v24  ;;  %v2358_v28 = vrot.slane %v2357_v37, 4  ;;  %v2387_v48 = vsel %vm6560_vm4, %v2382_v15, %v2386_v60  ;;  %v5269_v14 = vcombine.low %v2401_v30, %v2411_v9 }
 0x157   : > { %v2372_v46 = vrot.slane %v2371_v1, 4 }
 0x158   : > { %v2363_v42 = vsel %vm6560_vm4, %v2358_v28, %v2362_v45 }
 0x159   : > { %v5267_v62 = vcombine.low %v2353_v20, %v2363_v42 }
 0x15c   : > { %6078 = vmatmul.mubr.msk.bf16.gmra.mrb[20].mxu0 %vm658_vm3, %v5541_v8  ;;  %v2377_v8 = vsel %vm6560_vm4, %v2372_v46, %v2376_v52 }
 0x15d   : > { %5942 = vmatmul.mubr.msk.bf16.gmra.mrb[20].mxu1 %vm658_vm3, %v5265_v44  ;;  %6081 = vmatprep.mubr.msk.bf16.mxu0 %vm658_vm3, %v5542_v56  ;;  %v5268_v56 = vcombine.low %v2377_v8, %v2387_v48 }
 0x15e   : > { %5945 = vmatprep.mubr.msk.bf16.mxu1 %vm658_vm3, %v5266_v3 }
 0x164   : > { %6082 = vmatmul.mubr.msk.bf16.gmra.mrb[24].mxu0 %vm658_vm3, %v5543_v43 }
 0x165   : > { %5946 = vmatmul.mubr.msk.bf16.gmra.mrb[24].mxu1 %vm658_vm3, %v5267_v62  ;;  %6085 = vmatprep.mubr.msk.bf16.mxu0 %vm658_vm3, %v5544_v50 }
 0x166   : > { %5949 = vmatprep.mubr.msk.bf16.mxu1 %vm658_vm3, %v5268_v56 }
 0x16c   : > { %6086 = vmatmul.mubr.msk.bf16.gmra.mrb[28].mxu0 %vm658_vm3, %v5545_v29 }
 0x16d   : > { %5950 = vmatmul.mubr.msk.bf16.gmra.mrb[28].mxu1 %vm658_vm3, %v5269_v14 }
 0x1e8   : > { %v5889_v63 = vpop.f32.mrb[0].mxu1 }
 0x1e9   : > { %v1821_v4 = vpop.f32.mrb[1].mxu1 }
 0x1ea   : > { %v5890_v43 = vpop.f32.mrb[2].mxu1 }
 0x1eb   : > { %v1824_v16 = vpop.f32.mrb[3].mxu1 }
 0x1f0   : > { %v5893_v58 = vpop.f32.mrb[4].mxu1 }
 0x1f1   : > { %v1837_v50 = vpop.f32.mrb[5].mxu1 }
 0x1f2   : > { %v5894_v54 = vpop.f32.mrb[6].mxu1 }
 0x1f3   : > { %v1840_v18 = vpop.f32.mrb[7].mxu1 }
 0x1f8   : > { %v5897_v11 = vpop.f32.mrb[8].mxu1 }
 0x1f9   : > { %v1853_v32 = vpop.f32.mrb[9].mxu1 }
 0x1fa   : > { %v8210_v24 = vpop.f32.mrb[10].mxu1 }
 0x1fb   : > { %v8212_v19 = vpop.f32.mrb[11].mxu1 }
 0x200   : > { %v8214_v5 = vpop.f32.mrb[12].mxu1 }
 0x201   : > { %v8216_v55 = vpop.f32.mrb[13].mxu1 }
 0x202   : > { %v8218_v29 = vpop.f32.mrb[14].mxu1 }
 0x203   : > { %v8220_v41 = vpop.f32.mrb[15].mxu1 }
 0x207   : > { %v6059_v52 = vpop.f32.mrb[0].mxu0 }
 0x208   : > { %v6091_v39 = vadd.f32 %v6059_v52, %v5889_v63  ;;  %v4572_v0 = vpop.f32.mrb[1].mxu0 }
 0x209   : > { %v6092_v36 = vadd.f32 %v4572_v0, %v1821_v4  ;;  %v6060_v10 = vpop.f32.mrb[2].mxu0 }
 0x20a   : > { %v4740_v59 = vadd.f32 %v6091_v39, %v8225_v2  ;;  %v6093_v38 = vadd.f32 %v6060_v10, %v5890_v43  ;;  %v4575_v37 = vpop.f32.mrb[3].mxu0 }
 0x20b   : > { %v4738_v26 = vadd.f32 %v6092_v36, %v8225_v2  ;;  %v6094_v35 = vadd.f32 %v4575_v37, %v1824_v16 }
 0x20c   : > { %v4772_v34 = vmax.f32 %v4740_v59, 0.0  ;;  %v4741_v6 = vadd.f32 %v6093_v38, %v8225_v2 }
 0x20d   : > { %v4770_v49 = vmax.f32 %v4738_v26, 0.0  ;;  %v4739_v23 = vadd.f32 %v6094_v35, %v8225_v2 }
 0x20e   : > { %v5600_v25 = vpack.c.bf16 %v4772_v34, %v4772_v34  ;;  %v4773_v1 = vmax.f32 %v4741_v6, 0.0 }
 0x20f   : > { %v5598_v7 = vpack.c.bf16 %v4770_v49, %v4770_v49  ;;  %v4771_v61 = vmax.f32 %v4739_v23, 0.0  ;;  %v6063_v22 = vpop.f32.mrb[4].mxu0 }
 0x210   : > { %4933 = vst.msk [vmem:[%s8234_s20 + $0x8] sm:$0xf] %vm4930_vm8, %v5600_v25  ;;  %v5601_v44 = vpack.c.bf16 %v4773_v1, %v4773_v1  ;;  %v6095_v3 = vadd.f32 %v6063_v22, %v5893_v58  ;;  %v4588_v51 = vpop.f32.mrb[5].mxu0 }
 0x211   : > { %4931 = vst.msk [vmem:[%s8234_s20] sm:$0xf] %vm4930_vm8, %v5598_v7  ;;  %v5599_v28 = vpack.c.bf16 %v4771_v61, %v4771_v61  ;;  %v6096_v45 = vadd.f32 %v4588_v51, %v1837_v50  ;;  %v6064_v27 = vpop.f32.mrb[6].mxu0 }
 0x212   : > { %4934 = vst.msk [vmem:[%s8234_s20 + $0xc] sm:$0xf] %vm4930_vm8, %v5601_v44  ;;  %v4744_v53 = vadd.f32 %v6095_v3, %v8225_v2  ;;  %v6097_v21 = vadd.f32 %v6064_v27, %v5894_v54  ;;  %v4591_v47 = vpop.f32.mrb[7].mxu0 }
 0x213   : > { %4932 = vst.msk [vmem:[%s8234_s20 + $0x4] sm:$0xf] %vm4930_vm8, %v5599_v28  ;;  %v4742_v46 = vadd.f32 %v6096_v45, %v8225_v2  ;;  %v6098_v15 = vadd.f32 %v4591_v47, %v1840_v18 }
 0x214   : > { %v4776_v60 = vmax.f32 %v4744_v53, 0.0  ;;  %v4745_v20 = vadd.f32 %v6097_v21, %v8225_v2 }
 0x215   : > { %v4774_v42 = vmax.f32 %v4742_v46, 0.0  ;;  %v4743_v33 = vadd.f32 %v6098_v15, %v8225_v2 }
 0x216   : > { %v5604_v12 = vpack.c.bf16 %v4776_v60, %v4776_v60  ;;  %v4777_v31 = vmax.f32 %v4745_v20, 0.0 }
 0x217   : > { %v5602_v57 = vpack.c.bf16 %v4774_v42, %v4774_v42  ;;  %v4775_v8 = vmax.f32 %v4743_v33, 0.0  ;;  %v6067_v48 = vpop.f32.mrb[8].mxu0 }
 0x218   : > { %4937 = vst.msk [vmem:[%s8234_s20 + $0x18] sm:$0xf] %vm4930_vm8, %v5604_v12  ;;  %v5605_v62 = vpack.c.bf16 %v4777_v31, %v4777_v31  ;;  %v6099_v56 = vadd.f32 %v6067_v48, %v5897_v11  ;;  %v4604_v40 = vpop.f32.mrb[9].mxu0 }
 0x219   : > { %4935 = vst.msk [vmem:[%s8234_s20 + $0x10] sm:$0xf] %vm4930_vm8, %v5602_v57  ;;  %v5603_v13 = vpack.c.bf16 %v4775_v8, %v4775_v8  ;;  %v6100_v17 = vadd.f32 %v4604_v40, %v1853_v32  ;;  %v6068_v30 = vpop.f32.mrb[10].mxu0 }
 0x21a   : > { %4938 = vst.msk [vmem:[%s8234_s20 + $0x1c] sm:$0xf] %vm4930_vm8, %v5605_v62  ;;  %v4748_v9 = vadd.f32 %v6099_v56, %v8225_v2  ;;  %v6101_v14 = vadd.f32 %v6068_v30, %v8210_v24  ;;  %v4607_v63 = vpop.f32.mrb[11].mxu0 }
 0x21b   : > { %4936 = vst.msk [vmem:[%s8234_s20 + $0x14] sm:$0xf] %vm4930_vm8, %v5603_v13  ;;  %v4746_v4 = vadd.f32 %v6100_v17, %v8225_v2  ;;  %v6102_v43 = vadd.f32 %v4607_v63, %v8212_v19 }
 0x21c   : > { %v4780_v16 = vmax.f32 %v4748_v9, 0.0  ;;  %v4749_v58 = vadd.f32 %v6101_v14, %v8225_v2 }
 0x21d   : > { %v4778_v50 = vmax.f32 %v4746_v4, 0.0  ;;  %v4747_v54 = vadd.f32 %v6102_v43, %v8225_v2 }
 0x21e   : > { %v5608_v18 = vpack.c.bf16 %v4780_v16, %v4780_v16  ;;  %v4781_v11 = vmax.f32 %v4749_v58, 0.0 }
 0x21f   : > { %v5606_v32 = vpack.c.bf16 %v4778_v50, %v4778_v50  ;;  %v4779_v24 = vmax.f32 %v4747_v54, 0.0  ;;  %v6071_v52 = vpop.f32.mrb[12].mxu0 }
 0x220   : > { %4941 = vst.msk [vmem:[%s8234_s20 + $0x28] sm:$0xf] %vm4930_vm8, %v5608_v18  ;;  %v5609_v39 = vpack.c.bf16 %v4781_v11, %v4781_v11  ;;  %v6103_v0 = vadd.f32 %v6071_v52, %v8214_v5  ;;  %v4620_v36 = vpop.f32.mrb[13].mxu0 }
 0x221   : > { %4939 = vst.msk [vmem:[%s8234_s20 + $0x20] sm:$0xf] %vm4930_vm8, %v5606_v32  ;;  %v5607_v19 = vpack.c.bf16 %v4779_v24, %v4779_v24  ;;  %v6104_v10 = vadd.f32 %v4620_v36, %v8216_v55  ;;  %v6072_v59 = vpop.f32.mrb[14].mxu0 }
 0x222   : > { %4942 = vst.msk [vmem:[%s8234_s20 + $0x2c] sm:$0xf] %vm4930_vm8, %v5609_v39  ;;  %v4752_v38 = vadd.f32 %v6103_v0, %v8225_v2  ;;  %v6105_v37 = vadd.f32 %v6072_v59, %v8218_v29  ;;  %v4623_v26 = vpop.f32.mrb[15].mxu0 }
 0x223   : > { %4940 = vst.msk [vmem:[%s8234_s20 + $0x24] sm:$0xf] %vm4930_vm8, %v5607_v19  ;;  %v4750_v5 = vadd.f32 %v6104_v10, %v8225_v2  ;;  %v6106_v35 = vadd.f32 %v4623_v26, %v8220_v41 }
 0x224   : > { %v4784_v34 = vmax.f32 %v4752_v38, 0.0  ;;  %v4753_v6 = vadd.f32 %v6105_v37, %v8225_v2 }
 0x225   : > { %v4782_v55 = vmax.f32 %v4750_v5, 0.0  ;;  %v4751_v49 = vadd.f32 %v6106_v35, %v8225_v2 }
 0x226   : > { %v5612_v23 = vpack.c.bf16 %v4784_v34, %v4784_v34  ;;  %v4785_v25 = vmax.f32 %v4753_v6, 0.0 }
 0x227   : > { %v5610_v1 = vpack.c.bf16 %v4782_v55, %v4782_v55  ;;  %v4783_v29 = vmax.f32 %v4751_v49, 0.0  ;;  %v6075_v7 = vpop.f32.mrb[16].mxu0 }
 0x228   : > { %4945 = vst.msk [vmem:[%s8234_s20 + $0x38] sm:$0xf] %vm4930_vm8, %v5612_v23  ;;  %v5613_v61 = vpack.c.bf16 %v4785_v25, %v4785_v25  ;;  %v5939_v22 = vpop.f32.mrb[16].mxu1  ;;  %v4636_v44 = vpop.f32.mrb[17].mxu0 }
 0x229   : > { %4943 = vst.msk [vmem:[%s8234_s20 + $0x30] sm:$0xf] %vm4930_vm8, %v5610_v1  ;;  %v5611_v41 = vpack.c.bf16 %v4783_v29, %v4783_v29  ;;  %v6107_v3 = vadd.f32 %v6075_v7, %v5939_v22  ;;  %v2611_v51 = vpop.f32.mrb[17].mxu1  ;;  %v6076_v28 = vpop.f32.mrb[18].mxu0 }
 0x22a   : > { %4946 = vst.msk [vmem:[%s8234_s20 + $0x3c] sm:$0xf] %vm4930_vm8, %v5613_v61  ;;  %v6108_v45 = vadd.f32 %v4636_v44, %v2611_v51  ;;  %v5940_v27 = vpop.f32.mrb[18].mxu1  ;;  %v4639_v53 = vpop.f32.mrb[19].mxu0 }
 0x22b   : > { %4944 = vst.msk [vmem:[%s8234_s20 + $0x34] sm:$0xf] %vm4930_vm8, %v5611_v41  ;;  %v4756_v21 = vadd.f32 %v6107_v3, %v8225_v2  ;;  %v6109_v47 = vadd.f32 %v6076_v28, %v5940_v27  ;;  %v2614_v46 = vpop.f32.mrb[19].mxu1 }
 0x22c   : > { %v4754_v15 = vadd.f32 %v6108_v45, %v8225_v2  ;;  %v6110_v60 = vadd.f32 %v4639_v53, %v2614_v46 }
 0x22d   : > { %v4788_v20 = vmax.f32 %v4756_v21, 0.0  ;;  %v4757_v42 = vadd.f32 %v6109_v47, %v8225_v2 }
 0x22e   : > { %v4786_v33 = vmax.f32 %v4754_v15, 0.0  ;;  %v4755_v12 = vadd.f32 %v6110_v60, %v8225_v2 }
 0x22f   : > { %v5616_v31 = vpack.c.bf16 %v4788_v20, %v4788_v20  ;;  %v4789_v57 = vmax.f32 %v4757_v42, 0.0  ;;  %v6079_v8 = vpop.f32.mrb[20].mxu0 }
 0x230   : > { %v5614_v48 = vpack.c.bf16 %v4786_v33, %v4786_v33  ;;  %v4787_v62 = vmax.f32 %v4755_v12, 0.0  ;;  %v5943_v56 = vpop.f32.mrb[20].mxu1  ;;  %v4652_v40 = vpop.f32.mrb[21].mxu0 }
 0x231   : > { %4949 = vst.msk [vmem:[%s8234_s20 + $0x48] sm:$0xf] %vm4930_vm8, %v5616_v31  ;;  %v5617_v13 = vpack.c.bf16 %v4789_v57, %v4789_v57  ;;  %v6111_v17 = vadd.f32 %v6079_v8, %v5943_v56  ;;  %v2627_v30 = vpop.f32.mrb[21].mxu1  ;;  %v6080_v9 = vpop.f32.mrb[22].mxu0 }
 0x232   : > { %4947 = vst.msk [vmem:[%s8234_s20 + $0x40] sm:$0xf] %vm4930_vm8, %v5614_v48  ;;  %v5615_v14 = vpack.c.bf16 %v4787_v62, %v4787_v62  ;;  %v6112_v63 = vadd.f32 %v4652_v40, %v2627_v30  ;;  %v5944_v4 = vpop.f32.mrb[22].mxu1  ;;  %v4655_v43 = vpop.f32.mrb[23].mxu0 }
 0x233   : > { %4950 = vst.msk [vmem:[%s8234_s20 + $0x4c] sm:$0xf] %vm4930_vm8, %v5617_v13  ;;  %v4760_v16 = vadd.f32 %v6111_v17, %v8225_v2  ;;  %v6113_v58 = vadd.f32 %v6080_v9, %v5944_v4  ;;  %v2630_v50 = vpop.f32.mrb[23].mxu1 }
 0x234   : > { %4948 = vst.msk [vmem:[%s8234_s20 + $0x44] sm:$0xf] %vm4930_vm8, %v5615_v14  ;;  %v4758_v54 = vadd.f32 %v6112_v63, %v8225_v2  ;;  %v6114_v18 = vadd.f32 %v4655_v43, %v2630_v50 }
 0x235   : > { %v4792_v11 = vmax.f32 %v4760_v16, 0.0  ;;  %v4761_v32 = vadd.f32 %v6113_v58, %v8225_v2 }
 0x236   : > { %v4790_v24 = vmax.f32 %v4758_v54, 0.0  ;;  %v4759_v52 = vadd.f32 %v6114_v18, %v8225_v2 }
 0x237   : > { %v5620_v39 = vpack.c.bf16 %v4792_v11, %v4792_v11  ;;  %v4793_v0 = vmax.f32 %v4761_v32, 0.0  ;;  %v6083_v36 = vpop.f32.mrb[24].mxu0 }
 0x238   : > { %v5618_v19 = vpack.c.bf16 %v4790_v24, %v4790_v24  ;;  %v4791_v10 = vmax.f32 %v4759_v52, 0.0  ;;  %v5947_v59 = vpop.f32.mrb[24].mxu1  ;;  %v4668_v38 = vpop.f32.mrb[25].mxu0 }
 0x239   : > { %4953 = vst.msk [vmem:[%s8234_s20 + $0x58] sm:$0xf] %vm4930_vm8, %v5620_v39  ;;  %v5621_v37 = vpack.c.bf16 %v4793_v0, %v4793_v0  ;;  %v6115_v26 = vadd.f32 %v6083_v36, %v5947_v59  ;;  %v2643_v5 = vpop.f32.mrb[25].mxu1  ;;  %v6084_v35 = vpop.f32.mrb[26].mxu0 }
 0x23a   : > { %4951 = vst.msk [vmem:[%s8234_s20 + $0x50] sm:$0xf] %vm4930_vm8, %v5618_v19  ;;  %v5619_v34 = vpack.c.bf16 %v4791_v10, %v4791_v10  ;;  %v6116_v6 = vadd.f32 %v4668_v38, %v2643_v5  ;;  %v5948_v55 = vpop.f32.mrb[26].mxu1  ;;  %v4671_v49 = vpop.f32.mrb[27].mxu0 }
 0x23b   : > { %4954 = vst.msk [vmem:[%s8234_s20 + $0x5c] sm:$0xf] %vm4930_vm8, %v5621_v37  ;;  %v4764_v23 = vadd.f32 %v6115_v26, %v8225_v2  ;;  %v6117_v25 = vadd.f32 %v6084_v35, %v5948_v55  ;;  %v2646_v1 = vpop.f32.mrb[27].mxu1 }
 0x23c   : > { %4952 = vst.msk [vmem:[%s8234_s20 + $0x54] sm:$0xf] %vm4930_vm8, %v5619_v34  ;;  %v4762_v29 = vadd.f32 %v6116_v6, %v8225_v2  ;;  %v6118_v7 = vadd.f32 %v4671_v49, %v2646_v1 }
 0x23d   : > { %v4796_v61 = vmax.f32 %v4764_v23, 0.0  ;;  %v4765_v22 = vadd.f32 %v6117_v25, %v8225_v2 }
 0x23e   : > { %v4794_v44 = vmax.f32 %v4762_v29, 0.0  ;;  %v4763_v41 = vadd.f32 %v6118_v7, %v8225_v2 }
 0x23f   : > { %v5624_v3 = vpack.c.bf16 %v4796_v61, %v4796_v61  ;;  %v4797_v51 = vmax.f32 %v4765_v22, 0.0  ;;  %v6087_v28 = vpop.f32.mrb[28].mxu0 }
 0x240   : > { %v5622_v45 = vpack.c.bf16 %v4794_v44, %v4794_v44  ;;  %v4795_v27 = vmax.f32 %v4763_v41, 0.0  ;;  %v5951_v53 = vpop.f32.mrb[28].mxu1  ;;  %v4684_v21 = vpop.f32.mrb[29].mxu0 }
 0x241   : > { %4957 = vst.msk [vmem:[%s8234_s20 + $0x68] sm:$0xf] %vm4930_vm8, %v5624_v3  ;;  %v5625_v47 = vpack.c.bf16 %v4797_v51, %v4797_v51  ;;  %v6119_v46 = vadd.f32 %v6087_v28, %v5951_v53  ;;  %v2659_v15 = vpop.f32.mrb[29].mxu1  ;;  %v6088_v60 = vpop.f32.mrb[30].mxu0 }
 0x242   : > { %4955 = vst.msk [vmem:[%s8234_s20 + $0x60] sm:$0xf] %vm4930_vm8, %v5622_v45  ;;  %v5623_v20 = vpack.c.bf16 %v4795_v27, %v4795_v27  ;;  %v6120_v42 = vadd.f32 %v4684_v21, %v2659_v15  ;;  %v5952_v33 = vpop.f32.mrb[30].mxu1  ;;  %v4687_v12 = vpop.f32.mrb[31].mxu0 }
 0x243   : > { %4958 = vst.msk [vmem:[%s8234_s20 + $0x6c] sm:$0xf] %vm4930_vm8, %v5625_v47  ;;  %v4768_v31 = vadd.f32 %v6119_v46, %v8225_v2  ;;  %v6121_v57 = vadd.f32 %v6088_v60, %v5952_v33  ;;  %v2662_v8 = vpop.f32.mrb[31].mxu1 }
 0x244   : > { %4956 = vst.msk [vmem:[%s8234_s20 + $0x64] sm:$0xf] %vm4930_vm8, %v5623_v20  ;;  %v4766_v48 = vadd.f32 %v6120_v42, %v8225_v2  ;;  %v6122_v62 = vadd.f32 %v4687_v12, %v2662_v8 }
 0x245   : > { %v4800_v56 = vmax.f32 %v4768_v31, 0.0  ;;  %v4769_v40 = vadd.f32 %v6121_v57, %v8225_v2 }
 0x246   : > { %v4798_v13 = vmax.f32 %v4766_v48, 0.0  ;;  %v4767_v17 = vadd.f32 %v6122_v62, %v8225_v2 }
 0x247   : > { %v5628_v30 = vpack.c.bf16 %v4800_v56, %v4800_v56  ;;  %v4801_v9 = vmax.f32 %v4769_v40, 0.0 }
 0x248   : > { %v5626_v14 = vpack.c.bf16 %v4798_v13, %v4798_v13  ;;  %v4799_v63 = vmax.f32 %v4767_v17, 0.0 }
 0x249   : > { %4961 = vst.msk [vmem:[%s8234_s20 + $0x78] sm:$0xf] %vm4930_vm8, %v5628_v30  ;;  %v5629_v4 = vpack.c.bf16 %v4801_v9, %v4801_v9 }
 0x24a   : > { %4959 = vst.msk [vmem:[%s8234_s20 + $0x70] sm:$0xf] %vm4930_vm8, %v5626_v14  ;;  %v5627_v43 = vpack.c.bf16 %v4799_v63, %v4799_v63 }
 0x24b   : > { %4962 = vst.msk [vmem:[%s8234_s20 + $0x7c] sm:$0xf] %vm4930_vm8, %v5629_v4 }
 0x24c   : > { %4960 = vst.msk [vmem:[%s8234_s20 + $0x74] sm:$0xf] %vm4930_vm8, %v5627_v43 }
 0x24d PF: > { %s13_s12 = sadd.s32 1, %s6477_s12  }
 0x24e   : > { %p10_p4 = scmp.ge.s32.totalorder %s13_s12, 6  }
 0x250   :  { %12 = sbr.rel (!%p10_p4) target bundleno = 1 (0x1), region = 72 }

// kernel: disaster_sam_v2.5
= control target key start
LH: loop header
LB: loop body
LE: loop exit
PB: predicated region body
PF: predicated region fallthrough
CT: control target
= control target key end

     0   :  { %s8294_s24 = smov 0   ;;  %s10246_s0 = inlined_call_operand.vmem [shape: bf16[2,10,10,256], index: 0, kind: input, shape index: {}]   ;;  %s10247_s1 = inlined_call_operand.vmem [shape: bf16[2,10,10,256], index: 1, kind: input, shape index: {}]   ;;  %s10248_s2 = inlined_call_operand.vmem [shape: bf16[9,256,128], index: 2, kind: input, shape index: {}]   ;;  %s10249_s3 = inlined_call_operand.vmem [shape: bf16[9,256,128], index: 3, kind: input, shape index: {}]   ;;  %s10250_s4 = inlined_call_operand.vmem [shape: f32[1,128], index: 4, kind: input, shape index: {}]   ;;  %s10251_s5 = inlined_call_operand.vmem [shape: f32[128,4], index: 5, kind: input, shape index: {}]   ;;  %s10252_s6 = inlined_call_operand.vmem [shape: f32[1,4], index: 6, kind: input, shape index: {}]   ;;  %s10253_s7 = inlined_call_operand.vmem [shape: f32[2,8,8,4], index: 7, kind: output, shape index: {}]  }
   0x1 LB: > { %s5931_s25 = sadd.s32 4294967295, %s8252_s24   ;;  %p5935_p0 = scmp.ge.s32.totalorder %s8252_s24, 1  ;;  %s8252_s24 = sphi %s8294_s24, %s17_s24  }
   0x2   : > { %p247_p1 = scmp.lt.s32.totalorder %s8252_s24, 3 }
   0x4   : > { %p248_p2 = pnand %p5935_p0, %p247_p1 }
   0x5   : > { %v7910_v0 = vld [vmem:[%s10249_s3 + $0x40] sm:$0xff] (!%p248_p2)   ;;  %v7914_v4 = vld [vmem:[%s10249_s3 + $0x48] sm:$0xff] (!%p248_p2)   ;;  %v7918_v8 = vld [vmem:[%s10249_s3 + $0x50] sm:$0xff] (!%p248_p2)   ;;  %p284_p3 = scmp.lt.s32.totalorder (!%p248_p2), %s5931_s25, 1  ;;  %vm798_vm0 = vsmask.f32 (!%p248_p2), 3328 }
   0x6   : > { %251 = sbr.rel (%p248_p2) target bundleno = 799 (0x31f), region = 48  ;;  %v7911_v1 = vld [vmem:[%s10248_s2 + $0x40] sm:$0xff] (!%p248_p2)   ;;  %7065 = vmatprep.subr.bf16.mxu0 (!%p248_p2), %v7910_v0  ;;  %v7915_v5 = vld [vmem:[%s10248_s2 + $0x48] sm:$0xff] (!%p248_p2)   ;;  %v7919_v9 = vld [vmem:[%s10248_s2 + $0x50] sm:$0xff] (!%p248_p2)   ;;  %vm799_vm1 = vsmask.f32 (!%p248_p2), 7440 }
   0x7   : > { %v7912_v2 = vld [vmem:[%s10249_s3] sm:$0xff] (!%p248_p2)   ;;  %7105 = vmatprep.subr.bf16.mxu1 (!%p248_p2), %v7911_v1  ;;  %v7916_v6 = vld [vmem:[%s10249_s3 + $0x8] sm:$0xff] (!%p248_p2)   ;;  %v7920_v10 = vld [vmem:[%s10249_s3 + $0x10] sm:$0xff] (!%p248_p2)   ;;  %vm1533_vm3 = vcmask (!%p248_p2), 1042432   ;;  %vm1534_vm4 = vcmask (!%p248_p2), 1046532   ;;  %vm5855_vm6 = vcmask (!%p248_p2), 31744  }
   0x8   : > { %v7913_v3 = vld [vmem:[%s10248_s2] sm:$0xff] (!%p248_p2)   ;;  %7066 = vmatpush3.bf16.msra.mxu0 (!%p248_p2), %v7912_v2  ;;  %v7917_v7 = vld [vmem:[%s10248_s2 + $0x8] sm:$0xff] (!%p248_p2)   ;;  %v7921_v11 = vld [vmem:[%s10248_s2 + $0x10] sm:$0xff] (!%p248_p2)  }
   0x9   : > { %7106 = vmatpush3.bf16.msra.mxu1 (!%p248_p2), %v7913_v3  ;;  %7067 = vmatprep.subr.bf16.mxu0 (!%p248_p2), %v7914_v4  ;;  %v7922_v12 = vld [vmem:[%s10249_s3 + $0x58] sm:$0xff] (!%p248_p2)   ;;  %v7926_v16 = vld [vmem:[%s10249_s3 + $0x60] sm:$0xff] (!%p248_p2)   ;;  %v7930_v20 = vld [vmem:[%s10249_s3 + $0x68] sm:$0xff] (!%p248_p2)  }
   0xa   : > { %7107 = vmatprep.subr.bf16.mxu1 (!%p248_p2), %v7915_v5  ;;  %v7923_v13 = vld [vmem:[%s10248_s2 + $0x58] sm:$0xff] (!%p248_p2)   ;;  %v7927_v17 = vld [vmem:[%s10248_s2 + $0x60] sm:$0xff] (!%p248_p2)   ;;  %v7931_v21 = vld [vmem:[%s10248_s2 + $0x68] sm:$0xff] (!%p248_p2)  }
   0xb   : > { %v7924_v14 = vld [vmem:[%s10249_s3 + $0x18] sm:$0xff] (!%p248_p2)   ;;  %v7928_v18 = vld [vmem:[%s10249_s3 + $0x20] sm:$0xff] (!%p248_p2)   ;;  %v7932_v22 = vld [vmem:[%s10249_s3 + $0x28] sm:$0xff] (!%p248_p2)  }
   0xc   : > { %7068 = vmatpush3.bf16.msra.mxu0 (!%p248_p2), %v7916_v6  ;;  %v7925_v15 = vld [vmem:[%s10248_s2 + $0x18] sm:$0xff] (!%p248_p2)   ;;  %v7929_v19 = vld [vmem:[%s10248_s2 + $0x20] sm:$0xff] (!%p248_p2)   ;;  %v7933_v23 = vld [vmem:[%s10248_s2 + $0x28] sm:$0xff] (!%p248_p2)  }
   0xd   : > { %7108 = vmatpush3.bf16.msra.mxu1 %v7917_v7  ;;  %7069 = vmatprep.subr.bf16.mxu0 %v7918_v8  ;;  %s10259_s25 = smov (!%p284_p3, %s5931_s25), 1  ;;  %v7934_v24 = vld [vmem:[%s10249_s3 + $0x70] sm:$0xff]   ;;  %v7938_v28 = vld [vmem:[%s10249_s3 + $0x78] sm:$0xff]   ;;  %v7946_v41 = vld [vmem:[%s10248_s2 + $0xc0] sm:$0xff]  }
   0xe   : > { %7109 = vmatprep.subr.bf16.mxu1 %v7919_v9  ;;  %v7935_v25 = vld [vmem:[%s10248_s2 + $0x70] sm:$0xff]   ;;  %s7901_s13 = smul.u32 160, %s10259_s25  ;;  %v7939_v29 = vld [vmem:[%s10248_s2 + $0x78] sm:$0xff]   ;;  %v7947_v43 = vld [vmem:[%s10249_s3 + $0xc0] sm:$0xff]   ;;  %s7064_s21 = sshll.u32 %s10259_s25, 6 }
   0xf   : > { %v7936_v26 = vld [vmem:[%s10249_s3 + $0x30] sm:$0xff]   ;;  %v7940_v30 = vld [vmem:[%s10249_s3 + $0x38] sm:$0xff]   ;;  %v7948_v45 = vld [vmem:[%s10248_s2 + $0x80] sm:$0xff]   ;;  %s298_s30 = scalar_lea.vmem %s10253_s7, %s7064_s21 }
  0x10   : > { %7070 = vmatpush3.bf16.msra.mxu0 %v7920_v10  ;;  %v7937_v27 = vld [vmem:[%s10248_s2 + $0x30] sm:$0xff]   ;;  %s8402_s26 = scalar_lea.vmem %s10247_s1, %s7901_s13  ;;  %s8407_s29 = scalar_lea.vmem %s10246_s0, %s7901_s13  ;;  %v7941_v31 = vld [vmem:[%s10248_s2 + $0x38] sm:$0xff]   ;;  %v7949_v47 = vld [vmem:[%s10249_s3 + $0x80] sm:$0xff]  }
  0x11   : > { %7110 = vmatpush3.bf16.msra.mxu1 %v7921_v11  ;;  %7071 = vmatprep.subr.bf16.mxu0 %v7922_v12  ;;  %v340_v32 = vld [vmem:[%s8402_s26] sm:$0xff]  ;;  %v8417_v33 = vld [vmem:[%s8402_s26 + $0x10] sm:$0xff]  ;;  %v7950_v49 = vld [vmem:[%s10248_s2 + $0xc8] sm:$0xff]  }
  0x12   : > { %7111 = vmatprep.subr.bf16.mxu1 %v7923_v13  ;;  %v300_v34 = vld [vmem:[%s8407_s29] sm:$0xff]  ;;  %v5940_v35 = vcombine.low %v340_v32, %v8417_v33  ;;  %v5941_v36 = vcombine.high %v340_v32, %v8417_v33  ;;  %v301_v37 = vld [vmem:[%s8407_s29 + $0x10] sm:$0xff]  ;;  %v7951_v52 = vld [vmem:[%s10249_s3 + $0xc8] sm:$0xff]   ;;  %v1164_v0 = vshrl.u32 %v340_v32, 16  ;;  %v1167_v1 = vshll.u32 %v340_v32, 16 }
  0x13   : > { %v802_v38 = vshrl.u32 %v300_v34, 16  ;;  %v5964_v39 = vcombine.low %v300_v34, %v301_v37  ;;  %v5965_v40 = vcombine.high %v300_v34, %v301_v37  ;;  %v805_v42 = vshll.u32 %v300_v34, 16  ;;  %v7952_v54 = vld [vmem:[%s10248_s2 + $0x88] sm:$0xff]   ;;  %v8448_v56 = vld [vmem:[%s8402_s26 + $0x20] sm:$0xff]  ;;  %v8451_v57 = vld [vmem:[%s8402_s26 + $0x30] sm:$0xff] }
  0x14   : > { %7072 = vmatpush3.bf16.msra.mxu0 %v7924_v14  ;;  %548 = vmatprep.mubr.bf16.mxu0 %v5941_v36  ;;  %v816_v48 = vshrl.u32 %v301_v37, 16  ;;  %v819_v51 = vshll.u32 %v301_v37, 16  ;;  %v7953_v55 = vld [vmem:[%s10249_s3 + $0x88] sm:$0xff]   ;;  %v5943_v60 = vcombine.high %v8448_v56, %v8451_v57  ;;  %v302_v61 = vld [vmem:[%s8407_s29 + $0x20] sm:$0xff]  ;;  %v8459_v62 = vld [vmem:[%s8407_s29 + $0x30] sm:$0xff]  ;;  %v5942_v63 = vcombine.low %v8448_v56, %v8451_v57 }
  0x15   : > { %7112 = vmatpush3.bf16.msra.mxu1 %v7925_v15  ;;  %7073 = vmatprep.subr.bf16.mxu0 %v7926_v16  ;;  %v804_v44 = vrot.slane %v802_v38, 4  ;;  %v807_v46 = vrot.slane %v805_v42, 5  ;;  %v5967_v2 = vcombine.high %v302_v61, %v8459_v62  ;;  %v5966_v3 = vcombine.low %v302_v61, %v8459_v62  ;;  %v7958_v4 = vld [vmem:[%s10248_s2 + $0xd0] sm:$0xff]   ;;  %v7962_v13 = vld [vmem:[%s10248_s2 + $0xd8] sm:$0xff]   ;;  %v7970_v34 = vld [vmem:[%s10248_s2 + $0xe0] sm:$0xff]  }
  0x16   : > { %7113 = vmatprep.subr.bf16.mxu1 %v7927_v17  ;;  %749 = vmatprep.mubr.bf16.mxu1 %v5965_v40  ;;  %v818_v53 = vrot.slane %v816_v48, 4  ;;  %v821_v59 = vrot.slane %v819_v51, 5  ;;  %v1178_v6 = vshrl.u32 %v8417_v33, 16  ;;  %v7959_v7 = vld [vmem:[%s10249_s3 + $0xd0] sm:$0xff]   ;;  %v1166_v8 = vrot.slane %v1164_v0, 4  ;;  %v7963_v15 = vld [vmem:[%s10249_s3 + $0xd8] sm:$0xff]   ;;  %vm8618_vm2 = vmor %vm798_vm0, %vm799_vm1 }
  0x17   : > { %v808_v50 = vor.u32 %v807_v46, %v804_v44  ;;  %v7960_v9 = vld [vmem:[%s10248_s2 + $0x90] sm:$0xff]   ;;  %v1169_v12 = vrot.slane %v1167_v1, 5  ;;  %v1181_v17 = vshll.u32 %v8417_v33, 16  ;;  %v7972_v38 = vld [vmem:[%s10248_s2 + $0xa0] sm:$0xff]   ;;  %v847_v44 = vshll.u32 %v8459_v62, 16  ;;  %vm8805_vm5 = vmor %vm1533_vm3, %vm1534_vm4 }
  0x18   : > { %7074 = vmatpush3.bf16.msra.mxu0 %v7928_v18  ;;  %v822_v5 = vor.u32 %v821_v59, %v818_v53  ;;  %v7961_v11 = vld [vmem:[%s10249_s3 + $0x90] sm:$0xff]   ;;  %v1180_v14 = vrot.slane %v1178_v6, 4  ;;  %v7964_v18 = vld [vmem:[%s10248_s2 + $0x98] sm:$0xff]   ;;  %v7973_v40 = vld [vmem:[%s10249_s3 + $0xa0] sm:$0xff]   ;;  %v1206_v59 = vshrl.u32 %v8451_v57, 16 }
  0x19   : > { %7114 = vmatpush3.bf16.msra.mxu1 %v7929_v19  ;;  %7075 = vmatprep.subr.bf16.mxu0 %v7930_v20  ;;  %v8453_v58 = vrot.slane %v808_v50, 4  ;;  %v1170_v16 = vor.u32 %v1169_v12, %v1166_v8  ;;  %v830_v19 = vshrl.u32 %v302_v61, 16  ;;  %v7965_v20 = vld [vmem:[%s10249_s3 + $0x98] sm:$0xff]   ;;  %v849_v48 = vrot.slane %v847_v44, 5  ;;  %v8547_v51 = vld [vmem:[%s8402_s26 + $0x60] sm:$0xff] }
  0x1a   : > { %7115 = vmatprep.subr.bf16.mxu1 %v7931_v21  ;;  %v8475_v10 = vrot.slane %v822_v5, 4  ;;  %v8494_v21 = vld [vmem:[%s8402_s26 + $0x40] sm:$0xff]  ;;  %v1192_v50 = vshrl.u32 %v8448_v56, 16  ;;  %v7984_v5 = vld [vmem:[%s10248_s2 + $0xb0] sm:$0xff]   ;;  %v1208_v6 = vrot.slane %v1206_v59, 4 }
  0x1b   : > { %v8553_v53 = vld [vmem:[%s8407_s29 + $0x60] sm:$0xff] }
  0x1c   : > { %7076 = vmatpush3.bf16.msra.mxu0 %v7932_v22  ;;  %v8496_v22 = vrot.slane %v1170_v16, 4  ;;  %v1194_v0 = vrot.slane %v1192_v50, 4  ;;  %v7988_v16 = vld [vmem:[%s10248_s2 + $0xb8] sm:$0xff]  }
  0x1d   : > { %7116 = vmatpush3.bf16.msra.mxu1 %v7933_v23  ;;  %7077 = vmatprep.subr.bf16.mxu0 %v7934_v24  ;;  %v1183_v23 = vrot.slane %v1181_v17, 5  ;;  %v8499_v24 = vld [vmem:[%s8402_s26 + $0x50] sm:$0xff] }
  0x1e   : > { %7117 = vmatprep.subr.bf16.mxu1 %v7935_v25  ;;  %v8502_v25 = vld [vmem:[%s8407_s29 + $0x40] sm:$0xff]  ;;  %v5944_v32 = vcombine.low %v8494_v21, %v8499_v24 }
  0x1f   : > { %v1184_v36 = vor.u32 %v1183_v23, %v1180_v14  ;;  %v858_v12 = vshrl.u32 %v8502_v25, 16  ;;  %v861_v44 = vshll.u32 %v8502_v25, 16 }
  0x20   : > { %7078 = vmatpush3.bf16.msra.mxu0 %v7936_v26  ;;  %v8505_v26 = vld [vmem:[%s8407_s29 + $0x50] sm:$0xff] }
  0x21   : > { %7118 = vmatpush3.bf16.msra.mxu1 %v7937_v27  ;;  %7079 = vmatprep.subr.bf16.mxu0 %v7938_v28  ;;  %v832_v27 = vrot.slane %v830_v19, 4  ;;  %v833_v28 = vshll.u32 %v302_v61, 16  ;;  %v5968_v33 = vcombine.low %v8502_v25, %v8505_v26  ;;  %v8595_v17 = vrot.slane %v858_v12, 4  ;;  %v8601_v19 = vld [vmem:[%s8407_s29 + $0x8] sm:$0x11]  ;;  %v8000_v12 = vld [vmem:[%s10248_s2 + $0x110] sm:$0xff]  }
  0x22   : > { %7119 = vmatprep.subr.bf16.mxu1 %v7939_v29  ;;  %v844_v29 = vshrl.u32 %v8459_v62, 16  ;;  %v8561_v62 = vld [vmem:[%s8407_s29 + $0x70] sm:$0xff]  ;;  %v875_v59 = vshll.u32 %v8505_v26, 16 }
  0x23   : > { %v835_v37 = vrot.slane %v833_v28, 5  ;;  %v5971_v1 = vcombine.high %v8553_v53, %v8561_v62 }
  0x24   : > { %7080 = vmatpush3.bf16.msra.mxu0 %v7940_v30  ;;  %v5945_v30 = vcombine.high %v8494_v21, %v8499_v24 }
  0x25   : > { %7120 = vmatpush3.bf16.msra.mxu1 %v7941_v31  ;;  %7145 = vmatprep.subr.bf16.mxu0 %v7946_v41  ;;  %v5969_v31 = vcombine.high %v8502_v25, %v8505_v26  ;;  %v8528_v41 = vrot.slane %v1184_v36, 4  ;;  %v836_v42 = vor.u32 %v835_v37, %v832_v27  ;;  %v811_v27 = vshll.u32 %v8601_v19, 16  ;;  %v7990_v36 = vld [vmem:[%s10248_s2 + $0x140] sm:$0xff]   ;;  %v7994_v25 = vld [vmem:[%s10248_s2 + $0x148] sm:$0xff]  }
  0x26   : > { %7185 = vmatprep.subr.bf16.mxu1 %v7947_v43  ;;  %v7974_v43 = vld [vmem:[%s10248_s2 + $0xe8] sm:$0xff]   ;;  %v7991_v37 = vld [vmem:[%s10249_s3 + $0x140] sm:$0xff]  }
  0x27   : > { %549 = vmatmul.mubr.bf16.vlgmr.msra.gmra.mrb[0].mxu0 %v5940_v35  ;;  %v7971_v35 = vld [vmem:[%s10249_s3 + $0xe0] sm:$0xff]   ;;  %v8537_v46 = vrot.slane %v836_v42, 4 }
  0x28   : > { %750 = vmatmul.mubr.bf16.vlgmr.msra.gmra.mrb[0].mxu1 %v5964_v39  ;;  %7146 = vmatpush3.bf16.msra.mxu0 %v7948_v45  ;;  %v846_v39 = vrot.slane %v844_v29, 4  ;;  %v7975_v45 = vld [vmem:[%s10249_s3 + $0xe8] sm:$0xff]  }
  0x29   : > { %7186 = vmatpush3.bf16.msra.mxu1 %v7949_v47  ;;  %7147 = vmatprep.subr.bf16.mxu0 %v7950_v49  ;;  %v7976_v47 = vld [vmem:[%s10248_s2 + $0xa8] sm:$0xff]  }
  0x2a   : > { %7187 = vmatprep.subr.bf16.mxu1 %v7951_v52  ;;  %556 = vmatprep.mubr.bf16.mxu0 %v5943_v60  ;;  %v7977_v49 = vld [vmem:[%s10249_s3 + $0xa8] sm:$0xff]   ;;  %v8550_v52 = vld [vmem:[%s8402_s26 + $0x70] sm:$0xff]  ;;  %v1209_v60 = vshll.u32 %v8451_v57, 16 }
  0x2b   : > { %757 = vmatprep.mubr.bf16.mxu1 %v5967_v2  ;;  %v5947_v61 = vcombine.high %v8547_v51, %v8550_v52  ;;  %v7982_v57 = vld [vmem:[%s10248_s2 + $0xf0] sm:$0xff]   ;;  %v8611_v29 = vld [vmem:[%s8402_s26 + $0x8] sm:$0x11] }
  0x2c   : > { %7148 = vmatpush3.bf16.msra.mxu0 %v7952_v54  ;;  %v850_v54 = vor.u32 %v849_v48, %v846_v39 }
  0x2d   : > { %7188 = vmatpush3.bf16.msra.mxu1 %v7953_v55  ;;  %7149 = vmatprep.subr.bf16.mxu0 %v7958_v4  ;;  %v1195_v55 = vshll.u32 %v8448_v56, 16  ;;  %v5970_v56 = vcombine.low %v8553_v53, %v8561_v62 }
  0x2e   : > { %7189 = vmatprep.subr.bf16.mxu1 %v7959_v7  ;;  %v8572_v2 = vrot.slane %v850_v54, 4  ;;  %v7985_v7 = vld [vmem:[%s10249_s3 + $0xb0] sm:$0xff]   ;;  %v863_v54 = vrot.slane %v861_v44, 5  ;;  %v8726_v44 = vld [vmem:[%s8402_s26 + $0x48] sm:$0x11] }
  0x2f   : > { %557 = vmatmul.mubr.bf16.gmra.mrb[4].mxu0 %v5942_v63  ;;  %v5946_v63 = vcombine.low %v8547_v51, %v8550_v52  ;;  %v1197_v4 = vrot.slane %v1195_v55, 5  ;;  %v7996_v55 = vld [vmem:[%s10248_s2 + $0x108] sm:$0xff]  }
  0x30   : > { %758 = vmatmul.mubr.bf16.gmra.mrb[4].mxu1 %v5966_v3  ;;  %7150 = vmatpush3.bf16.msra.mxu0 %v7960_v9  ;;  %v7983_v3 = vld [vmem:[%s10249_s3 + $0xf0] sm:$0xff]   ;;  %v1211_v9 = vrot.slane %v1209_v60, 5  ;;  %v7997_v60 = vld [vmem:[%s10249_s3 + $0x108] sm:$0xff]  }
  0x31   : > { %7190 = vmatpush3.bf16.msra.mxu1 %v7961_v11  ;;  %7151 = vmatprep.subr.bf16.mxu0 %v7962_v13  ;;  %v1198_v8 = vor.u32 %v1197_v4, %v1194_v0  ;;  %v7986_v11 = vld [vmem:[%s10248_s2 + $0xf8] sm:$0xff]  }
  0x32   : > { %7191 = vmatprep.subr.bf16.mxu1 %v7963_v15  ;;  %564 = vmatprep.mubr.bf16.mxu0 %v5945_v30  ;;  %v7987_v13 = vld [vmem:[%s10249_s3 + $0xf8] sm:$0xff]   ;;  %v1212_v15 = vor.u32 %v1211_v9, %v1208_v6 }
  0x33   : > { %765 = vmatprep.mubr.bf16.mxu1 %v5969_v31  ;;  %v8590_v14 = vrot.slane %v1198_v8, 4  ;;  %v8614_v30 = vld [vmem:[%s8402_s26 + $0x18] sm:$0x11] }
  0x34   : > { %7152 = vmatpush3.bf16.msra.mxu0 %v7964_v18  ;;  %v7989_v18 = vld [vmem:[%s10249_s3 + $0xb8] sm:$0xff]   ;;  %v8606_v23 = vrot.slane %v1212_v15, 4 }
  0x35   : > { %7192 = vmatpush3.bf16.msra.mxu1 %v7965_v20  ;;  %7153 = vmatprep.subr.bf16.mxu0 %v7970_v34  ;;  %v8604_v20 = vld [vmem:[%s8407_s29 + $0x18] sm:$0x11]  ;;  %v813_v34 = vrot.slane %v811_v27, 5 }
  0x36   : > { %7193 = vmatprep.subr.bf16.mxu1 %v7971_v35  ;;  %v825_v28 = vshll.u32 %v8604_v20, 16  ;;  %v8667_v0 = vld [vmem:[%s8407_s29 + $0x38] sm:$0x11] }
  0x37   : > { %565 = vmatmul.mubr.bf16.gmra.mrb[8].mxu0 %v5944_v32  ;;  %v1173_v32 = vshll.u32 %v8611_v29, 16 }
  0x38   : > { %766 = vmatmul.mubr.bf16.gmra.mrb[8].mxu1 %v5968_v33  ;;  %7154 = vmatpush3.bf16.msra.mxu0 %v7972_v38  ;;  %v1187_v33 = vshll.u32 %v8614_v30, 16  ;;  %v827_v35 = vrot.slane %v825_v28, 5 }
  0x39   : > { %7194 = vmatpush3.bf16.msra.mxu1 %v7973_v40  ;;  %7155 = vmatprep.subr.bf16.mxu0 %v7974_v43  ;;  %v1175_v38 = vrot.slane %v1173_v32, 5  ;;  %v814_v40 = vsel %vm8618_vm2, %v8453_v58, %v813_v34  ;;  %v7992_v43 = vld [vmem:[%s10248_s2 + $0x100] sm:$0xff]   ;;  %v8002_v32 = vld [vmem:[%s10248_s2 + $0x158] sm:$0xff]  }
  0x3a   : > { %7195 = vmatprep.subr.bf16.mxu1 %v7975_v45  ;;  %572 = vmatprep.mubr.bf16.mxu0 %v5947_v61  ;;  %v1189_v39 = vrot.slane %v1187_v33, 5  ;;  %v828_v42 = vsel %vm8618_vm2, %v8475_v10, %v827_v35  ;;  %v7993_v10 = vld [vmem:[%s10249_s3 + $0x100] sm:$0xff]   ;;  %v8664_v61 = vld [vmem:[%s8407_s29 + $0x28] sm:$0x11] }
  0x3b   : > { %773 = vmatprep.mubr.bf16.mxu1 %v5971_v1  ;;  %v6020_v45 = vcombine.low %v814_v40, %v828_v42  ;;  %v1176_v48 = vsel %vm8618_vm2, %v8496_v22, %v1175_v38  ;;  %v7995_v22 = vld [vmem:[%s10249_s3 + $0x148] sm:$0xff]   ;;  %v839_v1 = vshll.u32 %v8664_v61, 16 }
  0x3c   : > { %7156 = vmatpush3.bf16.msra.mxu0 %v7976_v47  ;;  %v6021_v47 = vcombine.high %v814_v40, %v828_v42  ;;  %v1190_v58 = vsel %vm8618_vm2, %v8528_v41, %v1189_v39  ;;  %v872_v41 = vshrl.u32 %v8505_v26, 16  ;;  %v7998_v26 = vld [vmem:[%s10248_s2 + $0x150] sm:$0xff]   ;;  %v8718_v38 = vld [vmem:[%s8407_s29 + $0x48] sm:$0x11]  ;;  %v1223_v40 = vshll.u32 %v8494_v21, 16 }
  0x3d   : > { %7196 = vmatpush3.bf16.msra.mxu1 %v7977_v49  ;;  %7157 = vmatprep.subr.bf16.mxu0 %v7982_v57  ;;  %v6076_v49 = vcombine.low %v1176_v48, %v1190_v58  ;;  %v6077_v50 = vcombine.high %v1176_v48, %v1190_v58  ;;  %v853_v57 = vshll.u32 %v8667_v0, 16  ;;  %v8722_v42 = vld [vmem:[%s8407_s29 + $0x58] sm:$0x11] }
  0x3e   : > { %7197 = vmatprep.subr.bf16.mxu1 %v7983_v3  ;;  %v8678_v3 = vld [vmem:[%s8402_s26 + $0x38] sm:$0x11]  ;;  %v881_v48 = vshll.u32 %v8722_v42, 16 }
  0x3f   : > { %573 = vmatmul.mubr.bf16.gmra.mrb[12].mxu0 %v5946_v63  ;;  %v874_v63 = vrot.slane %v872_v41, 4  ;;  %v1215_v6 = vshll.u32 %v8678_v3, 16  ;;  %v855_v8 = vrot.slane %v853_v57, 5  ;;  %v8730_v58 = vld [vmem:[%s8402_s26 + $0x58] sm:$0x11] }
  0x40   : > { %774 = vmatmul.mubr.bf16.gmra.mrb[12].mxu1 %v5970_v56  ;;  %7158 = vmatpush3.bf16.msra.mxu0 %v7984_v5  ;;  %v8671_v56 = vld [vmem:[%s8402_s26 + $0x28] sm:$0x11]  ;;  %v841_v5 = vrot.slane %v839_v1, 5 }
  0x41   : > { %7198 = vmatpush3.bf16.msra.mxu1 %v7985_v7  ;;  %7159 = vmatprep.subr.bf16.mxu0 %v7986_v11  ;;  %v1201_v4 = vshll.u32 %v8671_v56, 16  ;;  %v864_v7 = vor.u32 %v863_v54, %v8595_v17  ;;  %v7999_v11 = vld [vmem:[%s10249_s3 + $0x150] sm:$0xff]   ;;  %v1217_v15 = vrot.slane %v1215_v6, 5  ;;  %v856_v17 = vsel %vm8618_vm2, %v8572_v2, %v855_v8  ;;  %v8003_v2 = vld [vmem:[%s10249_s3 + $0x158] sm:$0xff]   ;;  %v8009_v6 = vld [vmem:[%s10249_s3 + $0x120] sm:$0xff]  }
  0x42   : > { %7199 = vmatprep.subr.bf16.mxu1 %v7987_v13  ;;  %1106 = vmatprep.mubr.bf16.mxu0 %v6021_v47  ;;  %v842_v13 = vsel %vm8618_vm2, %v8537_v46, %v841_v5  ;;  %v1243_v54 = vshll.u32 %v8730_v58, 16 }
  0x43   : > { %1468 = vmatprep.mubr.bf16.mxu1 %v6077_v50  ;;  %v1203_v9 = vrot.slane %v1201_v4, 5  ;;  %v6023_v27 = vcombine.high %v842_v13, %v856_v17  ;;  %v1218_v46 = vsel %vm8618_vm2, %v8606_v23, %v1217_v15  ;;  %v6022_v28 = vcombine.low %v842_v13, %v856_v17  ;;  %v8004_v23 = vld [vmem:[%s10248_s2 + $0x118] sm:$0xff]   ;;  %v8012_v17 = vld [vmem:[%s10248_s2 + $0x128] sm:$0xff]  }
  0x44   : > { %7160 = vmatpush3.bf16.msra.mxu0 %v7988_v16  ;;  %v8001_v16 = vld [vmem:[%s10249_s3 + $0x110] sm:$0xff]   ;;  %v865_v33 = vrot.slane %v864_v7, 4  ;;  %v1234_v50 = vshrl.u32 %v8499_v24, 16  ;;  %v1245_v57 = vrot.slane %v1243_v54, 5 }
  0x45   : > { %7200 = vmatpush3.bf16.msra.mxu1 %v7989_v18  ;;  %7225 = vmatprep.subr.bf16.mxu0 %v7990_v36  ;;  %v1204_v18 = vsel %vm8618_vm2, %v8590_v14, %v1203_v9  ;;  %v877_v14 = vrot.slane %v875_v59, 5  ;;  %v1220_v36 = vshrl.u32 %v8494_v21, 16  ;;  %v8006_v59 = vld [vmem:[%s10248_s2 + $0x160] sm:$0xff]  }
  0x46   : > { %7265 = vmatprep.subr.bf16.mxu1 %v7991_v37  ;;  %v6079_v34 = vcombine.high %v1204_v18, %v1218_v46  ;;  %v6078_v35 = vcombine.low %v1204_v18, %v1218_v46  ;;  %v8005_v37 = vld [vmem:[%s10249_s3 + $0x118] sm:$0xff]   ;;  %v1236_v1 = vrot.slane %v1234_v50, 4  ;;  %v8013_v46 = vld [vmem:[%s10249_s3 + $0x128] sm:$0xff]   ;;  %v8014_v50 = vld [vmem:[%s10248_s2 + $0x170] sm:$0xff]  }
  0x47   : > { %1107 = vmatmul.mubr.bf16.vlgmr.msra.gmra.mrb[16].mxu0 %v6020_v45  ;;  %v878_v39 = vor.u32 %v877_v14, %v874_v63  ;;  %v1222_v45 = vrot.slane %v1220_v36, 4  ;;  %v903_v14 = vshll.u32 %v8561_v62, 16 }
  0x48   : > { %1469 = vmatmul.mubr.bf16.vlgmr.msra.gmra.mrb[16].mxu1 %v6076_v49  ;;  %7226 = vmatpush3.bf16.msra.mxu0 %v7992_v43  ;;  %v867_v43 = vshll.u32 %v8718_v38, 16  ;;  %v1229_v49 = vshll.u32 %v8726_v44, 16 }
  0x49   : > { %7266 = vmatpush3.bf16.msra.mxu1 %v7993_v10  ;;  %7227 = vmatprep.subr.bf16.mxu0 %v7994_v25  ;;  %v879_v47 = vrot.slane %v878_v39, 4  ;;  %v1225_v10 = vrot.slane %v1223_v40, 5  ;;  %v1237_v25 = vshll.u32 %v8499_v24, 16  ;;  %v8008_v24 = vld [vmem:[%s10248_s2 + $0x120] sm:$0xff]   ;;  %v8781_v39 = vld [vmem:[%s8402_s26 + $0x68] sm:$0x11] }
  0x4a   : > { %7267 = vmatprep.subr.bf16.mxu1 %v7995_v22  ;;  %1114 = vmatprep.mubr.bf16.mxu0 %v6023_v27  ;;  %v869_v21 = vrot.slane %v867_v43, 5  ;;  %v883_v22 = vrot.slane %v881_v48, 5  ;;  %v905_v43 = vrot.slane %v903_v14, 5  ;;  %v1257_v48 = vshll.u32 %v8781_v39, 16  ;;  %v1802_v14 = vld [vmem:[%s8402_s26] sm:$0xee] }
  0x4b   : > { %1476 = vmatprep.mubr.bf16.mxu1 %v6079_v34  ;;  %v1226_v41 = vor.u32 %v1225_v10, %v1222_v45  ;;  %v8771_v34 = vld [vmem:[%s8407_s29 + $0x68] sm:$0x11]  ;;  %v8785_v45 = vld [vmem:[%s8402_s26 + $0x78] sm:$0x11] }
  0x4c   : > { %7228 = vmatpush3.bf16.msra.mxu0 %v7996_v55  ;;  %v1231_v55 = vrot.slane %v1229_v49, 5  ;;  %v870_v63 = vsel %vm8618_vm2, %v865_v33, %v869_v21  ;;  %v884_v4 = vsel %vm8618_vm2, %v879_v47, %v883_v22  ;;  %v895_v36 = vshll.u32 %v8771_v34, 16 }
  0x4d   : > { %7268 = vmatpush3.bf16.msra.mxu1 %v7997_v60  ;;  %7229 = vmatprep.subr.bf16.mxu0 %v7998_v26  ;;  %v8007_v60 = vld [vmem:[%s10249_s3 + $0x160] sm:$0xff]   ;;  %v1239_v26 = vrot.slane %v1237_v25, 5  ;;  %v1227_v5 = vrot.slane %v1226_v41, 4  ;;  %v6025_v7 = vcombine.high %v870_v63, %v884_v4  ;;  %v6024_v9 = vcombine.low %v870_v63, %v884_v4  ;;  %v8016_v63 = vld [vmem:[%s10248_s2 + $0x130] sm:$0xff]  }
  0x4e   : > { %7269 = vmatprep.subr.bf16.mxu1 %v7999_v11  ;;  %v8010_v11 = vld [vmem:[%s10248_s2 + $0x168] sm:$0xff]   ;;  %v1251_v47 = vshll.u32 %v8547_v51, 16  ;;  %v897_v10 = vrot.slane %v895_v36, 5  ;;  %v1259_v22 = vrot.slane %v1257_v48, 5  ;;  %v1262_v41 = vshrl.u32 %v8550_v52, 16 }
  0x4f   : > { %1115 = vmatmul.mubr.bf16.gmra.mrb[20].mxu0 %v6022_v28  ;;  %v1240_v8 = vor.u32 %v1239_v26, %v1236_v1  ;;  %v1232_v13 = vsel %vm8618_vm2, %v1227_v5, %v1231_v55  ;;  %v889_v28 = vshll.u32 %v8553_v53, 16 }
  0x50   : > { %7230 = vmatpush3.bf16.msra.mxu0 %v8000_v12  ;;  %1477 = vmatmul.mubr.bf16.gmra.mrb[20].mxu1 %v6078_v35  ;;  %v886_v12 = vshrl.u32 %v8553_v53, 16  ;;  %v8774_v35 = vld [vmem:[%s8407_s29 + $0x78] sm:$0x11]  ;;  %v1248_v53 = vshrl.u32 %v8547_v51, 16  ;;  %v1253_v54 = vrot.slane %v1251_v47, 5  ;;  %v8015_v51 = vld [vmem:[%s10249_s3 + $0x170] sm:$0xff]  }
  0x51   : > { %7270 = vmatpush3.bf16.msra.mxu1 %v8001_v16  ;;  %7231 = vmatprep.subr.bf16.mxu0 %v8002_v32  ;;  %v1241_v15 = vrot.slane %v1240_v8, 4  ;;  %v8011_v16 = vld [vmem:[%s10249_s3 + $0x168] sm:$0xff]   ;;  %v8017_v8 = vld [vmem:[%s10249_s3 + $0x130] sm:$0xff]  }
  0x52   : > { %7271 = vmatprep.subr.bf16.mxu1 %v8003_v2  ;;  %1122 = vmatprep.mubr.bf16.mxu0 %v6025_v7  ;;  %v888_v18 = vrot.slane %v886_v12, 4  ;;  %v900_v2 = vshrl.u32 %v8561_v62, 16  ;;  %v1250_v21 = vrot.slane %v1248_v53, 4 }
  0x53   : > { %v1246_v27 = vsel %vm8618_vm2, %v1241_v15, %v1245_v57  ;;  %v1264_v57 = vrot.slane %v1262_v41, 4  ;;  %v1538_v15 = vrot.slane %v8601_v19, 5  ;;  %v8021_v19 = vld [vmem:[%s10249_s3 + $0x138] sm:$0xff]   ;;  %v1546_v41 = vrot.slane %v8664_v61, 5  ;;  %v8027_v61 = vld [vmem:[%s10249_s3 + $0x1c8] sm:$0xff]  }
  0x54   : > { %7232 = vmatpush3.bf16.msra.mxu0 %v8004_v23  ;;  %v6081_v32 = vcombine.high %v1232_v13, %v1246_v27  ;;  %v6080_v33 = vcombine.low %v1232_v13, %v1246_v27  ;;  %v891_v23 = vrot.slane %v889_v28, 5  ;;  %v902_v40 = vrot.slane %v900_v2, 4  ;;  %v8018_v13 = vld [vmem:[%s10248_s2 + $0x178] sm:$0xff]   ;;  %v1509_v28 = vld [vmem:[%s8407_s29] sm:$0xee] }
  0x55   : > { %7272 = vmatpush3.bf16.msra.mxu1 %v8005_v37  ;;  %7233 = vmatprep.subr.bf16.mxu0 %v8006_v59  ;;  %v909_v37 = vshll.u32 %v8774_v35, 16  ;;  %v1265_v59 = vshll.u32 %v8550_v52, 16  ;;  %v1254_v26 = vor.u32 %v1253_v54, %v1250_v21  ;;  %v6100_v2 = vrot.slane %v1509_v28, 9 }
  0x56   : > { %7273 = vmatprep.subr.bf16.mxu1 %v8007_v60  ;;  %1484 = vmatprep.mubr.bf16.mxu1 %v6081_v32  ;;  %v892_v62 = vor.u32 %v891_v23, %v888_v18  ;;  %v906_v25 = vor.u32 %v905_v43, %v902_v40  ;;  %v1271_v60 = vshll.u32 %v8785_v45, 16  ;;  %v1832_v23 = vrot.slane %v8614_v30, 5  ;;  %v1803_v40 = vld [vmem:[%s8402_s26 + $0x10] sm:$0xee] }
  0x57   : > { %1123 = vmatmul.mubr.bf16.gmra.mrb[24].mxu0 %v6024_v9  ;;  %v911_v49 = vrot.slane %v909_v37, 5  ;;  %v1267_v4 = vrot.slane %v1265_v59, 5  ;;  %v1255_v7 = vrot.slane %v1254_v26, 4  ;;  %v6164_v43 = vrot.slane %v1802_v14, 9  ;;  %v1513_v14 = vld [vmem:[%s8407_s29 + $0x40] sm:$0xee] }
  0x58   : > { %7234 = vmatpush3.bf16.msra.mxu0 %v8008_v24  ;;  %1485 = vmatmul.mubr.bf16.gmra.mrb[24].mxu1 %v6080_v33  ;;  %v893_v55 = vrot.slane %v892_v62, 4  ;;  %v907_v1 = vrot.slane %v906_v25, 4  ;;  %v1273_v5 = vrot.slane %v1271_v60, 5  ;;  %v1510_v33 = vld [vmem:[%s8407_s29 + $0x10] sm:$0xee]  ;;  %v1539_v47 = vsel %vm8805_vm5, %v6100_v2, %v1538_v15  ;;  %v8024_v25 = vld [vmem:[%s10248_s2 + $0x180] sm:$0xff]  }
  0x59   : > { %7274 = vmatpush3.bf16.msra.mxu1 %v8009_v6  ;;  %7235 = vmatprep.subr.bf16.mxu0 %v8010_v11  ;;  %v1268_v11 = vor.u32 %v1267_v4, %v1264_v57  ;;  %v1260_v18 = vsel %vm8618_vm2, %v1255_v7, %v1259_v22  ;;  %v6101_v53 = vrot.slane %v1510_v33, 9  ;;  %v6165_v48 = vrot.slane %v1803_v40, 9  ;;  %v8026_v22 = vld [vmem:[%s10248_s2 + $0x1c8] sm:$0xff]   ;;  %v1512_v57 = vld [vmem:[%s8407_s29 + $0x30] sm:$0xee]  ;;  %v8036_v33 = vld [vmem:[%s10248_s2 + $0x198] sm:$0xff]  }
  0x5a   : > { %7275 = vmatprep.subr.bf16.mxu1 %v8011_v16  ;;  %v898_v24 = vsel %vm8618_vm2, %v893_v55, %v897_v10  ;;  %v912_v6 = vsel %vm8618_vm2, %v907_v1, %v911_v49  ;;  %v8019_v16 = vld [vmem:[%s10249_s3 + $0x178] sm:$0xff]   ;;  %v8023_v10 = vld [vmem:[%s10249_s3 + $0x1c0] sm:$0xff]   ;;  %v1550_v55 = vrot.slane %v8667_v0, 5  ;;  %v8028_v60 = vld [vmem:[%s10248_s2 + $0x188] sm:$0xff]   ;;  %v1840_v26 = vrot.slane %v8678_v3, 5 }
  0x5b   : > { %v6027_v9 = vcombine.high %v898_v24, %v912_v6  ;;  %v6026_v12 = vcombine.low %v898_v24, %v912_v6  ;;  %v1269_v27 = vrot.slane %v1268_v11, 4  ;;  %v1511_v1 = vld [vmem:[%s8407_s29 + $0x20] sm:$0xee]  ;;  %v8030_v0 = vld [vmem:[%s10248_s2 + $0x1d0] sm:$0xff]   ;;  %v1554_v28 = vrot.slane %v8718_v38, 5  ;;  %v8037_v38 = vld [vmem:[%s10249_s3 + $0x198] sm:$0xff]  }
  0x5c   : > { %7236 = vmatpush3.bf16.msra.mxu0 %v8012_v17  ;;  %v1542_v17 = vrot.slane %v8604_v20, 5  ;;  %v1828_v20 = vrot.slane %v8611_v29, 5  ;;  %v8022_v29 = vld [vmem:[%s10248_s2 + $0x1c0] sm:$0xff]   ;;  %v6102_v24 = vrot.slane %v1511_v1, 9  ;;  %v1805_v6 = vld [vmem:[%s8402_s26 + $0x30] sm:$0xee] }
  0x5d   : > { %7276 = vmatpush3.bf16.msra.mxu1 %v8013_v46  ;;  %7237 = vmatprep.subr.bf16.mxu0 %v8014_v50  ;;  %v8020_v46 = vld [vmem:[%s10248_s2 + $0x138] sm:$0xff]   ;;  %v1274_v32 = vsel %vm8618_vm2, %v1269_v27, %v1273_v5  ;;  %v1833_v50 = vsel %vm8805_vm5, %v6165_v48, %v1832_v23  ;;  %v1804_v4 = vld [vmem:[%s8402_s26 + $0x20] sm:$0xee]  ;;  %v8029_v5 = vld [vmem:[%s10249_s3 + $0x188] sm:$0xff]   ;;  %v6167_v3 = vrot.slane %v1805_v6, 9  ;;  %v1844_v2 = vrot.slane %v8726_v44, 5 }
  0x5e   : > { %7277 = vmatprep.subr.bf16.mxu1 %v8015_v51  ;;  %1130 = vmatprep.mubr.bf16.mxu0 %v6027_v9  ;;  %v6083_v36 = vcombine.high %v1260_v18, %v1274_v32  ;;  %v6082_v37 = vcombine.low %v1260_v18, %v1274_v32  ;;  %v1543_v62 = vsel %vm8805_vm5, %v6101_v53, %v1542_v17  ;;  %v8025_v51 = vld [vmem:[%s10249_s3 + $0x180] sm:$0xff]   ;;  %v6166_v7 = vrot.slane %v1804_v4, 9  ;;  %v8031_v9 = vld [vmem:[%s10249_s3 + $0x1d0] sm:$0xff]  }
  0x5f   : > { %1131 = vmatmul.mubr.bf16.gmra.mrb[28].mxu0 %v6026_v12  ;;  %v1829_v30 = vsel %vm8805_vm5, %v6164_v43, %v1828_v20  ;;  %v6140_v49 = vcombine.low %v1539_v47, %v1543_v62  ;;  %v6141_v21 = vcombine.high %v1539_v47, %v1543_v62  ;;  %v1841_v15 = vsel %vm8805_vm5, %v6167_v3, %v1840_v26  ;;  %v8032_v17 = vld [vmem:[%s10248_s2 + $0x190] sm:$0xff]   ;;  %v8035_v20 = vld [vmem:[%s10249_s3 + $0x1d8] sm:$0xff]   ;;  %v1806_v53 = vld [vmem:[%s8402_s26 + $0x40] sm:$0xee] }
  0x60   : > { %7238 = vmatpush3.bf16.msra.mxu0 %v8016_v63  ;;  %1492 = vmatprep.mubr.bf16.mxu1 %v6083_v36  ;;  %v6205_v54 = vcombine.high %v1829_v30, %v1833_v50  ;;  %v6204_v59 = vcombine.low %v1829_v30, %v1833_v50  ;;  %v1836_v63 = vrot.slane %v8671_v56, 5  ;;  %v6103_v56 = vrot.slane %v1512_v57, 9  ;;  %v8033_v27 = vld [vmem:[%s10249_s3 + $0x190] sm:$0xff]   ;;  %v1808_v57 = vld [vmem:[%s8402_s26 + $0x60] sm:$0xee] }
  0x61   : > { %7278 = vmatpush3.bf16.msra.mxu1 %v8017_v8  ;;  %7239 = vmatprep.subr.bf16.mxu0 %v8018_v13  ;;  %v1547_v8 = vsel %vm8805_vm5, %v6102_v24, %v1546_v41  ;;  %v1558_v32 = vrot.slane %v8722_v42, 5  ;;  %v1514_v23 = vld [vmem:[%s8407_s29 + $0x50] sm:$0xee]  ;;  %v1848_v36 = vrot.slane %v8730_v58, 5  ;;  %v6104_v42 = vrot.slane %v1513_v14, 9  ;;  %v8038_v58 = vld [vmem:[%s10248_s2 + $0x1e0] sm:$0xff]  }
  0x62   : > { %7279 = vmatprep.subr.bf16.mxu1 %v8019_v16  ;;  %1493 = vmatmul.mubr.bf16.gmra.mrb[28].mxu1 %v6082_v37  ;;  %v1551_v11 = vsel %vm8805_vm5, %v6103_v56, %v1550_v55  ;;  %v1837_v12 = vsel %vm8805_vm5, %v6166_v7, %v1836_v63  ;;  %v6105_v37 = vrot.slane %v1514_v23, 9  ;;  %v1807_v40 = vld [vmem:[%s8402_s26 + $0x50] sm:$0xee]  ;;  %v6168_v43 = vrot.slane %v1806_v53, 9  ;;  %v1515_v63 = vld [vmem:[%s8407_s29 + $0x60] sm:$0xee] }
  0x63   : > { %1761 = vmatprep.mubr.bf16.mxu0 %v6141_v21  ;;  %2051 = vmatprep.mubr.bf16.mxu1 %v6205_v54  ;;  %v6143_v13 = vcombine.high %v1547_v8, %v1551_v11  ;;  %v6142_v16 = vcombine.low %v1547_v8, %v1551_v11  ;;  %v6207_v18 = vcombine.high %v1837_v12, %v1841_v15  ;;  %v6169_v47 = vrot.slane %v1807_v40, 9  ;;  %v8041_v54 = vld [vmem:[%s10249_s3 + $0x1a0] sm:$0xff]   ;;  %v1809_v24 = vld [vmem:[%s8402_s26 + $0x70] sm:$0xee] }
  0x64   : > { %7240 = vmatpush3.bf16.msra.mxu0 %v8020_v46  ;;  %v6206_v46 = vcombine.low %v1837_v12, %v1841_v15  ;;  %v1555_v44 = vsel %vm8805_vm5, %v6104_v42, %v1554_v28  ;;  %v1559_v48 = vsel %vm8805_vm5, %v6105_v37, %v1558_v32  ;;  %v1845_v62 = vsel %vm8805_vm5, %v6168_v43, %v1844_v2  ;;  %v8046_v56 = vld [vmem:[%s10248_s2 + $0x1f0] sm:$0xff]   ;;  %v8050_v15 = vld [vmem:[%s10248_s2 + $0x1f8] sm:$0xff]   ;;  %v8994_v32 = vld [vmem:[%s8402_s26 + $0x20] sm:$0xff] }
  0x65   : > { %7280 = vmatpush3.bf16.msra.mxu1 %v8021_v19  ;;  %7305 = vmatprep.subr.bf16.mxu0 %v8022_v29  ;;  %v8034_v19 = vld [vmem:[%s10248_s2 + $0x1d8] sm:$0xff]   ;;  %v6145_v29 = vcombine.high %v1555_v44, %v1559_v48  ;;  %v1849_v30 = vsel %vm8805_vm5, %v6169_v47, %v1848_v36  ;;  %v1562_v41 = vrot.slane %v8771_v34, 5  ;;  %v1566_v55 = vrot.slane %v8774_v35, 5  ;;  %v8045_v34 = vld [vmem:[%s10249_s3 + $0x1a8] sm:$0xff]   ;;  %v8047_v3 = vld [vmem:[%s10249_s3 + $0x1f0] sm:$0xff]  }
  0x66   : > { %7345 = vmatprep.subr.bf16.mxu1 %v8023_v10  ;;  %v6144_v10 = vcombine.low %v1555_v44, %v1559_v48  ;;  %v6209_v21 = vcombine.high %v1845_v62, %v1849_v30  ;;  %v6208_v50 = vcombine.low %v1845_v62, %v1849_v30  ;;  %v1856_v1 = vrot.slane %v8785_v45, 5  ;;  %v8048_v12 = vld [vmem:[%s10248_s2 + $0x1b0] sm:$0xff]   ;;  %v8058_v23 = vld [vmem:[%s10248_s2 + $0x240] sm:$0xff]   ;;  %v8062_v47 = vld [vmem:[%s10248_s2 + $0x248] sm:$0xff]  }
  0x67   : > { %1762 = vmatmul.mubr.bf16.vlgmr.msra.gmra.mrb[32].mxu0 %v6140_v49  ;;  %v8039_v49 = vld [vmem:[%s10249_s3 + $0x1e0] sm:$0xff]   ;;  %v6106_v26 = vrot.slane %v1515_v63, 9  ;;  %v6170_v4 = vrot.slane %v1808_v57, 9  ;;  %v8063_v48 = vld [vmem:[%s10249_s3 + $0x248] sm:$0xff]   ;;  %v6230_v30 = vld [vmem:[%s8407_s29 + $0x30] sm:$0xff] }
  0x68   : > { %7306 = vmatpush3.bf16.msra.mxu0 %v8024_v25  ;;  %1769 = vmatprep.mubr.bf16.mxu0 %v6143_v13  ;;  %v8040_v25 = vld [vmem:[%s10248_s2 + $0x1a0] sm:$0xff]   ;;  %v8049_v13 = vld [vmem:[%s10249_s3 + $0x1b0] sm:$0xff]   ;;  %v8065_v62 = vld [vmem:[%s10249_s3 + $0x208] sm:$0xff]  }
  0x69   : > { %7307 = vmatprep.subr.bf16.mxu0 %v8026_v22  ;;  %v8042_v22 = vld [vmem:[%s10248_s2 + $0x1e8] sm:$0xff]   ;;  %v8059_v36 = vld [vmem:[%s10249_s3 + $0x240] sm:$0xff]   ;;  %v8070_v63 = vld [vmem:[%s10248_s2 + $0x250] sm:$0xff]  }
  0x6a   : > { %2052 = vmatmul.mubr.bf16.vlgmr.msra.gmra.mrb[32].mxu1 %v6204_v59  ;;  %v8044_v59 = vld [vmem:[%s10248_s2 + $0x1a8] sm:$0xff]   ;;  %v8060_v37 = vld [vmem:[%s10248_s2 + $0x200] sm:$0xff]   ;;  %v8073_v57 = vld [vmem:[%s10249_s3 + $0x210] sm:$0xff]  }
  0x6b   : > { %7346 = vmatpush3.bf16.msra.mxu1 %v8025_v51  ;;  %2059 = vmatprep.mubr.bf16.mxu1 %v6207_v18  ;;  %v8043_v51 = vld [vmem:[%s10249_s3 + $0x1e8] sm:$0xff]   ;;  %v8053_v18 = vld [vmem:[%s10249_s3 + $0x1b8] sm:$0xff]   ;;  %v8061_v40 = vld [vmem:[%s10249_s3 + $0x200] sm:$0xff]  }
  0x6c   : > { %7308 = vmatpush3.bf16.msra.mxu0 %v8028_v60  ;;  %7347 = vmatprep.subr.bf16.mxu1 %v8027_v61  ;;  %v1852_v60 = vrot.slane %v8781_v39, 5  ;;  %v1516_v61 = vld [vmem:[%s8407_s29 + $0x70] sm:$0xee]  ;;  %v1563_v39 = vsel %vm8805_vm5, %v6106_v26, %v1562_v41 }
  0x6d   : > { %7309 = vmatprep.subr.bf16.mxu0 %v8030_v0  ;;  %v6107_v35 = vrot.slane %v1516_v61, 9  ;;  %v6171_v0 = vrot.slane %v1809_v24, 9  ;;  %v8071_v61 = vld [vmem:[%s10249_s3 + $0x250] sm:$0xff]  }
  0x6e   : > { %v1853_v6 = vsel %vm8805_vm5, %v6170_v4, %v1852_v60  ;;  %v8072_v26 = vld [vmem:[%s10248_s2 + $0x210] sm:$0xff]   ;;  %v8074_v4 = vld [vmem:[%s10248_s2 + $0x258] sm:$0xff]  }
  0x6f   : > { %7348 = vmatpush3.bf16.msra.mxu1 %v8029_v5  ;;  %1770 = vmatmul.mubr.bf16.gmra.mrb[36].mxu0 %v6142_v16  ;;  %v1567_v5 = vsel %vm8805_vm5, %v6107_v35, %v1566_v55  ;;  %v1857_v7 = vsel %vm8805_vm5, %v6171_v0, %v1856_v1  ;;  %v8051_v16 = vld [vmem:[%s10249_s3 + $0x1f8] sm:$0xff]   ;;  %v2990_v1 = vshll.u32 %v8994_v32, 16 }
  0x70   : > { %7310 = vmatpush3.bf16.msra.mxu0 %v8032_v17  ;;  %7349 = vmatprep.subr.bf16.mxu1 %v8031_v9  ;;  %v6147_v45 = vcombine.high %v1563_v39, %v1567_v5  ;;  %v6146_v8 = vcombine.low %v1563_v39, %v1567_v5  ;;  %v6211_v9 = vcombine.high %v1853_v6, %v1857_v7  ;;  %v8052_v17 = vld [vmem:[%s10248_s2 + $0x1b8] sm:$0xff]  }
  0x71   : > { %7311 = vmatprep.subr.bf16.mxu0 %v8034_v19  ;;  %1777 = vmatprep.mubr.bf16.mxu0 %v6145_v29  ;;  %v6210_v11 = vcombine.low %v1853_v6, %v1857_v7  ;;  %v8064_v29 = vld [vmem:[%s10248_s2 + $0x208] sm:$0xff]   ;;  %v8075_v5 = vld [vmem:[%s10249_s3 + $0x258] sm:$0xff]   ;;  %v2639_v7 = vshrl.u32 %v6230_v30, 16 }
  0x72   : > { %2060 = vmatmul.mubr.bf16.gmra.mrb[36].mxu1 %v6206_v46  ;;  %v6229_v46 = vld [vmem:[%s8407_s29 + $0x20] sm:$0xff] }
  0x73   : > { %7350 = vmatpush3.bf16.msra.mxu1 %v8033_v27  ;;  %2067 = vmatprep.mubr.bf16.mxu1 %v6209_v21  ;;  %v6228_v27 = vld [vmem:[%s8407_s29 + $0x10] sm:$0xff]  ;;  %v2625_v42 = vshrl.u32 %v6229_v46, 16  ;;  %v2628_v44 = vshll.u32 %v6229_v46, 16  ;;  %v9024_v21 = vld [vmem:[%s8407_s29 + $0x40] sm:$0xff] }
  0x74   : > { %7312 = vmatpush3.bf16.msra.mxu0 %v8036_v33  ;;  %7351 = vmatprep.subr.bf16.mxu1 %v8035_v20  ;;  %v6268_v19 = vcombine.low %v6228_v27, %v6229_v46  ;;  %v6269_v28 = vcombine.high %v6228_v27, %v6229_v46  ;;  %v6292_v20 = vld [vmem:[%s8402_s26 + $0x10] sm:$0xff]  ;;  %v2611_v33 = vshrl.u32 %v6228_v27, 16  ;;  %v2614_v2 = vshll.u32 %v6228_v27, 16 }
  0x75   : > { %7313 = vmatprep.subr.bf16.mxu0 %v8038_v58  ;;  %v6333_v14 = vcombine.high %v6292_v20, %v8994_v32  ;;  %v2973_v58 = vshrl.u32 %v6292_v20, 16  ;;  %v2976_v41 = vshll.u32 %v6292_v20, 16  ;;  %v6271_v55 = vcombine.high %v6230_v30, %v9024_v21 }
  0x76   : > { %v2613_v53 = vrot.slane %v2611_v33, 4  ;;  %v2616_v43 = vrot.slane %v2614_v2, 5  ;;  %v6270_v60 = vcombine.low %v6230_v30, %v9024_v21  ;;  %v8083_v33 = vld [vmem:[%s10249_s3 + $0x260] sm:$0xff]  }
  0x77   : > { %7352 = vmatpush3.bf16.msra.mxu1 %v8037_v38  ;;  %1778 = vmatmul.mubr.bf16.gmra.mrb[40].mxu0 %v6144_v10  ;;  %v6332_v38 = vcombine.low %v6292_v20, %v8994_v32  ;;  %v2627_v10 = vrot.slane %v2625_v42, 4  ;;  %v2978_v35 = vrot.slane %v2976_v41, 5  ;;  %v8082_v20 = vld [vmem:[%s10248_s2 + $0x260] sm:$0xff]  }
  0x78   : > { %7353 = vmatprep.subr.bf16.mxu1 %v8039_v49  ;;  %7314 = vmatpush3.bf16.msra.mxu0 %v8040_v25  ;;  %v2630_v49 = vrot.slane %v2628_v44, 5  ;;  %v9030_v25 = vld [vmem:[%s8402_s26 + $0x40] sm:$0xff]  ;;  %v8088_v44 = vld [vmem:[%s10248_s2 + $0x228] sm:$0xff]  }
  0x79   : > { %7315 = vmatprep.subr.bf16.mxu0 %v8042_v22  ;;  %1785 = vmatprep.mubr.bf16.mxu0 %v6147_v45  ;;  %v2975_v22 = vrot.slane %v2973_v58, 4  ;;  %v8076_v45 = vld [vmem:[%s10248_s2 + $0x218] sm:$0xff]  }
  0x7a   : > { %2068 = vmatmul.mubr.bf16.gmra.mrb[40].mxu1 %v6208_v50  ;;  %v9027_v50 = vld [vmem:[%s8402_s26 + $0x30] sm:$0xff]  ;;  %v2631_v0 = vor.u32 %v2630_v49, %v2627_v10 }
  0x7b   : > { %7354 = vmatpush3.bf16.msra.mxu1 %v8041_v54  ;;  %2075 = vmatprep.mubr.bf16.mxu1 %v6211_v9  ;;  %v2617_v54 = vor.u32 %v2616_v43, %v2613_v53  ;;  %v2979_v6 = vor.u32 %v2978_v35, %v2975_v22  ;;  %v9067_v9 = vld [vmem:[%s8407_s29 + $0x50] sm:$0xff]  ;;  %v8086_v53 = vld [vmem:[%s10248_s2 + $0x268] sm:$0xff]   ;;  %v3004_v58 = vshll.u32 %v9027_v50, 16 }
  0x7c   : > { %7355 = vmatprep.subr.bf16.mxu1 %v8043_v51  ;;  %7316 = vmatpush3.bf16.msra.mxu0 %v8044_v59  ;;  %v2987_v51 = vshrl.u32 %v8994_v32, 16  ;;  %v6335_v59 = vcombine.high %v9027_v50, %v9030_v25  ;;  %v8087_v43 = vld [vmem:[%s10249_s3 + $0x268] sm:$0xff]   ;;  %v9132_v22 = vld [vmem:[%s8402_s26 + $0x70] sm:$0xff] }
  0x7d   : > { %7317 = vmatprep.subr.bf16.mxu0 %v8046_v56  ;;  %v9052_v24 = vrot.slane %v2617_v54, 4  ;;  %v2992_v56 = vrot.slane %v2990_v1, 5  ;;  %v9092_v32 = vrot.slane %v2979_v6, 4 }
  0x7e   : > { %v2989_v39 = vrot.slane %v2987_v51, 4  ;;  %v3006_v51 = vrot.slane %v3004_v58, 5 }
  0x7f   : > { %7356 = vmatpush3.bf16.msra.mxu1 %v8045_v34  ;;  %1786 = vmatmul.mubr.bf16.gmra.mrb[44].mxu0 %v6146_v8  ;;  %v6334_v34 = vcombine.low %v9027_v50, %v9030_v25  ;;  %v8077_v8 = vld [vmem:[%s10249_s3 + $0x218] sm:$0xff]  }
  0x80   : > { %7357 = vmatprep.subr.bf16.mxu1 %v8047_v3  ;;  %7318 = vmatpush3.bf16.msra.mxu0 %v8048_v12  ;;  %v2642_v3 = vshll.u32 %v6230_v30, 16  ;;  %v9073_v12 = vld [vmem:[%s8402_s26 + $0x50] sm:$0xff]  ;;  %v2993_v2 = vor.u32 %v2992_v56, %v2989_v39  ;;  %v9124_v30 = vld [vmem:[%s8407_s29 + $0x80] sm:$0xff]  ;;  %v2670_v39 = vshll.u32 %v9067_v9, 16 }
  0x81   : > { %7319 = vmatprep.subr.bf16.mxu0 %v8050_v15  ;;  %2302 = vmatprep.mubr.bf16.mxu0 %v6269_v28  ;;  %v2641_v15 = vrot.slane %v2639_v7, 4  ;;  %v8101_v7 = vld [vmem:[%s10249_s3 + $0x238] sm:$0xff]  }
  0x82   : > { %2076 = vmatmul.mubr.bf16.gmra.mrb[44].mxu1 %v6210_v11  ;;  %v9070_v11 = vld [vmem:[%s8407_s29 + $0x60] sm:$0xff]  ;;  %v2644_v46 = vrot.slane %v2642_v3, 5  ;;  %v2672_v3 = vrot.slane %v2670_v39, 5  ;;  %v8111_v39 = vld [vmem:[%s10249_s3 + $0x2d0] sm:$0xff]  }
  0x83   : > { %7358 = vmatpush3.bf16.msra.mxu1 %v8049_v13  ;;  %2553 = vmatprep.mubr.bf16.mxu1 %v6333_v14  ;;  %v9075_v13 = vrot.slane %v2631_v0, 4  ;;  %v6272_v27 = vcombine.low %v9067_v9, %v9070_v11  ;;  %v8084_v14 = vld [vmem:[%s10248_s2 + $0x220] sm:$0xff]   ;;  %v8098_v0 = vld [vmem:[%s10248_s2 + $0x278] sm:$0xff]  }
  0x84   : > { %7359 = vmatprep.subr.bf16.mxu1 %v8051_v16  ;;  %7320 = vmatpush3.bf16.msra.mxu0 %v8052_v17  ;;  %v2653_v16 = vshrl.u32 %v9024_v21, 16  ;;  %v6273_v17 = vcombine.high %v9067_v9, %v9070_v11  ;;  %v2645_v42 = vor.u32 %v2644_v46, %v2641_v15  ;;  %v9189_v46 = vld [vmem:[%s8402_s26 + $0x28] sm:$0x11] }
  0x85   : > { %7385 = vmatprep.subr.bf16.mxu0 %v8058_v23 }
  0x86   : > { %v2655_v23 = vrot.slane %v2653_v16, 4  ;;  %v9126_v10 = vrot.slane %v2645_v42, 4  ;;  %v9182_v16 = vld [vmem:[%s8402_s26 + $0x18] sm:$0x11] }
  0x87   : > { %7360 = vmatpush3.bf16.msra.mxu1 %v8053_v18  ;;  %2303 = vmatmul.mubr.bf16.vlgmr.msra.gmra.mrb[48].mxu0 %v6268_v19  ;;  %v9081_v18 = vld [vmem:[%s8402_s26 + $0x60] sm:$0xff] }
  0x88   : > { %7425 = vmatprep.subr.bf16.mxu1 %v8059_v36  ;;  %7386 = vmatpush3.bf16.msra.mxu0 %v8060_v37  ;;  %v6337_v19 = vcombine.high %v9073_v12, %v9081_v18  ;;  %v6336_v28 = vcombine.low %v9073_v12, %v9081_v18  ;;  %v8085_v36 = vld [vmem:[%s10249_s3 + $0x220] sm:$0xff]   ;;  %v3001_v37 = vshrl.u32 %v9027_v50, 16 }
  0x89   : > { %7387 = vmatprep.subr.bf16.mxu0 %v8062_v47  ;;  %2310 = vmatprep.mubr.bf16.mxu0 %v6271_v55  ;;  %v9111_v47 = vrot.slane %v2993_v2, 4  ;;  %v9135_v50 = vld [vmem:[%s8402_s26 + $0x80] sm:$0xff]  ;;  %v3018_v55 = vshll.u32 %v9030_v25, 16 }
  0x8a   : > { %2554 = vmatmul.mubr.bf16.vlgmr.msra.gmra.mrb[48].mxu1 %v6332_v38  ;;  %v2656_v38 = vshll.u32 %v9024_v21, 16  ;;  %v3003_v49 = vrot.slane %v3001_v37, 4  ;;  %v3015_v21 = vshrl.u32 %v9030_v25, 16  ;;  %v8096_v25 = vld [vmem:[%s10248_s2 + $0x230] sm:$0xff]  }
  0x8b   : > { %7426 = vmatpush3.bf16.msra.mxu1 %v8061_v40  ;;  %2561 = vmatprep.mubr.bf16.mxu1 %v6335_v59  ;;  %v6339_v59 = vcombine.high %v9132_v22, %v9135_v50 }
  0x8c   : > { %7427 = vmatprep.subr.bf16.mxu1 %v8063_v48  ;;  %7388 = vmatpush3.bf16.msra.mxu0 %v8064_v29  ;;  %v2658_v40 = vrot.slane %v2656_v38, 5  ;;  %v8089_v29 = vld [vmem:[%s10249_s3 + $0x228] sm:$0xff]   ;;  %v3017_v35 = vrot.slane %v3015_v21, 4 }
  0x8d   : > { %7389 = vmatprep.subr.bf16.mxu0 %v8070_v63  ;;  %v2667_v63 = vshrl.u32 %v9067_v9, 16  ;;  %v9178_v9 = vld [vmem:[%s8407_s29 + $0x28] sm:$0x11] }
  0x8e   : > { %v2659_v48 = vor.u32 %v2658_v40, %v2655_v23  ;;  %v8107_v21 = vld [vmem:[%s10249_s3 + $0x2c8] sm:$0xff]  }
  0x8f   : > { %7428 = vmatpush3.bf16.msra.mxu1 %v8065_v62  ;;  %2311 = vmatmul.mubr.bf16.gmra.mrb[52].mxu0 %v6270_v60  ;;  %v9121_v62 = vld [vmem:[%s8407_s29 + $0x70] sm:$0xff]  ;;  %v6338_v60 = vcombine.low %v9132_v22, %v9135_v50  ;;  %v2669_v56 = vrot.slane %v2667_v63, 4  ;;  %v9238_v63 = vld [vmem:[%s8402_s26 + $0x38] sm:$0x11] }
  0x90   : > { %7429 = vmatprep.subr.bf16.mxu1 %v8071_v61  ;;  %7390 = vmatpush3.bf16.msra.mxu0 %v8072_v26  ;;  %v6275_v54 = vcombine.high %v9121_v62, %v9124_v30  ;;  %v6274_v41 = vcombine.low %v9121_v62, %v9124_v30  ;;  %v8095_v61 = vld [vmem:[%s10249_s3 + $0x270] sm:$0xff]   ;;  %v9151_v1 = vrot.slane %v2659_v48, 4  ;;  %v3007_v26 = vor.u32 %v3006_v51, %v3003_v49  ;;  %v8109_v51 = vld [vmem:[%s10249_s3 + $0x288] sm:$0xff]  }
  0x91   : > { %7391 = vmatprep.subr.bf16.mxu0 %v8074_v4  ;;  %2318 = vmatprep.mubr.bf16.mxu0 %v6273_v17  ;;  %v3020_v4 = vrot.slane %v3018_v55, 5  ;;  %v8102_v17 = vld [vmem:[%s10248_s2 + $0x2c0] sm:$0xff]   ;;  %v2673_v23 = vor.u32 %v2672_v3, %v2669_v56  ;;  %v9230_v55 = vld [vmem:[%s8407_s29 + $0x38] sm:$0x11] }
  0x92   : > { %2562 = vmatmul.mubr.bf16.gmra.mrb[52].mxu1 %v6334_v34  ;;  %v8094_v34 = vld [vmem:[%s10248_s2 + $0x270] sm:$0xff]   ;;  %v9169_v6 = vrot.slane %v3007_v26, 4  ;;  %v9245_v26 = vld [vmem:[%s8402_s26 + $0x48] sm:$0x11] }
  0x93   : > { %7430 = vmatpush3.bf16.msra.mxu1 %v8073_v57  ;;  %2569 = vmatprep.mubr.bf16.mxu1 %v6337_v19  ;;  %v8097_v57 = vld [vmem:[%s10249_s3 + $0x230] sm:$0xff]   ;;  %v2982_v19 = vshll.u32 %v9182_v16, 16 }
  0x94   : > { %7431 = vmatprep.subr.bf16.mxu1 %v8075_v5  ;;  %7392 = vmatpush3.bf16.msra.mxu0 %v8076_v45  ;;  %v8099_v5 = vld [vmem:[%s10249_s3 + $0x278] sm:$0xff]  }
  0x95   : > { %7393 = vmatprep.subr.bf16.mxu0 %v8082_v20  ;;  %v8100_v45 = vld [vmem:[%s10248_s2 + $0x238] sm:$0xff]   ;;  %v2996_v20 = vshll.u32 %v9189_v46, 16  ;;  %v2984_v38 = vrot.slane %v2982_v19, 5 }
  0x97   : > { %7432 = vmatpush3.bf16.msra.mxu1 %v8077_v8  ;;  %2319 = vmatmul.mubr.bf16.gmra.mrb[56].mxu0 %v6272_v27  ;;  %v9175_v8 = vld [vmem:[%s8407_s29 + $0x18] sm:$0x11]  ;;  %v2634_v27 = vshll.u32 %v9178_v9, 16  ;;  %v2998_v37 = vrot.slane %v2996_v20, 5 }
  0x98   : > { %7433 = vmatprep.subr.bf16.mxu1 %v8083_v33  ;;  %7394 = vmatpush3.bf16.msra.mxu0 %v8084_v14  ;;  %v2620_v15 = vshll.u32 %v9175_v8, 16  ;;  %v3021_v33 = vor.u32 %v3020_v4, %v3017_v35  ;;  %v8103_v14 = vld [vmem:[%s10249_s3 + $0x2c0] sm:$0xff]  }
  0x99   : > { %7395 = vmatprep.subr.bf16.mxu0 %v8086_v53  ;;  %2326 = vmatprep.mubr.bf16.mxu0 %v6275_v54  ;;  %v2636_v2 = vrot.slane %v2634_v27, 5  ;;  %v8104_v53 = vld [vmem:[%s10248_s2 + $0x280] sm:$0xff]   ;;  %v2999_v58 = vsel %vm8618_vm2, %v9111_v47, %v2998_v37  ;;  %v9221_v54 = vrot.slane %v2673_v23, 4  ;;  %v8108_v47 = vld [vmem:[%s10248_s2 + $0x288] sm:$0xff]   ;;  %v3032_v23 = vshll.u32 %v9073_v12, 16 }
  0x9a   : > { %2570 = vmatmul.mubr.bf16.gmra.mrb[56].mxu1 %v6336_v28  ;;  %v2622_v28 = vrot.slane %v2620_v15, 5  ;;  %v3043_v37 = vshrl.u32 %v9081_v18, 16 }
  0x9b   : > { %7434 = vmatpush3.bf16.msra.mxu1 %v8085_v36  ;;  %2577 = vmatprep.mubr.bf16.mxu1 %v6339_v59  ;;  %v2681_v36 = vshrl.u32 %v9070_v11, 16  ;;  %v2637_v40 = vsel %vm8618_vm2, %v9075_v13, %v2636_v2  ;;  %v8106_v13 = vld [vmem:[%s10248_s2 + $0x2c8] sm:$0xff]   ;;  %v2684_v59 = vshll.u32 %v9070_v11, 16  ;;  %v3010_v11 = vshll.u32 %v9238_v63, 16 }
  0x9c   : > { %7435 = vmatprep.subr.bf16.mxu1 %v8087_v43  ;;  %7396 = vmatpush3.bf16.msra.mxu0 %v8088_v44  ;;  %v2623_v42 = vsel %vm8618_vm2, %v9052_v24, %v2622_v28  ;;  %v2985_v43 = vsel %vm8618_vm2, %v9092_v32, %v2984_v38  ;;  %v8105_v44 = vld [vmem:[%s10249_s3 + $0x280] sm:$0xff]   ;;  %v8116_v38 = vld [vmem:[%s10248_s2 + $0x298] sm:$0xff]  }
  0x9d   : > { %7397 = vmatprep.subr.bf16.mxu0 %v8094_v34  ;;  %v6404_v24 = vcombine.low %v2623_v42, %v2637_v40  ;;  %v6405_v48 = vcombine.high %v2623_v42, %v2637_v40  ;;  %v6476_v49 = vcombine.low %v2985_v43, %v2999_v58  ;;  %v6477_v32 = vcombine.high %v2985_v43, %v2999_v58  ;;  %v9284_v42 = vld [vmem:[%s8407_s29 + $0x58] sm:$0x11] }
  0x9e   : > { %v2648_v34 = vshll.u32 %v9230_v55, 16  ;;  %v2686_v28 = vrot.slane %v2684_v59, 5  ;;  %v2676_v40 = vshll.u32 %v9284_v42, 16 }
  0x9f   : > { %7436 = vmatpush3.bf16.msra.mxu1 %v8089_v29  ;;  %2327 = vmatmul.mubr.bf16.gmra.mrb[60].mxu0 %v6274_v41  ;;  %v3022_v29 = vrot.slane %v3021_v33, 4  ;;  %v2683_v41 = vrot.slane %v2681_v36, 4  ;;  %v8115_v33 = vld [vmem:[%s10249_s3 + $0x2d8] sm:$0xff]  }
  0xa0   : > { %7437 = vmatprep.subr.bf16.mxu1 %v8095_v61  ;;  %7398 = vmatpush3.bf16.msra.mxu0 %v8096_v25  ;;  %v8110_v61 = vld [vmem:[%s10248_s2 + $0x2d0] sm:$0xff]   ;;  %v2650_v35 = vrot.slane %v2648_v34, 5  ;;  %v8117_v36 = vld [vmem:[%s10249_s3 + $0x298] sm:$0xff]  }
  0xa1   : > { %7399 = vmatprep.subr.bf16.mxu0 %v8098_v0  ;;  %2915 = vmatprep.mubr.bf16.mxu0 %v6405_v48  ;;  %v3012_v0 = vrot.slane %v3010_v11, 5  ;;  %v3034_v48 = vrot.slane %v3032_v23, 5 }
  0xa2   : > { %2578 = vmatmul.mubr.bf16.gmra.mrb[60].mxu1 %v6338_v60  ;;  %v9234_v60 = vld [vmem:[%s8407_s29 + $0x48] sm:$0x11]  ;;  %v2651_v56 = vsel %vm8618_vm2, %v9126_v10, %v2650_v35 }
  0xa3   : > { %7438 = vmatpush3.bf16.msra.mxu1 %v8097_v57  ;;  %3277 = vmatprep.mubr.bf16.mxu1 %v6477_v32  ;;  %v2662_v25 = vshll.u32 %v9234_v60, 16  ;;  %v3024_v57 = vshll.u32 %v9245_v26, 16  ;;  %v3013_v15 = vsel %vm8618_vm2, %v9169_v6, %v3012_v0 }
  0xa4   : > { %7439 = vmatprep.subr.bf16.mxu1 %v8099_v5  ;;  %7400 = vmatpush3.bf16.msra.mxu0 %v8100_v45  ;;  %v3029_v5 = vshrl.u32 %v9073_v12, 16 }
  0xa5   : > { %7465 = vmatprep.subr.bf16.mxu0 %v8102_v17  ;;  %v2664_v4 = vrot.slane %v2662_v25, 5  ;;  %v3026_v45 = vrot.slane %v3024_v57, 5  ;;  %v8113_v17 = vld [vmem:[%s10249_s3 + $0x290] sm:$0xff]   ;;  %v8120_v25 = vld [vmem:[%s10248_s2 + $0x2a0] sm:$0xff]  }
  0xa6   : > { %v3031_v2 = vrot.slane %v3029_v5, 4  ;;  %v2695_v5 = vshrl.u32 %v9121_v62, 16 }
  0xa7   : > { %7440 = vmatpush3.bf16.msra.mxu1 %v8101_v7  ;;  %2916 = vmatmul.mubr.bf16.vlgmr.msra.gmra.mrb[64].mxu0 %v6404_v24  ;;  %v8112_v7 = vld [vmem:[%s10248_s2 + $0x290] sm:$0xff]   ;;  %v2665_v3 = vsel %vm8618_vm2, %v9151_v1, %v2664_v4  ;;  %v3027_v27 = vsel %vm8618_vm2, %v3022_v29, %v3026_v45  ;;  %v8114_v1 = vld [vmem:[%s10248_s2 + $0x2d8] sm:$0xff]   ;;  %v9296_v24 = vld [vmem:[%s8402_s26 + $0x68] sm:$0x11]  ;;  %v2678_v29 = vrot.slane %v2676_v40, 5 }
  0xa8   : > { %7505 = vmatprep.subr.bf16.mxu1 %v8103_v14  ;;  %7466 = vmatpush3.bf16.msra.mxu0 %v8104_v53  ;;  %v6407_v10 = vcombine.high %v2651_v56, %v2665_v3  ;;  %v6406_v19 = vcombine.low %v2651_v56, %v2665_v3  ;;  %v6479_v20 = vcombine.high %v3013_v15, %v3027_v27  ;;  %v9288_v53 = vld [vmem:[%s8407_s29 + $0x68] sm:$0x11]  ;;  %v3052_v32 = vshll.u32 %v9296_v24, 16 }
  0xa9   : > { %7467 = vmatprep.subr.bf16.mxu0 %v8106_v13  ;;  %v6478_v6 = vcombine.low %v3013_v15, %v3027_v27  ;;  %v2687_v14 = vor.u32 %v2686_v28, %v2683_v41  ;;  %v2690_v12 = vshll.u32 %v9288_v53, 16  ;;  %v3045_v13 = vrot.slane %v3043_v37, 4  ;;  %v8124_v3 = vld [vmem:[%s10248_s2 + $0x2a8] sm:$0xff]   ;;  %v9336_v27 = vld [vmem:[%s8407_s29 + $0x78] sm:$0x11] }
  0xaa   : > { %3278 = vmatmul.mubr.bf16.vlgmr.msra.gmra.mrb[64].mxu1 %v6476_v49  ;;  %2923 = vmatprep.mubr.bf16.mxu0 %v6407_v10  ;;  %v3046_v49 = vshll.u32 %v9081_v18, 16  ;;  %v3035_v41 = vor.u32 %v3034_v48, %v3031_v2  ;;  %v2679_v59 = vsel %vm8618_vm2, %v9221_v54, %v2678_v29  ;;  %v8119_v18 = vld [vmem:[%s10249_s3 + $0x2e0] sm:$0xff]   ;;  %v2697_v15 = vrot.slane %v2695_v5, 4  ;;  %v8125_v10 = vld [vmem:[%s10249_s3 + $0x2a8] sm:$0xff]   ;;  %v9345_v2 = vld [vmem:[%s8402_s26 + $0x78] sm:$0x11] }
  0xab   : > { %7506 = vmatpush3.bf16.msra.mxu1 %v8105_v44  ;;  %3285 = vmatprep.mubr.bf16.mxu1 %v6479_v20  ;;  %v2688_v43 = vrot.slane %v2687_v14, 4  ;;  %v9292_v44 = vld [vmem:[%s8402_s26 + $0x58] sm:$0x11]  ;;  %v8121_v54 = vld [vmem:[%s10249_s3 + $0x2a0] sm:$0xff]   ;;  %v9340_v20 = vld [vmem:[%s8407_s29 + $0x88] sm:$0x11] }
  0xac   : > { %7507 = vmatprep.subr.bf16.mxu1 %v8107_v21  ;;  %7468 = vmatpush3.bf16.msra.mxu0 %v8108_v47  ;;  %v3038_v58 = vshll.u32 %v9292_v44, 16  ;;  %v8118_v21 = vld [vmem:[%s10248_s2 + $0x2e0] sm:$0xff]   ;;  %v2692_v47 = vrot.slane %v2690_v12, 5  ;;  %v3048_v34 = vrot.slane %v3046_v49, 5  ;;  %v3036_v35 = vrot.slane %v3035_v41, 4 }
  0xad   : > { %7469 = vmatprep.subr.bf16.mxu0 %v8110_v61  ;;  %v3054_v61 = vrot.slane %v3052_v32, 5  ;;  %v2712_v14 = vshll.u32 %v9124_v30, 16  ;;  %v2718_v23 = vshll.u32 %v9340_v20, 16  ;;  %v3066_v12 = vshll.u32 %v9345_v2, 16 }
  0xae   : > { %v2693_v11 = vsel %vm8618_vm2, %v2688_v43, %v2692_v47  ;;  %v3049_v4 = vor.u32 %v3048_v34, %v3045_v13  ;;  %v3060_v43 = vshll.u32 %v9132_v22, 16  ;;  %v3074_v47 = vshll.u32 %v9135_v50, 16  ;;  %v8128_v34 = vld [vmem:[%s10248_s2 + $0x2b0] sm:$0xff]  }
  0xaf   : > { %7508 = vmatpush3.bf16.msra.mxu1 %v8109_v51  ;;  %2924 = vmatmul.mubr.bf16.gmra.mrb[68].mxu0 %v6406_v19  ;;  %v3040_v51 = vrot.slane %v3038_v58, 5  ;;  %v6409_v57 = vcombine.high %v2679_v59, %v2693_v11  ;;  %v6408_v0 = vcombine.low %v2679_v59, %v2693_v11  ;;  %v2698_v19 = vshll.u32 %v9121_v62, 16  ;;  %v8127_v59 = vld [vmem:[%s10249_s3 + $0x2f0] sm:$0xff]  }
  0xb0   : > { %7509 = vmatprep.subr.bf16.mxu1 %v8111_v39  ;;  %7470 = vmatpush3.bf16.msra.mxu0 %v8112_v7  ;;  %v8122_v39 = vld [vmem:[%s10248_s2 + $0x2e8] sm:$0xff]   ;;  %v3050_v45 = vrot.slane %v3049_v4, 4  ;;  %v3057_v62 = vshrl.u32 %v9132_v22, 16  ;;  %v2714_v58 = vrot.slane %v2712_v14, 5  ;;  %v2720_v13 = vrot.slane %v2718_v23, 5  ;;  %v8129_v4 = vld [vmem:[%s10249_s3 + $0x2b0] sm:$0xff]  }
  0xb1   : > { %7471 = vmatprep.subr.bf16.mxu0 %v8114_v1  ;;  %2931 = vmatprep.mubr.bf16.mxu0 %v6409_v57  ;;  %v3041_v56 = vsel %vm8618_vm2, %v3036_v35, %v3040_v51  ;;  %v8123_v7 = vld [vmem:[%s10249_s3 + $0x2e8] sm:$0xff]   ;;  %v3062_v49 = vrot.slane %v3060_v43, 5  ;;  %v3068_v32 = vrot.slane %v3066_v12, 5  ;;  %v3344_v5 = vrot.slane %v9175_v8, 5  ;;  %v8134_v12 = vld [vmem:[%s10248_s2 + $0x340] sm:$0xff]  }
  0xb2   : > { %3286 = vmatmul.mubr.bf16.gmra.mrb[68].mxu1 %v6478_v6  ;;  %v2704_v6 = vshll.u32 %v9336_v27, 16  ;;  %v3059_v29 = vrot.slane %v3057_v62, 4  ;;  %v3348_v8 = vrot.slane %v9178_v9, 5  ;;  %v6572_v62 = vld [vmem:[%s8402_s26 + $0x10] sm:$0xee]  ;;  %v3638_v43 = vrot.slane %v9189_v46, 5 }
  0xb3   : > { %7510 = vmatpush3.bf16.msra.mxu1 %v8113_v17  ;;  %v3055_v17 = vsel %vm8618_vm2, %v3050_v45, %v3054_v61  ;;  %v6573_v9 = vld [vmem:[%s8402_s26 + $0x20] sm:$0xee] }
  0xb4   : > { %7511 = vmatprep.subr.bf16.mxu1 %v8115_v33  ;;  %7472 = vmatpush3.bf16.msra.mxu0 %v8116_v38  ;;  %v6481_v1 = vcombine.high %v3041_v56, %v3055_v17  ;;  %v6480_v28 = vcombine.low %v3041_v56, %v3055_v17  ;;  %v2709_v33 = vshrl.u32 %v9124_v30, 16  ;;  %v2700_v38 = vrot.slane %v2698_v19, 5  ;;  %v8126_v30 = vld [vmem:[%s10248_s2 + $0x2f0] sm:$0xff]   ;;  %v8132_v17 = vld [vmem:[%s10248_s2 + $0x2b8] sm:$0xff]   ;;  %v8135_v46 = vld [vmem:[%s10249_s3 + $0x340] sm:$0xff]  }
  0xb5   : > { %7473 = vmatprep.subr.bf16.mxu0 %v8118_v21  ;;  %v2706_v37 = vrot.slane %v2704_v6, 5  ;;  %v3071_v21 = vshrl.u32 %v9135_v50, 16  ;;  %v3063_v61 = vor.u32 %v3062_v49, %v3059_v29  ;;  %v8133_v19 = vld [vmem:[%s10249_s3 + $0x2b8] sm:$0xff]   ;;  %v3634_v6 = vrot.slane %v9182_v16, 5 }
  0xb6   : > { %3293 = vmatprep.mubr.bf16.mxu1 %v6481_v1  ;;  %v2711_v40 = vrot.slane %v2709_v33, 4  ;;  %v2701_v48 = vor.u32 %v2700_v38, %v2697_v15  ;;  %v8131_v15 = vld [vmem:[%s10249_s3 + $0x2f8] sm:$0xff]   ;;  %v6500_v1 = vld [vmem:[%s8407_s29 + $0x10] sm:$0xee] }
  0xb7   : > { %7512 = vmatpush3.bf16.msra.mxu1 %v8117_v36  ;;  %2932 = vmatmul.mubr.bf16.gmra.mrb[72].mxu0 %v6408_v0  ;;  %v9350_v36 = vld [vmem:[%s8402_s26 + $0x88] sm:$0x11]  ;;  %v6508_v14 = vrot.slane %v6500_v1, 9  ;;  %v3372_v1 = vrot.slane %v9340_v20, 5 }
  0xb8   : > { %7513 = vmatprep.subr.bf16.mxu1 %v8119_v18  ;;  %7474 = vmatpush3.bf16.msra.mxu0 %v8120_v25  ;;  %v2702_v41 = vrot.slane %v2701_v48, 4  ;;  %v2715_v51 = vor.u32 %v2714_v58, %v2711_v40  ;;  %v3080_v22 = vshll.u32 %v9350_v36, 16  ;;  %v3073_v18 = vrot.slane %v3071_v21, 4 }
  0xb9   : > { %7475 = vmatprep.subr.bf16.mxu0 %v8122_v39  ;;  %v3076_v25 = vrot.slane %v3074_v47, 5  ;;  %v8130_v39 = vld [vmem:[%s10248_s2 + $0x2f8] sm:$0xff]   ;;  %v6581_v40 = vrot.slane %v6573_v9, 9  ;;  %v3345_v16 = vsel %vm8805_vm5, %v6508_v14, %v3344_v5  ;;  %v3352_v21 = vrot.slane %v9230_v55, 5  ;;  %v8137_v47 = vld [vmem:[%s10249_s3 + $0x300] sm:$0xff]  }
  0xba   : > { %3294 = vmatmul.mubr.bf16.gmra.mrb[72].mxu1 %v6480_v28  ;;  %v2707_v11 = vsel %vm8618_vm2, %v2702_v41, %v2706_v37  ;;  %v2716_v50 = vrot.slane %v2715_v51, 4  ;;  %v3082_v35 = vrot.slane %v3080_v22, 5  ;;  %v6501_v28 = vld [vmem:[%s8407_s29 + $0x20] sm:$0xee]  ;;  %v6580_v37 = vrot.slane %v6572_v62, 9  ;;  %v8138_v41 = vld [vmem:[%s10248_s2 + $0x348] sm:$0xff]  }
  0xbb   : > { %7514 = vmatpush3.bf16.msra.mxu1 %v8121_v54  ;;  %v3064_v54 = vrot.slane %v3063_v61, 4  ;;  %v3077_v57 = vor.u32 %v3076_v25, %v3073_v18  ;;  %v6509_v23 = vrot.slane %v6501_v28, 9  ;;  %v3639_v29 = vsel %vm8805_vm5, %v6581_v40, %v3638_v43  ;;  %v6502_v18 = vld [vmem:[%s8407_s29 + $0x30] sm:$0xee]  ;;  %v6503_v25 = vld [vmem:[%s8407_s29 + $0x40] sm:$0xee] }
  0xbc   : > { %7515 = vmatprep.subr.bf16.mxu1 %v8123_v7  ;;  %7476 = vmatpush3.bf16.msra.mxu0 %v8124_v3  ;;  %v2721_v0 = vsel %vm8618_vm2, %v2716_v50, %v2720_v13  ;;  %v3635_v13 = vsel %vm8805_vm5, %v6580_v37, %v3634_v6  ;;  %v3356_v51 = vrot.slane %v9234_v60, 5  ;;  %v3642_v55 = vrot.slane %v9238_v63, 5  ;;  %v8141_v50 = vld [vmem:[%s10249_s3 + $0x308] sm:$0xff]   ;;  %v8147_v6 = vld [vmem:[%s10249_s3 + $0x358] sm:$0xff]   ;;  %v6504_v62 = vld [vmem:[%s8407_s29 + $0x50] sm:$0xee] }
  0xbd   : > { %7477 = vmatprep.subr.bf16.mxu0 %v8126_v30  ;;  %v6411_v56 = vcombine.high %v2707_v11, %v2721_v0  ;;  %v3069_v45 = vsel %vm8618_vm2, %v3064_v54, %v3068_v32  ;;  %v3078_v7 = vrot.slane %v3077_v57, 4  ;;  %v6410_v3 = vcombine.low %v2707_v11, %v2721_v0  ;;  %v8136_v32 = vld [vmem:[%s10248_s2 + $0x300] sm:$0xff]   ;;  %v6574_v54 = vld [vmem:[%s8402_s26 + $0x30] sm:$0xee] }
  0xbe   : > { %v3349_v48 = vsel %vm8805_vm5, %v6509_v23, %v3348_v8  ;;  %v6621_v49 = vcombine.high %v3635_v13, %v3639_v29  ;;  %v6620_v22 = vcombine.low %v3635_v13, %v3639_v29  ;;  %v3646_v61 = vrot.slane %v9245_v26, 5  ;;  %v6575_v57 = vld [vmem:[%s8402_s26 + $0x40] sm:$0xee]  ;;  %v8149_v23 = vld [vmem:[%s10249_s3 + $0x318] sm:$0xff]  }
  0xbf   : > { %7516 = vmatpush3.bf16.msra.mxu1 %v8125_v10  ;;  %2939 = vmatprep.mubr.bf16.mxu0 %v6411_v56  ;;  %v3083_v10 = vsel %vm8618_vm2, %v3078_v7, %v3082_v35  ;;  %v6549_v58 = vcombine.high %v3345_v16, %v3349_v48  ;;  %v6548_v30 = vcombine.low %v3345_v16, %v3349_v48  ;;  %v3360_v60 = vrot.slane %v9284_v42, 5  ;;  %v8143_v7 = vld [vmem:[%s10249_s3 + $0x350] sm:$0xff]   ;;  %v6505_v9 = vld [vmem:[%s8407_s29 + $0x60] sm:$0xee] }
  0xc0   : > { %7517 = vmatprep.subr.bf16.mxu1 %v8127_v59  ;;  %7478 = vmatpush3.bf16.msra.mxu0 %v8128_v34  ;;  %v6483_v33 = vcombine.high %v3069_v45, %v3083_v10  ;;  %v6482_v38 = vcombine.low %v3069_v45, %v3083_v10  ;;  %v8139_v59 = vld [vmem:[%s10249_s3 + $0x348] sm:$0xff]   ;;  %v3364_v11 = vrot.slane %v9288_v53, 5  ;;  %v6510_v63 = vrot.slane %v6502_v18, 9  ;;  %v8142_v53 = vld [vmem:[%s10248_s2 + $0x350] sm:$0xff]   ;;  %v6577_v16 = vld [vmem:[%s8402_s26 + $0x60] sm:$0xee] }
  0xc1   : > { %7479 = vmatprep.subr.bf16.mxu0 %v8130_v39  ;;  %2940 = vmatmul.mubr.bf16.gmra.mrb[76].mxu0 %v6410_v3  ;;  %v8140_v34 = vld [vmem:[%s10248_s2 + $0x308] sm:$0xff]   ;;  %v6511_v35 = vrot.slane %v6503_v25, 9  ;;  %v6583_v0 = vrot.slane %v6575_v57, 9  ;;  %v3650_v39 = vrot.slane %v9292_v44, 5  ;;  %v3654_v3 = vrot.slane %v9296_v24, 5  ;;  %v8144_v44 = vld [vmem:[%s10248_s2 + $0x310] sm:$0xff]  }
  0xc2   : > { %3301 = vmatprep.mubr.bf16.mxu1 %v6483_v33  ;;  %3567 = vmatprep.mubr.bf16.mxu0 %v6549_v58  ;;  %v3353_v26 = vsel %vm8805_vm5, %v6510_v63, %v3352_v21  ;;  %v3368_v8 = vrot.slane %v9336_v27, 5  ;;  %v8146_v24 = vld [vmem:[%s10248_s2 + $0x358] sm:$0xff]   ;;  %v3658_v28 = vrot.slane %v9345_v2, 5  ;;  %v3662_v33 = vrot.slane %v9350_v36, 5  ;;  %v8153_v18 = vld [vmem:[%s10249_s3 + $0x320] sm:$0xff]   ;;  %v8155_v63 = vld [vmem:[%s10249_s3 + $0x368] sm:$0xff]  }
  0xc3   : > { %7518 = vmatpush3.bf16.msra.mxu1 %v8129_v4  ;;  %v6582_v4 = vrot.slane %v6574_v54, 9  ;;  %v3357_v42 = vsel %vm8805_vm5, %v6511_v35, %v3356_v51  ;;  %v3647_v45 = vsel %vm8805_vm5, %v6583_v0, %v3646_v61  ;;  %v6512_v40 = vrot.slane %v6504_v62, 9  ;;  %v8160_v2 = vld [vmem:[%s10248_s2 + $0x330] sm:$0xff]  }
  0xc4   : > { %7519 = vmatprep.subr.bf16.mxu1 %v8131_v15  ;;  %7480 = vmatpush3.bf16.msra.mxu0 %v8132_v17  ;;  %v6551_v5 = vcombine.high %v3353_v26, %v3357_v42  ;;  %v6550_v17 = vcombine.low %v3353_v26, %v3357_v42  ;;  %v6513_v43 = vrot.slane %v6505_v9, 9  ;;  %v6585_v58 = vrot.slane %v6577_v16, 9  ;;  %v8157_v42 = vld [vmem:[%s10249_s3 + $0x328] sm:$0xff]   ;;  %v8161_v36 = vld [vmem:[%s10249_s3 + $0x330] sm:$0xff]   ;;  %v8163_v16 = vld [vmem:[%s10249_s3 + $0x378] sm:$0xff]  }
  0xc5   : > { %3302 = vmatmul.mubr.bf16.gmra.mrb[76].mxu1 %v6482_v38  ;;  %7545 = vmatprep.subr.bf16.mxu0 %v8134_v12  ;;  %v3643_v56 = vsel %vm8805_vm5, %v6582_v4, %v3642_v55  ;;  %v8148_v38 = vld [vmem:[%s10248_s2 + $0x318] sm:$0xff]   ;;  %v6576_v12 = vld [vmem:[%s8402_s26 + $0x50] sm:$0xee]  ;;  %v3361_v13 = vsel %vm8805_vm5, %v6512_v40, %v3360_v60  ;;  %v8152_v55 = vld [vmem:[%s10248_s2 + $0x320] sm:$0xff]  }
  0xc6   : > { %3857 = vmatprep.mubr.bf16.mxu1 %v6621_v49  ;;  %v6623_v15 = vcombine.high %v3643_v56, %v3647_v45  ;;  %v6622_v10 = vcombine.low %v3643_v56, %v3647_v45  ;;  %v6584_v48 = vrot.slane %v6576_v12, 9  ;;  %v3365_v29 = vsel %vm8805_vm5, %v6513_v43, %v3364_v11  ;;  %v8154_v11 = vld [vmem:[%s10248_s2 + $0x368] sm:$0xff]   ;;  %v8162_v40 = vld [vmem:[%s10248_s2 + $0x378] sm:$0xff]  }
  0xc7   : > { %7520 = vmatpush3.bf16.msra.mxu1 %v8133_v19  ;;  %v8145_v19 = vld [vmem:[%s10249_s3 + $0x310] sm:$0xff]   ;;  %v6553_v49 = vcombine.high %v3361_v13, %v3365_v29  ;;  %v3655_v21 = vsel %vm8805_vm5, %v6585_v58, %v3654_v3  ;;  %v8156_v4 = vld [vmem:[%s10248_s2 + $0x328] sm:$0xff]   ;;  %v6579_v3 = vld [vmem:[%s8402_s26 + $0x80] sm:$0xee] }
  0xc8   : > { %7585 = vmatprep.subr.bf16.mxu1 %v8135_v46  ;;  %v8150_v46 = vld [vmem:[%s10248_s2 + $0x360] sm:$0xff]  }
  0xc9   : > { %3568 = vmatmul.mubr.bf16.vlgmr.msra.gmra.mrb[80].mxu0 %v6548_v30 }
  0xca   : > { %7546 = vmatpush3.bf16.msra.mxu0 %v8136_v32  ;;  %3575 = vmatprep.mubr.bf16.mxu0 %v6551_v5  ;;  %v3651_v32 = vsel %vm8805_vm5, %v6584_v48, %v3650_v39  ;;  %v6507_v39 = vld [vmem:[%s8407_s29 + $0x80] sm:$0xee] }
  0xcb   : > { %7547 = vmatprep.subr.bf16.mxu0 %v8138_v41  ;;  %v8151_v41 = vld [vmem:[%s10249_s3 + $0x360] sm:$0xff]   ;;  %v6515_v45 = vrot.slane %v6507_v39, 9  ;;  %v8174_v39 = vld [vmem:[%s10248_s2 + $0x3c8] sm:$0xff]  }
  0xcd   : > { %3858 = vmatmul.mubr.bf16.vlgmr.msra.gmra.mrb[80].mxu1 %v6620_v22  ;;  %v6625_v22 = vcombine.high %v3651_v32, %v3655_v21 }
  0xce   : > { %7586 = vmatpush3.bf16.msra.mxu1 %v8137_v47  ;;  %7548 = vmatpush3.bf16.msra.mxu0 %v8140_v34  ;;  %v6552_v47 = vcombine.low %v3361_v13, %v3365_v29  ;;  %v8164_v13 = vld [vmem:[%s10248_s2 + $0x338] sm:$0xff]  }
  0xcf   : > { %7587 = vmatprep.subr.bf16.mxu1 %v8139_v59  ;;  %7549 = vmatprep.subr.bf16.mxu0 %v8142_v53  ;;  %v6624_v59 = vcombine.low %v3651_v32, %v3655_v21  ;;  %v6506_v53 = vld [vmem:[%s8407_s29 + $0x70] sm:$0xee] }
  0xd0   : > { %3865 = vmatprep.mubr.bf16.mxu1 %v6623_v15  ;;  %v6514_v56 = vrot.slane %v6506_v53, 9  ;;  %v6645_v32 = vld [vmem:[%s8407_s29 + $0x30] sm:$0xff] }
  0xd1   : > { %3576 = vmatmul.mubr.bf16.gmra.mrb[84].mxu0 %v6550_v17 }
  0xd2   : > { %7588 = vmatpush3.bf16.msra.mxu1 %v8141_v50  ;;  %7550 = vmatpush3.bf16.msra.mxu0 %v8144_v44  ;;  %v6587_v44 = vrot.slane %v6579_v3, 9  ;;  %v8177_v3 = vld [vmem:[%s10249_s3 + $0x388] sm:$0xff]  }
  0xd3   : > { %7589 = vmatprep.subr.bf16.mxu1 %v8143_v7  ;;  %7551 = vmatprep.subr.bf16.mxu0 %v8146_v24  ;;  %v6578_v7 = vld [vmem:[%s8402_s26 + $0x70] sm:$0xee] }
  0xd4   : > { %3583 = vmatprep.mubr.bf16.mxu0 %v6553_v49  ;;  %v6586_v17 = vrot.slane %v6578_v7, 9  ;;  %v8158_v24 = vld [vmem:[%s10248_s2 + $0x370] sm:$0xff]   ;;  %v3663_v27 = vsel %vm8805_vm5, %v6587_v44, %v3662_v33  ;;  %v6644_v49 = vld [vmem:[%s8407_s29 + $0x20] sm:$0xff] }
  0xd5   : > { %3866 = vmatmul.mubr.bf16.gmra.mrb[84].mxu1 %v6622_v10  ;;  %v3369_v10 = vsel %vm8805_vm5, %v6514_v56, %v3368_v8  ;;  %v8159_v8 = vld [vmem:[%s10249_s3 + $0x370] sm:$0xff]   ;;  %v8175_v56 = vld [vmem:[%s10249_s3 + $0x3c8] sm:$0xff]  }
  0xd6   : > { %7590 = vmatpush3.bf16.msra.mxu1 %v8145_v19  ;;  %7552 = vmatpush3.bf16.msra.mxu0 %v8148_v38  ;;  %v3373_v19 = vsel %vm8805_vm5, %v6515_v45, %v3372_v1  ;;  %v8176_v45 = vld [vmem:[%s10248_s2 + $0x388] sm:$0xff]  }
  0xd7   : > { %7591 = vmatprep.subr.bf16.mxu1 %v8147_v6  ;;  %7553 = vmatprep.subr.bf16.mxu0 %v8150_v46  ;;  %v6555_v38 = vcombine.high %v3369_v10, %v3373_v19  ;;  %v6554_v20 = vcombine.low %v3369_v10, %v3373_v19  ;;  %v9604_v19 = vld [vmem:[%s8407_s29 + $0x50] sm:$0xff] }
  0xd8   : > { %3873 = vmatprep.mubr.bf16.mxu1 %v6625_v22  ;;  %v6708_v22 = vld [vmem:[%s8402_s26 + $0x20] sm:$0xff] }
  0xd9   : > { %3584 = vmatmul.mubr.bf16.gmra.mrb[88].mxu0 %v6552_v47  ;;  %v4779_v10 = vshrl.u32 %v6708_v22, 16 }
  0xda   : > { %7592 = vmatpush3.bf16.msra.mxu1 %v8149_v23  ;;  %7554 = vmatpush3.bf16.msra.mxu0 %v8152_v55 }
  0xdb   : > { %7593 = vmatprep.subr.bf16.mxu1 %v8151_v41  ;;  %7555 = vmatprep.subr.bf16.mxu0 %v8154_v11  ;;  %v6684_v41 = vcombine.low %v6644_v49, %v6645_v32  ;;  %v4420_v11 = vshll.u32 %v6644_v49, 16 }
  0xdc   : > { %3591 = vmatprep.mubr.bf16.mxu0 %v6555_v38 }
  0xdd   : > { %3874 = vmatmul.mubr.bf16.gmra.mrb[88].mxu1 %v6624_v59  ;;  %v9568_v59 = vld [vmem:[%s8402_s26 + $0x30] sm:$0xff] }
  0xde   : > { %7594 = vmatpush3.bf16.msra.mxu1 %v8153_v18  ;;  %7556 = vmatpush3.bf16.msra.mxu0 %v8156_v4  ;;  %v6748_v18 = vcombine.low %v6708_v22, %v9568_v59  ;;  %v8172_v4 = vld [vmem:[%s10248_s2 + $0x380] sm:$0xff]  }
  0xdf   : > { %7595 = vmatprep.subr.bf16.mxu1 %v8155_v63  ;;  %7557 = vmatprep.subr.bf16.mxu0 %v8158_v24  ;;  %v8171_v63 = vld [vmem:[%s10249_s3 + $0x3c0] sm:$0xff]  }
  0xe0   : > { %v9607_v24 = vld [vmem:[%s8402_s26 + $0x40] sm:$0xff] }
  0xe1   : > { %3592 = vmatmul.mubr.bf16.gmra.mrb[92].mxu0 %v6554_v20  ;;  %v4796_v20 = vshll.u32 %v9568_v59, 16 }
  0xe2   : > { %7596 = vmatpush3.bf16.msra.mxu1 %v8157_v42  ;;  %7558 = vmatpush3.bf16.msra.mxu0 %v8160_v2  ;;  %v4431_v42 = vshrl.u32 %v6645_v32, 16  ;;  %v8182_v2 = vld [vmem:[%s10248_s2 + $0x3d0] sm:$0xff]  }
  0xe3   : > { %7597 = vmatprep.subr.bf16.mxu1 %v8159_v8  ;;  %7559 = vmatprep.subr.bf16.mxu0 %v8162_v40 }
  0xe4   : > { %v4433_v7 = vrot.slane %v4431_v42, 4  ;;  %v8196_v42 = vld [vmem:[%s10248_s2 + $0x3a0] sm:$0xff]  }
  0xe6   : > { %7598 = vmatpush3.bf16.msra.mxu1 %v8161_v36  ;;  %7560 = vmatpush3.bf16.msra.mxu0 %v8164_v13  ;;  %v4781_v36 = vrot.slane %v4779_v10, 4  ;;  %v8187_v13 = vld [vmem:[%s10249_s3 + $0x3d8] sm:$0xff]  }
  0xe7   : > { %7599 = vmatprep.subr.bf16.mxu1 %v8163_v16 }
  0xfa   : > { %v7081_v14 = vpop.f32.mrb[0].mxu0 }
  0xfb   : > { %v7121_v37 = vpop.f32.mrb[0].mxu1  ;;  %v7082_v30 = vpop.f32.mrb[1].mxu0 }
  0xfc   : > { %v7122_v51 = vpop.f32.mrb[1].mxu1  ;;  %v7083_v34 = vadd.f32 %v7082_v30, %v7081_v14  ;;  %v7084_v61 = vpop.f32.mrb[2].mxu0  ;;  %v3659_v14 = vsel %vm8805_vm5, %v6586_v17, %v3658_v28  ;;  %v8165_v30 = vld [vmem:[%s10249_s3 + $0x338] sm:$0xff]   ;;  %v9601_v17 = vld [vmem:[%s8407_s29 + $0x40] sm:$0xff] }
  0xfd   : > { %v7123_v25 = vadd.f32 %v7122_v51, %v7121_v37  ;;  %v7124_v60 = vpop.f32.mrb[2].mxu1  ;;  %v7085_v50 = vpop.f32.mrb[3].mxu0  ;;  %v6627_v23 = vcombine.high %v3659_v14, %v3663_v27  ;;  %v6626_v62 = vcombine.low %v3659_v14, %v3663_v27  ;;  %v6685_v51 = vcombine.high %v6644_v49, %v6645_v32  ;;  %7600 = vmatpush3.bf16.msra.mxu1 %v8165_v30  ;;  %v8188_v30 = vld [vmem:[%s10248_s2 + $0x398] sm:$0xff]  }
  0xfe   : > { %v7086_v54 = vadd.f32 %v7085_v50, %v7084_v61  ;;  %v7125_v57 = vpop.f32.mrb[3].mxu1  ;;  %7665 = vmatprep.subr.bf16.mxu1 %v8171_v63  ;;  %v4782_v14 = vshll.u32 %v6708_v22, 16  ;;  %v4793_v27 = vshrl.u32 %v9568_v59, 16  ;;  %v6687_v8 = vcombine.high %v9601_v17, %v9604_v19 }
  0xff   : > { %v9508_v35 = vadd.f32 %v7123_v25, %v7083_v34  ;;  %v7126_v0 = vadd.f32 %v7125_v57, %v7124_v60  ;;  %3881 = vmatprep.mubr.bf16.mxu1 %v6627_v23  ;;  %v4417_v34 = vshrl.u32 %v6644_v49, 16  ;;  %v6749_v25 = vcombine.high %v6708_v22, %v9568_v59  ;;  %v8170_v60 = vld [vmem:[%s10248_s2 + $0x3c0] sm:$0xff]   ;;  %4108 = vmatprep.mubr.bf16.mxu0 %v6685_v51 }
 0x100   : > { %3882 = vmatmul.mubr.bf16.gmra.mrb[92].mxu1 %v6626_v62  ;;  %7625 = vmatprep.subr.bf16.mxu0 %v8170_v60  ;;  %v6686_v23 = vcombine.low %v9601_v17, %v9604_v19  ;;  %v4784_v40 = vrot.slane %v4782_v14, 5  ;;  %v4798_v49 = vrot.slane %v4796_v20, 5  ;;  %v9657_v51 = vld [vmem:[%s8402_s26 + $0x60] sm:$0xff]  ;;  %v8200_v14 = vld [vmem:[%s10248_s2 + $0x3a8] sm:$0xff]  }
 0x101   : > { %v9520_v15 = vadd.f32 %v7126_v0, %v7086_v54  ;;  %v4419_v54 = vrot.slane %v4417_v34, 4  ;;  %4359 = vmatprep.mubr.bf16.mxu1 %v6749_v25  ;;  %v4422_v0 = vrot.slane %v4420_v11, 5  ;;  %4109 = vmatmul.mubr.bf16.vlgmr.msra.gmra.mrb[96].mxu0 %v6684_v41  ;;  %v9654_v41 = vld [vmem:[%s8407_s29 + $0x70] sm:$0xff]  ;;  %v4445_v34 = vshrl.u32 %v9601_v17, 16  ;;  %v8201_v20 = vld [vmem:[%s10249_s3 + $0x3a8] sm:$0xff]  }
 0x102   : > { %v7087_v26 = vpop.f32.mrb[4].mxu0  ;;  %7626 = vmatpush3.bf16.msra.mxu0 %v8172_v4  ;;  %4116 = vmatprep.mubr.bf16.mxu0 %v6687_v8  ;;  %v9704_v8 = vld [vmem:[%s8407_s29 + $0x80] sm:$0xff] }
 0x103   : > { %v7127_v5 = vpop.f32.mrb[4].mxu1  ;;  %v7088_v6 = vpop.f32.mrb[5].mxu0  ;;  %7627 = vmatprep.subr.bf16.mxu0 %v8174_v39  ;;  %v4423_v38 = vor.u32 %v4422_v0, %v4419_v54  ;;  %v8194_v54 = vld [vmem:[%s10248_s2 + $0x3e0] sm:$0xff]   ;;  %v4447_v4 = vrot.slane %v4445_v34, 4  ;;  %v8211_v34 = vld [vmem:[%s10249_s3 + $0x3f8] sm:$0xff]  }
 0x104   : > { %v7128_v1 = vpop.f32.mrb[5].mxu1  ;;  %v7089_v9 = vadd.f32 %v7088_v6, %v7087_v26  ;;  %v7090_v37 = vpop.f32.mrb[6].mxu0  ;;  %v8173_v26 = vld [vmem:[%s10249_s3 + $0x380] sm:$0xff]   ;;  %v9610_v6 = vld [vmem:[%s8402_s26 + $0x50] sm:$0xff] }
 0x105   : > { %v7129_v28 = vadd.f32 %v7128_v1, %v7127_v5  ;;  %v7130_v33 = vpop.f32.mrb[6].mxu1  ;;  %v7091_v12 = vpop.f32.mrb[7].mxu0  ;;  %v4434_v5 = vshll.u32 %v6645_v32, 16  ;;  %v6751_v1 = vcombine.high %v9607_v24, %v9610_v6  ;;  %v6750_v62 = vcombine.low %v9607_v24, %v9610_v6  ;;  %v8189_v32 = vld [vmem:[%s10249_s3 + $0x398] sm:$0xff]   ;;  %v8195_v0 = vld [vmem:[%s10249_s3 + $0x3e0] sm:$0xff]  }
 0x106   : > { %v7092_v48 = vadd.f32 %v7091_v12, %v7090_v37  ;;  %v7131_v58 = vpop.f32.mrb[7].mxu1  ;;  %7628 = vmatpush3.bf16.msra.mxu0 %v8176_v45  ;;  %v8185_v12 = vld [vmem:[%s10249_s3 + $0x390] sm:$0xff]   ;;  %v9634_v16 = vrot.slane %v4423_v38, 4  ;;  %v4462_v38 = vshll.u32 %v9604_v19, 16 }
 0x107   : > { %v9553_v43 = vadd.f32 %v7129_v28, %v7089_v9  ;;  %v7132_v29 = vadd.f32 %v7131_v58, %v7130_v33  ;;  %v4436_v44 = vrot.slane %v4434_v5, 5  ;;  %v8183_v28 = vld [vmem:[%s10249_s3 + $0x3d0] sm:$0xff]   ;;  %7629 = vmatprep.subr.bf16.mxu0 %v8182_v2  ;;  %v4459_v5 = vshrl.u32 %v9604_v19, 16 }
 0x108   : > { %4360 = vmatmul.mubr.bf16.vlgmr.msra.gmra.mrb[96].mxu1 %v6748_v18  ;;  %v8184_v33 = vld [vmem:[%s10248_s2 + $0x390] sm:$0xff]   ;;  %v4810_v19 = vshll.u32 %v9607_v24, 16 }
 0x109   : > { %v9570_v55 = vadd.f32 %v7132_v29, %v7092_v48  ;;  %7666 = vmatpush3.bf16.msra.mxu1 %v8173_v26  ;;  %v4437_v37 = vor.u32 %v4436_v44, %v4433_v7  ;;  %4367 = vmatprep.mubr.bf16.mxu1 %v6751_v1  ;;  %v8186_v48 = vld [vmem:[%s10248_s2 + $0x3d8] sm:$0xff]   ;;  %v4785_v29 = vor.u32 %v4784_v40, %v4781_v36  ;;  %v9663_v18 = vld [vmem:[%s8402_s26 + $0x70] sm:$0xff]  ;;  %v4448_v26 = vshll.u32 %v9601_v17, 16  ;;  %v8199_v44 = vld [vmem:[%s10249_s3 + $0x3e8] sm:$0xff]  }
 0x10a   : > { %v7093_v46 = vpop.f32.mrb[8].mxu0  ;;  %7667 = vmatprep.subr.bf16.mxu1 %v8175_v56  ;;  %4117 = vmatmul.mubr.bf16.gmra.mrb[100].mxu0 %v6686_v23  ;;  %v6752_v63 = vcombine.low %v9657_v51, %v9663_v18  ;;  %v8197_v56 = vld [vmem:[%s10249_s3 + $0x3a0] sm:$0xff]   ;;  %v4461_v17 = vrot.slane %v4459_v5, 4  ;;  %v9707_v1 = vld [vmem:[%s8407_s29 + $0x90] sm:$0xff]  ;;  %v9771_v5 = vld [vmem:[%s8402_s26 + $0x38] sm:$0x11] }
 0x10b   : > { %v7133_v21 = vpop.f32.mrb[8].mxu1  ;;  %v7094_v47 = vpop.f32.mrb[9].mxu0  ;;  %v9639_v58 = vrot.slane %v4437_v37, 4  ;;  %7630 = vmatpush3.bf16.msra.mxu0 %v8184_v33  ;;  %v9667_v60 = vrot.slane %v4785_v29, 4  ;;  %v4450_v7 = vrot.slane %v4448_v26, 5  ;;  %v6691_v2 = vcombine.high %v9704_v8, %v9707_v1  ;;  %v8207_v29 = vld [vmem:[%s10249_s3 + $0x3f0] sm:$0xff]  }
 0x10c   : > { %v7134_v61 = vpop.f32.mrb[9].mxu1  ;;  %v7095_v50 = vadd.f32 %v7094_v47, %v7093_v46  ;;  %v7096_v9 = vpop.f32.mrb[10].mxu0  ;;  %v4795_v46 = vrot.slane %v4793_v27, 4  ;;  %7631 = vmatprep.subr.bf16.mxu0 %v8186_v48  ;;  %v9651_v47 = vld [vmem:[%s8407_s29 + $0x60] sm:$0xff]  ;;  %v4807_v27 = vshrl.u32 %v9607_v24, 16  ;;  %v6690_v37 = vcombine.low %v9704_v8, %v9707_v1 }
 0x10d   : > { %v7135_v57 = vadd.f32 %v7134_v61, %v7133_v21  ;;  %7668 = vmatpush3.bf16.msra.mxu1 %v8177_v3  ;;  %v7136_v21 = vpop.f32.mrb[10].mxu1  ;;  %v7097_v22 = vpop.f32.mrb[11].mxu0  ;;  %v6689_v61 = vcombine.high %v9651_v47, %v9654_v41  ;;  %v6688_v25 = vcombine.low %v9651_v47, %v9654_v41  ;;  %v8198_v3 = vld [vmem:[%s10248_s2 + $0x3e8] sm:$0xff]   ;;  %v4451_v10 = vor.u32 %v4450_v7, %v4447_v4  ;;  %v8214_v26 = vld [vmem:[%s10248_s2 + $0x440] sm:$0xff]  }
 0x10e   : > { %7669 = vmatprep.subr.bf16.mxu1 %v8183_v28  ;;  %v7137_v59 = vpop.f32.mrb[11].mxu1  ;;  %v7098_v11 = vadd.f32 %v7097_v22, %v7096_v9  ;;  %v4799_v45 = vor.u32 %v4798_v49, %v4795_v46  ;;  %v9715_v9 = vld [vmem:[%s8402_s26 + $0x80] sm:$0xff]  ;;  %v9718_v28 = vld [vmem:[%s8402_s26 + $0x90] sm:$0xff]  ;;  %v4821_v33 = vshrl.u32 %v9610_v6, 16  ;;  %v4812_v46 = vrot.slane %v4810_v19, 5  ;;  %v8210_v22 = vld [vmem:[%s10248_s2 + $0x3f8] sm:$0xff]  }
 0x10f   : > { %v9586_v53 = vadd.f32 %v7135_v57, %v7095_v50  ;;  %7632 = vmatpush3.bf16.msra.mxu0 %v8188_v30  ;;  %v6753_v50 = vcombine.high %v9657_v51, %v9663_v18  ;;  %v7138_v57 = vadd.f32 %v7137_v59, %v7136_v21  ;;  %4124 = vmatprep.mubr.bf16.mxu0 %v6689_v61  ;;  %v9722_v36 = vrot.slane %v4451_v10, 4  ;;  %v8208_v30 = vld [vmem:[%s10248_s2 + $0x3b0] sm:$0xff]   ;;  %v8215_v10 = vld [vmem:[%s10249_s3 + $0x440] sm:$0xff]  }
 0x110   : > { %4368 = vmatmul.mubr.bf16.gmra.mrb[100].mxu1 %v6750_v62  ;;  %7633 = vmatprep.subr.bf16.mxu0 %v8194_v54  ;;  %v9709_v23 = vrot.slane %v4799_v45, 4  ;;  %v4464_v62 = vrot.slane %v4462_v38, 5  ;;  %v6755_v40 = vcombine.high %v9715_v9, %v9718_v28  ;;  %v6754_v24 = vcombine.low %v9715_v9, %v9718_v28 }
 0x111   : > { %7670 = vmatpush3.bf16.msra.mxu1 %v8185_v12  ;;  %4375 = vmatprep.mubr.bf16.mxu1 %v6753_v50  ;;  %v9683_v39 = vadd.f32 %v7138_v57, %v7098_v11  ;;  %v8206_v12 = vld [vmem:[%s10248_s2 + $0x3f0] sm:$0xff]   ;;  %v4823_v49 = vrot.slane %v4821_v33, 4  ;;  %v4824_v21 = vshll.u32 %v9610_v6, 16  ;;  %v8212_v6 = vld [vmem:[%s10248_s2 + $0x3b8] sm:$0xff]   ;;  %v9757_v50 = vld [vmem:[%s8407_s29 + $0x28] sm:$0x11] }
 0x112   : > { %7671 = vmatprep.subr.bf16.mxu1 %v8187_v13  ;;  %4125 = vmatmul.mubr.bf16.gmra.mrb[104].mxu0 %v6688_v25  ;;  %v4465_v48 = vor.u32 %v4464_v62, %v4461_v17  ;;  %v4809_v13 = vrot.slane %v4807_v27, 4  ;;  %v7099_v25 = vpop.f32.mrb[12].mxu0  ;;  %v8213_v11 = vld [vmem:[%s10249_s3 + $0x3b8] sm:$0xff]   ;;  %v4426_v4 = vshll.u32 %v9757_v50, 16  ;;  %v4802_v7 = vshll.u32 %v9771_v5, 16 }
 0x113   : > { %7634 = vmatpush3.bf16.msra.mxu0 %v8196_v42  ;;  %4132 = vmatprep.mubr.bf16.mxu0 %v6691_v2  ;;  %v4826_v61 = vrot.slane %v4824_v21, 5  ;;  %v7139_v54 = vpop.f32.mrb[12].mxu1  ;;  %v9760_v57 = vld [vmem:[%s8407_s29 + $0x38] sm:$0x11]  ;;  %v8217_v2 = vld [vmem:[%s10249_s3 + $0x400] sm:$0xff]  }
 0x114   : > { %7635 = vmatprep.subr.bf16.mxu0 %v8198_v3  ;;  %v9745_v59 = vrot.slane %v4465_v48, 4  ;;  %v4440_v42 = vshll.u32 %v9760_v57, 16  ;;  %v4428_v45 = vrot.slane %v4426_v4, 5  ;;  %v4804_v27 = vrot.slane %v4802_v7, 5  ;;  %v7100_v48 = vpop.f32.mrb[13].mxu0 }
 0x115   : > { %7672 = vmatpush3.bf16.msra.mxu1 %v8189_v32  ;;  %v8209_v32 = vld [vmem:[%s10249_s3 + $0x3b0] sm:$0xff]   ;;  %v4827_v3 = vor.u32 %v4826_v61, %v4823_v49  ;;  %v9812_v21 = vld [vmem:[%s8407_s29 + $0x58] sm:$0x11] }
 0x116   : > { %7673 = vmatprep.subr.bf16.mxu1 %v8195_v0  ;;  %v9764_v0 = vld [vmem:[%s8402_s26 + $0x28] sm:$0x11]  ;;  %v4442_v17 = vrot.slane %v4440_v42, 5  ;;  %v4805_v33 = vsel %vm8618_vm2, %v9709_v23, %v4804_v27  ;;  %v7101_v23 = vadd.f32 %v7100_v48, %v7099_v25  ;;  %v8222_v61 = vld [vmem:[%s10248_s2 + $0x450] sm:$0xff]   ;;  %v9823_v25 = vld [vmem:[%s8402_s26 + $0x58] sm:$0x11] }
 0x117   : > { %7636 = vmatpush3.bf16.msra.mxu0 %v8200_v14  ;;  %v4429_v14 = vsel %vm8618_vm2, %v9634_v16, %v4428_v45  ;;  %v4830_v4 = vshll.u32 %v9823_v25, 16  ;;  %v4476_v48 = vshll.u32 %v9651_v47, 16 }
 0x118   : > { %4376 = vmatmul.mubr.bf16.gmra.mrb[104].mxu1 %v6752_v63  ;;  %7637 = vmatprep.subr.bf16.mxu0 %v8206_v12  ;;  %v4813_v63 = vor.u32 %v4812_v46, %v4809_v13  ;;  %v4443_v62 = vsel %vm8618_vm2, %v9639_v58, %v4442_v17  ;;  %v8218_v58 = vld [vmem:[%s10248_s2 + $0x448] sm:$0xff]  }
 0x119   : > { %7674 = vmatpush3.bf16.msra.mxu1 %v8197_v56  ;;  %4383 = vmatprep.mubr.bf16.mxu1 %v6755_v40  ;;  %v4788_v56 = vshll.u32 %v9764_v0, 16  ;;  %v6821_v16 = vcombine.high %v4429_v14, %v4443_v62  ;;  %v4828_v40 = vrot.slane %v4827_v3, 4  ;;  %v8219_v12 = vld [vmem:[%s10249_s3 + $0x448] sm:$0xff]   ;;  %v4832_v7 = vrot.slane %v4830_v4, 5  ;;  %v8224_v3 = vld [vmem:[%s10248_s2 + $0x410] sm:$0xff]  }
 0x11a   : > { %7675 = vmatprep.subr.bf16.mxu1 %v8199_v44  ;;  %4133 = vmatmul.mubr.bf16.gmra.mrb[108].mxu0 %v6690_v37  ;;  %v4814_v38 = vrot.slane %v4813_v63, 4  ;;  %v6820_v37 = vcombine.low %v4429_v14, %v4443_v62  ;;  %v8220_v13 = vld [vmem:[%s10248_s2 + $0x408] sm:$0xff]  }
 0x11b   : > { %7638 = vmatpush3.bf16.msra.mxu0 %v8208_v30  ;;  %v4790_v44 = vrot.slane %v4788_v56, 5  ;;  %4721 = vmatprep.mubr.bf16.mxu0 %v6821_v16  ;;  %v8221_v46 = vld [vmem:[%s10249_s3 + $0x408] sm:$0xff]   ;;  %v8223_v56 = vld [vmem:[%s10249_s3 + $0x450] sm:$0xff]  }
 0x11c   : > { %7639 = vmatprep.subr.bf16.mxu0 %v8210_v22  ;;  %v9809_v30 = vld [vmem:[%s8407_s29 + $0x48] sm:$0x11] }
 0x11d   : > { %7676 = vmatpush3.bf16.msra.mxu1 %v8201_v20  ;;  %v8216_v20 = vld [vmem:[%s10248_s2 + $0x400] sm:$0xff]   ;;  %v4791_v19 = vsel %vm8618_vm2, %v9667_v60, %v4790_v44  ;;  %v4454_v22 = vshll.u32 %v9809_v30, 16 }
 0x11e   : > { %7677 = vmatprep.subr.bf16.mxu1 %v8207_v29  ;;  %v6893_v60 = vcombine.high %v4791_v19, %v4805_v33  ;;  %v7140_v29 = vpop.f32.mrb[13].mxu1 }
 0x11f   : > { %7640 = vmatpush3.bf16.msra.mxu0 %v8212_v6  ;;  %v7141_v49 = vadd.f32 %v7140_v29, %v7139_v54  ;;  %v4468_v6 = vshll.u32 %v9812_v21, 16  ;;  %v4456_v54 = vrot.slane %v4454_v22, 5  ;;  %v4490_v29 = vshll.u32 %v9654_v41, 16  ;;  %v9875_v22 = vld [vmem:[%s8402_s26 + $0x68] sm:$0x11] }
 0x120   : > { %4384 = vmatmul.mubr.bf16.gmra.mrb[108].mxu1 %v6754_v24  ;;  %7705 = vmatprep.subr.bf16.mxu0 %v8214_v26  ;;  %v6892_v24 = vcombine.low %v4791_v19, %v4805_v33 }
 0x121   : > { %7678 = vmatpush3.bf16.msra.mxu1 %v8209_v32  ;;  %5083 = vmatprep.mubr.bf16.mxu1 %v6893_v60  ;;  %v7102_v32 = vpop.f32.mrb[14].mxu0  ;;  %v9826_v63 = vadd.f32 %v7141_v49, %v7101_v23  ;;  %v4470_v26 = vrot.slane %v4468_v6, 5  ;;  %v4457_v45 = vsel %vm8618_vm2, %v9722_v36, %v4456_v54  ;;  %v4833_v36 = vsel %vm8618_vm2, %v4828_v40, %v4832_v7 }
 0x122   : > { %7679 = vmatprep.subr.bf16.mxu1 %v8211_v34  ;;  %4722 = vmatmul.mubr.bf16.vlgmr.msra.gmra.mrb[112].mxu0 %v6820_v37  ;;  %v9816_v34 = vld [vmem:[%s8402_s26 + $0x48] sm:$0x11]  ;;  %v8228_v37 = vld [vmem:[%s10248_s2 + $0x418] sm:$0xff]   ;;  %v4473_v60 = vshrl.u32 %v9651_v47, 16  ;;  %v4487_v23 = vshrl.u32 %v9654_v41, 16  ;;  %v4478_v6 = vrot.slane %v4476_v48, 5 }
 0x123   : > { %7706 = vmatpush3.bf16.msra.mxu0 %v8216_v20  ;;  %v4471_v17 = vsel %vm8618_vm2, %v9745_v59, %v4470_v26  ;;  %v8226_v20 = vld [vmem:[%s10248_s2 + $0x458] sm:$0xff]   ;;  %v7142_v59 = vpop.f32.mrb[14].mxu1  ;;  %v4492_v54 = vrot.slane %v4490_v29, 5  ;;  %v4835_v26 = vshrl.u32 %v9657_v51, 16  ;;  %v4838_v41 = vshll.u32 %v9657_v51, 16 }
 0x124   : > { %7707 = vmatprep.subr.bf16.mxu0 %v8218_v58  ;;  %v6823_v14 = vcombine.high %v4457_v45, %v4471_v17  ;;  %v6822_v27 = vcombine.low %v4457_v45, %v4471_v17  ;;  %v7143_v33 = vpop.f32.mrb[15].mxu1  ;;  %v8229_v58 = vld [vmem:[%s10249_s3 + $0x418] sm:$0xff]   ;;  %v4475_v49 = vrot.slane %v4473_v60, 4  ;;  %v4849_v7 = vshrl.u32 %v9663_v18, 16  ;;  %v8230_v17 = vld [vmem:[%s10248_s2 + $0x460] sm:$0xff]   ;;  %v8234_v60 = vld [vmem:[%s10248_s2 + $0x468] sm:$0xff]  }
 0x125   : > { %7680 = vmatpush3.bf16.msra.mxu1 %v8213_v11  ;;  %v4816_v11 = vshll.u32 %v9816_v34, 16  ;;  %v7144_v40 = vadd.f32 %v7143_v33, %v7142_v59  ;;  %v8233_v33 = vld [vmem:[%s10249_s3 + $0x420] sm:$0xff]  }
 0x126   : > { %7745 = vmatprep.subr.bf16.mxu1 %v8215_v10  ;;  %v8225_v10 = vld [vmem:[%s10249_s3 + $0x410] sm:$0xff]   ;;  %4729 = vmatprep.mubr.bf16.mxu0 %v6823_v14  ;;  %v4840_v14 = vrot.slane %v4838_v41, 5  ;;  %v4851_v59 = vrot.slane %v4849_v7, 4  ;;  %v8236_v41 = vld [vmem:[%s10248_s2 + $0x428] sm:$0xff]  }
 0x127   : > { %v4818_v42 = vrot.slane %v4816_v11, 5  ;;  %7708 = vmatpush3.bf16.msra.mxu0 %v8220_v13  ;;  %v4489_v11 = vrot.slane %v4487_v23, 4 }
 0x128   : > { %5084 = vmatmul.mubr.bf16.vlgmr.msra.gmra.mrb[112].mxu1 %v6892_v24  ;;  %7709 = vmatprep.subr.bf16.mxu0 %v8222_v61  ;;  %v9861_v24 = vld [vmem:[%s8407_s29 + $0x68] sm:$0x11]  ;;  %v9878_v61 = vld [vmem:[%s8402_s26 + $0x78] sm:$0x11] }
 0x129   : > { %7746 = vmatpush3.bf16.msra.mxu1 %v8217_v2  ;;  %v4819_v44 = vsel %vm8618_vm2, %v4814_v38, %v4818_v42  ;;  %v8227_v38 = vld [vmem:[%s10249_s3 + $0x458] sm:$0xff]   ;;  %v7103_v2 = vpop.f32.mrb[15].mxu0  ;;  %v4482_v13 = vshll.u32 %v9861_v24, 16  ;;  %v4844_v42 = vshll.u32 %v9875_v22, 16  ;;  %v4493_v45 = vor.u32 %v4492_v54, %v4489_v11 }
 0x12a   : > { %7747 = vmatprep.subr.bf16.mxu1 %v8219_v12  ;;  %v6895_v62 = vcombine.high %v4819_v44, %v4833_v36  ;;  %v6894_v19 = vcombine.low %v4819_v44, %v4833_v36  ;;  %v7104_v16 = vadd.f32 %v7103_v2, %v7102_v32  ;;  %4730 = vmatmul.mubr.bf16.gmra.mrb[116].mxu0 %v6822_v27  ;;  %v9865_v12 = vld [vmem:[%s8407_s29 + $0x78] sm:$0x11]  ;;  %v8231_v44 = vld [vmem:[%s10249_s3 + $0x460] sm:$0xff]   ;;  %v4858_v36 = vshll.u32 %v9878_v61, 16 }
 0x12b   : > { %7710 = vmatpush3.bf16.msra.mxu0 %v8224_v3  ;;  %v4496_v32 = vshll.u32 %v9865_v12, 16  ;;  %v4484_v47 = vrot.slane %v4482_v13, 5  ;;  %v4852_v3 = vshll.u32 %v9663_v18, 16  ;;  %v4846_v51 = vrot.slane %v4844_v42, 5 }
 0x12c   : > { %5091 = vmatprep.mubr.bf16.mxu1 %v6895_v62  ;;  %7711 = vmatprep.subr.bf16.mxu0 %v8226_v20  ;;  %v4494_v20 = vrot.slane %v4493_v45, 4 }
 0x12d   : > { %7748 = vmatpush3.bf16.msra.mxu1 %v8221_v46  ;;  %v9871_v46 = vadd.f32 %v7144_v40, %v7104_v16  ;;  %v4498_v4 = vrot.slane %v4496_v32, 5  ;;  %v4854_v62 = vrot.slane %v4852_v3, 5  ;;  %v7201_v40 = vpop.f32.mrb[16].mxu1  ;;  %v8235_v32 = vld [vmem:[%s10249_s3 + $0x468] sm:$0xff]  }
 0x12e   : > { %7749 = vmatprep.subr.bf16.mxu1 %v8223_v56  ;;  %v4479_v56 = vor.u32 %v4478_v6, %v4475_v49  ;;  %v7202_v49 = vpop.f32.mrb[17].mxu1  ;;  %v8237_v3 = vld [vmem:[%s10249_s3 + $0x428] sm:$0xff]  }
 0x12f   : > { %7712 = vmatpush3.bf16.msra.mxu0 %v8228_v37  ;;  %v4499_v37 = vsel %vm8618_vm2, %v4494_v20, %v4498_v4  ;;  %v4855_v16 = vor.u32 %v4854_v62, %v4851_v59  ;;  %v7203_v11 = vadd.f32 %v7202_v49, %v7201_v40  ;;  %v9926_v20 = vld [vmem:[%s8407_s29 + $0x98] sm:$0x11]  ;;  %v9930_v59 = vld [vmem:[%s8402_s26 + $0x88] sm:$0x11]  ;;  %v8238_v62 = vld [vmem:[%s10248_s2 + $0x470] sm:$0xff]  }
 0x130   : > { %5092 = vmatmul.mubr.bf16.gmra.mrb[116].mxu1 %v6894_v19  ;;  %v4480_v27 = vrot.slane %v4479_v56, 4  ;;  %7713 = vmatprep.subr.bf16.mxu0 %v8230_v17  ;;  %v4860_v19 = vrot.slane %v4858_v36, 5  ;;  %v8239_v40 = vld [vmem:[%s10249_s3 + $0x470] sm:$0xff]  }
 0x131   : > { %7750 = vmatpush3.bf16.msra.mxu1 %v8225_v10  ;;  %v4837_v10 = vrot.slane %v4835_v26, 4  ;;  %v4856_v6 = vrot.slane %v4855_v16, 4  ;;  %v7204_v26 = vpop.f32.mrb[18].mxu1 }
 0x132   : > { %7751 = vmatprep.subr.bf16.mxu1 %v8227_v38  ;;  %v8232_v38 = vld [vmem:[%s10248_s2 + $0x420] sm:$0xff]   ;;  %v4485_v2 = vsel %vm8618_vm2, %v4480_v27, %v4484_v47 }
 0x133   : > { %v4841_v18 = vor.u32 %v4840_v14, %v4837_v10  ;;  %v6825_v48 = vcombine.high %v4485_v2, %v4499_v37  ;;  %v6824_v23 = vcombine.low %v4485_v2, %v4499_v37  ;;  %7714 = vmatpush3.bf16.msra.mxu0 %v8232_v38  ;;  %v4861_v42 = vsel %vm8618_vm2, %v4856_v6, %v4860_v19  ;;  %v9920_v10 = vld [vmem:[%s8407_s29 + $0x88] sm:$0x11]  ;;  %v9939_v37 = vld [vmem:[%s8402_s26 + $0x98] sm:$0x11] }
 0x134   : > { %7715 = vmatprep.subr.bf16.mxu0 %v8234_v60  ;;  %v4501_v14 = vshrl.u32 %v9704_v8, 16  ;;  %v4510_v19 = vshll.u32 %v9920_v10, 16  ;;  %v4515_v38 = vshrl.u32 %v9707_v1, 16  ;;  %v4518_v2 = vshll.u32 %v9707_v1, 16 }
 0x135   : > { %7752 = vmatpush3.bf16.msra.mxu1 %v8229_v58  ;;  %v7161_v58 = vpop.f32.mrb[16].mxu0  ;;  %v4842_v13 = vrot.slane %v4841_v18, 4  ;;  %4737 = vmatprep.mubr.bf16.mxu0 %v6825_v48  ;;  %v4866_v1 = vshll.u32 %v9715_v9, 16 }
 0x136   : > { %7753 = vmatprep.subr.bf16.mxu1 %v8231_v44  ;;  %v7162_v29 = vpop.f32.mrb[17].mxu0  ;;  %4738 = vmatmul.mubr.bf16.gmra.mrb[120].mxu0 %v6824_v23  ;;  %v7205_v44 = vpop.f32.mrb[19].mxu1  ;;  %v4503_v18 = vrot.slane %v4501_v14, 4  ;;  %v4512_v60 = vrot.slane %v4510_v19, 5  ;;  %v4517_v48 = vrot.slane %v4515_v38, 4 }
 0x137   : > { %v7163_v47 = vadd.f32 %v7162_v29, %v7161_v58  ;;  %v7164_v54 = vpop.f32.mrb[18].mxu0  ;;  %v4847_v4 = vsel %vm8618_vm2, %v4842_v13, %v4846_v51  ;;  %7716 = vmatpush3.bf16.msra.mxu0 %v8236_v41  ;;  %v7206_v27 = vadd.f32 %v7205_v44, %v7204_v26  ;;  %v4863_v58 = vshrl.u32 %v9715_v9, 16  ;;  %v8241_v41 = vld [vmem:[%s10249_s3 + $0x430] sm:$0xff]  }
 0x138   : > { %v6897_v45 = vcombine.high %v4847_v4, %v4861_v42  ;;  %v6896_v7 = vcombine.low %v4847_v4, %v4861_v42  ;;  %v7165_v17 = vpop.f32.mrb[19].mxu0  ;;  %7717 = vmatprep.subr.bf16.mxu0 %v8238_v62  ;;  %v4520_v13 = vrot.slane %v4518_v2, 5  ;;  %v4868_v6 = vrot.slane %v4866_v1, 5  ;;  %v8244_v1 = vld [vmem:[%s10248_s2 + $0x438] sm:$0xff]  }
 0x139   : > { %7754 = vmatpush3.bf16.msra.mxu1 %v8233_v33  ;;  %v1139_v56 = vadd.f32 %v7163_v47, %v9508_v35  ;;  %v7166_v36 = vadd.f32 %v7165_v17, %v7164_v54  ;;  %v4504_v35 = vshll.u32 %v9704_v8, 16  ;;  %v4524_v33 = vshll.u32 %v9926_v20, 16  ;;  %v8240_v54 = vld [vmem:[%s10248_s2 + $0x430] sm:$0xff]  }
 0x13a   : > { %7755 = vmatprep.subr.bf16.mxu1 %v8235_v32  ;;  %5099 = vmatprep.mubr.bf16.mxu1 %v6897_v45  ;;  %v4521_v32 = vor.u32 %v4520_v13, %v4517_v48  ;;  %v4872_v47 = vshll.u32 %v9930_v59, 16  ;;  %v4880_v26 = vshll.u32 %v9718_v28, 16  ;;  %v4886_v9 = vshll.u32 %v9939_v37, 16 }
 0x13b   : > { %v9923_v51 = vadd.f32 %v7203_v11, %v1139_v56  ;;  %5100 = vmatmul.mubr.bf16.gmra.mrb[120].mxu1 %v6896_v7  ;;  %v1140_v8 = vadd.f32 %v7166_v36, %v9520_v15  ;;  %v4506_v16 = vrot.slane %v4504_v35, 5  ;;  %v4526_v49 = vrot.slane %v4524_v33, 5  ;;  %7718 = vmatpush3.bf16.msra.mxu0 %v8240_v54  ;;  %v7207_v36 = vpop.f32.mrb[20].mxu1 }
 0x13c   : > { %v4865_v15 = vrot.slane %v4863_v58, 4  ;;  %v4877_v11 = vshrl.u32 %v9718_v28, 16  ;;  %v4522_v42 = vrot.slane %v4521_v32, 4  ;;  %v4874_v45 = vrot.slane %v4872_v47, 5  ;;  %v6916_v32 = vld [vmem:[%s8407_s29 + $0x20] sm:$0xee] }
 0x13d   : > { %7756 = vmatpush3.bf16.msra.mxu1 %v8237_v3  ;;  %v9948_v23 = vadd.f32 %v7206_v27, %v1140_v8  ;;  %v4507_v29 = vor.u32 %v4506_v16, %v4503_v18  ;;  %v7167_v3 = vpop.f32.mrb[20].mxu0  ;;  %v4882_v44 = vrot.slane %v4880_v26, 5  ;;  %v4888_v14 = vrot.slane %v4886_v9, 5  ;;  %v7208_v18 = vpop.f32.mrb[21].mxu1  ;;  %v8242_v16 = vld [vmem:[%s10248_s2 + $0x478] sm:$0xff]  }
 0x13e   : > { %7757 = vmatprep.subr.bf16.mxu1 %v8239_v40  ;;  %v4869_v56 = vor.u32 %v4868_v6, %v4865_v15  ;;  %v4879_v7 = vrot.slane %v4877_v11, 4  ;;  %v7168_v28 = vpop.f32.mrb[21].mxu0  ;;  %v4527_v27 = vsel %vm8618_vm2, %v4522_v42, %v4526_v49  ;;  %v7209_v8 = vadd.f32 %v7208_v18, %v7207_v36  ;;  %v8243_v40 = vld [vmem:[%s10249_s3 + $0x478] sm:$0xff]   ;;  %7719 = vmatprep.subr.bf16.mxu0 %v8242_v16  ;;  %v6988_v9 = vld [vmem:[%s8402_s26 + $0x20] sm:$0xee] }
 0x13f   : > { %v4508_v4 = vrot.slane %v4507_v29, 4  ;;  %v7169_v62 = vadd.f32 %v7168_v28, %v7167_v3  ;;  %v7170_v33 = vpop.f32.mrb[22].mxu0  ;;  %v5150_v6 = vrot.slane %v9757_v50, 5  ;;  %7720 = vmatpush3.bf16.msra.mxu0 %v8244_v1  ;;  %v6924_v26 = vrot.slane %v6916_v32, 9  ;;  %v6989_v3 = vld [vmem:[%s8402_s26 + $0x30] sm:$0xee] }
 0x140   : > { %v4870_v35 = vrot.slane %v4869_v56, 4  ;;  %v4883_v38 = vor.u32 %v4882_v44, %v4879_v7  ;;  %v7171_v49 = vpop.f32.mrb[23].mxu0  ;;  %v5154_v7 = vrot.slane %v9760_v57, 5  ;;  %v5440_v36 = vrot.slane %v9764_v0, 5  ;;  %v6990_v1 = vld [vmem:[%s8402_s26 + $0x40] sm:$0xee] }
 0x141   : > { %v4513_v17 = vsel %vm8618_vm2, %v4508_v4, %v4512_v60  ;;  %7758 = vmatpush3.bf16.msra.mxu1 %v8241_v41  ;;  %v1141_v58 = vadd.f32 %v7169_v62, %v9553_v43  ;;  %v7210_v60 = vpop.f32.mrb[22].mxu1  ;;  %v8245_v43 = vld [vmem:[%s10249_s3 + $0x438] sm:$0xff]   ;;  %v7172_v11 = vadd.f32 %v7171_v49, %v7170_v33  ;;  %v6917_v4 = vld [vmem:[%s8407_s29 + $0x30] sm:$0xee]  ;;  %v7173_v41 = vpop.f32.mrb[24].mxu0  ;;  %v5151_v44 = vsel %vm8805_vm5, %v6924_v26, %v5150_v6 }
 0x142   : > { %v6827_v19 = vcombine.high %v4513_v17, %v4527_v27  ;;  %v6826_v2 = vcombine.low %v4513_v17, %v4527_v27  ;;  %v4875_v48 = vsel %vm8618_vm2, %v4870_v35, %v4874_v45  ;;  %v4884_v13 = vrot.slane %v4883_v38, 4  ;;  %7759 = vmatprep.subr.bf16.mxu1 %v8243_v40  ;;  %v7211_v15 = vpop.f32.mrb[23].mxu1  ;;  %v7174_v50 = vpop.f32.mrb[25].mxu0  ;;  %v6918_v38 = vld [vmem:[%s8407_s29 + $0x40] sm:$0xee] }
 0x143   : > { %v9976_v29 = vadd.f32 %v7209_v8, %v1141_v58  ;;  %v7212_v54 = vadd.f32 %v7211_v15, %v7210_v60  ;;  %v6925_v45 = vrot.slane %v6917_v4, 9  ;;  %v7213_v17 = vpop.f32.mrb[24].mxu1  ;;  %v1142_v31 = vadd.f32 %v7172_v11, %v9570_v55  ;;  %v7176_v27 = vpop.f32.mrb[26].mxu0  ;;  %v6919_v58 = vld [vmem:[%s8407_s29 + $0x50] sm:$0xee] }
 0x144   : > { %4745 = vmatprep.mubr.bf16.mxu0 %v6827_v19  ;;  %v4889_v47 = vsel %vm8618_vm2, %v4884_v13, %v4888_v14  ;;  %v6996_v14 = vrot.slane %v6988_v9, 9  ;;  %v7214_v28 = vpop.f32.mrb[25].mxu1  ;;  %v6997_v57 = vrot.slane %v6989_v3, 9  ;;  %v5444_v62 = vrot.slane %v9771_v5, 5  ;;  %v7177_v55 = vpop.f32.mrb[27].mxu0 }
 0x145   : > { %4746 = vmatmul.mubr.bf16.gmra.mrb[124].mxu0 %v6826_v2  ;;  %v6899_v42 = vcombine.high %v4875_v48, %v4889_v47  ;;  %v6898_v56 = vcombine.low %v4875_v48, %v4889_v47  ;;  %7760 = vmatpush3.bf16.msra.mxu1 %v8245_v43  ;;  %v5155_v35 = vsel %vm8805_vm5, %v6925_v45, %v5154_v7  ;;  %v7216_v19 = vpop.f32.mrb[26].mxu1  ;;  %v7179_v40 = vpop.f32.mrb[28].mxu0  ;;  %v6991_v43 = vld [vmem:[%s8402_s26 + $0x50] sm:$0xee]  ;;  %v6926_v11 = vrot.slane %v6918_v38, 9 }
 0x146   : > { %v7175_v18 = vadd.f32 %v7174_v50, %v7173_v41  ;;  %v9997_v2 = vadd.f32 %v7212_v54, %v1142_v31  ;;  %v6964_v0 = vcombine.low %v5151_v44, %v5155_v35  ;;  %v6965_v8 = vcombine.high %v5151_v44, %v5155_v35  ;;  %v7217_v33 = vpop.f32.mrb[27].mxu1  ;;  %v7180_v15 = vpop.f32.mrb[29].mxu0 }
 0x147   : > { %5107 = vmatprep.mubr.bf16.mxu1 %v6899_v42  ;;  %v5441_v16 = vsel %vm8805_vm5, %v6996_v14, %v5440_v36  ;;  %v5445_v5 = vsel %vm8805_vm5, %v6997_v57, %v5444_v62  ;;  %v7215_v48 = vadd.f32 %v7214_v28, %v7213_v17  ;;  %v7178_v13 = vadd.f32 %v7177_v55, %v7176_v27  ;;  %v7219_v49 = vpop.f32.mrb[28].mxu1  ;;  %v7182_v4 = vpop.f32.mrb[30].mxu0  ;;  %v6920_v57 = vld [vmem:[%s8407_s29 + $0x60] sm:$0xee]  ;;  %v6921_v62 = vld [vmem:[%s8407_s29 + $0x70] sm:$0xee] }
 0x148   : > { %5108 = vmatmul.mubr.bf16.gmra.mrb[124].mxu1 %v6898_v56  ;;  %v1143_v60 = vadd.f32 %v7175_v18, %v9586_v53  ;;  %5373 = vmatprep.mubr.bf16.mxu0 %v6965_v8  ;;  %v7036_v32 = vcombine.low %v5441_v16, %v5445_v5  ;;  %v7037_v6 = vcombine.high %v5441_v16, %v5445_v5  ;;  %v7220_v54 = vpop.f32.mrb[29].mxu1  ;;  %v5158_v53 = vrot.slane %v9809_v30, 5  ;;  %v7183_v56 = vpop.f32.mrb[31].mxu0  ;;  %v6992_v8 = vld [vmem:[%s8402_s26 + $0x60] sm:$0xee] }
 0x149   : > { %v7218_v47 = vadd.f32 %v7217_v33, %v7216_v19  ;;  %v1144_v9 = vadd.f32 %v7178_v13, %v9683_v39  ;;  %v6927_v41 = vrot.slane %v6919_v58, 9  ;;  %v7222_v42 = vpop.f32.mrb[30].mxu1  ;;  %v5162_v45 = vrot.slane %v9812_v21, 5  ;;  %v7241_v31 = vpop.f32.mrb[32].mxu0 }
 0x14a   : > { %v10007_v26 = vadd.f32 %v7215_v48, %v1143_v60  ;;  %5663 = vmatprep.mubr.bf16.mxu1 %v7037_v6  ;;  %v6998_v7 = vrot.slane %v6990_v1, 9  ;;  %v5448_v3 = vrot.slane %v9816_v34, 5  ;;  %v6999_v17 = vrot.slane %v6991_v43, 9  ;;  %v7223_v50 = vpop.f32.mrb[31].mxu1  ;;  %v7242_v28 = vpop.f32.mrb[33].mxu0 }
 0x14b   : > { %v10013_v44 = vadd.f32 %v7218_v47, %v1144_v9  ;;  %v5159_v39 = vsel %vm8805_vm5, %v6926_v11, %v5158_v53  ;;  %v5452_v30 = vrot.slane %v9823_v25, 5  ;;  %v7181_v14 = vadd.f32 %v7180_v15, %v7179_v40  ;;  %v7281_v36 = vpop.f32.mrb[32].mxu1  ;;  %v7244_v19 = vpop.f32.mrb[34].mxu0  ;;  %v6993_v48 = vld [vmem:[%s8402_s26 + $0x70] sm:$0xee] }
 0x14c   : > { %v5163_v21 = vsel %vm8805_vm5, %v6927_v41, %v5162_v45  ;;  %v10022_v34 = vsel %vm8805_vm5, %v6998_v7, %v5448_v3  ;;  %v7221_v27 = vadd.f32 %v7220_v54, %v7219_v49  ;;  %v7184_v35 = vadd.f32 %v7183_v56, %v7182_v4  ;;  %v7282_v18 = vpop.f32.mrb[33].mxu1  ;;  %v7245_v33 = vpop.f32.mrb[35].mxu0 }
 0x14d   : > { %5374 = vmatmul.mubr.bf16.vlgmr.msra.gmra.mrb[128].mxu0 %v6964_v0  ;;  %v6967_v55 = vcombine.high %v5159_v39, %v5163_v21  ;;  %v10028_v25 = vsel %vm8805_vm5, %v6999_v17, %v5452_v30  ;;  %v6966_v38 = vcombine.low %v5159_v39, %v5163_v21  ;;  %v1145_v0 = vadd.f32 %v7181_v14, %v9826_v63  ;;  %v7284_v16 = vpop.f32.mrb[34].mxu1  ;;  %v7247_v1 = vpop.f32.mrb[36].mxu0  ;;  %v6922_v17 = vld [vmem:[%s8407_s29 + $0x80] sm:$0xee] }
 0x14e   : > { %v7039_v58 = vcombine.high %v10022_v34, %v10028_v25  ;;  %v7038_v40 = vcombine.low %v10022_v34, %v10028_v25  ;;  %v1146_v5 = vadd.f32 %v7184_v35, %v9871_v46  ;;  %v7224_v60 = vadd.f32 %v7223_v50, %v7222_v42  ;;  %v7285_v13 = vpop.f32.mrb[35].mxu1  ;;  %v7248_v6 = vpop.f32.mrb[37].mxu0  ;;  %v6923_v50 = vld [vmem:[%s8407_s29 + $0x90] sm:$0xee] }
 0x14f   : > { %5381 = vmatprep.mubr.bf16.mxu0 %v6967_v55  ;;  %v10038_v43 = vadd.f32 %v7221_v27, %v1145_v0  ;;  %v6928_v63 = vrot.slane %v6920_v57, 9  ;;  %v5166_v49 = vrot.slane %v9861_v24, 5  ;;  %v6929_v15 = vrot.slane %v6921_v62, 9  ;;  %v7250_v9 = vpop.f32.mrb[38].mxu0  ;;  %v6995_v62 = vld [vmem:[%s8402_s26 + $0x90] sm:$0xee] }
 0x150   : > { %5664 = vmatmul.mubr.bf16.vlgmr.msra.gmra.mrb[128].mxu1 %v7036_v32  ;;  %v7287_v32 = vpop.f32.mrb[36].mxu1  ;;  %v10041_v47 = vadd.f32 %v7224_v60, %v1146_v5  ;;  %v5170_v11 = vrot.slane %v9865_v12, 5  ;;  %v7000_v46 = vrot.slane %v6992_v8, 9  ;;  %v5456_v54 = vrot.slane %v9875_v22, 5  ;;  %v7251_v45 = vpop.f32.mrb[39].mxu0 }
 0x151   : > { %5671 = vmatprep.mubr.bf16.mxu1 %v7039_v58  ;;  %v7288_v4 = vpop.f32.mrb[37].mxu1  ;;  %v5167_v53 = vsel %vm8805_vm5, %v6928_v63, %v5166_v49  ;;  %v7001_v24 = vrot.slane %v6993_v48, 9  ;;  %v5460_v41 = vrot.slane %v9878_v61, 5  ;;  %v7243_v42 = vadd.f32 %v7242_v28, %v7241_v31  ;;  %v7253_v30 = vpop.f32.mrb[40].mxu0  ;;  %v6994_v28 = vld [vmem:[%s8402_s26 + $0x80] sm:$0xee] }
 0x152   : > { %v7290_v56 = vpop.f32.mrb[38].mxu1  ;;  %v5171_v12 = vsel %vm8805_vm5, %v6929_v15, %v5170_v11  ;;  %v10052_v7 = vsel %vm8805_vm5, %v7000_v46, %v5456_v54  ;;  %v7283_v22 = vadd.f32 %v7282_v18, %v7281_v36  ;;  %v7246_v3 = vadd.f32 %v7245_v33, %v7244_v19  ;;  %v7254_v34 = vpop.f32.mrb[41].mxu0 }
 0x153   : > { %v7291_v39 = vpop.f32.mrb[39].mxu1  ;;  %v6969_v14 = vcombine.high %v5167_v53, %v5171_v12  ;;  %v10058_v61 = vsel %vm8805_vm5, %v7001_v24, %v5460_v41  ;;  %v1794_v31 = vadd.f32 %v7243_v42, %v9923_v51  ;;  %v6968_v36 = vcombine.low %v5167_v53, %v5171_v12  ;;  %v7256_v19 = vpop.f32.mrb[42].mxu0 }
 0x154   : > { %v7293_v21 = vpop.f32.mrb[40].mxu1  ;;  %v7041_v27 = vcombine.high %v10052_v7, %v10058_v61  ;;  %v1795_v35 = vadd.f32 %v7246_v3, %v9948_v23  ;;  %v7286_v57 = vadd.f32 %v7285_v13, %v7284_v16  ;;  %v6930_v25 = vrot.slane %v6922_v17, 9  ;;  %v7257_v8 = vpop.f32.mrb[43].mxu0 }
 0x155   : > { %5382 = vmatmul.mubr.bf16.gmra.mrb[132].mxu0 %v6966_v38  ;;  %v7294_v18 = vpop.f32.mrb[41].mxu1  ;;  %v10066_v55 = vadd.f32 %v7283_v22, %v1794_v31  ;;  %v5174_v38 = vrot.slane %v9920_v10, 5  ;;  %v6931_v51 = vrot.slane %v6923_v50, 9  ;;  %v5178_v58 = vrot.slane %v9926_v20, 5  ;;  %v7259_v60 = vpop.f32.mrb[44].mxu0 }
 0x156   : > { %5389 = vmatprep.mubr.bf16.mxu0 %v6969_v14  ;;  %v7296_v0 = vpop.f32.mrb[42].mxu1  ;;  %v10069_v33 = vadd.f32 %v7286_v57, %v1795_v35  ;;  %v7002_v5 = vrot.slane %v6994_v28, 9  ;;  %v5464_v23 = vrot.slane %v9930_v59, 5  ;;  %v7003_v13 = vrot.slane %v6995_v62, 9 }
 0x157   : > { %v7297_v16 = vpop.f32.mrb[43].mxu1  ;;  %v10075_v48 = vsel %vm8805_vm5, %v6930_v25, %v5174_v38  ;;  %v5468_v10 = vrot.slane %v9939_v37, 5  ;;  %v7249_v63 = vadd.f32 %v7248_v6, %v7247_v1  ;;  %v5179_v15 = vsel %vm8805_vm5, %v6931_v51, %v5178_v58 }
 0x158   : > { %5672 = vmatmul.mubr.bf16.gmra.mrb[132].mxu1 %v7038_v40  ;;  %v7299_v49 = vpop.f32.mrb[44].mxu1  ;;  %v7260_v40 = vpop.f32.mrb[45].mxu0  ;;  %v10082_v20 = vsel %vm8805_vm5, %v7002_v5, %v5464_v23  ;;  %v7289_v59 = vadd.f32 %v7288_v4, %v7287_v32  ;;  %v7252_v11 = vadd.f32 %v7251_v45, %v7250_v9  ;;  %v7040_v53 = vcombine.low %v10052_v7, %v10058_v61 }
 0x159   : > { %5679 = vmatprep.mubr.bf16.mxu1 %v7041_v27  ;;  %v7300_v46 = vpop.f32.mrb[45].mxu1  ;;  %v7262_v54 = vpop.f32.mrb[46].mxu0  ;;  %v6971_v37 = vcombine.high %v10075_v48, %v5179_v15  ;;  %v10089_v1 = vsel %vm8805_vm5, %v7003_v13, %v5468_v10  ;;  %v1796_v6 = vadd.f32 %v7249_v63, %v9976_v29  ;;  %v6970_v4 = vcombine.low %v10075_v48, %v5179_v15 }
 0x15a   : > { %v7302_v24 = vpop.f32.mrb[46].mxu1  ;;  %v7263_v41 = vpop.f32.mrb[47].mxu0  ;;  %v7043_v32 = vcombine.high %v10082_v20, %v10089_v1  ;;  %v1797_v9 = vadd.f32 %v7252_v11, %v9997_v2  ;;  %v7292_v42 = vadd.f32 %v7291_v39, %v7290_v56  ;;  %v7255_v22 = vadd.f32 %v7254_v34, %v7253_v30 }
 0x15b   : > { %v7303_v45 = vpop.f32.mrb[47].mxu1  ;;  %v7321_v12 = vpop.f32.mrb[48].mxu0  ;;  %v2086_v7 = vadd.f32 %v7289_v59, %v1796_v6  ;;  %v7295_v52 = vadd.f32 %v7294_v18, %v7293_v21  ;;  %v7258_v3 = vadd.f32 %v7257_v8, %v7256_v19  ;;  %v7298_v14 = vadd.f32 %v7297_v16, %v7296_v0 }
 0x15c   : > { %v7322_v50 = vpop.f32.mrb[49].mxu0  ;;  %v2087_v29 = vadd.f32 %v7292_v42, %v1797_v9  ;;  %v7261_v61 = vadd.f32 %v7260_v40, %v7259_v60  ;;  %v7301_v31 = vadd.f32 %v7300_v46, %v7299_v49  ;;  %v7264_v56 = vadd.f32 %v7263_v41, %v7262_v54 }
 0x15d   : > { %5390 = vmatmul.mubr.bf16.gmra.mrb[136].mxu0 %v6968_v36  ;;  %v7361_v17 = vpop.f32.mrb[48].mxu1  ;;  %v7324_v27 = vpop.f32.mrb[50].mxu0  ;;  %v1798_v36 = vadd.f32 %v7255_v22, %v10007_v26  ;;  %v1799_v2 = vadd.f32 %v7258_v3, %v10013_v44  ;;  %v7304_v39 = vadd.f32 %v7303_v45, %v7302_v24  ;;  %v7323_v21 = vadd.f32 %v7322_v50, %v7321_v12 }
 0x15e   : > { %5397 = vmatprep.mubr.bf16.mxu0 %v6971_v37  ;;  %v7362_v28 = vpop.f32.mrb[49].mxu1  ;;  %v7325_v57 = vpop.f32.mrb[51].mxu0  ;;  %v1800_v30 = vadd.f32 %v7261_v61, %v10038_v43  ;;  %v1801_v51 = vadd.f32 %v7264_v56, %v10041_v47  ;;  %v7042_v60 = vcombine.low %v10082_v20, %v10089_v1 }
 0x15f   : > { %v7364_v35 = vpop.f32.mrb[50].mxu1  ;;  %v7363_v34 = vadd.f32 %v7362_v28, %v7361_v17  ;;  %v7326_v62 = vadd.f32 %v7325_v57, %v7324_v27  ;;  %v2088_v25 = vadd.f32 %v7295_v52, %v1798_v36  ;;  %v2089_v38 = vadd.f32 %v7298_v14, %v1799_v2 }
 0x160   : > { %5680 = vmatmul.mubr.bf16.gmra.mrb[136].mxu1 %v7040_v53  ;;  %v7365_v18 = vpop.f32.mrb[51].mxu1  ;;  %v2090_v8 = vadd.f32 %v7301_v31, %v1800_v30  ;;  %v2335_v58 = vadd.f32 %v7323_v21, %v10066_v55  ;;  %v2091_v48 = vadd.f32 %v7304_v39, %v1801_v51 }
 0x161   : > { %5687 = vmatprep.mubr.bf16.mxu1 %v7043_v32  ;;  %v7366_v26 = vadd.f32 %v7365_v18, %v7364_v35  ;;  %v2336_v5 = vadd.f32 %v7326_v62, %v10069_v33 }
 0x162   : > { %v7327_v19 = vpop.f32.mrb[52].mxu0  ;;  %v2586_v47 = vadd.f32 %v7363_v34, %v2335_v58 }
 0x163   : > { %v7328_v44 = vpop.f32.mrb[53].mxu0  ;;  %v2587_v49 = vadd.f32 %v7366_v26, %v2336_v5 }
 0x164   : > { %v7329_v23 = vadd.f32 %v7328_v44, %v7327_v19  ;;  %v7330_v16 = vpop.f32.mrb[54].mxu0 }
 0x165   : > { %v7367_v0 = vpop.f32.mrb[52].mxu1  ;;  %5398 = vmatmul.mubr.bf16.gmra.mrb[140].mxu0 %v6970_v4  ;;  %v7331_v63 = vpop.f32.mrb[55].mxu0 }
 0x166   : > { %v7368_v43 = vpop.f32.mrb[53].mxu1  ;;  %v2337_v40 = vadd.f32 %v7329_v23, %v2086_v7  ;;  %v7332_v15 = vadd.f32 %v7331_v63, %v7330_v16 }
 0x167   : > { %v7369_v13 = vadd.f32 %v7368_v43, %v7367_v0  ;;  %v7370_v10 = vpop.f32.mrb[54].mxu1 }
 0x168   : > { %v7371_v59 = vpop.f32.mrb[55].mxu1  ;;  %v2338_v53 = vadd.f32 %v7332_v15, %v2087_v29  ;;  %5688 = vmatmul.mubr.bf16.gmra.mrb[140].mxu1 %v7042_v60 }
 0x169   : > { %v7372_v55 = vadd.f32 %v7371_v59, %v7370_v10  ;;  %v2588_v54 = vadd.f32 %v7369_v13, %v2337_v40  ;;  %v5728_v13 = vld [vmem:[%s10251_s5 + $0x8] sm:$0xff] }
 0x16a   : > { %v7333_v11 = vpop.f32.mrb[56].mxu0 }
 0x16b   : > { %v7334_v33 = vpop.f32.mrb[57].mxu0  ;;  %v2589_v32 = vadd.f32 %v7372_v55, %v2338_v53 }
 0x16c   : > { %v7335_v37 = vadd.f32 %v7334_v33, %v7333_v11  ;;  %v7336_v24 = vpop.f32.mrb[58].mxu0 }
 0x16d   : > { %v7373_v46 = vpop.f32.mrb[56].mxu1  ;;  %v7337_v1 = vpop.f32.mrb[59].mxu0 }
 0x16e   : > { %v7374_v6 = vpop.f32.mrb[57].mxu1  ;;  %v2339_v4 = vadd.f32 %v7335_v37, %v2088_v25  ;;  %v7338_v9 = vadd.f32 %v7337_v1, %v7336_v24 }
 0x16f   : > { %v7375_v41 = vadd.f32 %v7374_v6, %v7373_v46  ;;  %v7376_v20 = vpop.f32.mrb[58].mxu1 }
 0x170   : > { %v7377_v42 = vpop.f32.mrb[59].mxu1  ;;  %v2340_v3 = vadd.f32 %v7338_v9, %v2089_v38 }
 0x171   : > { %v7378_v12 = vadd.f32 %v7377_v42, %v7376_v20  ;;  %v2590_v52 = vadd.f32 %v7375_v41, %v2339_v4 }
 0x172   : > { %v7339_v45 = vpop.f32.mrb[60].mxu0 }
 0x173   : > { %v7340_v22 = vpop.f32.mrb[61].mxu0  ;;  %v2591_v28 = vadd.f32 %v7378_v12, %v2340_v3  ;;  %v5731_v3 = vld [vmem:[%s10251_s5 + $0x20] sm:$0xff] }
 0x174   : > { %v7341_v17 = vadd.f32 %v7340_v22, %v7339_v45  ;;  %v7342_v29 = vpop.f32.mrb[62].mxu0  ;;  %v5730_v45 = vld [vmem:[%s10251_s5 + $0x18] sm:$0xff] }
 0x175   : > { %v7379_v7 = vpop.f32.mrb[60].mxu1  ;;  %v7343_v31 = vpop.f32.mrb[63].mxu0 }
 0x176   : > { %v7380_v50 = vpop.f32.mrb[61].mxu1  ;;  %v2341_v27 = vadd.f32 %v7341_v17, %v2090_v8  ;;  %v7344_v36 = vadd.f32 %v7343_v31, %v7342_v29 }
 0x177   : > { %v7381_v14 = vadd.f32 %v7380_v50, %v7379_v7  ;;  %v7382_v61 = vpop.f32.mrb[62].mxu1 }
 0x178   : > { %v7383_v2 = vpop.f32.mrb[63].mxu1  ;;  %v2342_v35 = vadd.f32 %v7344_v36, %v2091_v48  ;;  %v5727_v48 = vld [vmem:[%s10251_s5] sm:$0xff]  ;;  %v5733_v36 = vld [vmem:[%s10251_s5 + $0x30] sm:$0xff] }
 0x179   : > { %v7384_v56 = vadd.f32 %v7383_v2, %v7382_v61  ;;  %v10104_v39 = vadd.f32 %v7381_v14, %v2341_v27  ;;  %v7853_v40 = vpack.c.bf16 %v5728_v13, %v5727_v48  ;;  %v5734_v2 = vld [vmem:[%s10251_s5 + $0x38] sm:$0xff] }
 0x17a   : > { %v7401_v30 = vpop.f32.mrb[64].mxu0  ;;  %v5738_v48 = vld [vmem:[%s10251_s5 + $0x58] sm:$0xff] }
 0x17b   : > { %v10106_v57 = vadd.f32 %v7384_v56, %v2342_v35  ;;  %v7402_v34 = vpop.f32.mrb[65].mxu0  ;;  %7854 = vmatprep.subr.bf16.mxu0 %v7853_v40  ;;  %7885 = vmatprep.subr.bf16.mxu1 %v7853_v40  ;;  %v7865_v35 = vpack.c.bf16 %v5734_v2, %v5733_v36 }
 0x17c   : > { %v7403_v62 = vadd.f32 %v7402_v34, %v7401_v30  ;;  %v7404_v19 = vpop.f32.mrb[66].mxu0  ;;  %7856 = vmatpush3.bf16.msra.mxu0 %v7853_v40  ;;  %7893 = vmatpush3.bf16.msra.mxu1 %v7853_v40 }
 0x17d   : > { %v7441_v21 = vpop.f32.mrb[64].mxu1  ;;  %v7405_v51 = vpop.f32.mrb[67].mxu0 }
 0x17e   : > { %v7442_v18 = vpop.f32.mrb[65].mxu1  ;;  %v2948_v26 = vadd.f32 %v7403_v62, %v2586_v47  ;;  %v7406_v0 = vadd.f32 %v7405_v51, %v7404_v19  ;;  %v5736_v51 = vld [vmem:[%s10251_s5 + $0x48] sm:$0xff] }
 0x17f   : > { %v7443_v25 = vadd.f32 %v7442_v18, %v7441_v21  ;;  %v7444_v38 = vpop.f32.mrb[66].mxu1 }
 0x180   : > { %v7445_v44 = vpop.f32.mrb[67].mxu1  ;;  %v2949_v5 = vadd.f32 %v7406_v0, %v2587_v49 }
 0x181   : > { %v7446_v8 = vadd.f32 %v7445_v44, %v7444_v38  ;;  %v10108_v58 = vadd.f32 %v7443_v25, %v2948_v26  ;;  %v5735_v38 = vld [vmem:[%s10251_s5 + $0x40] sm:$0xff] }
 0x182   : > { %v7407_v43 = vpop.f32.mrb[68].mxu0  ;;  %v7869_v44 = vpack.c.bf16 %v5736_v51, %v5735_v38 }
 0x183   : > { %v10110_v23 = vadd.f32 %v7446_v8, %v2949_v5  ;;  %v7408_v60 = vpop.f32.mrb[69].mxu0 }
 0x184   : > { %v7409_v10 = vadd.f32 %v7408_v60, %v7407_v43  ;;  %v7410_v47 = vpop.f32.mrb[70].mxu0  ;;  %v5737_v60 = vld [vmem:[%s10251_s5 + $0x50] sm:$0xff] }
 0x185   : > { %v7447_v16 = vpop.f32.mrb[68].mxu1  ;;  %v7411_v49 = vpop.f32.mrb[71].mxu0 }
 0x186   : > { %v7448_v63 = vpop.f32.mrb[69].mxu1  ;;  %v2950_v11 = vadd.f32 %v7409_v10, %v2588_v54  ;;  %v7412_v55 = vadd.f32 %v7411_v49, %v7410_v47  ;;  %v5729_v54 = vld [vmem:[%s10251_s5 + $0x10] sm:$0xff]  ;;  %v7873_v10 = vpack.c.bf16 %v5738_v48, %v5737_v60 }
 0x187   : > { %v7449_v15 = vadd.f32 %v7448_v63, %v7447_v16  ;;  %v7450_v59 = vpop.f32.mrb[70].mxu1  ;;  %v7857_v7 = vpack.c.bf16 %v5730_v45, %v5729_v54 }
 0x188   : > { %v7451_v46 = vpop.f32.mrb[71].mxu1  ;;  %v2951_v37 = vadd.f32 %v7412_v55, %v2589_v32  ;;  %v5739_v55 = vld [vmem:[%s10251_s5 + $0x60] sm:$0xff] }
 0x189   : > { %v7452_v33 = vadd.f32 %v7451_v46, %v7450_v59  ;;  %v10118_v53 = vadd.f32 %v7449_v15, %v2950_v11  ;;  %7858 = vmatprep.subr.bf16.mxu0 %v7857_v7  ;;  %7886 = vmatprep.subr.bf16.mxu1 %v7857_v7  ;;  %v5740_v46 = vld [vmem:[%s10251_s5 + $0x68] sm:$0xff] }
 0x18a   : > { %v7413_v24 = vpop.f32.mrb[72].mxu0  ;;  %7860 = vmatpush3.bf16.msra.mxu0 %v7857_v7  ;;  %7894 = vmatpush3.bf16.msra.mxu1 %v7857_v7 }
 0x18b   : > { %v10120_v6 = vadd.f32 %v7452_v33, %v2951_v37  ;;  %v7414_v41 = vpop.f32.mrb[73].mxu0 }
 0x18c   : > { %v7415_v20 = vadd.f32 %v7414_v41, %v7413_v24  ;;  %v7416_v1 = vpop.f32.mrb[74].mxu0  ;;  %v7877_v24 = vpack.c.bf16 %v5740_v46, %v5739_v55 }
 0x18d   : > { %v7417_v4 = vpop.f32.mrb[75].mxu0  ;;  %v7453_v12 = vpop.f32.mrb[72].mxu1 }
 0x18e   : > { %v2952_v9 = vadd.f32 %v7415_v20, %v2590_v52  ;;  %v7418_v42 = vadd.f32 %v7417_v4, %v7416_v1  ;;  %v7454_v32 = vpop.f32.mrb[73].mxu1  ;;  %v5732_v52 = vld [vmem:[%s10251_s5 + $0x28] sm:$0xff]  ;;  %v5741_v4 = vld [vmem:[%s10251_s5 + $0x70] sm:$0xff] }
 0x18f   : > { %v7455_v17 = vadd.f32 %v7454_v32, %v7453_v12  ;;  %v7456_v50 = vpop.f32.mrb[74].mxu1  ;;  %v7861_v29 = vpack.c.bf16 %v5732_v52, %v5731_v3 }
 0x190   : > { %v2953_v22 = vadd.f32 %v7418_v42, %v2591_v28  ;;  %v7457_v14 = vpop.f32.mrb[75].mxu1 }
 0x191   : > { %v10134_v61 = vadd.f32 %v7455_v17, %v2952_v9  ;;  %v7458_v31 = vadd.f32 %v7457_v14, %v7456_v50  ;;  %7862 = vmatprep.subr.bf16.mxu0 %v7861_v29  ;;  %7887 = vmatprep.subr.bf16.mxu1 %v7861_v29  ;;  %v5742_v9 = vld [vmem:[%s10251_s5 + $0x78] sm:$0xff] }
 0x192   : > { %7864 = vmatpush3.bf16.msra.mxu0 %v7861_v29  ;;  %7895 = vmatpush3.bf16.msra.mxu1 %v7861_v29 }
 0x193   : > { %v10136_v28 = vadd.f32 %v7458_v31, %v2953_v22  ;;  %7866 = vmatprep.subr.bf16.mxu0 %v7865_v35  ;;  %7888 = vmatprep.subr.bf16.mxu1 %v7865_v35 }
 0x194   : > { %v7419_v27 = vpop.f32.mrb[76].mxu0 }
 0x195   : > { %v7420_v56 = vpop.f32.mrb[77].mxu0 }
 0x196   : > { %v7421_v30 = vadd.f32 %v7420_v56, %v7419_v27  ;;  %v7422_v21 = vpop.f32.mrb[78].mxu0  ;;  %7868 = vmatpush3.bf16.msra.mxu0 %v7865_v35  ;;  %7896 = vmatpush3.bf16.msra.mxu1 %v7865_v35 }
 0x197   : > { %v7423_v62 = vpop.f32.mrb[79].mxu0  ;;  %7870 = vmatprep.subr.bf16.mxu0 %v7869_v44  ;;  %7889 = vmatprep.subr.bf16.mxu1 %v7869_v44 }
 0x198   : > { %v7459_v34 = vpop.f32.mrb[76].mxu1  ;;  %v2954_v18 = vadd.f32 %v7421_v30, %v10104_v39  ;;  %v7424_v25 = vadd.f32 %v7423_v62, %v7422_v21 }
 0x199   : > { %v7460_v19 = vpop.f32.mrb[77].mxu1 }
 0x19a   : > { %v7461_v26 = vadd.f32 %v7460_v19, %v7459_v34  ;;  %v7462_v0 = vpop.f32.mrb[78].mxu1  ;;  %v2955_v8 = vadd.f32 %v7424_v25, %v10106_v57  ;;  %7872 = vmatpush3.bf16.msra.mxu0 %v7869_v44  ;;  %7897 = vmatpush3.bf16.msra.mxu1 %v7869_v44 }
 0x19b   : > { %v7463_v5 = vpop.f32.mrb[79].mxu1  ;;  %7874 = vmatprep.subr.bf16.mxu0 %v7873_v10  ;;  %7890 = vmatprep.subr.bf16.mxu1 %v7873_v10 }
 0x19c   : > { %v10152_v43 = vadd.f32 %v7461_v26, %v2954_v18  ;;  %v7464_v39 = vadd.f32 %v7463_v5, %v7462_v0  ;;  %v7481_v16 = vpop.f32.mrb[80].mxu0 }
 0x19d   : > { %v7482_v57 = vpop.f32.mrb[81].mxu0 }
 0x19e   : > { %v10160_v13 = vadd.f32 %v7464_v39, %v2955_v8  ;;  %v7483_v63 = vadd.f32 %v7482_v57, %v7481_v16  ;;  %v7484_v47 = vpop.f32.mrb[82].mxu0  ;;  %7876 = vmatpush3.bf16.msra.mxu0 %v7873_v10  ;;  %7898 = vmatpush3.bf16.msra.mxu1 %v7873_v10 }
 0x19f   : > { %v7485_v15 = vpop.f32.mrb[83].mxu0  ;;  %7878 = vmatprep.subr.bf16.mxu0 %v7877_v24  ;;  %7891 = vmatprep.subr.bf16.mxu1 %v7877_v24 }
 0x1a0   : > { %v7521_v40 = vpop.f32.mrb[80].mxu1  ;;  %v3600_v59 = vadd.f32 %v7483_v63, %v10108_v58  ;;  %v7486_v11 = vadd.f32 %v7485_v15, %v7484_v47 }
 0x1a1   : > { %v7522_v49 = vpop.f32.mrb[81].mxu1 }
 0x1a2   : > { %v7523_v33 = vadd.f32 %v7522_v49, %v7521_v40  ;;  %v7524_v37 = vpop.f32.mrb[82].mxu1  ;;  %v3601_v41 = vadd.f32 %v7486_v11, %v10110_v23  ;;  %7880 = vmatpush3.bf16.msra.mxu0 %v7877_v24  ;;  %7899 = vmatpush3.bf16.msra.mxu1 %v7877_v24  ;;  %v7881_v23 = vpack.c.bf16 %v5742_v9, %v5741_v4 }
 0x1a3   : > { %v7525_v20 = vpop.f32.mrb[83].mxu1 }
 0x1a4   : > { %v10170_v1 = vadd.f32 %v7523_v33, %v3600_v59  ;;  %v7526_v58 = vadd.f32 %v7525_v20, %v7524_v37  ;;  %v7487_v54 = vpop.f32.mrb[84].mxu0  ;;  %7882 = vmatprep.subr.bf16.mxu0 %v7881_v23  ;;  %7892 = vmatprep.subr.bf16.mxu1 %v7881_v23 }
 0x1a5   : > { %v7488_v45 = vpop.f32.mrb[85].mxu0 }
 0x1a6   : > { %v10178_v42 = vadd.f32 %v7526_v58, %v3601_v41  ;;  %v7489_v7 = vadd.f32 %v7488_v45, %v7487_v54  ;;  %v7490_v32 = vpop.f32.mrb[86].mxu0  ;;  %7884 = vmatpush3.bf16.msra.mxu0 %v7881_v23  ;;  %7900 = vmatpush3.bf16.msra.mxu1 %v7881_v23 }
 0x1a7   : > { %v7491_v3 = vpop.f32.mrb[87].mxu0 }
 0x1a8   : > { %v7527_v12 = vpop.f32.mrb[84].mxu1  ;;  %v3602_v52 = vadd.f32 %v7489_v7, %v10118_v53  ;;  %v7492_v29 = vadd.f32 %v7491_v3, %v7490_v32 }
 0x1a9   : > { %v7528_v22 = vpop.f32.mrb[85].mxu1 }
 0x1aa   : > { %v7529_v17 = vadd.f32 %v7528_v22, %v7527_v12  ;;  %v7530_v50 = vpop.f32.mrb[86].mxu1  ;;  %v3603_v27 = vadd.f32 %v7492_v29, %v10120_v6 }
 0x1ab   : > { %v7531_v14 = vpop.f32.mrb[87].mxu1 }
 0x1ac   : > { %v3892_v31 = vadd.f32 %v7529_v17, %v3602_v52  ;;  %v7532_v36 = vadd.f32 %v7531_v14, %v7530_v50  ;;  %v7493_v56 = vpop.f32.mrb[88].mxu0 }
 0x1ad   : > { %v7494_v30 = vpop.f32.mrb[89].mxu0 }
 0x1ae   : > { %v10182_v2 = vadd.f32 %v7532_v36, %v3603_v27  ;;  %v7495_v21 = vadd.f32 %v7494_v30, %v7493_v56  ;;  %v7496_v62 = vpop.f32.mrb[90].mxu0 }
 0x1af   : > { %v7497_v25 = vpop.f32.mrb[91].mxu0 }
 0x1b0   : > { %v7533_v35 = vpop.f32.mrb[88].mxu1  ;;  %v3604_v53 = vadd.f32 %v7495_v21, %v10134_v61  ;;  %v7498_v38 = vadd.f32 %v7497_v25, %v7496_v62 }
 0x1b1   : > { %v7534_v34 = vpop.f32.mrb[89].mxu1 }
 0x1b2   : > { %v7535_v18 = vadd.f32 %v7534_v34, %v7533_v35  ;;  %v7536_v19 = vpop.f32.mrb[90].mxu1  ;;  %v3605_v6 = vadd.f32 %v7498_v38, %v10136_v28 }
 0x1b3   : > { %v7537_v51 = vpop.f32.mrb[91].mxu1 }
 0x1b4   : > { %v7538_v26 = vadd.f32 %v7537_v51, %v7536_v19  ;;  %v3894_v0 = vadd.f32 %v7535_v18, %v3604_v53  ;;  %v7499_v8 = vpop.f32.mrb[92].mxu0 }
 0x1b5   : > { %v7500_v39 = vpop.f32.mrb[93].mxu0 }
 0x1b6   : > { %v10186_v44 = vadd.f32 %v7538_v26, %v3605_v6  ;;  %v7501_v16 = vadd.f32 %v7500_v39, %v7499_v8  ;;  %v7502_v48 = vpop.f32.mrb[94].mxu0 }
 0x1b7   : > { %v7503_v63 = vpop.f32.mrb[95].mxu0 }
 0x1b8   : > { %v3606_v47 = vadd.f32 %v7501_v16, %v10152_v43  ;;  %v7504_v61 = vadd.f32 %v7503_v63, %v7502_v48 }
 0x1ba   : > { %v3607_v49 = vadd.f32 %v7504_v61, %v10160_v13 }
 0x1d3   : > { %v7539_v5 = vpop.f32.mrb[92].mxu1 }
 0x1d4   : > { %v7540_v60 = vpop.f32.mrb[93].mxu1  ;;  %v7561_v11 = vpop.f32.mrb[96].mxu0 }
 0x1d5   : > { %v7541_v57 = vadd.f32 %v7540_v60, %v7539_v5  ;;  %v7542_v10 = vpop.f32.mrb[94].mxu1  ;;  %v7562_v46 = vpop.f32.mrb[97].mxu0 }
 0x1d6   : > { %v7543_v40 = vpop.f32.mrb[95].mxu1  ;;  %v7563_v33 = vadd.f32 %v7562_v46, %v7561_v11  ;;  %v7564_v24 = vpop.f32.mrb[98].mxu0 }
 0x1d7   : > { %v7544_v15 = vadd.f32 %v7543_v40, %v7542_v10  ;;  %v3896_v59 = vadd.f32 %v7541_v57, %v3606_v47  ;;  %v7565_v58 = vpop.f32.mrb[99].mxu0 }
 0x1d8   : > { %v4141_v4 = vadd.f32 %v7563_v33, %v10170_v1  ;;  %v7566_v43 = vadd.f32 %v7565_v58, %v7564_v24 }
 0x1d9   : > { %v10190_v28 = vadd.f32 %v7544_v15, %v3607_v49 }
 0x1da   : > { %v4142_v45 = vadd.f32 %v7566_v43, %v10178_v42 }
 0x1db   : > { %v7601_v55 = vpop.f32.mrb[96].mxu1 }
 0x1dc   : > { %v7602_v37 = vpop.f32.mrb[97].mxu1 }
 0x1dd   : > { %v7603_v41 = vadd.f32 %v7602_v37, %v7601_v55  ;;  %v7604_v20 = vpop.f32.mrb[98].mxu1  ;;  %v7567_v12 = vpop.f32.mrb[100].mxu0 }
 0x1de   : > { %v7605_v9 = vpop.f32.mrb[99].mxu1  ;;  %v7568_v32 = vpop.f32.mrb[101].mxu0 }
 0x1df   : > { %v7606_v54 = vadd.f32 %v7605_v9, %v7604_v20  ;;  %v4392_v23 = vadd.f32 %v7603_v41, %v4141_v4  ;;  %v7569_v3 = vadd.f32 %v7568_v32, %v7567_v12  ;;  %v7570_v17 = vpop.f32.mrb[102].mxu0 }
 0x1e0   : > { %v7571_v29 = vpop.f32.mrb[103].mxu0 }
 0x1e1   : > { %v10194_v13 = vadd.f32 %v7606_v54, %v4142_v45  ;;  %v4143_v27 = vadd.f32 %v7569_v3, %v3892_v31  ;;  %v7572_v1 = vadd.f32 %v7571_v29, %v7570_v17 }
 0x1e3   : > { %v7607_v7 = vpop.f32.mrb[100].mxu1  ;;  %v4144_v35 = vadd.f32 %v7572_v1, %v10182_v2 }
 0x1e4   : > { %v7608_v22 = vpop.f32.mrb[101].mxu1 }
 0x1e5   : > { %v7609_v52 = vadd.f32 %v7608_v22, %v7607_v7  ;;  %v7610_v50 = vpop.f32.mrb[102].mxu1  ;;  %v7573_v42 = vpop.f32.mrb[104].mxu0 }
 0x1e6   : > { %v7611_v14 = vpop.f32.mrb[103].mxu1  ;;  %v7574_v34 = vpop.f32.mrb[105].mxu0 }
 0x1e7   : > { %v7612_v36 = vadd.f32 %v7611_v14, %v7610_v50  ;;  %v4394_v56 = vadd.f32 %v7609_v52, %v4143_v27  ;;  %v7575_v62 = vadd.f32 %v7574_v34, %v7573_v42  ;;  %v7576_v19 = vpop.f32.mrb[106].mxu0 }
 0x1e8   : > { %v7577_v38 = vpop.f32.mrb[107].mxu0 }
 0x1e9   : > { %v10197_v30 = vadd.f32 %v7612_v36, %v4144_v35  ;;  %v4145_v51 = vadd.f32 %v7575_v62, %v3894_v0  ;;  %v7578_v26 = vadd.f32 %v7577_v38, %v7576_v19 }
 0x1eb   : > { %v7613_v21 = vpop.f32.mrb[104].mxu1  ;;  %v4146_v5 = vadd.f32 %v7578_v26, %v10186_v44 }
 0x1ec   : > { %v7614_v18 = vpop.f32.mrb[105].mxu1 }
 0x1ed   : > { %v7615_v25 = vadd.f32 %v7614_v18, %v7613_v21  ;;  %v7616_v53 = vpop.f32.mrb[106].mxu1  ;;  %v7579_v2 = vpop.f32.mrb[108].mxu0 }
 0x1ee   : > { %v7617_v6 = vpop.f32.mrb[107].mxu1  ;;  %v7580_v60 = vpop.f32.mrb[109].mxu0 }
 0x1ef   : > { %v7618_v31 = vadd.f32 %v7617_v6, %v7616_v53  ;;  %v4396_v8 = vadd.f32 %v7615_v25, %v4145_v51  ;;  %v7581_v48 = vadd.f32 %v7580_v60, %v7579_v2  ;;  %v7582_v10 = vpop.f32.mrb[110].mxu0 }
 0x1f0   : > { %v7583_v61 = vpop.f32.mrb[111].mxu0 }
 0x1f1   : > { %v4397_v39 = vadd.f32 %v7618_v31, %v4146_v5  ;;  %v4147_v40 = vadd.f32 %v7581_v48, %v3896_v59  ;;  %v7584_v15 = vadd.f32 %v7583_v61, %v7582_v10 }
 0x1f3   : > { %v7619_v16 = vpop.f32.mrb[108].mxu1  ;;  %v4148_v55 = vadd.f32 %v7584_v15, %v10190_v28 }
 0x1f4   : > { %v7620_v57 = vpop.f32.mrb[109].mxu1 }
 0x1f5   : > { %v7621_v63 = vadd.f32 %v7620_v57, %v7619_v16  ;;  %v7622_v47 = vpop.f32.mrb[110].mxu1  ;;  %v7641_v33 = vpop.f32.mrb[112].mxu0 }
 0x1f6   : > { %v7623_v49 = vpop.f32.mrb[111].mxu1  ;;  %v7642_v37 = vpop.f32.mrb[113].mxu0 }
 0x1f7   : > { %v7624_v0 = vadd.f32 %v7623_v49, %v7622_v47  ;;  %v4398_v11 = vadd.f32 %v7621_v63, %v4147_v40  ;;  %v7643_v24 = vadd.f32 %v7642_v37, %v7641_v33  ;;  %v7644_v20 = vpop.f32.mrb[114].mxu0 }
 0x1f8   : > { %v7645_v43 = vpop.f32.mrb[115].mxu0 }
 0x1f9   : > { %v4399_v46 = vadd.f32 %v7624_v0, %v4148_v55  ;;  %v4754_v9 = vadd.f32 %v7643_v24, %v4392_v23  ;;  %v7646_v54 = vadd.f32 %v7645_v43, %v7644_v20 }
 0x1fb   : > { %v7681_v44 = vpop.f32.mrb[112].mxu1  ;;  %v4755_v7 = vadd.f32 %v7646_v54, %v10194_v13 }
 0x1fc   : > { %v7682_v41 = vpop.f32.mrb[113].mxu1 }
 0x1fd   : > { %v7683_v58 = vadd.f32 %v7682_v41, %v7681_v44  ;;  %v7684_v4 = vpop.f32.mrb[114].mxu1  ;;  %v7647_v22 = vpop.f32.mrb[116].mxu0 }
 0x1fe   : > { %v7685_v45 = vpop.f32.mrb[115].mxu1  ;;  %v7648_v3 = vpop.f32.mrb[117].mxu0 }
 0x1ff   : > { %v7686_v59 = vadd.f32 %v7685_v45, %v7684_v4  ;;  %v5116_v12 = vadd.f32 %v7683_v58, %v4754_v9  ;;  %v7649_v52 = vadd.f32 %v7648_v3, %v7647_v22  ;;  %v7650_v50 = vpop.f32.mrb[118].mxu0 }
 0x200   : > { %v7651_v27 = vpop.f32.mrb[119].mxu0 }
 0x201   : > { %v5117_v32 = vadd.f32 %v7686_v59, %v4755_v7  ;;  %v4756_v1 = vadd.f32 %v7649_v52, %v4394_v56  ;;  %v7652_v36 = vadd.f32 %v7651_v27, %v7650_v50  ;;  %v10214_v7 = vld [vmem:[%s10250_s4] ss:$0 sm:$0xff] }
 0x203   : > { %v7687_v28 = vpop.f32.mrb[116].mxu1  ;;  %v4757_v21 = vadd.f32 %v7652_v36, %v10197_v30 }
 0x204   : > { %v7688_v17 = vpop.f32.mrb[117].mxu1 }
 0x205   : > { %v7689_v29 = vadd.f32 %v7688_v17, %v7687_v28  ;;  %v7690_v14 = vpop.f32.mrb[118].mxu1 }
 0x206   : > { %v7691_v35 = vpop.f32.mrb[119].mxu1 }
 0x207   : > { %v7692_v23 = vadd.f32 %v7691_v35, %v7690_v14  ;;  %v5118_v42 = vadd.f32 %v7689_v29, %v4756_v1 }
 0x209   : > { %v5119_v34 = vadd.f32 %v7692_v23, %v4757_v21  ;;  %v7653_v62 = vpop.f32.mrb[120].mxu0 }
 0x20a   : > { %v7654_v13 = vpop.f32.mrb[121].mxu0 }
 0x20b   : > { %v7655_v18 = vadd.f32 %v7654_v13, %v7653_v62  ;;  %v7656_v19 = vpop.f32.mrb[122].mxu0 }
 0x20c   : > { %v7657_v25 = vpop.f32.mrb[123].mxu0 }
 0x20d   : > { %v4758_v38 = vadd.f32 %v7655_v18, %v4396_v8  ;;  %v7658_v51 = vadd.f32 %v7657_v25, %v7656_v19 }
 0x20e   : > { %v7693_v53 = vpop.f32.mrb[120].mxu1 }
 0x20f   : > { %v7694_v26 = vpop.f32.mrb[121].mxu1  ;;  %v4759_v5 = vadd.f32 %v7658_v51, %v4397_v39 }
 0x210   : > { %v7695_v6 = vadd.f32 %v7694_v26, %v7693_v53  ;;  %v7696_v31 = vpop.f32.mrb[122].mxu1 }
 0x211   : > { %v7697_v56 = vpop.f32.mrb[123].mxu1 }
 0x212   : > { %v10203_v2 = vadd.f32 %v7695_v6, %v4758_v38  ;;  %v7698_v16 = vadd.f32 %v7697_v56, %v7696_v31 }
 0x214   : > { %v10205_v60 = vadd.f32 %v7698_v16, %v4759_v5 }
 0x218   : > { %v7659_v30 = vpop.f32.mrb[124].mxu0 }
 0x219   : > { %v7660_v48 = vpop.f32.mrb[125].mxu0 }
 0x21a   : > { %v7661_v57 = vadd.f32 %v7660_v48, %v7659_v30  ;;  %v7662_v10 = vpop.f32.mrb[126].mxu0 }
 0x21b   : > { %v7663_v63 = vpop.f32.mrb[127].mxu0  ;;  %v7699_v40 = vpop.f32.mrb[124].mxu1 }
 0x21c   : > { %v4760_v47 = vadd.f32 %v7661_v57, %v4398_v11  ;;  %v7664_v61 = vadd.f32 %v7663_v63, %v7662_v10  ;;  %v7700_v8 = vpop.f32.mrb[125].mxu1 }
 0x21d   : > { %v7701_v49 = vadd.f32 %v7700_v8, %v7699_v40  ;;  %v7702_v0 = vpop.f32.mrb[126].mxu1 }
 0x21e   : > { %v4761_v15 = vadd.f32 %v7664_v61, %v4399_v46  ;;  %v7703_v55 = vpop.f32.mrb[127].mxu1 }
 0x21f   : > { %v10207_v33 = vadd.f32 %v7701_v49, %v4760_v47  ;;  %v7704_v44 = vadd.f32 %v7703_v55, %v7702_v0 }
 0x220   : > { %v7721_v39 = vpop.f32.mrb[128].mxu0 }
 0x221   : > { %v7722_v37 = vpop.f32.mrb[129].mxu0  ;;  %v10209_v20 = vadd.f32 %v7704_v44, %v4761_v15 }
 0x222   : > { %v7723_v24 = vadd.f32 %v7722_v37, %v7721_v39  ;;  %v7724_v41 = vpop.f32.mrb[130].mxu0 }
 0x223   : > { %v7725_v58 = vpop.f32.mrb[131].mxu0  ;;  %v7761_v11 = vpop.f32.mrb[128].mxu1 }
 0x224   : > { %v5406_v4 = vadd.f32 %v7723_v24, %v5116_v12  ;;  %v7726_v43 = vadd.f32 %v7725_v58, %v7724_v41  ;;  %v7762_v9 = vpop.f32.mrb[129].mxu1 }
 0x225   : > { %v7763_v45 = vadd.f32 %v7762_v9, %v7761_v11  ;;  %v7764_v46 = vpop.f32.mrb[130].mxu1 }
 0x226   : > { %v5407_v54 = vadd.f32 %v7726_v43, %v5117_v32  ;;  %v7765_v59 = vpop.f32.mrb[131].mxu1 }
 0x227   : > { %v5696_v28 = vadd.f32 %v7763_v45, %v5406_v4  ;;  %v7766_v3 = vadd.f32 %v7765_v59, %v7764_v46 }
 0x228   : > { %v7727_v22 = vpop.f32.mrb[132].mxu0 }
 0x229   : > { %v7728_v52 = vpop.f32.mrb[133].mxu0  ;;  %v5697_v29 = vadd.f32 %v7766_v3, %v5407_v54  ;;  %v5711_v14 = vadd.f32 %v10214_v7, %v5696_v28 }
 0x22a   : > { %v7729_v17 = vadd.f32 %v7728_v52, %v7727_v22  ;;  %v7730_v50 = vpop.f32.mrb[134].mxu0 }
 0x22b   : > { %v7731_v12 = vpop.f32.mrb[135].mxu0  ;;  %v5712_v1 = vadd.f32 %v10214_v7, %v5697_v29  ;;  %v7767_v36 = vpop.f32.mrb[132].mxu1  ;;  %v5719_v35 = vmax.f32 %v5711_v14, 0.0 }
 0x22c   : > { %v5408_v27 = vadd.f32 %v7729_v17, %v5118_v42  ;;  %v7732_v32 = vadd.f32 %v7731_v12, %v7730_v50  ;;  %v7768_v23 = vpop.f32.mrb[133].mxu1 }
 0x22d   : > { %v5720_v62 = vmax.f32 %v5712_v1, 0.0  ;;  %v7769_v13 = vadd.f32 %v7768_v23, %v7767_v36  ;;  %v7770_v18 = vpop.f32.mrb[134].mxu1  ;;  %7841 = vmatprep.mubr.f32.mxu0 %v5719_v35 }
 0x22e   : > { %v5409_v21 = vadd.f32 %v7732_v32, %v5119_v34  ;;  %v7771_v19 = vpop.f32.mrb[135].mxu1 }
 0x22f   : > { %v5698_v53 = vadd.f32 %v7769_v13, %v5408_v27  ;;  %v7772_v38 = vadd.f32 %v7771_v19, %v7770_v18  ;;  %7842 = vmatmul.mubr.f32.vlgmr.msra.gmra.mrb[144].mxu0 %v5720_v62 }
 0x230   : > { %v7733_v25 = vpop.f32.mrb[136].mxu0 }
 0x231   : > { %v7734_v51 = vpop.f32.mrb[137].mxu0  ;;  %v5699_v42 = vadd.f32 %v7772_v38, %v5409_v21  ;;  %v5713_v5 = vadd.f32 %v10214_v7, %v5698_v53 }
 0x232   : > { %v7735_v26 = vadd.f32 %v7734_v51, %v7733_v25  ;;  %v7736_v6 = vpop.f32.mrb[138].mxu0 }
 0x233   : > { %v7737_v31 = vpop.f32.mrb[139].mxu0  ;;  %v7773_v34 = vpop.f32.mrb[136].mxu1  ;;  %v5721_v30 = vmax.f32 %v5713_v5, 0.0  ;;  %v5714_v48 = vadd.f32 %v10214_v7, %v5699_v42 }
 0x234   : > { %v5410_v56 = vadd.f32 %v7735_v26, %v10203_v2  ;;  %v7738_v16 = vadd.f32 %v7737_v31, %v7736_v6  ;;  %v7774_v57 = vpop.f32.mrb[137].mxu1 }
 0x235   : > { %v7775_v63 = vadd.f32 %v7774_v57, %v7773_v34  ;;  %v7776_v47 = vpop.f32.mrb[138].mxu1  ;;  %7844 = vmatprep.mubr.f32.mxu0 %v5721_v30  ;;  %v5722_v61 = vmax.f32 %v5714_v48, 0.0 }
 0x236   : > { %v5411_v10 = vadd.f32 %v7738_v16, %v10205_v60  ;;  %v7777_v40 = vpop.f32.mrb[139].mxu1 }
 0x237   : > { %v5700_v15 = vadd.f32 %v7775_v63, %v5410_v56  ;;  %v7778_v49 = vadd.f32 %v7777_v40, %v7776_v47  ;;  %7845 = vmatmul.mubr.f32.gmra.mrb[146].mxu0 %v5722_v61 }
 0x238   : > { %v7739_v8 = vpop.f32.mrb[140].mxu0 }
 0x239   : > { %v7740_v0 = vpop.f32.mrb[141].mxu0  ;;  %v5701_v39 = vadd.f32 %v7778_v49, %v5411_v10  ;;  %v5715_v37 = vadd.f32 %v10214_v7, %v5700_v15 }
 0x23a   : > { %v7741_v55 = vadd.f32 %v7740_v0, %v7739_v8  ;;  %v7742_v2 = vpop.f32.mrb[142].mxu0 }
 0x23b   : > { %v7743_v44 = vpop.f32.mrb[143].mxu0  ;;  %v5716_v60 = vadd.f32 %v10214_v7, %v5701_v39  ;;  %v7779_v58 = vpop.f32.mrb[140].mxu1  ;;  %v5723_v4 = vmax.f32 %v5715_v37, 0.0 }
 0x23c   : > { %v5412_v24 = vadd.f32 %v7741_v55, %v10207_v33  ;;  %v7744_v41 = vadd.f32 %v7743_v44, %v7742_v2  ;;  %v7780_v43 = vpop.f32.mrb[141].mxu1 }
 0x23d   : > { %v5724_v9 = vmax.f32 %v5716_v60, 0.0  ;;  %v7781_v54 = vadd.f32 %v7780_v43, %v7779_v58  ;;  %v7782_v45 = vpop.f32.mrb[142].mxu1  ;;  %7847 = vmatprep.mubr.f32.mxu1 %v5723_v4 }
 0x23e   : > { %v5413_v11 = vadd.f32 %v7744_v41, %v10209_v20  ;;  %v7783_v46 = vpop.f32.mrb[143].mxu1  ;;  %v7061_v20 = vld [vmem:[%s10252_s6] ss:$0 sm:$0xff] }
 0x23f   : > { %v5702_v59 = vadd.f32 %v7781_v54, %v5412_v24  ;;  %v7784_v22 = vadd.f32 %v7783_v46, %v7782_v45  ;;  %7848 = vmatmul.mubr.f32.vlgmr.msra.gmra.mrb[144].mxu1 %v5724_v9 }
 0x241   : > { %v5703_v28 = vadd.f32 %v7784_v22, %v5413_v11  ;;  %v5717_v33 = vadd.f32 %v10214_v7, %v5702_v59 }
 0x243   : > { %v5725_v3 = vmax.f32 %v5717_v33, 0.0  ;;  %v5718_v52 = vadd.f32 %v10214_v7, %v5703_v28 }
 0x245   : > { %7850 = vmatprep.mubr.f32.mxu1 %v5725_v3  ;;  %v5726_v17 = vmax.f32 %v5718_v52, 0.0 }
 0x247   : > { %7851 = vmatmul.mubr.f32.gmra.mrb[146].mxu1 %v5726_v17 }
 0x302   : > { %v7843_v50 = vpop.f32.mrb[144].mxu0 }
 0x303   : > { %v5822_v29 = vadd.f32 %v7843_v50, %v7061_v20  ;;  %v5816_v12 = vpop.f32.mrb[145].mxu0 }
 0x304   : > { %v5817_v14 = vadd.f32 %v7061_v20, %v5816_v12 }
 0x305   : > { %5857 = vst.msk [vmem:[%s298_s30 + $0x8] sm:$0xff] %vm5855_vm6, %v5822_v29 }
 0x306   : > { %5856 = vst.msk [vmem:[%s298_s30] sm:$0xff] %vm5855_vm6, %v5817_v14 }
 0x30a   : > { %v7846_v7 = vpop.f32.mrb[146].mxu0 }
 0x30b   : > { %v5832_v27 = vadd.f32 %v7846_v7, %v7061_v20  ;;  %v5826_v32 = vpop.f32.mrb[147].mxu0 }
 0x30c   : > { %v5827_v1 = vadd.f32 %v7061_v20, %v5826_v32 }
 0x30d   : > { %5859 = vst.msk [vmem:[%s298_s30 + $0x18] sm:$0xff] %vm5855_vm6, %v5832_v27 }
 0x30e   : > { %5858 = vst.msk [vmem:[%s298_s30 + $0x10] sm:$0xff] %vm5855_vm6, %v5827_v1 }
 0x312   : > { %v7849_v36 = vpop.f32.mrb[144].mxu1 }
 0x313   : > { %v5842_v35 = vadd.f32 %v7849_v36, %v7061_v20  ;;  %v5836_v23 = vpop.f32.mrb[145].mxu1 }
 0x314   : > { %v5837_v21 = vadd.f32 %v7061_v20, %v5836_v23 }
 0x315   : > { %5861 = vst.msk [vmem:[%s298_s30 + $0x28] sm:$0xff] %vm5855_vm6, %v5842_v35 }
 0x316   : > { %5860 = vst.msk [vmem:[%s298_s30 + $0x20] sm:$0xff] %vm5855_vm6, %v5837_v21 }
 0x31a   : > { %v7852_v62 = vpop.f32.mrb[146].mxu1 }
 0x31b   : > { %v5852_v13 = vadd.f32 %v7852_v62, %v7061_v20  ;;  %v5846_v18 = vpop.f32.mrb[147].mxu1 }
 0x31c   : > { %v5847_v19 = vadd.f32 %v7061_v20, %v5846_v18 }
 0x31d   : > { %5863 = vst.msk [vmem:[%s298_s30 + $0x38] sm:$0xff] %vm5855_vm6, %v5852_v13 }
 0x31e   : > { %5862 = vst.msk [vmem:[%s298_s30 + $0x30] sm:$0xff] %vm5855_vm6, %v5847_v19 }
 0x31f PF: > { %s17_s24 = sadd.s32 1, %s8252_s24  }
 0x320   : > { %p14_p4 = scmp.ge.s32.totalorder %s17_s24, 4  }
 0x322   :  { %16 = sbr.rel (!%p14_p4) target bundleno = 1 (0x1), region = 101 }

</bundles_post_ra>
